<compile_context>
chip_gen: v7x
topology: tpu7x:2x2x1
jax: 0.10.0
libtpu: 0.0.40
codegen_flags: <defaults>
</compile_context>

<pallas_src>
import functools

import jax
import jax.numpy as jnp
from jax.experimental import pallas as pl
from jax.experimental.pallas import tpu as pltpu


def _round_up(a: int, b: int) -> int:
    return (a + b - 1) // b * b


def _matmul_kernel(x_ref, q_ref, o_ref, acc_ref):
    """One (tm, tn) output tile; grid axis 2 (K) is the reduction axis."""

    @pl.when(pl.program_id(2) == 0)
    def _():
        acc_ref[...] = jnp.zeros_like(acc_ref)

    # x_ref: (tm, tk), q_ref: (tk, tn).  Contract last dim of x with first dim
    # of q directly on the MXU (f32 accumulation); no operand transpose.
    acc_ref[...] += jax.lax.dot_general(
        x_ref[...],
        q_ref[...],
        dimension_numbers=(((1,), (0,)), ((), ())),
        preferred_element_type=jnp.float32,
    )

    @pl.when(pl.program_id(2) == pl.num_programs(2) - 1)
    def _():
        o_ref[...] = acc_ref[...].astype(o_ref.dtype)


def _projection_matmul(x, q, *, tm_cap=256, tn_cap=256, tk_cap=512):
    """x: (M, K), q: (K, N) -> (M, N) via a tiled Pallas matmul."""
    M, K = x.shape
    K2, N = q.shape
    assert K == K2, (K, K2)

    # Tile sizes: respect the (8, 128) layout constraint, cap so that
    # double-buffered tiles stay well inside the scoped VMEM limit on all chips
    # (worst case ~2*2*(256*512 + 512*256)*4B + acc ~ 4.3 MiB).
    tm = min(tm_cap, _round_up(M, 8))
    tn = min(tn_cap, _round_up(N, 128))
    tk = min(tk_cap, _round_up(K, 128))

    Mp, Kp, Np = _round_up(M, tm), _round_up(K, tk), _round_up(N, tn)
    if (Mp, Kp) != (M, K):
        x = jnp.pad(x, ((0, Mp - M), (0, Kp - K)))  # zeros don't change x @ q
    if (Kp, Np) != (K, N):
        q = jnp.pad(q, ((0, Kp - K), (0, Np - N)))

    grid = (Mp // tm, Np // tn, Kp // tk)

    out = pl.pallas_call(
        _matmul_kernel,
        out_shape=jax.ShapeDtypeStruct((Mp, Np), x.dtype),
        grid_spec=pltpu.PrefetchScalarGridSpec(
            num_scalar_prefetch=0,
            grid=grid,
            in_specs=[
                pl.BlockSpec((tm, tk), lambda i, j, k: (i, k)),
                pl.BlockSpec((tk, tn), lambda i, j, k: (k, j)),
            ],
            out_specs=pl.BlockSpec((tm, tn), lambda i, j, k: (i, j)),
            scratch_shapes=[pltpu.VMEM((tm, tn), jnp.float32)],
        ),
        compiler_params=pltpu.CompilerParams(
            dimension_semantics=("parallel", "parallel", "arbitrary"),
        ),
    )(x, q)

    return out[:M, :N]


@functools.partial(jax.jit, static_argnames=("target_dim",))
def rm_forward(x, key, target_dim: int = 128):
    """JAX/Pallas equivalent of RM.forward.

    x: (batch, in_dim) float array with in_dim >= target_dim (as the PyTorch
    module implicitly requires for the reduced QR to yield an
    (in_dim, target_dim) Q).  Returns (batch, target_dim, 1, 1).
    """
    batch, in_dim = x.shape
    # TODO(synk): torch.randn + torch.qr have no in-kernel Pallas equivalent;
    # the random orthonormal basis is built with plain JAX here.
    rand_matrix = jax.random.normal(key, (in_dim, target_dim), dtype=x.dtype)
    q_matrix, _ = jnp.linalg.qr(rand_matrix)       # reduced QR: (in_dim, target_dim)
    projected = _projection_matmul(x, q_matrix)    # Pallas kernel: (batch, target_dim)
    return projected.reshape(batch, q_matrix.shape[1], 1, 1)


if __name__ == "__main__":
    key = jax.random.PRNGKey(0)
    kx, kq = jax.random.split(key)

    batch, in_dim, target_dim = 2, 256, 128
    x = jax.random.normal(kx, (batch, in_dim), dtype=jnp.float32)

    out = rm_forward(x, kq, target_dim=target_dim)
    jax.block_until_ready(out)
    assert out.shape == (batch, target_dim, 1, 1), out.shape

    # Reference: same key -> same random matrix -> same Q; projection in plain JAX.
    rand_matrix = jax.random.normal(kq, (in_dim, target_dim), dtype=jnp.float32)
    q_matrix, _ = jnp.linalg.qr(rand_matrix)
    ref = jnp.dot(x, q_matrix, precision=jax.lax.Precision.HIGHEST).reshape(
        batch, target_dim, 1, 1
    )

    err = jnp.max(jnp.abs(out - ref))
    assert jnp.allclose(out, ref, atol=1e-3, rtol=1e-3), f"max abs err {err}"
    print("KERNEL_OK")
</pallas_src>

<mosaic_0001>
module attributes {stable_mosaic.version = 11 : i64} {
  func.func @_matmul_kernel(%arg0: i32, %arg1: i32, %arg2: i32, %arg3: memref<8x256xf32, #tpu.memory_space<vmem>>, %arg4: memref<256x128xf32, #tpu.memory_space<vmem>>, %arg5: memref<8x128xf32, #tpu.memory_space<vmem>>, %arg6: memref<8x128xf32, #tpu.memory_space<vmem>>) attributes {dimension_semantics = [#tpu.dimension_semantics<parallel>, #tpu.dimension_semantics<parallel>, #tpu.dimension_semantics<arbitrary>], iteration_bounds = array<i64: 1, 1, 1>, scalar_prefetch = 0 : i64, scratch_operands = 1 : i64, tpu.core_type = #tpu.core_type<tc>, window_params = [{transform_indices = @transform_0, window_bounds = array<i64: 8, 256>}, {transform_indices = @transform_1, window_bounds = array<i64: 256, 128>}, {transform_indices = @transform_2, window_bounds = array<i64: 8, 128>}]} {
    %c0_i32 = arith.constant 0 : i32
    %0 = arith.cmpi eq, %arg2, %c0_i32 : i32
    %1 = arith.extui %0 : i1 to i32
    %c0_i32_0 = arith.constant 0 : i32
    %2 = arith.cmpi ne, %1, %c0_i32_0 : i32
    scf.if %2 {
      %cst_10 = arith.constant 0.000000e+00 : f32
      %12 = vector.broadcast %cst_10 : f32 to vector<8x128xf32>
      %c0_11 = arith.constant 0 : index
      %c0_12 = arith.constant 0 : index
      %13 = vector.load %arg6[%c0_11, %c0_12] : memref<8x128xf32, #tpu.memory_space<vmem>>, vector<8x128xf32>
      tpu.vector_store %arg6[%c0_11, %c0_12], %12 {strides = array<i32>} : memref<8x128xf32, #tpu.memory_space<vmem>>, vector<8x128xf32>,
    } else {
    }
    %c0 = arith.constant 0 : index
    %c0_1 = arith.constant 0 : index
    %3 = vector.load %arg6[%c0, %c0_1] : memref<8x128xf32, #tpu.memory_space<vmem>>, vector<8x128xf32>
    %c0_2 = arith.constant 0 : index
    %c0_3 = arith.constant 0 : index
    %4 = vector.load %arg3[%c0_2, %c0_3] : memref<8x256xf32, #tpu.memory_space<vmem>>, vector<8x256xf32>
    %c0_4 = arith.constant 0 : index
    %c0_5 = arith.constant 0 : index
    %5 = vector.load %arg4[%c0_4, %c0_5] : memref<256x128xf32, #tpu.memory_space<vmem>>, vector<256x128xf32>
    %cst = arith.constant dense<0.000000e+00> : vector<8x128xf32>
    %6 = tpu.matmul %4, %5, %cst {dimension_numbers = #tpu.dot_dimension_numbers<[1], [0], [0], [1], [0, 0, 1, 1], [], []>} : vector<8x256xf32>, vector<256x128xf32>, vector<8x128xf32> -> vector<8x128xf32>
    %7 = arith.addf %3, %6 : vector<8x128xf32>
    %c0_6 = arith.constant 0 : index
    %c0_7 = arith.constant 0 : index
    %8 = vector.load %arg6[%c0_6, %c0_7] : memref<8x128xf32, #tpu.memory_space<vmem>>, vector<8x128xf32>
    tpu.vector_store %arg6[%c0_6, %c0_7], %7 {strides = array<i32>} : memref<8x128xf32, #tpu.memory_space<vmem>>, vector<8x128xf32>,
    %c0_i32_8 = arith.constant 0 : i32
    %9 = arith.cmpi eq, %arg2, %c0_i32_8 : i32
    %10 = arith.extui %9 : i1 to i32
    %c0_i32_9 = arith.constant 0 : i32
    %11 = arith.cmpi ne, %10, %c0_i32_9 : i32
    scf.if %11 {
      %c0_10 = arith.constant 0 : index
      %c0_11 = arith.constant 0 : index
      %12 = vector.load %arg6[%c0_10, %c0_11] : memref<8x128xf32, #tpu.memory_space<vmem>>, vector<8x128xf32>
      %c0_12 = arith.constant 0 : index
      %c0_13 = arith.constant 0 : index
      %13 = vector.load %arg5[%c0_12, %c0_13] : memref<8x128xf32, #tpu.memory_space<vmem>>, vector<8x128xf32>
      tpu.vector_store %arg5[%c0_12, %c0_13], %12 {strides = array<i32>} : memref<8x128xf32, #tpu.memory_space<vmem>>, vector<8x128xf32>,
    } else {
    }
    return
  }
  func.func @transform_0(%arg0: i32, %arg1: i32, %arg2: i32) -> (i32, i32) {
    %c0_i32 = arith.constant 0 : i32
    return %arg0, %arg2 : i32, i32
  }
  func.func @transform_1(%arg0: i32, %arg1: i32, %arg2: i32) -> (i32, i32) {
    %c0_i32 = arith.constant 0 : i32
    return %arg2, %arg1 : i32, i32
  }
  func.func @transform_2(%arg0: i32, %arg1: i32, %arg2: i32) -> (i32, i32) {
    %c0_i32 = arith.constant 0 : i32
    return %arg0, %arg1 : i32, i32
  }
}

</mosaic_0001>

<bundles_post_ra>
// kernel: custom-call.6
= control target key start
LH: loop header
LB: loop body
LE: loop exit
PB: predicated region body
PF: predicated region fallthrough
CT: control target
= control target key end

     0   :  { %v2615_v6 = vmov 0.0   ;;  %s2728_s17 = smov 0   ;;  %s4157_s0 = inlined_call_operand.vmem [shape: f32[256,128], index: 0, kind: input, shape index: {}]   ;;  %s4158_s1 = inlined_call_operand.vmem [shape: f32[256,128], index: 1, kind: output, shape index: {0}]   ;;  %s4159_s2 = inlined_call_operand.vmem [shape: f32[128], index: 2, kind: output, shape index: {1}]  }
   0x1   :  { %v93_v0 = vld [vmem:[%s4157_s0] sm:$0xff]  ;;  %v95_v1 = vld [vmem:[%s4157_s0 + $0x8] sm:$0xff]  ;;  %v97_v2 = vld [vmem:[%s4157_s0 + $0x10] sm:$0xff]  ;;  %286 = vst [vmem:[#allocation2] sm:$0x1] %v2615_v6 }
   0x2   :  { %v99_v3 = vld [vmem:[%s4157_s0 + $0x18] sm:$0xff]  ;;  %v101_v4 = vld [vmem:[%s4157_s0 + $0x20] sm:$0xff]  ;;  %v103_v5 = vld [vmem:[%s4157_s0 + $0x28] sm:$0xff]  ;;  %161 = vst [vmem:[#allocation1] sm:$0xff] %v93_v0 }
   0x3   :  { %165 = vst [vmem:[#allocation1 + $0x8] sm:$0xff] %v95_v1  ;;  %169 = vst [vmem:[#allocation1 + $0x10] sm:$0xff] %v97_v2  ;;  %v105_v7 = vld [vmem:[%s4157_s0 + $0x30] sm:$0xff]  ;;  %v107_v8 = vld [vmem:[%s4157_s0 + $0x38] sm:$0xff] }
   0x4   :  { %v109_v9 = vld [vmem:[%s4157_s0 + $0x40] sm:$0xff]  ;;  %173 = vst [vmem:[#allocation1 + $0x18] sm:$0xff] %v99_v3  ;;  %177 = vst [vmem:[#allocation1 + $0x20] sm:$0xff] %v101_v4  ;;  %v111_v10 = vld [vmem:[%s4157_s0 + $0x48] sm:$0xff] }
   0x5   :  { %181 = vst [vmem:[#allocation1 + $0x28] sm:$0xff] %v103_v5  ;;  %v113_v11 = vld [vmem:[%s4157_s0 + $0x50] sm:$0xff]  ;;  %v115_v12 = vld [vmem:[%s4157_s0 + $0x58] sm:$0xff]  ;;  %185 = vst [vmem:[#allocation1 + $0x30] sm:$0xff] %v105_v7 }
   0x6   :  { %189 = vst [vmem:[#allocation1 + $0x38] sm:$0xff] %v107_v8  ;;  %193 = vst [vmem:[#allocation1 + $0x40] sm:$0xff] %v109_v9  ;;  %v117_v13 = vld [vmem:[%s4157_s0 + $0x60] sm:$0xff]  ;;  %v119_v14 = vld [vmem:[%s4157_s0 + $0x68] sm:$0xff] }
   0x7   :  { %v121_v15 = vld [vmem:[%s4157_s0 + $0x70] sm:$0xff]  ;;  %197 = vst [vmem:[#allocation1 + $0x48] sm:$0xff] %v111_v10  ;;  %201 = vst [vmem:[#allocation1 + $0x50] sm:$0xff] %v113_v11  ;;  %v123_v16 = vld [vmem:[%s4157_s0 + $0x78] sm:$0xff] }
   0x8   :  { %205 = vst [vmem:[#allocation1 + $0x58] sm:$0xff] %v115_v12  ;;  %v125_v17 = vld [vmem:[%s4157_s0 + $0x80] sm:$0xff]  ;;  %v127_v18 = vld [vmem:[%s4157_s0 + $0x88] sm:$0xff]  ;;  %209 = vst [vmem:[#allocation1 + $0x60] sm:$0xff] %v117_v13 }
   0x9   :  { %213 = vst [vmem:[#allocation1 + $0x68] sm:$0xff] %v119_v14  ;;  %217 = vst [vmem:[#allocation1 + $0x70] sm:$0xff] %v121_v15  ;;  %v129_v19 = vld [vmem:[%s4157_s0 + $0x90] sm:$0xff]  ;;  %v131_v20 = vld [vmem:[%s4157_s0 + $0x98] sm:$0xff] }
   0xa   :  { %v133_v21 = vld [vmem:[%s4157_s0 + $0xa0] sm:$0xff]  ;;  %221 = vst [vmem:[#allocation1 + $0x78] sm:$0xff] %v123_v16  ;;  %225 = vst [vmem:[#allocation1 + $0x80] sm:$0xff] %v125_v17  ;;  %v135_v22 = vld [vmem:[%s4157_s0 + $0xa8] sm:$0xff] }
   0xb   :  { %229 = vst [vmem:[#allocation1 + $0x88] sm:$0xff] %v127_v18  ;;  %v137_v23 = vld [vmem:[%s4157_s0 + $0xb0] sm:$0xff]  ;;  %v139_v24 = vld [vmem:[%s4157_s0 + $0xb8] sm:$0xff]  ;;  %233 = vst [vmem:[#allocation1 + $0x90] sm:$0xff] %v129_v19 }
   0xc   :  { %237 = vst [vmem:[#allocation1 + $0x98] sm:$0xff] %v131_v20  ;;  %241 = vst [vmem:[#allocation1 + $0xa0] sm:$0xff] %v133_v21  ;;  %v141_v25 = vld [vmem:[%s4157_s0 + $0xc0] sm:$0xff]  ;;  %v143_v26 = vld [vmem:[%s4157_s0 + $0xc8] sm:$0xff] }
   0xd   :  { %v145_v27 = vld [vmem:[%s4157_s0 + $0xd0] sm:$0xff]  ;;  %245 = vst [vmem:[#allocation1 + $0xa8] sm:$0xff] %v135_v22  ;;  %249 = vst [vmem:[#allocation1 + $0xb0] sm:$0xff] %v137_v23  ;;  %v147_v28 = vld [vmem:[%s4157_s0 + $0xd8] sm:$0xff] }
   0xe   :  { %253 = vst [vmem:[#allocation1 + $0xb8] sm:$0xff] %v139_v24  ;;  %v149_v29 = vld [vmem:[%s4157_s0 + $0xe0] sm:$0xff]  ;;  %v151_v30 = vld [vmem:[%s4157_s0 + $0xe8] sm:$0xff]  ;;  %257 = vst [vmem:[#allocation1 + $0xc0] sm:$0xff] %v141_v25 }
   0xf   :  { %261 = vst [vmem:[#allocation1 + $0xc8] sm:$0xff] %v143_v26  ;;  %265 = vst [vmem:[#allocation1 + $0xd0] sm:$0xff] %v145_v27  ;;  %v153_v31 = vld [vmem:[%s4157_s0 + $0xf0] sm:$0xff]  ;;  %v155_v32 = vld [vmem:[%s4157_s0 + $0xf8] sm:$0xff] }
  0x10   :  { %269 = vst [vmem:[#allocation1 + $0xd8] sm:$0xff] %v147_v28  ;;  %273 = vst [vmem:[#allocation1 + $0xe0] sm:$0xff] %v149_v29 }
  0x11   :  { %277 = vst [vmem:[#allocation1 + $0xe8] sm:$0xff] %v151_v30  ;;  %281 = vst [vmem:[#allocation1 + $0xf0] sm:$0xff] %v153_v31 }
  0x12   :  { %285 = vst [vmem:[#allocation1 + $0xf8] sm:$0xff] %v155_v32 }
  0x13 LB: > { %v294_v33 = vlaneseq  ;;  %v293_v34 = vld [vmem:[#allocation1] sm:$0xff]  ;;  %v2737_v36 = vstv %s2613_s17  ;;  %v302_v37 = vld [vmem:[#allocation1 + $0x8] sm:$0xff]  ;;  %v312_v39 = vld [vmem:[#allocation1 + $0x10] sm:$0xff]  ;;  %s631_s0 = scalar_lea.vmem [#allocation1], %s2613_s17  ;;  %s2831_s18 = smov [#allocation1]  ;;  %s2613_s17 = sphi %s2728_s17, %s292_s17  }
  0x14   : > { %v322_v41 = vld [vmem:[#allocation1 + $0x18] sm:$0xff]  ;;  %v332_v48 = vld [vmem:[#allocation1 + $0x20] sm:$0xff]  ;;  %v342_v54 = vld [vmem:[#allocation1 + $0x28] sm:$0xff]  ;;  %s1247_s19 = scalar_lea.vmem [#allocation4], %s2613_s17  ;;  %s3121_s20 = smov [#allocation1] }
  0x15   : > { %v2734_v35 = vshrl.u32 %v294_v33, 7  ;;  %v352_v59 = vld [vmem:[#allocation1 + $0x30] sm:$0xff]  ;;  %v362_v0 = vld [vmem:[#allocation1 + $0x38] sm:$0xff]  ;;  %v372_v5 = vld [vmem:[#allocation1 + $0x40] sm:$0xff]  ;;  %s3128_s21 = smov [#allocation4] }
  0x16   : > { %v382_v10 = vld [vmem:[#allocation1 + $0x48] sm:$0xff]  ;;  %v392_v15 = vld [vmem:[#allocation1 + $0x50] sm:$0xff]  ;;  %v402_v20 = vld [vmem:[#allocation1 + $0x58] sm:$0xff] }
  0x17   : > { %vm298_vm0 = vcmp.gt.s32.totalorder %v2734_v35, %v2737_v36  ;;  %v305_v38 = vadd.s32 8, %v2734_v35  ;;  %v315_v40 = vadd.s32 16, %v2734_v35  ;;  %v325_v42 = vadd.s32 24, %v2734_v35  ;;  %v412_v25 = vld [vmem:[#allocation1 + $0x60] sm:$0xff]  ;;  %v422_v30 = vld [vmem:[#allocation1 + $0x68] sm:$0xff] }
  0x18   : > { %v299_v43 = vsel %vm298_vm0, %v293_v34, 0.0  ;;  %v335_v44 = vadd.s32 32, %v2734_v35  ;;  %v345_v45 = vadd.s32 40, %v2734_v35  ;;  %v355_v46 = vadd.s32 48, %v2734_v35 }
  0x19   : > { %v300_v47 = vmul.f32 %v299_v43, %v299_v43  ;;  %vm307_vm1 = vcmp.gt.s32.totalorder %v305_v38, %v2737_v36  ;;  %vm317_vm2 = vcmp.gt.s32.totalorder %v315_v40, %v2737_v36  ;;  %vm327_vm3 = vcmp.gt.s32.totalorder %v325_v42, %v2737_v36  ;;  %v432_v38 = vld [vmem:[#allocation1 + $0x70] sm:$0xff]  ;;  %v442_v43 = vld [vmem:[#allocation1 + $0x78] sm:$0xff] }
  0x1a   : > { %v308_v49 = vsel %vm307_vm1, %v302_v37, 0.0  ;;  %v318_v50 = vsel %vm317_vm2, %v312_v39, 0.0  ;;  %v328_v51 = vsel %vm327_vm3, %v322_v41, 0.0  ;;  %vm337_vm4 = vcmp.gt.s32.totalorder %v335_v44, %v2737_v36 }
  0x1b   : > { %v309_v52 = vmul.f32 %v308_v49, %v308_v49  ;;  %v319_v53 = vmul.f32 %v318_v50, %v318_v50  ;;  %v338_v55 = vsel %vm337_vm4, %v332_v48, 0.0  ;;  %vm347_vm5 = vcmp.gt.s32.totalorder %v345_v45, %v2737_v36  ;;  %v452_v48 = vld [vmem:[#allocation1 + $0x80] sm:$0xff] }
  0x1c   : > { %v365_v56 = vadd.s32 56, %v2734_v35  ;;  %v329_v58 = vmul.f32 %v328_v51, %v328_v51  ;;  %vm357_vm6 = vcmp.gt.s32.totalorder %v355_v46, %v2737_v36  ;;  %v375_v60 = vadd.s32 64, %v2734_v35 }
  0x1d   : > { %v310_v57 = vadd.f32 %v309_v52, %v300_v47  ;;  %v348_v61 = vsel %vm347_vm5, %v342_v54, 0.0  ;;  %v339_v63 = vmul.f32 %v338_v55, %v338_v55  ;;  %v385_v1 = vadd.s32 72, %v2734_v35 }
  0x1e   : > { %vm367_vm7 = vcmp.gt.s32.totalorder %v365_v56, %v2737_v36  ;;  %v358_v2 = vsel %vm357_vm6, %v352_v59, 0.0  ;;  %v349_v4 = vmul.f32 %v348_v61, %v348_v61  ;;  %vm377_vm8 = vcmp.gt.s32.totalorder %v375_v60, %v2737_v36 }
  0x1f   : > { %v320_v62 = vadd.f32 %v319_v53, %v310_v57  ;;  %v395_v6 = vadd.s32 80, %v2734_v35  ;;  %v368_v7 = vsel %vm367_vm7, %v362_v0, 0.0  ;;  %v359_v9 = vmul.f32 %v358_v2, %v358_v2  ;;  %v462_v53 = vld [vmem:[#allocation1 + $0x88] sm:$0xff] }
  0x20   : > { %vm387_vm9 = vcmp.gt.s32.totalorder %v385_v1, %v2737_v36  ;;  %v405_v11 = vadd.s32 88, %v2734_v35  ;;  %v378_v12 = vsel %vm377_vm8, %v372_v5, 0.0  ;;  %v369_v14 = vmul.f32 %v368_v7, %v368_v7 }
  0x21   : > { %v330_v3 = vadd.f32 %v329_v58, %v320_v62  ;;  %vm397_vm10 = vcmp.gt.s32.totalorder %v395_v6, %v2737_v36  ;;  %v415_v16 = vadd.s32 96, %v2734_v35  ;;  %v388_v17 = vsel %vm387_vm9, %v382_v10, 0.0  ;;  %v472_v58 = vld [vmem:[#allocation1 + $0x90] sm:$0xff] }
  0x22   : > { %v379_v19 = vmul.f32 %v378_v12, %v378_v12  ;;  %vm407_vm11 = vcmp.gt.s32.totalorder %v405_v11, %v2737_v36  ;;  %v425_v21 = vadd.s32 104, %v2734_v35  ;;  %v398_v22 = vsel %vm397_vm10, %v392_v15, 0.0 }
  0x23   : > { %v340_v8 = vadd.f32 %v339_v63, %v330_v3  ;;  %v389_v24 = vmul.f32 %v388_v17, %v388_v17  ;;  %vm417_vm12 = vcmp.gt.s32.totalorder %v415_v16, %v2737_v36  ;;  %v435_v26 = vadd.s32 112, %v2734_v35  ;;  %v482_v63 = vld [vmem:[#allocation1 + $0x98] sm:$0xff] }
  0x24   : > { %v408_v27 = vsel %vm407_vm11, %v402_v20, 0.0  ;;  %v399_v29 = vmul.f32 %v398_v22, %v398_v22  ;;  %vm427_vm13 = vcmp.gt.s32.totalorder %v425_v21, %v2737_v36  ;;  %v445_v31 = vadd.s32 120, %v2734_v35 }
  0x25   : > { %v350_v13 = vadd.f32 %v349_v4, %v340_v8  ;;  %v418_v32 = vsel %vm417_vm12, %v412_v25, 0.0  ;;  %v409_v37 = vmul.f32 %v408_v27, %v408_v27  ;;  %vm437_vm14 = vcmp.gt.s32.totalorder %v435_v26, %v2737_v36  ;;  %v492_v4 = vld [vmem:[#allocation1 + $0xa0] sm:$0xff] }
  0x26   : > { %v455_v39 = vadd.s32 128, %v2734_v35  ;;  %v428_v40 = vsel %vm427_vm13, %v422_v30, 0.0  ;;  %v419_v42 = vmul.f32 %v418_v32, %v418_v32  ;;  %vm447_vm15 = vcmp.gt.s32.totalorder %v445_v31, %v2737_v36 }
  0x27   : > { %v360_v18 = vadd.f32 %v359_v9, %v350_v13  ;;  %v465_v44 = vadd.s32 136, %v2734_v35  ;;  %v438_v45 = vsel %vm437_vm14, %v432_v38, 0.0  ;;  %v429_v47 = vmul.f32 %v428_v40, %v428_v40  ;;  %v502_v9 = vld [vmem:[#allocation1 + $0xa8] sm:$0xff] }
  0x28   : > { %vm457_vm0 = vcmp.gt.s32.totalorder %v455_v39, %v2737_v36  ;;  %v475_v49 = vadd.s32 144, %v2734_v35  ;;  %v448_v50 = vsel %vm447_vm15, %v442_v43, 0.0  ;;  %v439_v52 = vmul.f32 %v438_v45, %v438_v45 }
  0x29   : > { %v370_v23 = vadd.f32 %v369_v14, %v360_v18  ;;  %vm467_vm1 = vcmp.gt.s32.totalorder %v465_v44, %v2737_v36  ;;  %v485_v54 = vadd.s32 152, %v2734_v35  ;;  %v458_v55 = vsel %vm457_vm0, %v452_v48, 0.0  ;;  %v512_v14 = vld [vmem:[#allocation1 + $0xb0] sm:$0xff] }
  0x2a   : > { %v449_v57 = vmul.f32 %v448_v50, %v448_v50  ;;  %vm477_vm2 = vcmp.gt.s32.totalorder %v475_v49, %v2737_v36  ;;  %v495_v59 = vadd.s32 160, %v2734_v35  ;;  %v468_v60 = vsel %vm467_vm1, %v462_v53, 0.0 }
  0x2b   : > { %v380_v28 = vadd.f32 %v379_v19, %v370_v23  ;;  %v459_v62 = vmul.f32 %v458_v55, %v458_v55  ;;  %vm487_vm3 = vcmp.gt.s32.totalorder %v485_v54, %v2737_v36  ;;  %v505_v0 = vadd.s32 168, %v2734_v35  ;;  %v522_v19 = vld [vmem:[#allocation1 + $0xb8] sm:$0xff] }
  0x2c   : > { %v478_v1 = vsel %vm477_vm2, %v472_v58, 0.0  ;;  %v469_v3 = vmul.f32 %v468_v60, %v468_v60  ;;  %vm497_vm4 = vcmp.gt.s32.totalorder %v495_v59, %v2737_v36  ;;  %v515_v5 = vadd.s32 176, %v2734_v35 }
  0x2d   : > { %v390_v34 = vadd.f32 %v389_v24, %v380_v28  ;;  %v488_v6 = vsel %vm487_vm3, %v482_v63, 0.0  ;;  %v479_v8 = vmul.f32 %v478_v1, %v478_v1  ;;  %vm507_vm5 = vcmp.gt.s32.totalorder %v505_v0, %v2737_v36  ;;  %v532_v24 = vld [vmem:[#allocation1 + $0xc0] sm:$0xff] }
  0x2e   : > { %v525_v10 = vadd.s32 184, %v2734_v35  ;;  %v498_v11 = vsel %vm497_vm4, %v492_v4, 0.0  ;;  %v489_v13 = vmul.f32 %v488_v6, %v488_v6  ;;  %vm517_vm6 = vcmp.gt.s32.totalorder %v515_v5, %v2737_v36 }
  0x2f   : > { %v400_v41 = vadd.f32 %v399_v29, %v390_v34  ;;  %v535_v15 = vadd.s32 192, %v2734_v35  ;;  %v508_v16 = vsel %vm507_vm5, %v502_v9, 0.0  ;;  %v499_v18 = vmul.f32 %v498_v11, %v498_v11  ;;  %v542_v29 = vld [vmem:[#allocation1 + $0xc8] sm:$0xff] }
  0x30   : > { %vm527_vm7 = vcmp.gt.s32.totalorder %v525_v10, %v2737_v36  ;;  %v545_v20 = vadd.s32 200, %v2734_v35  ;;  %v518_v21 = vsel %vm517_vm6, %v512_v14, 0.0  ;;  %v509_v23 = vmul.f32 %v508_v16, %v508_v16  ;;  %v2807_v14 = vld [vmem:[%s631_s0] ss:$0 sm:$0xff] }
  0x31   : > { %v410_v46 = vadd.f32 %v409_v37, %v400_v41  ;;  %vm537_vm8 = vcmp.gt.s32.totalorder %v535_v15, %v2737_v36  ;;  %v555_v25 = vadd.s32 208, %v2734_v35  ;;  %v528_v26 = vsel %vm527_vm7, %v522_v19, 0.0  ;;  %v552_v37 = vld [vmem:[#allocation1 + $0xd0] sm:$0xff] }
  0x32   : > { %v519_v28 = vmul.f32 %v518_v21, %v518_v21  ;;  %vm547_vm9 = vcmp.gt.s32.totalorder %v545_v20, %v2737_v36  ;;  %v565_v30 = vadd.s32 216, %v2734_v35  ;;  %v538_v31 = vsel %vm537_vm8, %v532_v24, 0.0 }
  0x33   : > { %v420_v51 = vadd.f32 %v419_v42, %v410_v46  ;;  %v529_v34 = vmul.f32 %v528_v26, %v528_v26  ;;  %vm557_vm10 = vcmp.gt.s32.totalorder %v555_v25, %v2737_v36  ;;  %v575_v38 = vadd.s32 224, %v2734_v35  ;;  %v562_v42 = vld [vmem:[#allocation1 + $0xd8] sm:$0xff] }
  0x34   : > { %v548_v39 = vsel %vm547_vm9, %v542_v29, 0.0  ;;  %v539_v41 = vmul.f32 %v538_v31, %v538_v31  ;;  %vm567_vm11 = vcmp.gt.s32.totalorder %v565_v30, %v2737_v36  ;;  %v585_v43 = vadd.s32 232, %v2734_v35 }
  0x35   : > { %v430_v56 = vadd.f32 %v429_v47, %v420_v51  ;;  %v558_v44 = vsel %vm557_vm10, %v552_v37, 0.0  ;;  %v549_v46 = vmul.f32 %v548_v39, %v548_v39  ;;  %v572_v47 = vld [vmem:[#allocation1 + $0xe0] sm:$0xff]  ;;  %vm577_vm12 = vcmp.gt.s32.totalorder %v575_v38, %v2737_v36 }
  0x36   : > { %v595_v48 = vadd.s32 240, %v2734_v35  ;;  %v568_v49 = vsel %vm567_vm11, %v562_v42, 0.0  ;;  %v559_v51 = vmul.f32 %v558_v44, %v558_v44  ;;  %vm587_vm13 = vcmp.gt.s32.totalorder %v585_v43, %v2737_v36 }
  0x37   : > { %v440_v61 = vadd.f32 %v439_v52, %v430_v56  ;;  %v582_v52 = vld [vmem:[#allocation1 + $0xe8] sm:$0xff]  ;;  %v605_v53 = vadd.s32 248, %v2734_v35  ;;  %v578_v54 = vsel %vm577_vm12, %v572_v47, 0.0  ;;  %v569_v56 = vmul.f32 %v568_v49, %v568_v49 }
  0x38   : > { %vm597_vm14 = vcmp.gt.s32.totalorder %v595_v48, %v2737_v36  ;;  %v588_v58 = vsel %vm587_vm13, %v582_v52, 0.0  ;;  %v579_v60 = vmul.f32 %v578_v54, %v578_v54  ;;  %v633_v15 = vand.u32 2147483647, %v2807_v14  ;;  %v671_v54 = vld [vmem:[%s2831_s18] sm:$0xff] }
  0x39   : > { %v450_v2 = vadd.f32 %v449_v57, %v440_v61  ;;  %v592_v57 = vld [vmem:[#allocation1 + $0xf0] sm:$0xff]  ;;  %v602_v61 = vld [vmem:[#allocation1 + $0xf8] sm:$0xff]  ;;  %vm607_vm15 = vcmp.gt.s32.totalorder %v605_v53, %v2737_v36  ;;  %v589_v0 = vmul.f32 %v588_v58, %v588_v58  ;;  %vm658_vm5 = vcmp.lt.f32.partialorder %v2807_v14, 0.0  ;;  %v2404_v58 = vld [vmem:[%s2831_s18 + $0x20] sm:$0xff] }
  0x3a   : > { %v610_v1 = vsel %vm607_vm15, %v602_v61, 0.0  ;;  %v634_v20 = vmax.f32 %v633_v15, 0.0  ;;  %v2829_v35 = vmov %v2734_v35  ;;  %v2839_v52 = vand.u32 127, %v294_v33  ;;  %v2402_v53 = vld [vmem:[%s2831_s18 + $0x10] sm:$0xff] }
  0x3b   : > { %v460_v7 = vadd.f32 %v459_v62, %v450_v2  ;;  %v598_v62 = vsel %vm597_vm14, %v592_v57, 0.0  ;;  %v611_v5 = vmul.f32 %v610_v1, %v610_v1  ;;  %v707_v47 = vadd.s32 16, %v2829_v35  ;;  %v2405_v57 = vld [vmem:[%s2831_s18 + $0x28] sm:$0xff] }
  0x3c   : > { %v725_v48 = vadd.s32 24, %v2829_v35  ;;  %v689_v49 = vadd.s32 8, %v2829_v35  ;;  %vm674_vm7 = vcmp.gt.s32.totalorder %v2829_v35, %v2737_v36  ;;  %v797_v33 = vadd.s32 56, %v2829_v35 }
  0x3d   : > { %v470_v12 = vadd.f32 %v469_v3, %v460_v7  ;;  %v599_v3 = vmul.f32 %v598_v62, %v598_v62  ;;  %vm709_vm6 = vcmp.gt.s32.totalorder %v707_v47, %v2737_v36  ;;  %v675_v61 = vsel %vm674_vm7, %v671_v54, 0.0  ;;  %v2413_v54 = vld [vmem:[%s2831_s18 + $0x68] sm:$0xff] }
  0x3e   : > { %vm727_vm8 = vcmp.gt.s32.totalorder %v725_v48, %v2737_v36  ;;  %vm691_vm9 = vcmp.gt.s32.totalorder %v689_v49, %v2737_v36  ;;  %vm2858_vm12 = vcmp.eq.s32.totalorder %v2839_v52, %v2737_v36  ;;  %vm799_vm13 = vcmp.gt.s32.totalorder %v797_v33, %v2737_v36 }
  0x3f   : > { %v480_v17 = vadd.f32 %v479_v8, %v470_v12 }
  0x41   : > { %v490_v22 = vadd.f32 %v489_v13, %v480_v17 }
  0x43   : > { %v500_v27 = vadd.f32 %v499_v18, %v490_v22 }
  0x45   : > { %v510_v32 = vadd.f32 %v509_v23, %v500_v27 }
  0x47   : > { %v520_v40 = vadd.f32 %v519_v28, %v510_v32 }
  0x49   : > { %v530_v45 = vadd.f32 %v529_v34, %v520_v40 }
  0x4b   : > { %v540_v50 = vadd.f32 %v539_v41, %v530_v45 }
  0x4d   : > { %v550_v55 = vadd.f32 %v549_v46, %v540_v50  ;;  %v761_v50 = vadd.s32 40, %v2829_v35 }
  0x4f   : > { %v560_v59 = vadd.f32 %v559_v51, %v550_v55  ;;  %v743_v51 = vadd.s32 32, %v2829_v35  ;;  %v2403_v55 = vld [vmem:[%s2831_s18 + $0x18] sm:$0xff]  ;;  %vm763_vm10 = vcmp.gt.s32.totalorder %v761_v50, %v2737_v36 }
  0x50   : > { %v728_v62 = vsel %vm727_vm8, %v2403_v55, 0.0  ;;  %v764_v1 = vsel %vm763_vm10, %v2405_v57, 0.0  ;;  %v2412_v55 = vld [vmem:[%s2831_s18 + $0x60] sm:$0xff]  ;;  %v923_v57 = vadd.s32 112, %v2829_v35 }
  0x51   : > { %v570_v63 = vadd.f32 %v569_v56, %v560_v59  ;;  %v2401_v56 = vld [vmem:[%s2831_s18 + $0x8] sm:$0xff]  ;;  %vm745_vm11 = vcmp.gt.s32.totalorder %v743_v51, %v2737_v36  ;;  %v779_v59 = vadd.s32 48, %v2829_v35 }
  0x52   : > { %vm925_vm7 = vcmp.gt.s32.totalorder %v923_v57, %v2737_v36 }
  0x53   : > { %v580_v2 = vadd.f32 %v579_v60, %v570_v63  ;;  %v710_v60 = vsel %vm709_vm6, %v2402_v53, 0.0  ;;  %v692_v63 = vsel %vm691_vm9, %v2401_v56, 0.0  ;;  %vm781_vm14 = vcmp.gt.s32.totalorder %v779_v59, %v2737_v36 }
  0x54   : > { %v941_v56 = vadd.s32 120, %v2829_v35 }
  0x55   : > { %v590_v4 = vadd.f32 %v589_v0, %v580_v2  ;;  %v746_v2 = vsel %vm745_vm11, %v2404_v58, 0.0 }
  0x56   : > { %vm943_vm6 = vcmp.gt.s32.totalorder %v941_v56, %v2737_v36 }
  0x57   : > { %v600_v6 = vadd.f32 %v599_v3, %v590_v4  ;;  %v833_v4 = vadd.s32 72, %v2829_v35 }
  0x59   : > { %v612_v7 = vadd.f32 %v611_v5, %v600_v6  ;;  %v815_v5 = vadd.s32 64, %v2829_v35  ;;  %vm835_vm15 = vcmp.gt.s32.totalorder %v833_v4, %v2737_v36  ;;  %v2414_v4 = vld [vmem:[%s2831_s18 + $0x70] sm:$0xff] }
  0x5b   : > { %v613_v8 = vrot.slane %v612_v7, 4 }
  0x5d   : > { %v614_v9 = vadd.f32 %v613_v8, %v612_v7 }
  0x5f   : > { %v615_v10 = vrot.slane %v614_v9, 2 }
  0x61   : > { %v616_v11 = vadd.f32 %v615_v10, %v614_v9  ;;  %v2407_v10 = vld [vmem:[%s2831_s18 + $0x38] sm:$0xff] }
  0x63   : > { %v617_v12 = vrot.slane %v616_v11, 1 }
  0x65   : > { %v2803_v13 = vadd.f32 %v617_v12, %v616_v11  ;;  %v2406_v11 = vld [vmem:[%s2831_s18 + $0x30] sm:$0xff] }
  0x67   : > { %2597 = vrsqrt.f32 %v2803_v13  ;;  %vm621_vm0 = vcmp.eq.f32.partialorder %v2803_v13, inf  ;;  %v624_v17 = vand.u32 2147483648, %v2803_v13  ;;  %vm623_vm1 = vcmp.eq.f32.partialorder %v2803_v13, 0.0 }
  0x71   : > { %v2598_v16 = vpop.eup %2597 }
  0x72   : > { %v620_v18 = vmul.f32 %v2598_v16, %v2803_v13 }
  0x74   : > { %v622_v19 = vsel %vm621_vm0, %v2803_v13, %v620_v18  ;;  %vm817_vm0 = vcmp.gt.s32.totalorder %v815_v5, %v2737_v36  ;;  %v977_v5 = vadd.s32 136, %v2829_v35 }
  0x75   : > { %v625_v21 = vsel %vm623_vm1, %v624_v17, %v622_v19 }
  0x76   : > { %v635_v22 = vand.u32 2147483647, %v625_v21  ;;  %vm979_vm8 = vcmp.gt.s32.totalorder %v977_v5, %v2737_v36 }
  0x78   : > { %v636_v23 = vmax.f32 %v634_v20, %v635_v22 }
  0x7a   : > { %2599 = vrcp.f32 %v636_v23  ;;  %vm648_vm4 = vcmp.eq.f32.partialorder %v636_v23, 0.0 }
  0x84   : > { %v2600_v24 = vpop.eup %2599 }
  0x85   : > { %v638_v25 = vmul.f32 %v2600_v24, %v633_v15  ;;  %v641_v26 = vmul.f32 0.0, %v2600_v24  ;;  %v645_v27 = vmul.f32 %v2600_v24, %v635_v22  ;;  %v800_v22 = vsel %vm799_vm13, %v2407_v10, 0.0  ;;  %v2409_v24 = vld [vmem:[%s2831_s18 + $0x48] sm:$0xff] }
  0x87   : > { %v639_v28 = vmul.f32 %v638_v25, %v638_v25  ;;  %v642_v29 = vmul.f32 %v641_v26, %v641_v26  ;;  %v646_v30 = vmul.f32 %v645_v27, %v645_v27  ;;  %v2408_v25 = vld [vmem:[%s2831_s18 + $0x40] sm:$0xff]  ;;  %v869_v26 = vadd.s32 88, %v2829_v35 }
  0x88   : > { %v851_v27 = vadd.s32 80, %v2829_v35 }
  0x89   : > { %v643_v31 = vadd.f32 %v642_v29, %v639_v28 }
  0x8b   : > { %v647_v32 = vadd.f32 %v646_v30, %v643_v31 }
  0x8d   : > { %2601 = vrsqrt.f32 %v647_v32  ;;  %vm651_vm2 = vcmp.eq.f32.partialorder %v647_v32, inf  ;;  %v654_v37 = vand.u32 2147483648, %v647_v32  ;;  %vm653_vm3 = vcmp.eq.f32.partialorder %v647_v32, 0.0 }
  0x97   : > { %v2602_v34 = vpop.eup %2601 }
  0x98   : > { %v650_v38 = vmul.f32 %v2602_v34, %v647_v32 }
  0x9a   : > { %v652_v39 = vsel %vm651_vm2, %v647_v32, %v650_v38  ;;  %v818_v38 = vsel %vm817_vm0, %v2408_v25, 0.0  ;;  %vm871_vm2 = vcmp.gt.s32.totalorder %v869_v26, %v2737_v36 }
  0x9b   : > { %v655_v40 = vsel %vm653_vm3, %v654_v37, %v652_v39  ;;  %v836_v37 = vsel %vm835_vm15, %v2409_v24, 0.0  ;;  %v2411_v39 = vld [vmem:[%s2831_s18 + $0x58] sm:$0xff]  ;;  %vm853_vm3 = vcmp.gt.s32.totalorder %v851_v27, %v2737_v36 }
  0x9c   : > { %v656_v41 = vmul.f32 %v655_v40, %v636_v23  ;;  %v782_v23 = vsel %vm781_vm14, %v2406_v11, 0.0  ;;  %v2410_v40 = vld [vmem:[%s2831_s18 + $0x50] sm:$0xff]  ;;  %v872_v51 = vsel %vm871_vm2, %v2411_v39, 0.0 }
  0x9d   : > { %v854_v53 = vsel %vm853_vm3, %v2410_v40, 0.0 }
  0x9e   : > { %v657_v42 = vsel %vm648_vm4, 0.0, %v656_v41  ;;  %v905_v41 = vadd.s32 104, %v2829_v35 }
  0x9f   : > { %v659_v43 = vxor.u32 2147483648, %v657_v42 }
  0xa0   : > { %vm907_vm4 = vcmp.gt.s32.totalorder %v905_v41, %v2737_v36 }
  0xa1   : > { %v2818_v44 = vsel %vm658_vm5, %v657_v42, %v659_v43  ;;  %v887_v42 = vadd.s32 96, %v2829_v35 }
  0xa2   : > { %v2824_v45 = vsel %vm623_vm1, %v2807_v14, %v2818_v44 }
  0xa3   : > { %4164 = vst [vmem:[#allocation5_spill] sm:$0xff] %v2824_v45  ;;  %v666_v46 = vsub.f32 %v2807_v14, %v2824_v45  ;;  %vm889_vm5 = vcmp.gt.s32.totalorder %v887_v42, %v2737_v36 }
  0xa5   : > { %2603 = vrcp.f32 %v666_v46 }
  0xa6   : > { %2605 = vrcp.f32 %v2818_v44 }
  0xaf   : > { %v2862_v3 = vpop.eup %2603 }
  0xb0   : > { %v712_v6 = vmul.f32 %v2862_v3, %v710_v60  ;;  %v677_v7 = vmul.f32 %v2862_v3, %v675_v61  ;;  %v730_v8 = vmul.f32 %v2862_v3, %v728_v62  ;;  %v694_v9 = vmul.f32 %v2862_v3, %v692_v63 }
  0xb1   : > { %v766_v12 = vmul.f32 %v2862_v3, %v764_v1  ;;  %v748_v15 = vmul.f32 %v2862_v3, %v746_v2  ;;  %v802_v32 = vmul.f32 %v2862_v3, %v800_v22  ;;  %v784_v34 = vmul.f32 %v2862_v3, %v782_v23  ;;  %v2415_v2 = vld [vmem:[%s2831_s18 + $0x78] sm:$0xff] }
  0xb2   : > { %v713_v16 = vsel %vm623_vm1, 0.0, %v712_v6  ;;  %v678_v17 = vsel %vm623_vm1, 0.0, %v677_v7  ;;  %v731_v18 = vsel %vm623_vm1, 0.0, %v730_v8  ;;  %v695_v19 = vsel %vm623_vm1, 0.0, %v694_v9 }
  0xb3   : > { %v718_v20 = vsel %vm2858_vm12, %v713_v16, 0.0  ;;  %v683_v21 = vsel %vm2858_vm12, %v678_v17, 0.0  ;;  %v736_v28 = vsel %vm2858_vm12, %v731_v18, 0.0  ;;  %v700_v29 = vsel %vm2858_vm12, %v695_v19, 0.0  ;;  %v2417_v17 = vld [vmem:[%s2831_s18 + $0x88] sm:$0xff]  ;;  %v2416_v18 = vld [vmem:[%s2831_s18 + $0x80] sm:$0xff] }
  0xb4   : > { %719 = vadd.xlane.f32.xlu1 %v718_v20  ;;  %684 = vadd.xlane.f32.xlu0 %v683_v21  ;;  %v767_v30 = vsel %vm623_vm1, 0.0, %v766_v12  ;;  %v749_v31 = vsel %vm623_vm1, 0.0, %v748_v15  ;;  %v803_v47 = vsel %vm623_vm1, 0.0, %v802_v32  ;;  %v785_v48 = vsel %vm623_vm1, 0.0, %v784_v34 }
  0xb5   : > { %v772_v43 = vsel %vm2858_vm12, %v767_v30, 0.0  ;;  %v754_v46 = vsel %vm2858_vm12, %v749_v31, 0.0  ;;  %v838_v49 = vmul.f32 %v2862_v3, %v836_v37  ;;  %v820_v50 = vmul.f32 %v2862_v3, %v818_v38  ;;  %v2418_v30 = vld [vmem:[%s2831_s18 + $0x90] sm:$0xff] }
  0xb6   : > { %v808_v58 = vsel %vm2858_vm12, %v803_v47, 0.0  ;;  %v790_v33 = vsel %vm2858_vm12, %v785_v48, 0.0  ;;  %v874_v61 = vmul.f32 %v2862_v3, %v872_v51  ;;  %v856_v62 = vmul.f32 %v2862_v3, %v854_v53  ;;  %v2420_v47 = vld [vmem:[%s2831_s18 + $0xa0] sm:$0xff] }
  0xb7   : > { %v839_v59 = vsel %vm623_vm1, 0.0, %v838_v49  ;;  %v821_v60 = vsel %vm623_vm1, 0.0, %v820_v50  ;;  %v908_v63 = vsel %vm907_vm4, %v2413_v54, 0.0  ;;  %v890_v1 = vsel %vm889_vm5, %v2412_v55, 0.0 }
  0xb8   : > { %737 = vadd.xlane.f32.xlu1 %v736_v28  ;;  %701 = vadd.xlane.f32.xlu0 %v700_v29  ;;  %v959_v6 = vadd.s32 128, %v2829_v35  ;;  %v844_v7 = vsel %vm2858_vm12, %v839_v59, 0.0  ;;  %v826_v8 = vsel %vm2858_vm12, %v821_v60, 0.0  ;;  %v875_v9 = vsel %vm623_vm1, 0.0, %v874_v61  ;;  %v2419_v29 = vld [vmem:[%s2831_s18 + $0x98] sm:$0xff]  ;;  %v2422_v59 = vld [vmem:[%s2831_s18 + $0xb0] sm:$0xff] }
  0xb9   : > { %v857_v10 = vsel %vm623_vm1, 0.0, %v856_v62  ;;  %v910_v11 = vmul.f32 %v2862_v3, %v908_v63  ;;  %v892_v12 = vmul.f32 %v2862_v3, %v890_v1  ;;  %v944_v15 = vsel %vm943_vm6, %v2415_v2, 0.0 }
  0xba   : > { %v926_v16 = vsel %vm925_vm7, %v2414_v4, 0.0  ;;  %vm961_vm9 = vcmp.gt.s32.totalorder %v959_v6, %v2737_v36  ;;  %v1013_v19 = vadd.s32 152, %v2829_v35  ;;  %v995_v20 = vadd.s32 144, %v2829_v35 }
  0xbb   : > { %v880_v21 = vsel %vm2858_vm12, %v875_v9, 0.0  ;;  %v862_v22 = vsel %vm2858_vm12, %v857_v10, 0.0  ;;  %v911_v23 = vsel %vm623_vm1, 0.0, %v910_v11  ;;  %v893_v24 = vsel %vm623_vm1, 0.0, %v892_v12  ;;  %v2424_v9 = vld [vmem:[%s2831_s18 + $0xc0] sm:$0xff] }
  0xbc   : > { %773 = vadd.xlane.f32.xlu1 %v772_v43  ;;  %755 = vadd.xlane.f32.xlu0 %v754_v46  ;;  %v946_v25 = vmul.f32 %v2862_v3, %v944_v15  ;;  %v928_v26 = vmul.f32 %v2862_v3, %v926_v16  ;;  %v980_v27 = vsel %vm979_vm8, %v2417_v17, 0.0  ;;  %v962_v28 = vsel %vm961_vm9, %v2416_v18, 0.0  ;;  %v2421_v46 = vld [vmem:[%s2831_s18 + $0xa8] sm:$0xff] }
  0xbd   : > { %vm1015_vm10 = vcmp.gt.s32.totalorder %v1013_v19, %v2737_v36  ;;  %vm997_vm11 = vcmp.gt.s32.totalorder %v995_v20, %v2737_v36  ;;  %v1049_v31 = vadd.s32 168, %v2829_v35  ;;  %v1031_v32 = vadd.s32 160, %v2829_v35 }
  0xbe   : > { %v916_v34 = vsel %vm2858_vm12, %v911_v23, 0.0  ;;  %v898_v37 = vsel %vm2858_vm12, %v893_v24, 0.0  ;;  %v947_v38 = vsel %vm623_vm1, 0.0, %v946_v25  ;;  %v929_v39 = vsel %vm623_vm1, 0.0, %v928_v26  ;;  %v2427_v23 = vld [vmem:[%s2831_s18 + $0xd8] sm:$0xff]  ;;  %v2426_v24 = vld [vmem:[%s2831_s18 + $0xd0] sm:$0xff] }
  0xbf   : > { %v982_v40 = vmul.f32 %v2862_v3, %v980_v27  ;;  %v964_v41 = vmul.f32 %v2862_v3, %v962_v28  ;;  %v1016_v42 = vsel %vm1015_vm10, %v2419_v29, 0.0  ;;  %v998_v43 = vsel %vm997_vm11, %v2418_v30, 0.0 }
  0xc0   : > { %809 = vadd.xlane.f32.xlu1 %v808_v58  ;;  %791 = vadd.xlane.f32.xlu0 %v790_v33  ;;  %vm1051_vm13 = vcmp.gt.s32.totalorder %v1049_v31, %v2737_v36  ;;  %vm1033_vm14 = vcmp.gt.s32.totalorder %v1031_v32, %v2737_v36  ;;  %v1085_v48 = vadd.s32 184, %v2829_v35  ;;  %v1067_v49 = vadd.s32 176, %v2829_v35  ;;  %v2423_v33 = vld [vmem:[%s2831_s18 + $0xb8] sm:$0xff] }
  0xc1   : > { %v952_v50 = vsel %vm2858_vm12, %v947_v38, 0.0  ;;  %v934_v51 = vsel %vm2858_vm12, %v929_v39, 0.0  ;;  %v983_v53 = vsel %vm623_vm1, 0.0, %v982_v40  ;;  %v965_v54 = vsel %vm623_vm1, 0.0, %v964_v41  ;;  %v2429_v38 = vld [vmem:[%s2831_s18 + $0xe8] sm:$0xff]  ;;  %v2428_v39 = vld [vmem:[%s2831_s18 + $0xe0] sm:$0xff] }
  0xc2   : > { %v1018_v55 = vmul.f32 %v2862_v3, %v1016_v42  ;;  %v1000_v56 = vmul.f32 %v2862_v3, %v998_v43  ;;  %v1052_v57 = vsel %vm1051_vm13, %v2421_v46, 0.0  ;;  %v1034_v58 = vsel %vm1033_vm14, %v2420_v47, 0.0 }
  0xc3   : > { %vm1087_vm15 = vcmp.gt.s32.totalorder %v1085_v48, %v2737_v36  ;;  %vm1069_vm0 = vcmp.gt.s32.totalorder %v1067_v49, %v2737_v36  ;;  %v1121_v60 = vadd.s32 200, %v2829_v35  ;;  %v1103_v61 = vadd.s32 192, %v2829_v35  ;;  %v2431_v49 = vld [vmem:[%s2831_s18 + $0xf8] sm:$0xff] }
  0xc4   : > { %845 = vadd.xlane.f32.xlu1 %v844_v7  ;;  %827 = vadd.xlane.f32.xlu0 %v826_v8  ;;  %v988_v62 = vsel %vm2858_vm12, %v983_v53, 0.0  ;;  %v970_v63 = vsel %vm2858_vm12, %v965_v54, 0.0  ;;  %v1019_v1 = vsel %vm623_vm1, 0.0, %v1018_v55  ;;  %v1001_v2 = vsel %vm623_vm1, 0.0, %v1000_v56  ;;  %v2425_v8 = vld [vmem:[%s2831_s18 + $0xc8] sm:$0xff]  ;;  %v2430_v54 = vld [vmem:[%s2831_s18 + $0xf0] sm:$0xff] }
  0xc5   : > { %v1054_v4 = vmul.f32 %v2862_v3, %v1052_v57  ;;  %v1036_v5 = vmul.f32 %v2862_v3, %v1034_v58  ;;  %v1088_v6 = vsel %vm1087_vm15, %v2423_v33, 0.0  ;;  %v1070_v7 = vsel %vm1069_vm0, %v2422_v59, 0.0 }
  0xc6   : > { %vm1123_vm2 = vcmp.gt.s32.totalorder %v1121_v60, %v2737_v36  ;;  %vm1105_vm3 = vcmp.gt.s32.totalorder %v1103_v61, %v2737_v36  ;;  %v1157_v10 = vadd.s32 216, %v2829_v35  ;;  %v1139_v11 = vadd.s32 208, %v2829_v35 }
  0xc7   : > { %v1024_v12 = vsel %vm2858_vm12, %v1019_v1, 0.0  ;;  %v1006_v15 = vsel %vm2858_vm12, %v1001_v2, 0.0  ;;  %v1055_v16 = vsel %vm623_vm1, 0.0, %v1054_v4  ;;  %v1037_v17 = vsel %vm623_vm1, 0.0, %v1036_v5 }
  0xc8   : > { %881 = vadd.xlane.f32.xlu1 %v880_v21  ;;  %863 = vadd.xlane.f32.xlu0 %v862_v22  ;;  %v1090_v18 = vmul.f32 %v2862_v3, %v1088_v6  ;;  %v1072_v19 = vmul.f32 %v2862_v3, %v1070_v7  ;;  %v1124_v20 = vsel %vm1123_vm2, %v2425_v8, 0.0  ;;  %v1106_v21 = vsel %vm1105_vm3, %v2424_v9, 0.0  ;;  %v2606_v7 = vpop.eup %2605 }
  0xc9   : > { %v1229_v22 = vadd.s32 248, %v2829_v35  ;;  %vm1159_vm4 = vcmp.gt.s32.totalorder %v1157_v10, %v2737_v36  ;;  %vm1141_vm5 = vcmp.gt.s32.totalorder %v1139_v11, %v2737_v36  ;;  %v1193_v25 = vadd.s32 232, %v2829_v35 }
  0xca   : > { %v1175_v26 = vadd.s32 224, %v2829_v35  ;;  %v1060_v27 = vsel %vm2858_vm12, %v1055_v16, 0.0  ;;  %v1042_v28 = vsel %vm2858_vm12, %v1037_v17, 0.0  ;;  %v1091_v29 = vsel %vm623_vm1, 0.0, %v1090_v18 }
  0xcb   : > { %v1073_v30 = vsel %vm623_vm1, 0.0, %v1072_v19  ;;  %v1126_v31 = vmul.f32 %v2862_v3, %v1124_v20  ;;  %v1108_v32 = vmul.f32 %v2862_v3, %v1106_v21  ;;  %vm1231_vm6 = vcmp.gt.s32.totalorder %v1229_v22, %v2737_v36 }
  0xcc   : > { %917 = vadd.xlane.f32.xlu1 %v916_v34  ;;  %899 = vadd.xlane.f32.xlu0 %v898_v37  ;;  %v1160_v34 = vsel %vm1159_vm4, %v2427_v23, 0.0  ;;  %v1142_v37 = vsel %vm1141_vm5, %v2426_v24, 0.0  ;;  %vm1232_vm7 = vcmp.lt.s32.totalorder %v1229_v22, 256  ;;  %vm1195_vm8 = vcmp.gt.s32.totalorder %v1193_v25, %v2737_v36 }
  0xcd   : > { %vm1177_vm9 = vcmp.gt.s32.totalorder %v1175_v26, %v2737_v36  ;;  %v1211_v40 = vadd.s32 240, %v2829_v35  ;;  %v1096_v41 = vsel %vm2858_vm12, %v1091_v29, 0.0  ;;  %v1078_v42 = vsel %vm2858_vm12, %v1073_v30, 0.0  ;;  %vm3074_vm10 = vmand %vm1231_vm6, %vm1232_vm7 }
  0xce   : > { %v1127_v43 = vsel %vm623_vm1, 0.0, %v1126_v31  ;;  %v1109_v46 = vsel %vm623_vm1, 0.0, %v1108_v32  ;;  %v1162_v47 = vmul.f32 %v2862_v3, %v1160_v34  ;;  %v1144_v48 = vmul.f32 %v2862_v3, %v1142_v37 }
  0xcf   : > { %v1178_v53 = vsel %vm1177_vm9, %v2428_v39, 0.0  ;;  %vm1213_vm11 = vcmp.gt.s32.totalorder %v1211_v40, %v2737_v36  ;;  %v1132_v55 = vsel %vm2858_vm12, %v1127_v43, 0.0  ;;  %v1114_v56 = vsel %vm2858_vm12, %v1109_v46, 0.0 }
  0xd0   : > { %953 = vadd.xlane.f32.xlu1 %v952_v50  ;;  %935 = vadd.xlane.f32.xlu0 %v934_v51  ;;  %v1196_v51 = vsel %vm1195_vm8, %v2429_v38, 0.0  ;;  %v1234_v57 = vsel %vm3074_vm10, %v2431_v49, 0.0  ;;  %v1163_v58 = vsel %vm623_vm1, 0.0, %v1162_v47  ;;  %v1145_v33 = vsel %vm623_vm1, 0.0, %v1144_v48 }
  0xd1   : > { %v1198_v59 = vmul.f32 %v2862_v3, %v1196_v51  ;;  %v1180_v60 = vmul.f32 %v2862_v3, %v1178_v53  ;;  %v1214_v61 = vsel %vm1213_vm11, %v2430_v54, 0.0  ;;  %v1236_v1 = vmul.f32 %v2862_v3, %v1234_v57  ;;  %v1260_v54 = vld [vmem:[#allocation2] ss:$0 sm:$0xff] }
  0xd2   : > { %v1216_v5 = vmul.f32 %v2862_v3, %v1214_v61  ;;  %v661_v6 = vsub.f32 %v2818_v44, %v2807_v14  ;;  %v2616_v53 = vmov 1.0   ;;  %v1270_v57 = vld [vmem:[%s3121_s20] sm:$0xff]  ;;  %v1267_v35 = vmov %v2734_v35 }
  0xd3   : > { %v1199_v2 = vsel %vm623_vm1, 0.0, %v1198_v59  ;;  %v1181_v4 = vsel %vm623_vm1, 0.0, %v1180_v60  ;;  %v1237_v10 = vsel %vm623_vm1, 0.0, %v1236_v1  ;;  %v2437_v1 = vld [vmem:[%s3121_s20 + $0x18] sm:$0xff]  ;;  %vm3240_vm6 = vcmp.gt.s32.totalorder %v2839_v52, %v2737_v36 }
  0xd4   : > { %989 = vadd.xlane.f32.xlu1 %v988_v62  ;;  %971 = vadd.xlane.f32.xlu0 %v970_v63  ;;  %v1168_v62 = vsel %vm2858_vm12, %v1163_v58, 0.0  ;;  %v1150_v63 = vsel %vm2858_vm12, %v1145_v33, 0.0  ;;  %v1204_v8 = vsel %vm2858_vm12, %v1199_v2, 0.0  ;;  %v1186_v9 = vsel %vm2858_vm12, %v1181_v4, 0.0  ;;  %v2433_v58 = vld [vmem:[%s3121_s20 + $0x8] sm:$0xff]  ;;  %v2435_v33 = vld [vmem:[%s3121_s20 + $0x10] sm:$0xff] }
  0xd5   : > { %v1217_v11 = vsel %vm623_vm1, 0.0, %v1216_v5  ;;  %v1242_v14 = vsel %vm2858_vm12, %v1237_v10, 0.0  ;;  %v2441_v10 = vld [vmem:[%s3121_s20 + $0x28] sm:$0xff] }
  0xd6   : > { %v1222_v44 = vsel %vm2858_vm12, %v1217_v11, 0.0 }
  0xd8   : > { %1025 = vadd.xlane.f32.xlu1 %v1024_v12  ;;  %1007 = vadd.xlane.f32.xlu0 %v1006_v15  ;;  %v663_v12 = vmul.f32 %v2606_v7, %v661_v6  ;;  %v2439_v6 = vld [vmem:[%s3121_s20 + $0x20] sm:$0xff] }
  0xda   : > { %v665_v3 = vsel %vm623_vm1, 0.0, %v663_v12 }
  0xdb   : > { %v1253_v15 = vsel %vm2858_vm12, %v665_v3, 0.0 }
  0xdc   : > { %1061 = vadd.xlane.f32.xlu1 %v1060_v27  ;;  %1043 = vadd.xlane.f32.xlu0 %v1042_v28 }
  0xe0   : > { %1097 = vadd.xlane.f32.xlu1 %v1096_v41  ;;  %1079 = vadd.xlane.f32.xlu0 %v1078_v42 }
  0xe4   : > { %1133 = vadd.xlane.f32.xlu1 %v1132_v55  ;;  %1115 = vadd.xlane.f32.xlu0 %v1114_v56 }
  0xe8   : > { %1169 = vadd.xlane.f32.xlu1 %v1168_v62  ;;  %1151 = vadd.xlane.f32.xlu0 %v1150_v63 }
  0xec   : > { %1205 = vadd.xlane.f32.xlu1 %v1204_v8  ;;  %1187 = vadd.xlane.f32.xlu0 %v1186_v9 }
  0xf0   : > { %1243 = vadd.xlane.f32.xlu1 %v1242_v14  ;;  %1223 = vadd.xlane.f32.xlu0 %v1222_v44  ;;  %v2443_v44 = vld [vmem:[%s3121_s20 + $0x30] sm:$0xff] }
  0xf4   : > { %1254 = vadd.xlane.f32.xlu0 %v1253_v15 }
 0x141   : > { %v720_v16 = vpop.xlane.xlu1 %719  ;;  %v685_v17 = vpop.xlane.xlu0 %684 }
 0x142   : > { %722 = vst [vmem:[#allocation4 + $0x10] sm:$0xff] %v720_v16  ;;  %686 = vst [vmem:[#allocation4] sm:$0xff] %v685_v17  ;;  %v2445_v17 = vld [vmem:[%s3121_s20 + $0x38] sm:$0xff] }
 0x145   : > { %v738_v18 = vpop.xlane.xlu1 %737  ;;  %v702_v19 = vpop.xlane.xlu0 %701 }
 0x146   : > { %740 = vst [vmem:[#allocation4 + $0x18] sm:$0xff] %v738_v18  ;;  %704 = vst [vmem:[#allocation4 + $0x8] sm:$0xff] %v702_v19 }
 0x149   : > { %v774_v20 = vpop.xlane.xlu1 %773  ;;  %v756_v21 = vpop.xlane.xlu0 %755 }
 0x14a   : > { %776 = vst [vmem:[#allocation4 + $0x28] sm:$0xff] %v774_v20  ;;  %758 = vst [vmem:[#allocation4 + $0x20] sm:$0xff] %v756_v21  ;;  %v2447_v21 = vld [vmem:[%s3121_s20 + $0x40] sm:$0xff] }
 0x14d   : > { %v810_v13 = vpop.xlane.xlu1 %809  ;;  %v792_v22 = vpop.xlane.xlu0 %791 }
 0x14e   : > { %812 = vst [vmem:[#allocation4 + $0x38] sm:$0xff] %v810_v13  ;;  %794 = vst [vmem:[#allocation4 + $0x30] sm:$0xff] %v792_v22 }
 0x151   : > { %v846_v23 = vpop.xlane.xlu1 %845  ;;  %v828_v24 = vpop.xlane.xlu0 %827 }
 0x152   : > { %848 = vst [vmem:[#allocation4 + $0x48] sm:$0xff] %v846_v23  ;;  %830 = vst [vmem:[#allocation4 + $0x40] sm:$0xff] %v828_v24  ;;  %v2449_v24 = vld [vmem:[%s3121_s20 + $0x48] sm:$0xff] }
 0x155   : > { %v882_v25 = vpop.xlane.xlu1 %881  ;;  %v864_v26 = vpop.xlane.xlu0 %863 }
 0x156   : > { %884 = vst [vmem:[#allocation4 + $0x58] sm:$0xff] %v882_v25  ;;  %866 = vst [vmem:[#allocation4 + $0x50] sm:$0xff] %v864_v26 }
 0x159   : > { %v918_v27 = vpop.xlane.xlu1 %917  ;;  %v900_v28 = vpop.xlane.xlu0 %899 }
 0x15a   : > { %920 = vst [vmem:[#allocation4 + $0x68] sm:$0xff] %v918_v27  ;;  %902 = vst [vmem:[#allocation4 + $0x60] sm:$0xff] %v900_v28  ;;  %v2451_v28 = vld [vmem:[%s3121_s20 + $0x50] sm:$0xff] }
 0x15d   : > { %v954_v29 = vpop.xlane.xlu1 %953  ;;  %v936_v30 = vpop.xlane.xlu0 %935 }
 0x15e   : > { %956 = vst [vmem:[#allocation4 + $0x78] sm:$0xff] %v954_v29  ;;  %938 = vst [vmem:[#allocation4 + $0x70] sm:$0xff] %v936_v30 }
 0x161   : > { %v990_v31 = vpop.xlane.xlu1 %989  ;;  %v972_v32 = vpop.xlane.xlu0 %971 }
 0x162   : > { %992 = vst [vmem:[#allocation4 + $0x88] sm:$0xff] %v990_v31  ;;  %974 = vst [vmem:[#allocation4 + $0x80] sm:$0xff] %v972_v32  ;;  %v2453_v32 = vld [vmem:[%s3121_s20 + $0x58] sm:$0xff] }
 0x165   : > { %v1026_v34 = vpop.xlane.xlu1 %1025  ;;  %v1008_v37 = vpop.xlane.xlu0 %1007 }
 0x166   : > { %1028 = vst [vmem:[#allocation4 + $0x98] sm:$0xff] %v1026_v34  ;;  %1010 = vst [vmem:[#allocation4 + $0x90] sm:$0xff] %v1008_v37 }
 0x169   : > { %v1062_v38 = vpop.xlane.xlu1 %1061  ;;  %v1044_v39 = vpop.xlane.xlu0 %1043 }
 0x16a   : > { %1064 = vst [vmem:[#allocation4 + $0xa8] sm:$0xff] %v1062_v38  ;;  %1046 = vst [vmem:[#allocation4 + $0xa0] sm:$0xff] %v1044_v39  ;;  %v2455_v39 = vld [vmem:[%s3121_s20 + $0x60] sm:$0xff] }
 0x16d   : > { %v1098_v40 = vpop.xlane.xlu1 %1097  ;;  %v1080_v41 = vpop.xlane.xlu0 %1079 }
 0x16e   : > { %1100 = vst [vmem:[#allocation4 + $0xb8] sm:$0xff] %v1098_v40  ;;  %1082 = vst [vmem:[#allocation4 + $0xb0] sm:$0xff] %v1080_v41 }
 0x171   : > { %v1134_v42 = vpop.xlane.xlu1 %1133  ;;  %v1116_v43 = vpop.xlane.xlu0 %1115 }
 0x172   : > { %1136 = vst [vmem:[#allocation4 + $0xc8] sm:$0xff] %v1134_v42  ;;  %1118 = vst [vmem:[#allocation4 + $0xc0] sm:$0xff] %v1116_v43  ;;  %v2457_v43 = vld [vmem:[%s3121_s20 + $0x68] sm:$0xff] }
 0x175   : > { %v1170_v46 = vpop.xlane.xlu1 %1169  ;;  %v1152_v47 = vpop.xlane.xlu0 %1151 }
 0x176   : > { %1172 = vst [vmem:[#allocation4 + $0xd8] sm:$0xff] %v1170_v46  ;;  %1154 = vst [vmem:[#allocation4 + $0xd0] sm:$0xff] %v1152_v47 }
 0x179   : > { %v1206_v48 = vpop.xlane.xlu1 %1205  ;;  %v1188_v49 = vpop.xlane.xlu0 %1187 }
 0x17a   : > { %1208 = vst [vmem:[#allocation4 + $0xe8] sm:$0xff] %v1206_v48  ;;  %1190 = vst [vmem:[#allocation4 + $0xe0] sm:$0xff] %v1188_v49  ;;  %v2459_v49 = vld [vmem:[%s3121_s20 + $0x70] sm:$0xff] }
 0x17d   : > { %v1244_v50 = vpop.xlane.xlu1 %1243  ;;  %v1224_v51 = vpop.xlane.xlu0 %1223 }
 0x17e   : > { %1246 = vst [vmem:[#allocation4 + $0xf8] sm:$0xff] %v1244_v50  ;;  %1226 = vst [vmem:[#allocation4 + $0xf0] sm:$0xff] %v1224_v51 }
 0x17f   : > { %1248 = vst [vmem:[%s1247_s19] sm:$0x1] %v2616_v53 }
 0x181   : > { %v3123_v55 = vpop.xlane.xlu0 %1254 }
 0x182   : > { %v1261_v56 = vsel %vm2858_vm12, %v3123_v55, %v1260_v54  ;;  %v2461_v54 = vld [vmem:[%s3121_s20 + $0x78] sm:$0xff] }
 0x183   : > { %1262 = vst [vmem:[#allocation2] sm:$0x1] %v1261_v56 }
 0x186   : > { %v1269_v59 = vld [vmem:[%s3128_s21] sm:$0xff]  ;;  %v2432_v60 = vld [vmem:[%s3128_s21 + $0x8] sm:$0xff]  ;;  %v2434_v61 = vld [vmem:[%s3128_s21 + $0x10] sm:$0xff] }
 0x187   : > { %v1271_v62 = vmul.f32 %v1270_v57, %v1269_v59  ;;  %v1277_v63 = vmul.f32 %v2433_v58, %v2432_v60  ;;  %v2436_v2 = vld [vmem:[%s3128_s21 + $0x18] sm:$0xff]  ;;  %v1284_v5 = vmul.f32 %v2435_v33, %v2434_v61  ;;  %v2438_v7 = vld [vmem:[%s3128_s21 + $0x20] sm:$0xff]  ;;  %v2440_v11 = vld [vmem:[%s3128_s21 + $0x28] sm:$0xff] }
 0x188   : > { %v1291_v9 = vmul.f32 %v2437_v1, %v2436_v2  ;;  %v1298_v14 = vmul.f32 %v2439_v6, %v2438_v7  ;;  %v2442_v3 = vld [vmem:[%s3128_s21 + $0x30] sm:$0xff]  ;;  %v1305_v16 = vmul.f32 %v2441_v10, %v2440_v11  ;;  %v2444_v18 = vld [vmem:[%s3128_s21 + $0x38] sm:$0xff]  ;;  %v2446_v13 = vld [vmem:[%s3128_s21 + $0x40] sm:$0xff] }
 0x189   : > { %v1278_v4 = vadd.f32 %v1277_v63, %v1271_v62  ;;  %v1312_v20 = vmul.f32 %v2443_v44, %v2442_v3  ;;  %v1319_v23 = vmul.f32 %v2445_v17, %v2444_v18  ;;  %v2448_v25 = vld [vmem:[%s3128_s21 + $0x48] sm:$0xff]  ;;  %v1326_v27 = vmul.f32 %v2447_v21, %v2446_v13  ;;  %v2450_v29 = vld [vmem:[%s3128_s21 + $0x50] sm:$0xff]  ;;  %v2452_v34 = vld [vmem:[%s3128_s21 + $0x58] sm:$0xff] }
 0x18a   : > { %v1333_v31 = vmul.f32 %v2449_v24, %v2448_v25  ;;  %v1340_v38 = vmul.f32 %v2451_v28, %v2450_v29  ;;  %v2454_v40 = vld [vmem:[%s3128_s21 + $0x60] sm:$0xff]  ;;  %v1347_v42 = vmul.f32 %v2453_v32, %v2452_v34  ;;  %v2456_v46 = vld [vmem:[%s3128_s21 + $0x68] sm:$0xff]  ;;  %v2458_v50 = vld [vmem:[%s3128_s21 + $0x70] sm:$0xff] }
 0x18b   : > { %v1285_v8 = vadd.f32 %v1284_v5, %v1278_v4  ;;  %v1354_v48 = vmul.f32 %v2455_v39, %v2454_v40  ;;  %v1361_v53 = vmul.f32 %v2457_v43, %v2456_v46  ;;  %v2460_v56 = vld [vmem:[%s3128_s21 + $0x78] sm:$0xff]  ;;  %v1368_v58 = vmul.f32 %v2459_v49, %v2458_v50  ;;  %v2463_v33 = vld [vmem:[%s3121_s20 + $0x80] sm:$0xff]  ;;  %v2465_v62 = vld [vmem:[%s3121_s20 + $0x88] sm:$0xff] }
 0x18c   : > { %v2462_v59 = vld [vmem:[%s3128_s21 + $0x80] sm:$0xff]  ;;  %v1375_v61 = vmul.f32 %v2461_v54, %v2460_v56  ;;  %v2464_v63 = vld [vmem:[%s3128_s21 + $0x88] sm:$0xff]  ;;  %v2467_v4 = vld [vmem:[%s3121_s20 + $0x90] sm:$0xff] }
 0x18d   : > { %v1292_v12 = vadd.f32 %v1291_v9, %v1285_v8  ;;  %v1382_v2 = vmul.f32 %v2463_v33, %v2462_v59  ;;  %v2466_v5 = vld [vmem:[%s3128_s21 + $0x90] sm:$0xff]  ;;  %v1389_v7 = vmul.f32 %v2465_v62, %v2464_v63  ;;  %v2469_v8 = vld [vmem:[%s3121_s20 + $0x98] sm:$0xff] }
 0x18e   : > { %v2468_v9 = vld [vmem:[%s3128_s21 + $0x98] sm:$0xff]  ;;  %v1396_v11 = vmul.f32 %v2467_v4, %v2466_v5  ;;  %v2490_v59 = vld [vmem:[%s3128_s21 + $0xf0] sm:$0xff] }
 0x18f   : > { %v1299_v15 = vadd.f32 %v1298_v14, %v1292_v12  ;;  %v2470_v12 = vld [vmem:[%s3128_s21 + $0xa0] sm:$0xff]  ;;  %v1403_v44 = vmul.f32 %v2469_v8, %v2468_v9  ;;  %v2493_v33 = vld [vmem:[%s3121_s20 + $0xf8] sm:$0xff] }
 0x190   : > { %v2471_v14 = vld [vmem:[%s3121_s20 + $0xa0] sm:$0xff] }
 0x191   : > { %v1306_v19 = vadd.f32 %v1305_v16, %v1299_v15  ;;  %v2472_v15 = vld [vmem:[%s3128_s21 + $0xa8] sm:$0xff]  ;;  %v1410_v18 = vmul.f32 %v2471_v14, %v2470_v12 }
 0x192   : > { %v2473_v16 = vld [vmem:[%s3121_s20 + $0xa8] sm:$0xff] }
 0x193   : > { %v1313_v22 = vadd.f32 %v1312_v20, %v1306_v19  ;;  %v2474_v19 = vld [vmem:[%s3128_s21 + $0xb0] sm:$0xff]  ;;  %v1417_v13 = vmul.f32 %v2473_v16, %v2472_v15 }
 0x194   : > { %v2475_v20 = vld [vmem:[%s3121_s20 + $0xb0] sm:$0xff] }
 0x195   : > { %v1320_v26 = vadd.f32 %v1319_v23, %v1313_v22  ;;  %v2476_v22 = vld [vmem:[%s3128_s21 + $0xb8] sm:$0xff]  ;;  %v1424_v25 = vmul.f32 %v2475_v20, %v2474_v19 }
 0x196   : > { %v2477_v23 = vld [vmem:[%s3121_s20 + $0xb8] sm:$0xff] }
 0x197   : > { %v1327_v30 = vadd.f32 %v1326_v27, %v1320_v26  ;;  %v2478_v26 = vld [vmem:[%s3128_s21 + $0xc0] sm:$0xff]  ;;  %v1431_v29 = vmul.f32 %v2477_v23, %v2476_v22  ;;  %v4261_v23 = vld [vmem:[#allocation5_spill] sm:$0xff] }
 0x198   : > { %v2479_v27 = vld [vmem:[%s3121_s20 + $0xc0] sm:$0xff] }
 0x199   : > { %v1334_v37 = vadd.f32 %v1333_v31, %v1327_v30  ;;  %v2480_v30 = vld [vmem:[%s3128_s21 + $0xc8] sm:$0xff]  ;;  %v1438_v34 = vmul.f32 %v2479_v27, %v2478_v26 }
 0x19a   : > { %v2481_v31 = vld [vmem:[%s3121_s20 + $0xc8] sm:$0xff] }
 0x19b   : > { %v1341_v41 = vadd.f32 %v1340_v38, %v1334_v37  ;;  %v2482_v37 = vld [vmem:[%s3128_s21 + $0xd0] sm:$0xff]  ;;  %v1445_v40 = vmul.f32 %v2481_v31, %v2480_v30 }
 0x19c   : > { %v2483_v38 = vld [vmem:[%s3121_s20 + $0xd0] sm:$0xff] }
 0x19d   : > { %v1348_v47 = vadd.f32 %v1347_v42, %v1341_v41  ;;  %v2484_v41 = vld [vmem:[%s3128_s21 + $0xd8] sm:$0xff]  ;;  %v1452_v46 = vmul.f32 %v2483_v38, %v2482_v37 }
 0x19e   : > { %v2485_v42 = vld [vmem:[%s3121_s20 + $0xd8] sm:$0xff] }
 0x19f   : > { %v1355_v51 = vadd.f32 %v1354_v48, %v1348_v47  ;;  %v2486_v47 = vld [vmem:[%s3128_s21 + $0xe0] sm:$0xff]  ;;  %v1459_v50 = vmul.f32 %v2485_v42, %v2484_v41 }
 0x1a0   : > { %v2487_v48 = vld [vmem:[%s3121_s20 + $0xe0] sm:$0xff] }
 0x1a1   : > { %v1362_v57 = vadd.f32 %v1361_v53, %v1355_v51  ;;  %v2488_v51 = vld [vmem:[%s3128_s21 + $0xe8] sm:$0xff]  ;;  %v1466_v56 = vmul.f32 %v2487_v48, %v2486_v47 }
 0x1a2   : > { %v2489_v53 = vld [vmem:[%s3121_s20 + $0xe8] sm:$0xff] }
 0x1a3   : > { %v1369_v60 = vadd.f32 %v1368_v58, %v1362_v57  ;;  %v1482_v57 = vadd.s32 248, %v1267_v35  ;;  %v2492_v58 = vld [vmem:[%s3128_s21 + $0xf8] sm:$0xff]  ;;  %v1473_v62 = vmul.f32 %v2489_v53, %v2488_v51  ;;  %v3196_v35 = vmov %v2734_v35  ;;  %s3289_s21 = smov %s3128_s21 }
 0x1a4   : > { %v1487_v63 = vmul.f32 %v2493_v33, %v2492_v58  ;;  %v1543_v9 = vadd.s32 16, %v3196_v35  ;;  %vm1518_vm13 = vcmp.ge.s32.totalorder %v3196_v35, %v2737_v36  ;;  %v1606_v14 = vadd.s32 40, %v3196_v35  ;;  %v3351_v51 = vld [vmem:[%s3289_s21] sm:$0xff]  ;;  %v3354_v53 = vld [vmem:[%s3289_s21 + $0x8] sm:$0xff] }
 0x1a5   : > { %v1376_v1 = vadd.f32 %v1375_v61, %v1369_v60  ;;  %v2491_v60 = vld [vmem:[%s3121_s20 + $0xf0] sm:$0xff]  ;;  %vm1488_vm1 = vcmp.lt.s32.totalorder %v1482_v57, 256  ;;  %v3211_v15 = vadd.s32 64, %v3196_v35  ;;  %v3214_v16 = vadd.s32 72, %v3196_v35  ;;  %s3254_s20 = smov %s3121_s20  ;;  %vm3261_vm10 = vmand %vm2858_vm12, %vm1518_vm13 }
 0x1a6   : > { %v1489_v5 = vsel %vm1488_vm1, %v1487_v63, 0.0  ;;  %vm1560_vm15 = vcmp.ge.s32.totalorder %v1543_v9, %v2737_v36  ;;  %v3221_v19 = vadd.s32 88, %v3196_v35  ;;  %v3224_v20 = vadd.s32 96, %v3196_v35  ;;  %v2495_v41 = vld [vmem:[%s3254_s20 + $0x8] sm:$0xff]  ;;  %v2498_v42 = vld [vmem:[%s3254_s20 + $0x10] sm:$0xff]  ;;  %v3374_v33 = vld [vmem:[%s3254_s20 + $0x38] sm:$0xff]  ;;  %s2173_s22 = scalar_lea.vmem %s3254_s20, %s2613_s17 }
 0x1a7   : > { %v1383_v6 = vadd.f32 %v1382_v2, %v1376_v1  ;;  %v1480_v2 = vmul.f32 %v2491_v60, %v2490_v59  ;;  %vm1623_vm3 = vcmp.ge.s32.totalorder %v1606_v14, %v2737_v36  ;;  %vm1686_vm7 = vcmp.ge.s32.totalorder %v3211_v15, %v2737_v36  ;;  %vm3277_vm1 = vmand %vm2858_vm12, %vm1560_vm15  ;;  %v3363_v57 = vld [vmem:[%s3254_s20 + $0x30] sm:$0xff]  ;;  %v3546_v52 = vld [vmem:[%s3254_s20 + $0x68] sm:$0xff]  ;;  %s292_s17 = sadd.s32 1, %s2613_s17  }
 0x1a8   : > { %vm1707_vm8 = vcmp.ge.s32.totalorder %v3214_v16, %v2737_v36  ;;  %v3304_v30 = vadd.s32 136, %v3196_v35  ;;  %v3307_v31 = vadd.s32 144, %v3196_v35  ;;  %v3318_v37 = vadd.s32 152, %v3196_v35  ;;  %v2497_v63 = vld [vmem:[%s3289_s21 + $0x10] sm:$0xff]  ;;  %v3561_v27 = vld [vmem:[%s3254_s20 + $0x78] sm:$0xff]  ;;  %p289_p0 = scmp.ge.s32.totalorder %s292_s17, 128  }
 0x1a9   : > { %v1390_v10 = vadd.f32 %v1389_v7, %v1383_v6  ;;  %v1522_v7 = vadd.s32 8, %v3196_v35  ;;  %v3321_v38 = vadd.s32 160, %v3196_v35  ;;  %v3339_v47 = vadd.s32 176, %v3196_v35 }
 0x1aa   : > { %v3342_v48 = vadd.s32 184, %v3196_v35  ;;  %v3379_v59 = vadd.s32 208, %v3196_v35  ;;  %v3382_v60 = vadd.s32 216, %v3196_v35  ;;  %v4193_v15 = vmov 0 }
 0x1ab   : > { %v1397_v3 = vadd.f32 %v1396_v11, %v1390_v10  ;;  %v1564_v10 = vadd.s32 24, %v3196_v35  ;;  %v1585_v11 = vadd.s32 32, %v3196_v35  ;;  %vm1539_vm14 = vcmp.ge.s32.totalorder %v1522_v7, %v2737_v36  ;;  %v3412_v7 = vld [vmem:[%s3289_s21 + $0x30] sm:$0xff] }
 0x1ac   : > { %vm3269_vm11 = vmand %vm2858_vm12, %vm1539_vm14 }
 0x1ad   : > { %v1404_v17 = vadd.f32 %v1403_v44, %v1397_v3  ;;  %v1627_v44 = vadd.s32 48, %v3196_v35  ;;  %v3207_v3 = vadd.s32 56, %v3196_v35  ;;  %vm1581_vm0 = vcmp.ge.s32.totalorder %v1564_v10, %v2737_v36 }
 0x1ae   : > { %vm1602_vm2 = vcmp.ge.s32.totalorder %v1585_v11, %v2737_v36  ;;  %vm3295_vm15 = vmand %vm2858_vm12, %vm1581_vm0 }
 0x1af   : > { %v1411_v21 = vadd.f32 %v1410_v18, %v1404_v17  ;;  %v3217_v17 = vadd.s32 80, %v3196_v35  ;;  %vm1644_vm4 = vcmp.ge.s32.totalorder %v1627_v44, %v2737_v36  ;;  %vm1665_vm5 = vcmp.ge.s32.totalorder %v3207_v3, %v2737_v36  ;;  %vm3313_vm0 = vmand %vm2858_vm12, %vm1602_vm2 }
 0x1b0   : > { %vm3334_vm2 = vmand %vm2858_vm12, %vm1623_vm3 }
 0x1b1   : > { %v1418_v24 = vadd.f32 %v1417_v13, %v1411_v21  ;;  %v3229_v21 = vadd.s32 104, %v3196_v35  ;;  %v3232_v13 = vadd.s32 112, %v3196_v35  ;;  %vm1728_vm9 = vcmp.ge.s32.totalorder %v3217_v17, %v2737_v36  ;;  %vm3369_vm3 = vmand %vm2858_vm12, %vm1644_vm4  ;;  %v3764_v17 = vld [vmem:[%s3254_s20 + $0xb8] sm:$0xff] }
 0x1b2   : > { %vm3430_vm14 = vmand %vm2858_vm12, %vm1665_vm5 }
 0x1b3   : > { %v1425_v28 = vadd.f32 %v1424_v25, %v1418_v24  ;;  %v3251_v24 = vadd.s32 120, %v3196_v35  ;;  %vm3449_vm5 = vmand %vm2858_vm12, %vm1686_vm7 }
 0x1b4   : > { %vm3458_vm4 = vmand %vm2858_vm12, %vm1707_vm8  ;;  %vm4195_vm8 = vcmp.ge.s32.totalorder %v3221_v19, %v2737_v36  ;;  %v4199_v19 = vmov 0 }
 0x1b5   : > { %v1432_v32 = vadd.f32 %v1431_v29, %v1425_v28  ;;  %v3286_v28 = vadd.s32 128, %v3196_v35  ;;  %vm3467_vm13 = vmand %vm2858_vm12, %vm1728_vm9 }
 0x1b6   : > { %v4194_v15 = vsel %vm3467_vm13, 4294967295, %v4193_v15  ;;  %vm3478_vm9 = vmand %vm2858_vm12, %vm4195_vm8  ;;  %vm4198_vm13 = vcmp.ge.s32.totalorder %v3224_v20, %v2737_v36 }
 0x1b7   : > { %v1439_v39 = vadd.f32 %v1438_v34, %v1432_v32  ;;  %vm3493_vm8 = vmand %vm2858_vm12, %vm4198_vm13  ;;  %vm4202_vm13 = vcmp.ge.s32.totalorder %v3229_v21, %v2737_v36 }
 0x1b8   : > { %v4200_v19 = vsel %vm3493_vm8, 4294967295, %v4199_v19  ;;  %vm3522_vm7 = vmand %vm2858_vm12, %vm4202_vm13  ;;  %vm4211_vm13 = vcmp.ge.s32.totalorder %v3286_v28, %v2737_v36 }
 0x1b9   : > { %v1446_v43 = vadd.f32 %v1445_v40, %v1439_v39  ;;  %v3324_v39 = vadd.s32 168, %v3196_v35  ;;  %v1508_v40 = vld [vmem:[%s3254_s20] sm:$0xff]  ;;  %4201 = vst [vmem:[#allocation8_spill] sm:$0xff] %v4200_v19  ;;  %v3512_v19 = vld [vmem:[%s3254_s20 + $0x50] sm:$0xff] }
 0x1bb   : > { %v1453_v49 = vadd.f32 %v1452_v46, %v1446_v43  ;;  %v2501_v43 = vld [vmem:[%s3254_s20 + $0x18] sm:$0xff] }
 0x1bd   : > { %v1460_v54 = vadd.f32 %v1459_v50, %v1453_v49  ;;  %v3345_v49 = vadd.s32 192, %v3196_v35  ;;  %v3348_v50 = vadd.s32 200, %v3196_v35 }
 0x1bf   : > { %v1467_v61 = vadd.f32 %v1466_v56, %v1460_v54  ;;  %v3357_v54 = vld [vmem:[%s3254_s20 + $0x20] sm:$0xff]  ;;  %v3360_v56 = vld [vmem:[%s3254_s20 + $0x28] sm:$0xff] }
 0x1c1   : > { %v1474_v1 = vadd.f32 %v1473_v62, %v1467_v61  ;;  %v3385_v61 = vadd.s32 224, %v3196_v35 }
 0x1c3   : > { %v1481_v4 = vadd.f32 %v1480_v2, %v1474_v1  ;;  %v2500_v1 = vld [vmem:[%s3289_s21 + $0x18] sm:$0xff]  ;;  %v3393_v2 = vld [vmem:[%s3289_s21 + $0x20] sm:$0xff] }
 0x1c5   : > { %v1490_v6 = vadd.f32 %v1489_v5, %v1481_v4  ;;  %v3400_v4 = vadd.s32 232, %v3196_v35  ;;  %v3403_v5 = vadd.s32 240, %v3196_v35 }
 0x1c7   : > { %v1491_v8 = vrot.slane %v1490_v6, 4  ;;  %4185 = vst [vmem:[#allocation6_spill] sm:$0xff] %v3403_v5  ;;  %v3509_v5 = vld [vmem:[%s3254_s20 + $0x48] sm:$0xff] }
 0x1c9   : > { %v1492_v12 = vadd.f32 %v1491_v8, %v1490_v6  ;;  %v3406_v6 = vadd.s32 248, %v3196_v35  ;;  %v3415_v8 = vld [vmem:[%s3289_s21 + $0x38] sm:$0xff] }
 0x1cb   : > { %v1493_v18 = vrot.slane %v1492_v12, 2  ;;  %4186 = vst [vmem:[#allocation7_spill] sm:$0xff] %v3406_v6 }
 0x1cd   : > { %v1494_v22 = vadd.f32 %v1493_v18, %v1492_v12 }
 0x1cf   : > { %v1495_v25 = vrot.slane %v1494_v22, 1 }
 0x1d1   : > { %v1496_v32 = vadd.f32 %v1495_v25, %v1494_v22  ;;  %v3746_v22 = vld [vmem:[%s3254_s20 + $0xa0] sm:$0xff] }
 0x1d3   : > { %v3388_v62 = vmul.f32 %v1496_v32, %v3123_v55  ;;  %v3409_v55 = vld [vmem:[%s3289_s21 + $0x28] sm:$0xff] }
 0x1d5   : > { %v1507_v9 = vmul.f32 %v3351_v51, %v3388_v62  ;;  %v1527_v10 = vmul.f32 %v3354_v53, %v3388_v62  ;;  %v1548_v11 = vmul.f32 %v2497_v63, %v3388_v62  ;;  %v1569_v35 = vmul.f32 %v2500_v1, %v3388_v62 }
 0x1d6   : > { %v1590_v14 = vmul.f32 %v3393_v2, %v3388_v62  ;;  %v1611_v44 = vmul.f32 %v3409_v55, %v3388_v62  ;;  %v1632_v18 = vmul.f32 %v3412_v7, %v3388_v62  ;;  %v1653_v3 = vmul.f32 %v3415_v8, %v3388_v62 }
 0x1d7   : > { %v1511_v16 = vsub.f32 %v1508_v40, %v1507_v9  ;;  %v1532_v32 = vsub.f32 %v2495_v41, %v1527_v10  ;;  %v1553_v45 = vsub.f32 %v2498_v42, %v1548_v11  ;;  %v1574_v6 = vsub.f32 %v2501_v43, %v1569_v35 }
 0x1d8   : > { %v1595_v9 = vsub.f32 %v3357_v54, %v1590_v14  ;;  %v1616_v10 = vsub.f32 %v3360_v56, %v1611_v44  ;;  %v1637_v11 = vsub.f32 %v3363_v57, %v1632_v18  ;;  %v1658_v35 = vsub.f32 %v3374_v33, %v1653_v3  ;;  %v3506_v3 = vld [vmem:[%s3254_s20 + $0x40] sm:$0xff] }
 0x1d9   : > { %v1512_v14 = vsel %vm3240_vm6, %v1511_v16, %v1508_v40  ;;  %v1533_v44 = vsel %vm3240_vm6, %v1532_v32, %v2495_v41  ;;  %v1554_v18 = vsel %vm3240_vm6, %v1553_v45, %v2498_v42  ;;  %v1575_v20 = vsel %vm3240_vm6, %v1574_v6, %v2501_v43  ;;  %v3515_v40 = vld [vmem:[%s3254_s20 + $0x58] sm:$0xff]  ;;  %v3537_v6 = vld [vmem:[%s3289_s21 + $0x40] sm:$0xff]  ;;  %v3540_v16 = vld [vmem:[%s3289_s21 + $0x48] sm:$0xff] }
 0x1da   : > { %v1520_v41 = vsel %vm3261_vm10, %v3351_v51, %v1512_v14  ;;  %v1541_v42 = vsel %vm3269_vm11, %v3354_v53, %v1533_v44  ;;  %v1562_v43 = vsel %vm3277_vm1, %v2497_v63, %v1554_v18  ;;  %v1583_v21 = vsel %vm3295_vm15, %v2500_v1, %v1575_v20  ;;  %v3543_v32 = vld [vmem:[%s3254_s20 + $0x60] sm:$0xff]  ;;  %v3549_v51 = vld [vmem:[%s3254_s20 + $0x70] sm:$0xff]  ;;  %v3585_v14 = vld [vmem:[%s3289_s21 + $0x58] sm:$0xff] }
 0x1db   : > { %vm4205_vm10 = vcmp.ge.s32.totalorder %v3232_v13, %v2737_v36  ;;  %1521 = vst [vmem:[%s3254_s20] sm:$0xff] %v1520_v41  ;;  %2496 = vst [vmem:[%s3254_s20 + $0x8] sm:$0xff] %v1541_v42  ;;  %v1596_v13 = vsel %vm3240_vm6, %v1595_v9, %v3357_v54  ;;  %v1617_v29 = vsel %vm3240_vm6, %v1616_v10, %v3360_v56  ;;  %v3582_v1 = vld [vmem:[%s3289_s21 + $0x50] sm:$0xff]  ;;  %v3588_v54 = vld [vmem:[%s3289_s21 + $0x60] sm:$0xff]  ;;  %vm4226_vm1 = vnez %v4194_v15 }
 0x1dc   : > { %vm3556_vm11 = vmand %vm2858_vm12, %vm4205_vm10  ;;  %2499 = vst [vmem:[%s3254_s20 + $0x10] sm:$0xff] %v1562_v43  ;;  %v1638_v53 = vsel %vm3240_vm6, %v1637_v11, %v3363_v57  ;;  %v1659_v63 = vsel %vm3240_vm6, %v1658_v35, %v3374_v33  ;;  %v1604_v56 = vsel %vm3313_vm0, %v3393_v2, %v1596_v13  ;;  %v1625_v57 = vsel %vm3334_vm2, %v3409_v55, %v1617_v29  ;;  %v3605_v10 = vld [vmem:[%s3289_s21 + $0x68] sm:$0xff]  ;;  %v3608_v11 = vld [vmem:[%s3289_s21 + $0x70] sm:$0xff] }
 0x1dd   : > { %2502 = vst [vmem:[%s3254_s20 + $0x18] sm:$0xff] %v1583_v21  ;;  %v1646_v33 = vsel %vm3369_vm3, %v3412_v7, %v1638_v53  ;;  %v1667_v9 = vsel %vm3430_vm14, %v3415_v8, %v1659_v63  ;;  %v3611_v35 = vld [vmem:[%s3289_s21 + $0x78] sm:$0xff]  ;;  %2505 = vst [vmem:[%s3254_s20 + $0x20] sm:$0xff] %v1604_v56  ;;  %v1674_v34 = vmul.f32 %v3537_v6, %v3388_v62  ;;  %v3761_v15 = vld [vmem:[%s3254_s20 + $0xb0] sm:$0xff] }
 0x1de   : > { %2508 = vst [vmem:[%s3254_s20 + $0x28] sm:$0xff] %v1625_v57  ;;  %2511 = vst [vmem:[%s3254_s20 + $0x30] sm:$0xff] %v1646_v33  ;;  %v1695_v46 = vmul.f32 %v3540_v16, %v3388_v62  ;;  %v1716_v58 = vmul.f32 %v3582_v1, %v3388_v62  ;;  %v1737_v2 = vmul.f32 %v3585_v14, %v3388_v62  ;;  %v3707_v57 = vld [vmem:[%s3254_s20 + $0x80] sm:$0xff]  ;;  %v3710_v33 = vld [vmem:[%s3254_s20 + $0x88] sm:$0xff] }
 0x1df   : > { %2514 = vst [vmem:[%s3254_s20 + $0x38] sm:$0xff] %v1667_v9  ;;  %vm4208_vm14 = vcmp.ge.s32.totalorder %v3251_v24, %v2737_v36  ;;  %v1758_v7 = vmul.f32 %v3588_v54, %v3388_v62  ;;  %v1779_v8 = vmul.f32 %v3605_v10, %v3388_v62  ;;  %v1800_v12 = vmul.f32 %v3608_v11, %v3388_v62  ;;  %vm3651_vm10 = vmand %vm2858_vm12, %vm4211_vm13  ;;  %v3716_v9 = vld [vmem:[%s3254_s20 + $0x98] sm:$0xff]  ;;  %v2576_v18 = vld [vmem:[%s3254_s20 + $0xe0] sm:$0xff] }
 0x1e0   : > { %vm3632_vm2 = vmand %vm2858_vm12, %vm4208_vm14  ;;  %v1821_v24 = vmul.f32 %v3611_v35, %v3388_v62  ;;  %vm4214_vm14 = vcmp.ge.s32.totalorder %v3304_v30, %v2737_v36  ;;  %v1679_v28 = vsub.f32 %v3506_v3, %v1674_v34  ;;  %v1700_v20 = vsub.f32 %v3509_v5, %v1695_v46  ;;  %v3740_v46 = vld [vmem:[%s3289_s21 + $0x80] sm:$0xff]  ;;  %v2579_v42 = vld [vmem:[%s3254_s20 + $0xe8] sm:$0xff] }
 0x1e1   : > { %vm3660_vm3 = vmand %vm2858_vm12, %vm4214_vm14  ;;  %v1721_v41 = vsub.f32 %v3512_v19, %v1716_v58  ;;  %v1742_v30 = vsub.f32 %v3515_v40, %v1737_v2  ;;  %vm4217_vm13 = vcmp.ge.s32.totalorder %v3307_v31, %v2737_v36  ;;  %v1763_v43 = vsub.f32 %v3543_v32, %v1758_v7  ;;  %v3743_v58 = vld [vmem:[%s3289_s21 + $0x88] sm:$0xff]  ;;  %v2545_v2 = vld [vmem:[%s3289_s21 + $0x90] sm:$0xff] }
 0x1e2   : > { %vm3675_vm14 = vmand %vm2858_vm12, %vm4217_vm13  ;;  %v1784_v21 = vsub.f32 %v3546_v52, %v1779_v8  ;;  %v1805_v13 = vsub.f32 %v3549_v51, %v1800_v12  ;;  %v1826_v29 = vsub.f32 %v3561_v27, %v1821_v24  ;;  %vm4220_vm15 = vcmp.ge.s32.totalorder %v3318_v37, %v2737_v36  ;;  %v2548_v7 = vld [vmem:[%s3289_s21 + $0x98] sm:$0xff]  ;;  %v3787_v8 = vld [vmem:[%s3289_s21 + $0xa0] sm:$0xff] }
 0x1e3   : > { %vm3690_vm13 = vmand %vm2858_vm12, %vm4220_vm15  ;;  %v1680_v53 = vsel %vm3240_vm6, %v1679_v28, %v3506_v3  ;;  %v1701_v63 = vsel %vm3240_vm6, %v1700_v20, %v3509_v5  ;;  %v1722_v37 = vsel %vm3240_vm6, %v1721_v41, %v3512_v19  ;;  %v1743_v56 = vsel %vm3240_vm6, %v1742_v30, %v3515_v40  ;;  %v3713_v3 = vld [vmem:[%s3254_s20 + $0x90] sm:$0xff]  ;;  %v3804_v24 = vld [vmem:[%s3289_s21 + $0xa8] sm:$0xff] }
 0x1e4   : > { %vm4223_vm15 = vcmp.ge.s32.totalorder %v3321_v38, %v2737_v36  ;;  %v1688_v19 = vsel %vm3449_vm5, %v3537_v6, %v1680_v53  ;;  %v1709_v40 = vsel %vm3458_vm4, %v3540_v16, %v1701_v63  ;;  %v1730_v38 = vsel %vm4226_vm1, %v3582_v1, %v1722_v37  ;;  %v3749_v6 = vld [vmem:[%s3254_s20 + $0xa8] sm:$0xff]  ;;  %v3807_v28 = vld [vmem:[%s3289_s21 + $0xb0] sm:$0xff]  ;;  %v3810_v20 = vld [vmem:[%s3289_s21 + $0xb8] sm:$0xff] }
 0x1e5   : > { %vm3723_vm0 = vmand %vm2858_vm12, %vm4223_vm15  ;;  %v1751_v34 = vsel %vm3478_vm9, %v3585_v14, %v1743_v56  ;;  %vm4227_vm4 = vcmp.ge.s32.totalorder %v3324_v39, %v2737_v36  ;;  %vm2106_vm9 = vcmp.ge.s32.totalorder %v3385_v61, %v2737_v36  ;;  %2517 = vst [vmem:[%s3254_s20 + $0x40] sm:$0xff] %v1688_v19  ;;  %v1764_v39 = vsel %vm3240_vm6, %v1763_v43, %v3543_v32  ;;  %v4235_v55 = vld [vmem:[#allocation7_spill] sm:$0xff] }
 0x1e6   : > { %vm3756_vm5 = vmand %vm2858_vm12, %vm4227_vm4  ;;  %2520 = vst [vmem:[%s3254_s20 + $0x48] sm:$0xff] %v1709_v40  ;;  %v1785_v16 = vsel %vm3240_vm6, %v1784_v21, %v3546_v52  ;;  %v1806_v1 = vsel %vm3240_vm6, %v1805_v13, %v3549_v51  ;;  %v1827_v14 = vsel %vm3240_vm6, %v1826_v29, %v3561_v27  ;;  %vm2127_vm1 = vcmp.ge.s32.totalorder %v3400_v4, %v2737_v36 }
 0x1e7   : > { %2523 = vst [vmem:[%s3254_s20 + $0x50] sm:$0xff] %v1730_v38  ;;  %2526 = vst [vmem:[%s3254_s20 + $0x58] sm:$0xff] %v1751_v34  ;;  %v1772_v52 = vsel %vm3493_vm8, %v3588_v54, %v1764_v39  ;;  %v1793_v51 = vsel %vm3522_vm7, %v3605_v10, %v1785_v16  ;;  %v1814_v27 = vsel %vm3556_vm11, %v3608_v11, %v1806_v1  ;;  %v4231_v54 = vld [vmem:[#allocation6_spill] sm:$0xff]  ;;  %v2564_v16 = vld [vmem:[%s3254_s20 + $0xc0] sm:$0xff] }
 0x1e8   : > { %v1835_v12 = vsel %vm3632_vm2, %v3611_v35, %v1827_v14  ;;  %2529 = vst [vmem:[%s3254_s20 + $0x60] sm:$0xff] %v1772_v52  ;;  %2532 = vst [vmem:[%s3254_s20 + $0x68] sm:$0xff] %v1793_v51  ;;  %v1842_v45 = vmul.f32 %v3740_v46, %v3388_v62  ;;  %v1863_v26 = vmul.f32 %v3743_v58, %v3388_v62  ;;  %v2567_v1 = vld [vmem:[%s3254_s20 + $0xc8] sm:$0xff]  ;;  %v2563_v52 = vld [vmem:[%s3289_s21 + $0xc0] sm:$0xff] }
 0x1e9   : > { %2535 = vst [vmem:[%s3254_s20 + $0x70] sm:$0xff] %v1814_v27  ;;  %2538 = vst [vmem:[%s3254_s20 + $0x78] sm:$0xff] %v1835_v12  ;;  %v1884_v10 = vmul.f32 %v2545_v2, %v3388_v62  ;;  %v1905_v11 = vmul.f32 %v2548_v7, %v3388_v62  ;;  %vm4232_vm7 = vcmp.ge.s32.totalorder %v3339_v47, %v2737_v36  ;;  %v2566_v51 = vld [vmem:[%s3289_s21 + $0xc8] sm:$0xff]  ;;  %v2569_v27 = vld [vmem:[%s3289_s21 + $0xd0] sm:$0xff] }
 0x1ea   : > { %vm3829_vm11 = vmand %vm2858_vm12, %vm4232_vm7  ;;  %v1926_v41 = vmul.f32 %v3787_v8, %v3388_v62  ;;  %v1947_v30 = vmul.f32 %v3804_v24, %v3388_v62  ;;  %v1968_v43 = vmul.f32 %v3807_v28, %v3388_v62  ;;  %v1989_v47 = vmul.f32 %v3810_v20, %v3388_v62  ;;  %v2572_v12 = vld [vmem:[%s3289_s21 + $0xd8] sm:$0xff] }
 0x1eb   : > { %vm4236_vm15 = vcmp.ge.s32.totalorder %v3342_v48, %v2737_v36  ;;  %v1847_v13 = vsub.f32 %v3707_v57, %v1842_v45  ;;  %v1868_v29 = vsub.f32 %v3710_v33, %v1863_v26  ;;  %v1889_v53 = vsub.f32 %v3713_v3, %v1884_v10  ;;  %v2575_v45 = vld [vmem:[%s3289_s21 + $0xe0] sm:$0xff]  ;;  %v2581_v10 = vld [vmem:[%s3289_s21 + $0xf0] sm:$0xff] }
 0x1ec   : > { %vm3848_vm4 = vmand %vm2858_vm12, %vm4236_vm15  ;;  %v1910_v63 = vsub.f32 %v3716_v9, %v1905_v11  ;;  %vm4239_vm7 = vcmp.ge.s32.totalorder %v3345_v49, %v2737_v36  ;;  %v1931_v37 = vsub.f32 %v3746_v22, %v1926_v41  ;;  %v1952_v56 = vsub.f32 %v3749_v6, %v1947_v30  ;;  %v2584_v11 = vld [vmem:[%s3289_s21 + $0xf8] sm:$0xff] }
 0x1ed   : > { %vm3861_vm15 = vmand %vm2858_vm12, %vm4239_vm7  ;;  %v1973_v19 = vsub.f32 %v3761_v15, %v1968_v43  ;;  %v1994_v40 = vsub.f32 %v3764_v17, %v1989_v47  ;;  %vm4242_vm2 = vcmp.ge.s32.totalorder %v3348_v50, %v2737_v36  ;;  %v1848_v38 = vsel %vm3240_vm6, %v1847_v13, %v3707_v57  ;;  %v2570_v57 = vld [vmem:[%s3254_s20 + $0xd0] sm:$0xff] }
 0x1ee   : > { %vm3874_vm8 = vmand %vm2858_vm12, %vm4242_vm2  ;;  %v1869_v34 = vsel %vm3240_vm6, %v1868_v29, %v3710_v33  ;;  %v1890_v50 = vsel %vm3240_vm6, %v1889_v53, %v3713_v3  ;;  %v1911_v39 = vsel %vm3240_vm6, %v1910_v63, %v3716_v9  ;;  %vm4245_vm2 = vcmp.ge.s32.totalorder %v3379_v59, %v2737_v36  ;;  %v2573_v3 = vld [vmem:[%s3254_s20 + $0xd8] sm:$0xff] }
 0x1ef   : > { %vm3898_vm7 = vmand %vm2858_vm12, %vm4245_vm2  ;;  %v1856_v9 = vsel %vm3651_vm10, %v3740_v46, %v1848_v38  ;;  %v1877_v14 = vsel %vm3660_vm3, %v3743_v58, %v1869_v34  ;;  %v1898_v59 = vsel %vm3675_vm14, %v2545_v2, %v1890_v50  ;;  %v1919_v32 = vsel %vm3690_vm13, %v2548_v7, %v1911_v39  ;;  %v2582_v46 = vld [vmem:[%s3254_s20 + $0xf0] sm:$0xff]  ;;  %v2585_v58 = vld [vmem:[%s3254_s20 + $0xf8] sm:$0xff] }
 0x1f0   : > { %vm4248_vm2 = vcmp.ge.s32.totalorder %v3382_v60, %v2737_v36  ;;  %2541 = vst [vmem:[%s3254_s20 + $0x80] sm:$0xff] %v1856_v9  ;;  %2544 = vst [vmem:[%s3254_s20 + $0x88] sm:$0xff] %v1877_v14  ;;  %v1932_v60 = vsel %vm3240_vm6, %v1931_v37, %v3746_v22  ;;  %v1953_v31 = vsel %vm3240_vm6, %v1952_v56, %v3749_v6  ;;  %v2184_v14 = vld [vmem:[#allocation2] sm:$0x1] (%p289_p0) }
 0x1f1   : > { %vm3920_vm10 = vmand %vm2858_vm12, %vm4248_vm2  ;;  %2547 = vst [vmem:[%s3254_s20 + $0x90] sm:$0xff] %v1898_v59  ;;  %v1974_v2 = vsel %vm3240_vm6, %v1973_v19, %v3761_v15  ;;  %v1995_v7 = vsel %vm3240_vm6, %v1994_v40, %v3764_v17  ;;  %v1940_v22 = vsel %vm3723_vm0, %v3787_v8, %v1932_v60  ;;  %v1961_v6 = vsel %vm3756_vm5, %v3804_v24, %v1953_v31  ;;  %v2578_v17 = vld [vmem:[%s3289_s21 + $0xe8] sm:$0xff] }
 0x1f2   : > { %2550 = vst [vmem:[%s3254_s20 + $0x98] sm:$0xff] %v1919_v32  ;;  %v1982_v26 = vsel %vm3829_vm11, %v3807_v28, %v1974_v2  ;;  %v2003_v15 = vsel %vm3848_vm4, %v3810_v20, %v1995_v7  ;;  %2553 = vst [vmem:[%s3254_s20 + $0xa0] sm:$0xff] %v1940_v22  ;;  %v2010_v5 = vmul.f32 %v2563_v52, %v3388_v62 }
 0x1f3   : > { %2556 = vst [vmem:[%s3254_s20 + $0xa8] sm:$0xff] %v1961_v6  ;;  %2559 = vst [vmem:[%s3254_s20 + $0xb0] sm:$0xff] %v1982_v26  ;;  %v2031_v25 = vmul.f32 %v2566_v51, %v3388_v62  ;;  %v2052_v8 = vmul.f32 %v2569_v27, %v3388_v62  ;;  %v2073_v24 = vmul.f32 %v2572_v12, %v3388_v62 }
 0x1f4   : > { %2562 = vst [vmem:[%s3254_s20 + $0xb8] sm:$0xff] %v2003_v15  ;;  %vm3975_vm0 = vmand %vm2858_vm12, %vm2106_vm9  ;;  %v2094_v20 = vmul.f32 %v2575_v45, %v3388_v62  ;;  %v2115_v35 = vmul.f32 %v2578_v17, %v3388_v62  ;;  %v2136_v41 = vmul.f32 %v2581_v10, %v3388_v62  ;;  %v2157_v30 = vmul.f32 %v2584_v11, %v3388_v62 }
 0x1f5   : > { %vm3988_vm3 = vmand %vm2858_vm12, %vm2127_vm1  ;;  %v2015_v43 = vsub.f32 %v2564_v16, %v2010_v5  ;;  %v2036_v47 = vsub.f32 %v2567_v1, %v2031_v25  ;;  %v2057_v21 = vsub.f32 %v2570_v57, %v2052_v8  ;;  %v2078_v13 = vsub.f32 %v2573_v3, %v2073_v24  ;;  %2186 = vst [vmem:[#allocation3] sm:$0x1] (%p289_p0), %v2184_v14 }
 0x1f6   : > { %vm4255_vm14 = vcmp.ge.s32.totalorder %v4231_v54, %v2737_v36  ;;  %v2099_v4 = vsub.f32 %v2576_v18, %v2094_v20  ;;  %v2120_v29 = vsub.f32 %v2579_v42, %v2115_v35  ;;  %v2141_v53 = vsub.f32 %v2582_v46, %v2136_v41 }
 0x1f7   : > { %vm3997_vm13 = vmand %vm2858_vm12, %vm4255_vm14  ;;  %v2162_v63 = vsub.f32 %v2585_v58, %v2157_v30  ;;  %vm4258_vm5 = vcmp.ge.s32.totalorder %v4235_v55, %v2737_v36  ;;  %v2016_v37 = vsel %vm3240_vm6, %v2015_v43, %v2564_v16  ;;  %v2037_v56 = vsel %vm3240_vm6, %v2036_v47, %v2567_v1 }
 0x1f8   : > { %vm4006_vm9 = vmand %vm2858_vm12, %vm4258_vm5  ;;  %v2058_v19 = vsel %vm3240_vm6, %v2057_v21, %v2570_v57  ;;  %v2079_v40 = vsel %vm3240_vm6, %v2078_v13, %v2573_v3  ;;  %v2024_v36 = vsel %vm3861_vm15, %v2563_v52, %v2016_v37  ;;  %v2045_v55 = vsel %vm3874_vm8, %v2566_v51, %v2037_v56 }
 0x1f9   : > { %v2066_v38 = vsel %vm3898_vm7, %v2569_v27, %v2058_v19  ;;  %v2087_v34 = vsel %vm3920_vm10, %v2572_v12, %v2079_v40  ;;  %2565 = vst [vmem:[%s3254_s20 + $0xc0] sm:$0xff] %v2024_v36  ;;  %2568 = vst [vmem:[%s3254_s20 + $0xc8] sm:$0xff] %v2045_v55  ;;  %v2100_v48 = vsel %vm3240_vm6, %v2099_v4, %v2576_v18 }
 0x1fa   : > { %2571 = vst [vmem:[%s3254_s20 + $0xd0] sm:$0xff] %v2066_v38  ;;  %2574 = vst [vmem:[%s3254_s20 + $0xd8] sm:$0xff] %v2087_v34  ;;  %v2121_v49 = vsel %vm3240_vm6, %v2120_v29, %v2579_v42  ;;  %v2142_v50 = vsel %vm3240_vm6, %v2141_v53, %v2582_v46  ;;  %v2163_v39 = vsel %vm3240_vm6, %v2162_v63, %v2585_v58 }
 0x1fb   : > { %v2108_v16 = vsel %vm3975_vm0, %v2575_v45, %v2100_v48  ;;  %v2129_v1 = vsel %vm3988_vm3, %v2578_v17, %v2121_v49  ;;  %v2150_v57 = vsel %vm3997_vm13, %v2581_v10, %v2142_v50  ;;  %v2171_v33 = vsel %vm4006_vm9, %v2584_v11, %v2163_v39 }
 0x1fc   : > { %2577 = vst [vmem:[%s3254_s20 + $0xe0] sm:$0xff] %v2108_v16  ;;  %2580 = vst [vmem:[%s3254_s20 + $0xe8] sm:$0xff] %v2129_v1  ;;  %v2360_v30 = vld [vmem:[#allocation3] sm:$0x1] (%p289_p0) }
 0x1fd   : > { %2583 = vst [vmem:[%s3254_s20 + $0xf0] sm:$0xff] %v2150_v57  ;;  %2586 = vst [vmem:[%s3254_s20 + $0xf8] sm:$0xff] %v2171_v33 }
 0x1fe   :  { %2361 = vst [vmem:[%s4159_s2] sm:$0x1] (%p289_p0), %v2360_v30 }
 0x202   :  { %291 = sbr.rel (!%p289_p0) target bundleno = 19 (0x13), region = 418 }
 0x204   : > { %v2174_v3 = vld [vmem:[%s2173_s22] ss:$0 sm:$0xff] }
 0x205   : > { %v2179_v9 = vsel %vm2858_vm12, %v4261_v23, %v2174_v3 }
 0x206   : > { %2180 = vst [vmem:[%s2173_s22] sm:$0x1] %v2179_v9 }
 0x20d   :  { %v2276_v59 = vld [vmem:[#allocation1] sm:$0xff]  ;;  %v2278_v32 = vld [vmem:[#allocation1 + $0x8] sm:$0xff]  ;;  %v2280_v0 = vld [vmem:[#allocation1 + $0x10] sm:$0xff] }
 0x20e   :  { %2277 = vst [vmem:[%s4158_s1] sm:$0xff] %v2276_v59  ;;  %2279 = vst [vmem:[%s4158_s1 + $0x8] sm:$0xff] %v2278_v32  ;;  %v2282_v52 = vld [vmem:[#allocation1 + $0x18] sm:$0xff]  ;;  %v2284_v51 = vld [vmem:[#allocation1 + $0x20] sm:$0xff] }
 0x20f   :  { %2281 = vst [vmem:[%s4158_s1 + $0x10] sm:$0xff] %v2280_v0  ;;  %2283 = vst [vmem:[%s4158_s1 + $0x18] sm:$0xff] %v2282_v52  ;;  %v2286_v44 = vld [vmem:[#allocation1 + $0x28] sm:$0xff]  ;;  %v2288_v18 = vld [vmem:[#allocation1 + $0x30] sm:$0xff] }
 0x210   :  { %2285 = vst [vmem:[%s4158_s1 + $0x20] sm:$0xff] %v2284_v51  ;;  %v2290_v42 = vld [vmem:[#allocation1 + $0x38] sm:$0xff]  ;;  %2287 = vst [vmem:[%s4158_s1 + $0x28] sm:$0xff] %v2286_v44  ;;  %v2292_v46 = vld [vmem:[#allocation1 + $0x40] sm:$0xff] }
 0x211   :  { %2289 = vst [vmem:[%s4158_s1 + $0x30] sm:$0xff] %v2288_v18  ;;  %2291 = vst [vmem:[%s4158_s1 + $0x38] sm:$0xff] %v2290_v42  ;;  %v2294_v58 = vld [vmem:[#allocation1 + $0x48] sm:$0xff]  ;;  %v2296_v60 = vld [vmem:[#allocation1 + $0x50] sm:$0xff] }
 0x212   :  { %2293 = vst [vmem:[%s4158_s1 + $0x40] sm:$0xff] %v2292_v46  ;;  %2295 = vst [vmem:[%s4158_s1 + $0x48] sm:$0xff] %v2294_v58  ;;  %v2298_v31 = vld [vmem:[#allocation1 + $0x58] sm:$0xff]  ;;  %v2300_v2 = vld [vmem:[#allocation1 + $0x60] sm:$0xff] }
 0x213   :  { %2297 = vst [vmem:[%s4158_s1 + $0x50] sm:$0xff] %v2296_v60  ;;  %v2302_v7 = vld [vmem:[#allocation1 + $0x68] sm:$0xff]  ;;  %2299 = vst [vmem:[%s4158_s1 + $0x58] sm:$0xff] %v2298_v31  ;;  %v2304_v27 = vld [vmem:[#allocation1 + $0x70] sm:$0xff] }
 0x214   :  { %2301 = vst [vmem:[%s4158_s1 + $0x60] sm:$0xff] %v2300_v2  ;;  %2303 = vst [vmem:[%s4158_s1 + $0x68] sm:$0xff] %v2302_v7  ;;  %v2306_v12 = vld [vmem:[#allocation1 + $0x78] sm:$0xff]  ;;  %v2308_v45 = vld [vmem:[#allocation1 + $0x80] sm:$0xff] }
 0x215   :  { %2305 = vst [vmem:[%s4158_s1 + $0x70] sm:$0xff] %v2304_v27  ;;  %2307 = vst [vmem:[%s4158_s1 + $0x78] sm:$0xff] %v2306_v12  ;;  %v2310_v22 = vld [vmem:[#allocation1 + $0x88] sm:$0xff]  ;;  %v2312_v6 = vld [vmem:[#allocation1 + $0x90] sm:$0xff] }
 0x216   :  { %2309 = vst [vmem:[%s4158_s1 + $0x80] sm:$0xff] %v2308_v45  ;;  %v2314_v26 = vld [vmem:[#allocation1 + $0x98] sm:$0xff]  ;;  %2311 = vst [vmem:[%s4158_s1 + $0x88] sm:$0xff] %v2310_v22  ;;  %v2316_v15 = vld [vmem:[#allocation1 + $0xa0] sm:$0xff] }
 0x217   :  { %2313 = vst [vmem:[%s4158_s1 + $0x90] sm:$0xff] %v2312_v6  ;;  %2315 = vst [vmem:[%s4158_s1 + $0x98] sm:$0xff] %v2314_v26  ;;  %v2318_v17 = vld [vmem:[#allocation1 + $0xa8] sm:$0xff]  ;;  %v2320_v10 = vld [vmem:[#allocation1 + $0xb0] sm:$0xff] }
 0x218   :  { %2317 = vst [vmem:[%s4158_s1 + $0xa0] sm:$0xff] %v2316_v15  ;;  %2319 = vst [vmem:[%s4158_s1 + $0xa8] sm:$0xff] %v2318_v17  ;;  %v2322_v11 = vld [vmem:[#allocation1 + $0xb8] sm:$0xff]  ;;  %v2324_v5 = vld [vmem:[#allocation1 + $0xc0] sm:$0xff] }
 0x219   :  { %2321 = vst [vmem:[%s4158_s1 + $0xb0] sm:$0xff] %v2320_v10  ;;  %v2326_v25 = vld [vmem:[#allocation1 + $0xc8] sm:$0xff]  ;;  %2323 = vst [vmem:[%s4158_s1 + $0xb8] sm:$0xff] %v2322_v11  ;;  %v2328_v8 = vld [vmem:[#allocation1 + $0xd0] sm:$0xff] }
 0x21a   :  { %2325 = vst [vmem:[%s4158_s1 + $0xc0] sm:$0xff] %v2324_v5  ;;  %2327 = vst [vmem:[%s4158_s1 + $0xc8] sm:$0xff] %v2326_v25  ;;  %v2330_v24 = vld [vmem:[#allocation1 + $0xd8] sm:$0xff]  ;;  %v2332_v28 = vld [vmem:[#allocation1 + $0xe0] sm:$0xff] }
 0x21b   :  { %2329 = vst [vmem:[%s4158_s1 + $0xd0] sm:$0xff] %v2328_v8  ;;  %2331 = vst [vmem:[%s4158_s1 + $0xd8] sm:$0xff] %v2330_v24  ;;  %v2334_v20 = vld [vmem:[#allocation1 + $0xe8] sm:$0xff]  ;;  %v2336_v35 = vld [vmem:[#allocation1 + $0xf0] sm:$0xff] }
 0x21c   :  { %2333 = vst [vmem:[%s4158_s1 + $0xe0] sm:$0xff] %v2332_v28  ;;  %v2338_v41 = vld [vmem:[#allocation1 + $0xf8] sm:$0xff]  ;;  %2335 = vst [vmem:[%s4158_s1 + $0xe8] sm:$0xff] %v2334_v20 }
 0x21d   :  { %2337 = vst [vmem:[%s4158_s1 + $0xf0] sm:$0xff] %v2336_v35  ;;  %2339 = vst [vmem:[%s4158_s1 + $0xf8] sm:$0xff] %v2338_v41 }

// kernel: custom-call.8
= control target key start
LH: loop header
LB: loop body
LE: loop exit
PB: predicated region body
PF: predicated region fallthrough
CT: control target
= control target key end

     0   :  { %s5485_s12 = smov [#allocation0]   ;;  %s8929_s0 = inlined_call_operand.vmem [shape: f32[128,128], index: 0, kind: input, shape index: {}]   ;;  %s8930_s1 = inlined_call_operand.vmem [shape: f32[128,128], index: 1, kind: output, shape index: {}]  }
   0x1   :  { %s5536_s8 = scalar_lea.vmem %s8929_s0, 120  ;;  %v16_v0 = vld [vmem:[%s8929_s0] sm:$0xff]   ;;  %s5489_s15 = smov %s8929_s0  }
   0x2   :  { %s5303_s11 = sadd.s32 4294967232, %s5536_s8  ;;  %v5481_v1 = vmov %v16_v0  }
   0x3 LB: > { %24 = vst [vmem:[%s5487_s12] sm:$0xff] %v5483_v1  ;;  %v25_v2 = vld [vmem:[%s5491_s15 + $0x8] sm:$0xff]  ;;  %v27_v3 = vld [vmem:[%s5491_s15 + $0x10] sm:$0xff]  ;;  %v29_v4 = vld [vmem:[%s5491_s15 + $0x18] sm:$0xff]  ;;  %s39_s0 = scalar_lea.vmem %s5491_s15, 64   ;;  %s40_s16 = scalar_lea.vmem %s5487_s12, 64   ;;  %s5491_s15 = sphi %s5489_s15, %s5490_s15   ;;  %s5487_s12 = sphi %s5485_s12, %s5486_s12   ;;  %v5483_v1 = vphi %v5481_v1, %v41_v1  }
   0x4   : > { %26 = vst [vmem:[%s5487_s12 + $0x8] sm:$0xff] %v25_v2  ;;  %28 = vst [vmem:[%s5487_s12 + $0x10] sm:$0xff] %v27_v3  ;;  %v31_v5 = vld [vmem:[%s5491_s15 + $0x20] sm:$0xff]  ;;  %v33_v6 = vld [vmem:[%s5491_s15 + $0x28] sm:$0xff]  ;;  %p21_p0 = scmp.gt.s32.totalorder %s39_s0, %s5303_s11 }
   0x5   : > { %30 = vst [vmem:[%s5487_s12 + $0x18] sm:$0xff] %v29_v4  ;;  %v35_v7 = vld [vmem:[%s5491_s15 + $0x30] sm:$0xff]  ;;  %32 = vst [vmem:[%s5487_s12 + $0x20] sm:$0xff] %v31_v5  ;;  %v37_v8 = vld [vmem:[%s5491_s15 + $0x38] sm:$0xff]  ;;  %p5277_p1 = scmp.gt.s32.totalorder (%p21_p0), %s39_s0, %s5536_s8 }
   0x6   : > { %34 = vst [vmem:[%s5487_s12 + $0x28] sm:$0xff] %v33_v6  ;;  %36 = vst [vmem:[%s5487_s12 + $0x30] sm:$0xff] %v35_v7  ;;  %v41_v1 = vld [vmem:[%s5491_s15 + $0x40] sm:$0xff]   ;;  %s5490_s15 = smov %s39_s0   ;;  %23 = sbr.rel (!%p21_p0) target bundleno = 3 (0x3), region = 211 }
   0x7   : > { %38 = vst [vmem:[%s5487_s12 + $0x38] sm:$0xff] %v37_v8  ;;  %s5486_s12 = smov %s40_s16  }
   0xd   :  { %5278 = sbr.rel (%p5277_p1) target bundleno = 30 (0x1e), region = 216  ;;  %s5493_s17 = smov (!%p5277_p1), %s40_s16  }
   0xe   :  { %s5497_s18 = smov (!%p5277_p1), %s39_s0  }
  0x14 LB: > { %v49_v9 = vld [vmem:[%s5499_s18] sm:$0xff]  ;;  %s51_s18 = scalar_lea.vmem %s5499_s18, 8   ;;  %s5499_s18 = sphi %s5497_s18, %s51_s18   ;;  %s5495_s17 = sphi %s5493_s17, %s52_s17  }
  0x15   : > { %50 = vst [vmem:[%s5495_s17] sm:$0xff] %v49_v9  ;;  %s52_s17 = scalar_lea.vmem %s5495_s17, 8   ;;  %p46_p2 = scmp.gt.s32.totalorder %s51_s18, %s5536_s8 }
  0x17   :  { %48 = sbr.rel (!%p46_p2) target bundleno = 20 (0x14), region = 222 }
  0x1e PF:  { %v64_v10 = vlaneseq  ;;  %v70_v13 = vld [vmem:[#allocation0] sm:$0xff]  ;;  %v5521_v42 = vmov 0.0   ;;  %v245_v44 = vld [vmem:[#allocation0 + $0x8] ss:$0 sm:$0xff]  ;;  %v258_v50 = vld [vmem:[#allocation0 + $0x9] ss:$0 sm:$0xff]  ;;  %s5505_s23 = smov %s8930_s1  }
  0x1f   :  { %v182_v14 = vld [vmem:[#allocation0 + $0x1] ss:$0 sm:$0xff]  ;;  %v191_v18 = vld [vmem:[#allocation0 + $0x2] ss:$0 sm:$0xff]  ;;  %v200_v22 = vld [vmem:[#allocation0 + $0x3] ss:$0 sm:$0xff] }
  0x20   :  { %v5549_v11 = vand.u32 127, %v64_v10  ;;  %v5551_v12 = vshrl.u32 %v64_v10, 7  ;;  %v209_v26 = vld [vmem:[#allocation0 + $0x4] ss:$0 sm:$0xff]  ;;  %v218_v30 = vld [vmem:[#allocation0 + $0x5] ss:$0 sm:$0xff] }
  0x21   :  { %v227_v34 = vld [vmem:[#allocation0 + $0x6] ss:$0 sm:$0xff]  ;;  %v236_v39 = vld [vmem:[#allocation0 + $0x7] ss:$0 sm:$0xff]  ;;  %v271_v57 = vld [vmem:[#allocation0 + $0xa] ss:$0 sm:$0xff] }
  0x22   :  { %vm69_vm0 = vcmp.eq.s32.totalorder %v5549_v11, %v5551_v12  ;;  %vm73_vm1 = vcmp.eq.s32.totalorder %v5549_v11, 0  ;;  %vm185_vm2 = vcmp.eq.s32.totalorder %v5549_v11, 1  ;;  %vm194_vm3 = vcmp.eq.s32.totalorder %v5549_v11, 2  ;;  %v284_v0 = vld [vmem:[#allocation0 + $0xb] ss:$0 sm:$0xff]  ;;  %s5522_s19 = smov [#allocation1 + $0x78]  }
  0x23   :  { %v74_v15 = vsel %vm73_vm1, %v70_v13, 1.0  ;;  %vm203_vm4 = vcmp.eq.s32.totalorder %v5549_v11, 3  ;;  %vm212_vm5 = vcmp.eq.s32.totalorder %v5549_v11, 4  ;;  %vm221_vm6 = vcmp.eq.s32.totalorder %v5549_v11, 5  ;;  %v297_v7 = vld [vmem:[#allocation0 + $0xc] ss:$0 sm:$0xff] }
  0x24   :  { %v75_v16 = vsel %vm69_vm0, %v74_v15, 0.0  ;;  %v80_v38 = vadd.s32 8, %v5551_v12  ;;  %vm230_vm7 = vcmp.eq.s32.totalorder %v5549_v11, 6  ;;  %vm239_vm9 = vcmp.eq.s32.totalorder %v5549_v11, 7  ;;  %s8923_s20 = sadd.s32 4294967232, %s5522_s19  ;;  %s5509_s24 = smov [#allocation1]  }
  0x25   :  { %v186_v17 = vmul.f32 %v182_v14, %v75_v16  ;;  %vm248_vm10 = vcmp.eq.s32.totalorder %v5549_v11, 8  ;;  %vm261_vm11 = vcmp.eq.s32.totalorder %v5549_v11, 9  ;;  %vm274_vm12 = vcmp.eq.s32.totalorder %v5549_v11, 10 }
  0x26   :  { %vm81_vm8 = vcmp.eq.s32.totalorder %v5549_v11, %v80_v38  ;;  %vm287_vm13 = vcmp.eq.s32.totalorder %v5549_v11, 11  ;;  %vm300_vm14 = vcmp.eq.s32.totalorder %v5549_v11, 12  ;;  %vm313_vm15 = vcmp.eq.s32.totalorder %v5549_v11, 13 }
  0x27   :  { %187 = vadd.xlane.f32.xlu0 %v186_v17  ;;  %v82_v43 = vsel %vm81_vm8, 1.0, %v5521_v42  ;;  %vm326_vm0 = vcmp.eq.s32.totalorder %v5549_v11, 14  ;;  %vm339_vm1 = vcmp.eq.s32.totalorder %v5549_v11, 15  ;;  %vm437_vm8 = vcmp.eq.s32.totalorder %v5549_v11, 21 }
  0x28   :  { %v253_v46 = vmul.f32 %v245_v44, %v82_v43 }
  0xb4   :  { %v188_v19 = vpop.xlane.xlu0 %187 }
  0xb5   :  { %v189_v20 = vsel %vm185_vm2, %v188_v19, %v75_v16  ;;  %v310_v16 = vld [vmem:[#allocation0 + $0xd] ss:$0 sm:$0xff] }
  0xb6   :  { %v195_v21 = vmul.f32 %v191_v18, %v189_v20 }
  0xb8   :  { %196 = vadd.xlane.f32.xlu0 %v195_v21 }
 0x145   :  { %v197_v23 = vpop.xlane.xlu0 %196 }
 0x146   :  { %v198_v24 = vsel %vm194_vm3, %v197_v23, %v189_v20  ;;  %v323_v23 = vld [vmem:[#allocation0 + $0xe] ss:$0 sm:$0xff]  ;;  %vm352_vm3 = vcmp.eq.s32.totalorder %v5549_v11, 16 }
 0x147   :  { %v204_v25 = vmul.f32 %v200_v22, %v198_v24 }
 0x149   :  { %205 = vadd.xlane.f32.xlu1 %v204_v25 }
 0x1d6   :  { %v206_v27 = vpop.xlane.xlu1 %205 }
 0x1d7   :  { %v207_v28 = vsel %vm203_vm4, %v206_v27, %v198_v24  ;;  %vm369_vm4 = vcmp.eq.s32.totalorder %v5549_v11, 17 }
 0x1d8   :  { %v213_v29 = vmul.f32 %v209_v26, %v207_v28 }
 0x1da   :  { %214 = vadd.xlane.f32.xlu1 %v213_v29 }
 0x267   :  { %v215_v31 = vpop.xlane.xlu1 %214 }
 0x268   :  { %v216_v32 = vsel %vm212_vm5, %v215_v31, %v207_v28  ;;  %vm386_vm5 = vcmp.eq.s32.totalorder %v5549_v11, 18 }
 0x269   :  { %v222_v33 = vmul.f32 %v218_v30, %v216_v32  ;;  %v336_v30 = vld [vmem:[#allocation0 + $0xf] ss:$0 sm:$0xff] }
 0x26b   :  { %223 = vadd.xlane.f32.xlu0 %v222_v33 }
 0x2f8   :  { %v224_v35 = vpop.xlane.xlu0 %223 }
 0x2f9   :  { %v225_v36 = vsel %vm221_vm6, %v224_v35, %v216_v32  ;;  %vm403_vm6 = vcmp.eq.s32.totalorder %v5549_v11, 19 }
 0x2fa   :  { %v231_v37 = vmul.f32 %v227_v34, %v225_v36 }
 0x2fc   :  { %232 = vadd.xlane.f32.xlu1 %v231_v37  ;;  %v349_v37 = vld [vmem:[#allocation0 + $0x10] ss:$0 sm:$0xff] }
 0x389   :  { %v233_v40 = vpop.xlane.xlu1 %232 }
 0x38a   :  { %v234_v41 = vsel %vm230_vm7, %v233_v40, %v225_v36  ;;  %vm420_vm7 = vcmp.eq.s32.totalorder %v5549_v11, 20 }
 0x38b   :  { %v240_v45 = vmul.f32 %v236_v39, %v234_v41 }
 0x38d   :  { %241 = vadd.xlane.f32.xlu0 %v240_v45 }
 0x391   :  { %254 = vadd.xlane.f32.xlu0 %v253_v46 }
 0x41a   :  { %v242_v47 = vpop.xlane.xlu0 %241 }
 0x41b   :  { %v243_v48 = vsel %vm239_vm9, %v242_v47, %v234_v41  ;;  %v87_v41 = vadd.s32 16, %v5551_v12  ;;  %vm454_vm9 = vcmp.eq.s32.totalorder %v5549_v11, 22 }
 0x41c   :  { %v249_v49 = vmul.f32 %v245_v44, %v243_v48 }
 0x41d   :  { %vm88_vm2 = vcmp.eq.s32.totalorder %v5549_v11, %v87_v41 }
 0x41e   :  { %250 = vadd.xlane.f32.xlu1 %v249_v49  ;;  %v255_v51 = vpop.xlane.xlu0 %254  ;;  %v89_v45 = vsel %vm88_vm2, 1.0, %v5521_v42  ;;  %vm614_vm2 = vcmp.eq.s32.totalorder %v5549_v11, 30 }
 0x41f   :  { %v256_v52 = vsel %vm248_vm10, %v255_v51, %v82_v43 }
 0x420   :  { %v266_v53 = vmul.f32 %v258_v50, %v256_v52 }
 0x422   :  { %267 = vadd.xlane.f32.xlu0 %v266_v53 }
 0x4ab   :  { %v251_v54 = vpop.xlane.xlu1 %250 }
 0x4ac   :  { %v252_v55 = vsel %vm248_vm10, %v251_v54, %v243_v48  ;;  %v361_v48 = vmul.f32 %v349_v37, %v89_v45  ;;  %vm471_vm10 = vcmp.eq.s32.totalorder %v5549_v11, 23 }
 0x4ad   :  { %v262_v56 = vmul.f32 %v258_v50, %v252_v55  ;;  %v366_v50 = vld [vmem:[#allocation0 + $0x11] ss:$0 sm:$0xff] }
 0x4af   :  { %263 = vadd.xlane.f32.xlu1 %v262_v56  ;;  %v268_v58 = vpop.xlane.xlu0 %267 }
 0x4b0   :  { %v269_v59 = vsel %vm261_vm11, %v268_v58, %v256_v52  ;;  %v383_v58 = vld [vmem:[#allocation0 + $0x12] ss:$0 sm:$0xff] }
 0x4b1   :  { %v279_v60 = vmul.f32 %v271_v57, %v269_v59 }
 0x4b3   :  { %280 = vadd.xlane.f32.xlu0 %v279_v60 }
 0x53c   :  { %v264_v61 = vpop.xlane.xlu1 %263 }
 0x53d   :  { %v265_v62 = vsel %vm261_vm11, %v264_v61, %v252_v55 }
 0x53e   :  { %v275_v63 = vmul.f32 %v271_v57, %v265_v62 }
 0x540   :  { %276 = vadd.xlane.f32.xlu1 %v275_v63  ;;  %v281_v1 = vpop.xlane.xlu0 %280 }
 0x541   :  { %v282_v2 = vsel %vm274_vm12, %v281_v1, %v269_v59 }
 0x542   :  { %v292_v3 = vmul.f32 %v284_v0, %v282_v2 }
 0x544   :  { %293 = vadd.xlane.f32.xlu0 %v292_v3 }
 0x5cd   :  { %v277_v4 = vpop.xlane.xlu1 %276 }
 0x5ce   :  { %v278_v5 = vsel %vm274_vm12, %v277_v4, %v265_v62  ;;  %v400_v4 = vld [vmem:[#allocation0 + $0x13] ss:$0 sm:$0xff]  ;;  %vm488_vm12 = vcmp.eq.s32.totalorder %v5549_v11, 24 }
 0x5cf   :  { %v288_v6 = vmul.f32 %v284_v0, %v278_v5 }
 0x5d1   :  { %289 = vadd.xlane.f32.xlu1 %v288_v6  ;;  %v294_v8 = vpop.xlane.xlu0 %293 }
 0x5d2   :  { %v295_v9 = vsel %vm287_vm13, %v294_v8, %v282_v2 }
 0x5d3   :  { %v305_v10 = vmul.f32 %v297_v7, %v295_v9 }
 0x5d5   :  { %306 = vadd.xlane.f32.xlu0 %v305_v10 }
 0x65e   :  { %v290_v13 = vpop.xlane.xlu1 %289 }
 0x65f   :  { %v291_v14 = vsel %vm287_vm13, %v290_v13, %v278_v5  ;;  %vm509_vm13 = vcmp.eq.s32.totalorder %v5549_v11, 25 }
 0x660   :  { %v301_v15 = vmul.f32 %v297_v7, %v291_v14 }
 0x662   :  { %302 = vadd.xlane.f32.xlu1 %v301_v15  ;;  %v307_v17 = vpop.xlane.xlu0 %306 }
 0x663   :  { %v308_v18 = vsel %vm300_vm14, %v307_v17, %v295_v9 }
 0x664   :  { %v318_v19 = vmul.f32 %v310_v16, %v308_v18 }
 0x666   :  { %319 = vadd.xlane.f32.xlu0 %v318_v19 }
 0x6ef   :  { %v303_v20 = vpop.xlane.xlu1 %302 }
 0x6f0   :  { %v304_v21 = vsel %vm300_vm14, %v303_v20, %v291_v14  ;;  %vm530_vm14 = vcmp.eq.s32.totalorder %v5549_v11, 26 }
 0x6f1   :  { %v314_v22 = vmul.f32 %v310_v16, %v304_v21  ;;  %v417_v16 = vld [vmem:[#allocation0 + $0x14] ss:$0 sm:$0xff] }
 0x6f3   :  { %315 = vadd.xlane.f32.xlu1 %v314_v22  ;;  %v320_v24 = vpop.xlane.xlu0 %319 }
 0x6f4   :  { %v321_v25 = vsel %vm313_vm15, %v320_v24, %v308_v18 }
 0x6f5   :  { %v331_v26 = vmul.f32 %v323_v23, %v321_v25 }
 0x6f7   :  { %332 = vadd.xlane.f32.xlu0 %v331_v26  ;;  %v434_v26 = vld [vmem:[#allocation0 + $0x15] ss:$0 sm:$0xff] }
 0x780   :  { %v316_v27 = vpop.xlane.xlu1 %315 }
 0x781   :  { %v317_v28 = vsel %vm313_vm15, %v316_v27, %v304_v21  ;;  %vm551_vm15 = vcmp.eq.s32.totalorder %v5549_v11, 27 }
 0x782   :  { %v327_v29 = vmul.f32 %v323_v23, %v317_v28 }
 0x784   :  { %328 = vadd.xlane.f32.xlu1 %v327_v29  ;;  %v333_v31 = vpop.xlane.xlu0 %332 }
 0x785   :  { %v334_v32 = vsel %vm326_vm0, %v333_v31, %v321_v25 }
 0x786   :  { %v344_v33 = vmul.f32 %v336_v30, %v334_v32 }
 0x788   :  { %345 = vadd.xlane.f32.xlu0 %v344_v33 }
 0x811   :  { %v329_v34 = vpop.xlane.xlu1 %328 }
 0x812   :  { %v330_v35 = vsel %vm326_vm0, %v329_v34, %v317_v28  ;;  %vm572_vm0 = vcmp.eq.s32.totalorder %v5549_v11, 28 }
 0x813   :  { %v340_v36 = vmul.f32 %v336_v30, %v330_v35 }
 0x815   :  { %341 = vadd.xlane.f32.xlu1 %v340_v36  ;;  %v346_v38 = vpop.xlane.xlu0 %345  ;;  %v451_v36 = vld [vmem:[#allocation0 + $0x16] ss:$0 sm:$0xff] }
 0x816   :  { %v347_v39 = vsel %vm339_vm1, %v346_v38, %v334_v32 }
 0x817   :  { %v357_v40 = vmul.f32 %v349_v37, %v347_v39 }
 0x819   :  { %358 = vadd.xlane.f32.xlu0 %v357_v40 }
 0x8a2   :  { %v342_v43 = vpop.xlane.xlu1 %341 }
 0x8a3   :  { %v343_v44 = vsel %vm339_vm1, %v342_v43, %v330_v35  ;;  %vm593_vm1 = vcmp.eq.s32.totalorder %v5549_v11, 29 }
 0x8a4   :  { %v353_v46 = vmul.f32 %v349_v37, %v343_v44 }
 0x8a6   :  { %354 = vadd.xlane.f32.xlu1 %v353_v46  ;;  %v359_v47 = vpop.xlane.xlu0 %358 }
 0x8a7   :  { %v360_v49 = vsel %vm352_vm3, %v359_v47, %v347_v39  ;;  %v468_v47 = vld [vmem:[#allocation0 + $0x17] ss:$0 sm:$0xff] }
 0x8a8   :  { %v374_v51 = vmul.f32 %v366_v50, %v360_v49 }
 0x8aa   :  { %362 = vadd.xlane.f32.xlu1 %v361_v48 }
 0x8ae   :  { %375 = vadd.xlane.f32.xlu1 %v374_v51 }
 0x933   :  { %v355_v52 = vpop.xlane.xlu1 %354 }
 0x934   :  { %v356_v53 = vsel %vm352_vm3, %v355_v52, %v343_v44 }
 0x935   :  { %v370_v54 = vmul.f32 %v366_v50, %v356_v53 }
 0x937   :  { %v363_v55 = vpop.xlane.xlu1 %362  ;;  %371 = vadd.xlane.f32.xlu0 %v370_v54  ;;  %v94_v54 = vadd.s32 24, %v5551_v12 }
 0x938   :  { %v364_v56 = vsel %vm352_vm3, %v363_v55, %v89_v45  ;;  %vm635_vm3 = vcmp.eq.s32.totalorder %v5549_v11, 31 }
 0x939   :  { %v378_v57 = vmul.f32 %v366_v50, %v364_v56  ;;  %vm95_vm11 = vcmp.eq.s32.totalorder %v5549_v11, %v94_v54 }
 0x93b   :  { %379 = vadd.xlane.f32.xlu0 %v378_v57  ;;  %v376_v59 = vpop.xlane.xlu1 %375 }
 0x93c   :  { %v377_v60 = vsel %vm369_vm4, %v376_v59, %v360_v49 }
 0x93d   :  { %v391_v61 = vmul.f32 %v383_v58, %v377_v60 }
 0x93f   :  { %392 = vadd.xlane.f32.xlu0 %v391_v61  ;;  %v96_v61 = vsel %vm95_vm11, 1.0, %v5521_v42  ;;  %vm806_vm11 = vcmp.eq.s32.totalorder %v5549_v11, 38 }
 0x9c4   :  { %v372_v62 = vpop.xlane.xlu0 %371 }
 0x9c5   :  { %v373_v63 = vsel %vm369_vm4, %v372_v62, %v356_v53 }
 0x9c6   :  { %v387_v0 = vmul.f32 %v383_v58, %v373_v63 }
 0x9c8   :  { %388 = vadd.xlane.f32.xlu1 %v387_v0  ;;  %v380_v1 = vpop.xlane.xlu0 %379 }
 0x9c9   :  { %v381_v2 = vsel %vm369_vm4, %v380_v1, %v364_v56 }
 0x9ca   :  { %v395_v3 = vmul.f32 %v383_v58, %v381_v2  ;;  %v485_v58 = vld [vmem:[#allocation0 + $0x18] ss:$0 sm:$0xff] }
 0x9cc   :  { %396 = vadd.xlane.f32.xlu1 %v395_v3  ;;  %v393_v5 = vpop.xlane.xlu0 %392 }
 0x9cd   :  { %v394_v6 = vsel %vm386_vm5, %v393_v5, %v377_v60 }
 0x9ce   :  { %v408_v7 = vmul.f32 %v400_v4, %v394_v6 }
 0x9d0   :  { %409 = vadd.xlane.f32.xlu1 %v408_v7 }
 0xa55   :  { %v389_v8 = vpop.xlane.xlu1 %388 }
 0xa56   :  { %v390_v9 = vsel %vm386_vm5, %v389_v8, %v373_v63  ;;  %v501_v63 = vmul.f32 %v485_v58, %v96_v61 }
 0xa57   :  { %v404_v10 = vmul.f32 %v400_v4, %v390_v9 }
 0xa59   :  { %405 = vadd.xlane.f32.xlu0 %v404_v10  ;;  %v397_v13 = vpop.xlane.xlu1 %396 }
 0xa5a   :  { %v398_v14 = vsel %vm386_vm5, %v397_v13, %v381_v2  ;;  %vm656_vm5 = vcmp.eq.s32.totalorder %v5549_v11, 32 }
 0xa5b   :  { %v412_v15 = vmul.f32 %v400_v4, %v398_v14 }
 0xa5d   :  { %413 = vadd.xlane.f32.xlu0 %v412_v15  ;;  %v410_v17 = vpop.xlane.xlu1 %409 }
 0xa5e   :  { %v411_v18 = vsel %vm403_vm6, %v410_v17, %v394_v6  ;;  %v506_v6 = vld [vmem:[#allocation0 + $0x19] ss:$0 sm:$0xff] }
 0xa5f   :  { %v425_v19 = vmul.f32 %v417_v16, %v411_v18 }
 0xa61   :  { %426 = vadd.xlane.f32.xlu0 %v425_v19 }
 0xae6   :  { %v406_v20 = vpop.xlane.xlu0 %405 }
 0xae7   :  { %v407_v21 = vsel %vm403_vm6, %v406_v20, %v390_v9 }
 0xae8   :  { %v421_v22 = vmul.f32 %v417_v16, %v407_v21 }
 0xaea   :  { %422 = vadd.xlane.f32.xlu1 %v421_v22  ;;  %v414_v23 = vpop.xlane.xlu0 %413 }
 0xaeb   :  { %v415_v24 = vsel %vm403_vm6, %v414_v23, %v398_v14  ;;  %vm681_vm6 = vcmp.eq.s32.totalorder %v5549_v11, 33 }
 0xaec   :  { %v429_v25 = vmul.f32 %v417_v16, %v415_v24 }
 0xaee   :  { %430 = vadd.xlane.f32.xlu1 %v429_v25  ;;  %v427_v27 = vpop.xlane.xlu0 %426 }
 0xaef   :  { %v428_v28 = vsel %vm420_vm7, %v427_v27, %v411_v18 }
 0xaf0   :  { %v442_v29 = vmul.f32 %v434_v26, %v428_v28 }
 0xaf2   :  { %443 = vadd.xlane.f32.xlu1 %v442_v29 }
 0xb77   :  { %v423_v30 = vpop.xlane.xlu1 %422 }
 0xb78   :  { %v424_v31 = vsel %vm420_vm7, %v423_v30, %v407_v21  ;;  %v527_v21 = vld [vmem:[#allocation0 + $0x1a] ss:$0 sm:$0xff] }
 0xb79   :  { %v438_v32 = vmul.f32 %v434_v26, %v424_v31 }
 0xb7b   :  { %439 = vadd.xlane.f32.xlu0 %v438_v32  ;;  %v431_v33 = vpop.xlane.xlu1 %430 }
 0xb7c   :  { %v432_v34 = vsel %vm420_vm7, %v431_v33, %v415_v24  ;;  %vm706_vm7 = vcmp.eq.s32.totalorder %v5549_v11, 34 }
 0xb7d   :  { %v446_v35 = vmul.f32 %v434_v26, %v432_v34 }
 0xb7f   :  { %447 = vadd.xlane.f32.xlu0 %v446_v35  ;;  %v444_v37 = vpop.xlane.xlu1 %443 }
 0xb80   :  { %v445_v38 = vsel %vm437_vm8, %v444_v37, %v428_v28 }
 0xb81   :  { %v459_v39 = vmul.f32 %v451_v36, %v445_v38 }
 0xb83   :  { %460 = vadd.xlane.f32.xlu0 %v459_v39 }
 0xc08   :  { %v440_v40 = vpop.xlane.xlu0 %439 }
 0xc09   :  { %v441_v41 = vsel %vm437_vm8, %v440_v40, %v424_v31 }
 0xc0a   :  { %v455_v43 = vmul.f32 %v451_v36, %v441_v41 }
 0xc0c   :  { %456 = vadd.xlane.f32.xlu1 %v455_v43  ;;  %v448_v44 = vpop.xlane.xlu0 %447 }
 0xc0d   :  { %v449_v45 = vsel %vm437_vm8, %v448_v44, %v432_v34  ;;  %v548_v34 = vld [vmem:[#allocation0 + $0x1b] ss:$0 sm:$0xff]  ;;  %vm731_vm8 = vcmp.eq.s32.totalorder %v5549_v11, 35 }
 0xc0e   :  { %v463_v46 = vmul.f32 %v451_v36, %v449_v45 }
 0xc10   :  { %464 = vadd.xlane.f32.xlu1 %v463_v46  ;;  %v461_v48 = vpop.xlane.xlu0 %460 }
 0xc11   :  { %v462_v49 = vsel %vm454_vm9, %v461_v48, %v445_v38  ;;  %v569_v48 = vld [vmem:[#allocation0 + $0x1c] ss:$0 sm:$0xff] }
 0xc12   :  { %v476_v50 = vmul.f32 %v468_v47, %v462_v49 }
 0xc14   :  { %477 = vadd.xlane.f32.xlu1 %v476_v50 }
 0xc99   :  { %v457_v51 = vpop.xlane.xlu1 %456 }
 0xc9a   :  { %v458_v52 = vsel %vm454_vm9, %v457_v51, %v441_v41 }
 0xc9b   :  { %v472_v53 = vmul.f32 %v468_v47, %v458_v52 }
 0xc9d   :  { %473 = vadd.xlane.f32.xlu0 %v472_v53  ;;  %v465_v55 = vpop.xlane.xlu1 %464 }
 0xc9e   :  { %v466_v56 = vsel %vm454_vm9, %v465_v55, %v449_v45  ;;  %vm756_vm9 = vcmp.eq.s32.totalorder %v5549_v11, 36 }
 0xc9f   :  { %v480_v57 = vmul.f32 %v468_v47, %v466_v56 }
 0xca1   :  { %481 = vadd.xlane.f32.xlu0 %v480_v57  ;;  %v478_v59 = vpop.xlane.xlu1 %477 }
 0xca2   :  { %v479_v60 = vsel %vm471_vm10, %v478_v59, %v462_v49 }
 0xca3   :  { %v493_v62 = vmul.f32 %v485_v58, %v479_v60 }
 0xca5   :  { %494 = vadd.xlane.f32.xlu0 %v493_v62 }
 0xca9   :  { %502 = vadd.xlane.f32.xlu0 %v501_v63 }
 0xd2a   :  { %v474_v0 = vpop.xlane.xlu0 %473 }
 0xd2b   :  { %v475_v1 = vsel %vm471_vm10, %v474_v0, %v458_v52 }
 0xd2c   :  { %v489_v2 = vmul.f32 %v485_v58, %v475_v1 }
 0xd2e   :  { %490 = vadd.xlane.f32.xlu1 %v489_v2  ;;  %v482_v3 = vpop.xlane.xlu0 %481 }
 0xd2f   :  { %v483_v4 = vsel %vm471_vm10, %v482_v3, %v466_v56  ;;  %vm781_vm10 = vcmp.eq.s32.totalorder %v5549_v11, 37 }
 0xd30   :  { %v497_v5 = vmul.f32 %v485_v58, %v483_v4 }
 0xd32   :  { %498 = vadd.xlane.f32.xlu1 %v497_v5  ;;  %v495_v7 = vpop.xlane.xlu0 %494 }
 0xd33   :  { %v496_v8 = vsel %vm488_vm12, %v495_v7, %v479_v60 }
 0xd34   :  { %v514_v9 = vmul.f32 %v506_v6, %v496_v8 }
 0xd36   :  { %515 = vadd.xlane.f32.xlu0 %v514_v9  ;;  %v503_v10 = vpop.xlane.xlu0 %502 }
 0xd37   :  { %v504_v13 = vsel %vm488_vm12, %v503_v10, %v96_v61  ;;  %v590_v61 = vld [vmem:[#allocation0 + $0x1d] ss:$0 sm:$0xff]  ;;  %v611_v10 = vld [vmem:[#allocation0 + $0x1e] ss:$0 sm:$0xff] }
 0xd38   :  { %v522_v14 = vmul.f32 %v506_v6, %v504_v13 }
 0xd3a   :  { %523 = vadd.xlane.f32.xlu0 %v522_v14 }
 0xdbb   :  { %v491_v15 = vpop.xlane.xlu1 %490 }
 0xdbc   :  { %v492_v16 = vsel %vm488_vm12, %v491_v15, %v475_v1 }
 0xdbd   :  { %v510_v17 = vmul.f32 %v506_v6, %v492_v16 }
 0xdbf   :  { %511 = vadd.xlane.f32.xlu1 %v510_v17  ;;  %v499_v18 = vpop.xlane.xlu1 %498 }
 0xdc0   :  { %v500_v19 = vsel %vm488_vm12, %v499_v18, %v483_v4  ;;  %vm831_vm12 = vcmp.eq.s32.totalorder %v5549_v11, 39 }
 0xdc1   :  { %v518_v20 = vmul.f32 %v506_v6, %v500_v19 }
 0xdc3   :  { %519 = vadd.xlane.f32.xlu1 %v518_v20  ;;  %v516_v22 = vpop.xlane.xlu0 %515 }
 0xdc4   :  { %v517_v23 = vsel %vm509_vm13, %v516_v22, %v496_v8 }
 0xdc5   :  { %v535_v24 = vmul.f32 %v527_v21, %v517_v23 }
 0xdc7   :  { %536 = vadd.xlane.f32.xlu0 %v535_v24  ;;  %v524_v25 = vpop.xlane.xlu0 %523 }
 0xdc8   :  { %v525_v26 = vsel %vm509_vm13, %v524_v25, %v504_v13  ;;  %v632_v25 = vld [vmem:[#allocation0 + $0x1f] ss:$0 sm:$0xff] }
 0xdc9   :  { %v543_v27 = vmul.f32 %v527_v21, %v525_v26 }
 0xdcb   :  { %544 = vadd.xlane.f32.xlu0 %v543_v27 }
 0xe4c   :  { %v512_v28 = vpop.xlane.xlu1 %511 }
 0xe4d   :  { %v513_v29 = vsel %vm509_vm13, %v512_v28, %v492_v16 }
 0xe4e   :  { %v531_v30 = vmul.f32 %v527_v21, %v513_v29 }
 0xe50   :  { %532 = vadd.xlane.f32.xlu1 %v531_v30  ;;  %v520_v31 = vpop.xlane.xlu1 %519 }
 0xe51   :  { %v521_v32 = vsel %vm509_vm13, %v520_v31, %v500_v19 }
 0xe52   :  { %v539_v33 = vmul.f32 %v527_v21, %v521_v32 }
 0xe54   :  { %540 = vadd.xlane.f32.xlu1 %v539_v33  ;;  %v537_v35 = vpop.xlane.xlu0 %536 }
 0xe55   :  { %v538_v36 = vsel %vm530_vm14, %v537_v35, %v517_v23 }
 0xe56   :  { %v556_v37 = vmul.f32 %v548_v34, %v538_v36 }
 0xe58   :  { %557 = vadd.xlane.f32.xlu0 %v556_v37  ;;  %v545_v38 = vpop.xlane.xlu0 %544 }
 0xe59   :  { %v546_v39 = vsel %vm530_vm14, %v545_v38, %v525_v26  ;;  %v653_v38 = vld [vmem:[#allocation0 + $0x20] ss:$0 sm:$0xff] }
 0xe5a   :  { %v564_v40 = vmul.f32 %v548_v34, %v546_v39 }
 0xe5c   :  { %565 = vadd.xlane.f32.xlu0 %v564_v40 }
 0xedd   :  { %v533_v41 = vpop.xlane.xlu1 %532 }
 0xede   :  { %v534_v43 = vsel %vm530_vm14, %v533_v41, %v513_v29 }
 0xedf   :  { %v552_v44 = vmul.f32 %v548_v34, %v534_v43 }
 0xee1   :  { %553 = vadd.xlane.f32.xlu1 %v552_v44  ;;  %v541_v45 = vpop.xlane.xlu1 %540 }
 0xee2   :  { %v542_v46 = vsel %vm530_vm14, %v541_v45, %v521_v32  ;;  %vm856_vm14 = vcmp.eq.s32.totalorder %v5549_v11, 40 }
 0xee3   :  { %v560_v47 = vmul.f32 %v548_v34, %v542_v46 }
 0xee5   :  { %561 = vadd.xlane.f32.xlu1 %v560_v47  ;;  %v558_v49 = vpop.xlane.xlu0 %557 }
 0xee6   :  { %v559_v50 = vsel %vm551_vm15, %v558_v49, %v538_v36 }
 0xee7   :  { %v577_v51 = vmul.f32 %v569_v48, %v559_v50 }
 0xee9   :  { %578 = vadd.xlane.f32.xlu0 %v577_v51  ;;  %v566_v52 = vpop.xlane.xlu0 %565 }
 0xeea   :  { %v567_v53 = vsel %vm551_vm15, %v566_v52, %v546_v39 }
 0xeeb   :  { %v585_v54 = vmul.f32 %v569_v48, %v567_v53 }
 0xeed   :  { %586 = vadd.xlane.f32.xlu0 %v585_v54 }
 0xf6e   :  { %v554_v55 = vpop.xlane.xlu1 %553 }
 0xf6f   :  { %v555_v56 = vsel %vm551_vm15, %v554_v55, %v534_v43 }
 0xf70   :  { %v573_v57 = vmul.f32 %v569_v48, %v555_v56 }
 0xf72   :  { %574 = vadd.xlane.f32.xlu1 %v573_v57  ;;  %v562_v58 = vpop.xlane.xlu1 %561  ;;  %v678_v57 = vld [vmem:[#allocation0 + $0x21] ss:$0 sm:$0xff] }
 0xf73   :  { %v563_v59 = vsel %vm551_vm15, %v562_v58, %v542_v46  ;;  %v101_v46 = vadd.s32 32, %v5551_v12  ;;  %vm885_vm15 = vcmp.eq.s32.totalorder %v5549_v11, 41 }
 0xf74   :  { %v581_v60 = vmul.f32 %v569_v48, %v563_v59 }
 0xf75   :  { %vm102_vm4 = vcmp.eq.s32.totalorder %v5549_v11, %v101_v46 }
 0xf76   :  { %582 = vadd.xlane.f32.xlu1 %v581_v60  ;;  %v579_v62 = vpop.xlane.xlu0 %578  ;;  %v103_v52 = vsel %vm102_vm4, 1.0, %v5521_v42  ;;  %vm1030_vm4 = vcmp.eq.s32.totalorder %v5549_v11, 46 }
 0xf77   :  { %v580_v63 = vsel %vm572_vm0, %v579_v62, %v559_v50  ;;  %v673_v55 = vmul.f32 %v653_v38, %v103_v52 }
 0xf78   :  { %v598_v0 = vmul.f32 %v590_v61, %v580_v63 }
 0xf7a   :  { %599 = vadd.xlane.f32.xlu0 %v598_v0  ;;  %v587_v1 = vpop.xlane.xlu0 %586 }
 0xf7b   :  { %v588_v2 = vsel %vm572_vm0, %v587_v1, %v567_v53 }
 0xf7c   :  { %v606_v3 = vmul.f32 %v590_v61, %v588_v2 }
 0xf7e   :  { %607 = vadd.xlane.f32.xlu0 %v606_v3 }
 0xfff   :  { %v575_v4 = vpop.xlane.xlu1 %574 }
0x1000   :  { %v576_v5 = vsel %vm572_vm0, %v575_v4, %v555_v56 }
0x1001   :  { %v594_v6 = vmul.f32 %v590_v61, %v576_v5 }
0x1003   :  { %595 = vadd.xlane.f32.xlu1 %v594_v6  ;;  %v583_v7 = vpop.xlane.xlu1 %582 }
0x1004   :  { %v584_v8 = vsel %vm572_vm0, %v583_v7, %v563_v59  ;;  %v703_v7 = vld [vmem:[#allocation0 + $0x22] ss:$0 sm:$0xff]  ;;  %vm914_vm0 = vcmp.eq.s32.totalorder %v5549_v11, 42 }
0x1005   :  { %v602_v9 = vmul.f32 %v590_v61, %v584_v8 }
0x1007   :  { %603 = vadd.xlane.f32.xlu1 %v602_v9  ;;  %v600_v13 = vpop.xlane.xlu0 %599 }
0x1008   :  { %v601_v14 = vsel %vm593_vm1, %v600_v13, %v580_v63 }
0x1009   :  { %v619_v15 = vmul.f32 %v611_v10, %v601_v14 }
0x100b   :  { %620 = vadd.xlane.f32.xlu0 %v619_v15  ;;  %v608_v16 = vpop.xlane.xlu0 %607 }
0x100c   :  { %v609_v17 = vsel %vm593_vm1, %v608_v16, %v588_v2 }
0x100d   :  { %v627_v18 = vmul.f32 %v611_v10, %v609_v17 }
0x100f   :  { %628 = vadd.xlane.f32.xlu0 %v627_v18 }
0x1090   :  { %v596_v19 = vpop.xlane.xlu1 %595 }
0x1091   :  { %v597_v20 = vsel %vm593_vm1, %v596_v19, %v576_v5 }
0x1092   :  { %v615_v21 = vmul.f32 %v611_v10, %v597_v20 }
0x1094   :  { %616 = vadd.xlane.f32.xlu1 %v615_v21  ;;  %v604_v22 = vpop.xlane.xlu1 %603 }
0x1095   :  { %v605_v23 = vsel %vm593_vm1, %v604_v22, %v584_v8  ;;  %vm943_vm1 = vcmp.eq.s32.totalorder %v5549_v11, 43 }
0x1096   :  { %v623_v24 = vmul.f32 %v611_v10, %v605_v23 }
0x1098   :  { %624 = vadd.xlane.f32.xlu1 %v623_v24  ;;  %v621_v26 = vpop.xlane.xlu0 %620 }
0x1099   :  { %v622_v27 = vsel %vm614_vm2, %v621_v26, %v601_v14 }
0x109a   :  { %v640_v28 = vmul.f32 %v632_v25, %v622_v27 }
0x109c   :  { %641 = vadd.xlane.f32.xlu0 %v640_v28  ;;  %v629_v29 = vpop.xlane.xlu0 %628 }
0x109d   :  { %v630_v30 = vsel %vm614_vm2, %v629_v29, %v609_v17 }
0x109e   :  { %v648_v31 = vmul.f32 %v632_v25, %v630_v30 }
0x10a0   :  { %649 = vadd.xlane.f32.xlu0 %v648_v31 }
0x1121   :  { %v617_v32 = vpop.xlane.xlu1 %616 }
0x1122   :  { %v618_v33 = vsel %vm614_vm2, %v617_v32, %v597_v20 }
0x1123   :  { %v636_v34 = vmul.f32 %v632_v25, %v618_v33 }
0x1125   :  { %637 = vadd.xlane.f32.xlu1 %v636_v34  ;;  %v625_v35 = vpop.xlane.xlu1 %624 }
0x1126   :  { %v626_v36 = vsel %vm614_vm2, %v625_v35, %v605_v23  ;;  %vm972_vm2 = vcmp.eq.s32.totalorder %v5549_v11, 44 }
0x1127   :  { %v644_v37 = vmul.f32 %v632_v25, %v626_v36  ;;  %v728_v25 = vld [vmem:[#allocation0 + $0x23] ss:$0 sm:$0xff] }
0x1129   :  { %645 = vadd.xlane.f32.xlu1 %v644_v37  ;;  %v642_v39 = vpop.xlane.xlu0 %641 }
0x112a   :  { %v643_v40 = vsel %vm635_vm3, %v642_v39, %v622_v27 }
0x112b   :  { %v661_v41 = vmul.f32 %v653_v38, %v643_v40 }
0x112d   :  { %662 = vadd.xlane.f32.xlu0 %v661_v41  ;;  %v650_v43 = vpop.xlane.xlu0 %649  ;;  %v753_v41 = vld [vmem:[#allocation0 + $0x24] ss:$0 sm:$0xff] }
0x112e   :  { %v651_v44 = vsel %vm635_vm3, %v650_v43, %v630_v30 }
0x112f   :  { %v669_v45 = vmul.f32 %v653_v38, %v651_v44 }
0x1131   :  { %670 = vadd.xlane.f32.xlu0 %v669_v45 }
0x11b2   :  { %v638_v47 = vpop.xlane.xlu1 %637 }
0x11b3   :  { %v639_v48 = vsel %vm635_vm3, %v638_v47, %v618_v33 }
0x11b4   :  { %v657_v49 = vmul.f32 %v653_v38, %v639_v48 }
0x11b6   :  { %658 = vadd.xlane.f32.xlu1 %v657_v49  ;;  %v646_v50 = vpop.xlane.xlu1 %645 }
0x11b7   :  { %v647_v51 = vsel %vm635_vm3, %v646_v50, %v626_v36  ;;  %vm1001_vm3 = vcmp.eq.s32.totalorder %v5549_v11, 45 }
0x11b8   :  { %v665_v53 = vmul.f32 %v653_v38, %v647_v51 }
0x11ba   :  { %666 = vadd.xlane.f32.xlu1 %v665_v53  ;;  %v663_v54 = vpop.xlane.xlu0 %662 }
0x11bb   :  { %v664_v56 = vsel %vm656_vm5, %v663_v54, %v643_v40 }
0x11bc   :  { %v686_v59 = vmul.f32 %v678_v57, %v664_v56 }
0x11be   :  { %674 = vadd.xlane.f32.xlu1 %v673_v55  ;;  %v671_v58 = vpop.xlane.xlu0 %670 }
0x11bf   :  { %v672_v60 = vsel %vm656_vm5, %v671_v58, %v651_v44  ;;  %v778_v58 = vld [vmem:[#allocation0 + $0x25] ss:$0 sm:$0xff] }
0x11c0   :  { %v694_v61 = vmul.f32 %v678_v57, %v672_v60 }
0x11c2   :  { %687 = vadd.xlane.f32.xlu1 %v686_v59 }
0x11c6   :  { %695 = vadd.xlane.f32.xlu1 %v694_v61 }
0x1243   :  { %v659_v62 = vpop.xlane.xlu1 %658 }
0x1244   :  { %v660_v63 = vsel %vm656_vm5, %v659_v62, %v639_v48 }
0x1245   :  { %v682_v0 = vmul.f32 %v678_v57, %v660_v63 }
0x1247   :  { %v667_v1 = vpop.xlane.xlu1 %666  ;;  %683 = vadd.xlane.f32.xlu0 %v682_v0 }
0x1248   :  { %v668_v2 = vsel %vm656_vm5, %v667_v1, %v647_v51 }
0x1249   :  { %v690_v3 = vmul.f32 %v678_v57, %v668_v2 }
0x124b   :  { %v675_v4 = vpop.xlane.xlu1 %674  ;;  %691 = vadd.xlane.f32.xlu0 %v690_v3 }
0x124c   :  { %v676_v5 = vsel %vm656_vm5, %v675_v4, %v103_v52  ;;  %vm1059_vm5 = vcmp.eq.s32.totalorder %v5549_v11, 47 }
0x124d   :  { %v698_v6 = vmul.f32 %v678_v57, %v676_v5 }
0x124f   :  { %699 = vadd.xlane.f32.xlu0 %v698_v6  ;;  %v688_v8 = vpop.xlane.xlu1 %687 }
0x1250   :  { %v689_v9 = vsel %vm681_vm6, %v688_v8, %v664_v56 }
0x1251   :  { %v711_v10 = vmul.f32 %v703_v7, %v689_v9 }
0x1253   :  { %712 = vadd.xlane.f32.xlu0 %v711_v10  ;;  %v696_v13 = vpop.xlane.xlu1 %695  ;;  %v803_v10 = vld [vmem:[#allocation0 + $0x26] ss:$0 sm:$0xff] }
0x1254   :  { %v697_v14 = vsel %vm681_vm6, %v696_v13, %v672_v60 }
0x1255   :  { %v719_v15 = vmul.f32 %v703_v7, %v697_v14 }
0x1257   :  { %720 = vadd.xlane.f32.xlu0 %v719_v15 }
0x12d4   :  { %v684_v16 = vpop.xlane.xlu0 %683 }
0x12d5   :  { %v685_v17 = vsel %vm681_vm6, %v684_v16, %v660_v63 }
0x12d6   :  { %v707_v18 = vmul.f32 %v703_v7, %v685_v17 }
0x12d8   :  { %708 = vadd.xlane.f32.xlu1 %v707_v18  ;;  %v692_v19 = vpop.xlane.xlu0 %691 }
0x12d9   :  { %v693_v20 = vsel %vm681_vm6, %v692_v19, %v668_v2 }
0x12da   :  { %v715_v21 = vmul.f32 %v703_v7, %v693_v20 }
0x12dc   :  { %716 = vadd.xlane.f32.xlu1 %v715_v21  ;;  %v700_v22 = vpop.xlane.xlu0 %699 }
0x12dd   :  { %v701_v23 = vsel %vm681_vm6, %v700_v22, %v676_v5 }
0x12de   :  { %v723_v24 = vmul.f32 %v703_v7, %v701_v23 }
0x12e0   :  { %724 = vadd.xlane.f32.xlu1 %v723_v24  ;;  %v713_v26 = vpop.xlane.xlu0 %712 }
0x12e1   :  { %v714_v27 = vsel %vm706_vm7, %v713_v26, %v689_v9 }
0x12e2   :  { %v736_v28 = vmul.f32 %v728_v25, %v714_v27 }
0x12e4   :  { %737 = vadd.xlane.f32.xlu1 %v736_v28  ;;  %v721_v29 = vpop.xlane.xlu0 %720  ;;  %v828_v28 = vld [vmem:[#allocation0 + $0x27] ss:$0 sm:$0xff] }
0x12e5   :  { %v722_v30 = vsel %vm706_vm7, %v721_v29, %v697_v14 }
0x12e6   :  { %v744_v31 = vmul.f32 %v728_v25, %v722_v30 }
0x12e8   :  { %745 = vadd.xlane.f32.xlu1 %v744_v31 }
0x1365   :  { %v709_v32 = vpop.xlane.xlu1 %708 }
0x1366   :  { %v710_v33 = vsel %vm706_vm7, %v709_v32, %v685_v17 }
0x1367   :  { %v732_v34 = vmul.f32 %v728_v25, %v710_v33 }
0x1369   :  { %733 = vadd.xlane.f32.xlu0 %v732_v34  ;;  %v717_v35 = vpop.xlane.xlu1 %716 }
0x136a   :  { %v718_v36 = vsel %vm706_vm7, %v717_v35, %v693_v20 }
0x136b   :  { %v740_v37 = vmul.f32 %v728_v25, %v718_v36 }
0x136d   :  { %741 = vadd.xlane.f32.xlu0 %v740_v37  ;;  %v725_v38 = vpop.xlane.xlu1 %724 }
0x136e   :  { %v726_v39 = vsel %vm706_vm7, %v725_v38, %v701_v23  ;;  %vm1088_vm7 = vcmp.eq.s32.totalorder %v5549_v11, 48 }
0x136f   :  { %v748_v40 = vmul.f32 %v728_v25, %v726_v39 }
0x1371   :  { %749 = vadd.xlane.f32.xlu0 %v748_v40  ;;  %v738_v43 = vpop.xlane.xlu1 %737 }
0x1372   :  { %v739_v44 = vsel %vm731_vm8, %v738_v43, %v714_v27 }
0x1373   :  { %v761_v45 = vmul.f32 %v753_v41, %v739_v44 }
0x1375   :  { %762 = vadd.xlane.f32.xlu0 %v761_v45  ;;  %v746_v46 = vpop.xlane.xlu1 %745  ;;  %v108_v45 = vadd.s32 40, %v5551_v12 }
0x1376   :  { %v747_v47 = vsel %vm731_vm8, %v746_v46, %v722_v30  ;;  %v853_v46 = vld [vmem:[#allocation0 + $0x28] ss:$0 sm:$0xff] }
0x1377   :  { %v769_v48 = vmul.f32 %v753_v41, %v747_v47  ;;  %vm109_vm13 = vcmp.eq.s32.totalorder %v5549_v11, %v108_v45 }
0x1379   :  { %770 = vadd.xlane.f32.xlu0 %v769_v48 }
0x13f6   :  { %v734_v49 = vpop.xlane.xlu0 %733 }
0x13f7   :  { %v735_v50 = vsel %vm731_vm8, %v734_v49, %v710_v33 }
0x13f8   :  { %v757_v51 = vmul.f32 %v753_v41, %v735_v50 }
0x13fa   :  { %758 = vadd.xlane.f32.xlu1 %v757_v51  ;;  %v742_v52 = vpop.xlane.xlu0 %741 }
0x13fb   :  { %v743_v53 = vsel %vm731_vm8, %v742_v52, %v718_v36  ;;  %v110_v52 = vsel %vm109_vm13, 1.0, %v5521_v42  ;;  %vm1286_vm13 = vcmp.eq.s32.totalorder %v5549_v11, 54 }
0x13fc   :  { %v765_v54 = vmul.f32 %v753_v41, %v743_v53 }
0x13fe   :  { %766 = vadd.xlane.f32.xlu1 %v765_v54  ;;  %v750_v55 = vpop.xlane.xlu0 %749  ;;  %v877_v54 = vmul.f32 %v853_v46, %v110_v52 }
0x13ff   :  { %v751_v56 = vsel %vm731_vm8, %v750_v55, %v726_v39  ;;  %vm1121_vm8 = vcmp.eq.s32.totalorder %v5549_v11, 49 }
0x1400   :  { %v773_v57 = vmul.f32 %v753_v41, %v751_v56 }
0x1402   :  { %774 = vadd.xlane.f32.xlu1 %v773_v57  ;;  %v763_v59 = vpop.xlane.xlu0 %762 }
0x1403   :  { %v764_v60 = vsel %vm756_vm9, %v763_v59, %v739_v44 }
0x1404   :  { %v786_v61 = vmul.f32 %v778_v58, %v764_v60 }
0x1406   :  { %787 = vadd.xlane.f32.xlu1 %v786_v61  ;;  %v771_v62 = vpop.xlane.xlu0 %770 }
0x1407   :  { %v772_v63 = vsel %vm756_vm9, %v771_v62, %v747_v47 }
0x1408   :  { %v794_v0 = vmul.f32 %v778_v58, %v772_v63 }
0x140a   :  { %795 = vadd.xlane.f32.xlu1 %v794_v0  ;;  %v882_v0 = vld [vmem:[#allocation0 + $0x29] ss:$0 sm:$0xff] }
0x1487   :  { %v759_v1 = vpop.xlane.xlu1 %758 }
0x1488   :  { %v760_v2 = vsel %vm756_vm9, %v759_v1, %v735_v50 }
0x1489   :  { %v782_v3 = vmul.f32 %v778_v58, %v760_v2 }
0x148b   :  { %783 = vadd.xlane.f32.xlu0 %v782_v3  ;;  %v767_v4 = vpop.xlane.xlu1 %766 }
0x148c   :  { %v768_v5 = vsel %vm756_vm9, %v767_v4, %v743_v53 }
0x148d   :  { %v790_v6 = vmul.f32 %v778_v58, %v768_v5 }
0x148f   :  { %791 = vadd.xlane.f32.xlu0 %v790_v6  ;;  %v775_v7 = vpop.xlane.xlu1 %774 }
0x1490   :  { %v776_v8 = vsel %vm756_vm9, %v775_v7, %v751_v56  ;;  %vm1154_vm9 = vcmp.eq.s32.totalorder %v5549_v11, 50 }
0x1491   :  { %v798_v9 = vmul.f32 %v778_v58, %v776_v8 }
0x1493   :  { %799 = vadd.xlane.f32.xlu0 %v798_v9  ;;  %v788_v13 = vpop.xlane.xlu1 %787 }
0x1494   :  { %v789_v14 = vsel %vm781_vm10, %v788_v13, %v764_v60 }
0x1495   :  { %v811_v15 = vmul.f32 %v803_v10, %v789_v14 }
0x1497   :  { %812 = vadd.xlane.f32.xlu0 %v811_v15  ;;  %v796_v16 = vpop.xlane.xlu1 %795 }
0x1498   :  { %v797_v17 = vsel %vm781_vm10, %v796_v16, %v772_v63 }
0x1499   :  { %v819_v18 = vmul.f32 %v803_v10, %v797_v17 }
0x149b   :  { %820 = vadd.xlane.f32.xlu0 %v819_v18 }
0x1518   :  { %v784_v19 = vpop.xlane.xlu0 %783 }
0x1519   :  { %v785_v20 = vsel %vm781_vm10, %v784_v19, %v760_v2 }
0x151a   :  { %v807_v21 = vmul.f32 %v803_v10, %v785_v20 }
0x151c   :  { %808 = vadd.xlane.f32.xlu1 %v807_v21  ;;  %v792_v22 = vpop.xlane.xlu0 %791  ;;  %v911_v21 = vld [vmem:[#allocation0 + $0x2a] ss:$0 sm:$0xff] }
0x151d   :  { %v793_v23 = vsel %vm781_vm10, %v792_v22, %v768_v5 }
0x151e   :  { %v815_v24 = vmul.f32 %v803_v10, %v793_v23 }
0x1520   :  { %816 = vadd.xlane.f32.xlu1 %v815_v24  ;;  %v800_v25 = vpop.xlane.xlu0 %799 }
0x1521   :  { %v801_v26 = vsel %vm781_vm10, %v800_v25, %v776_v8  ;;  %vm1187_vm10 = vcmp.eq.s32.totalorder %v5549_v11, 51 }
0x1522   :  { %v823_v27 = vmul.f32 %v803_v10, %v801_v26 }
0x1524   :  { %824 = vadd.xlane.f32.xlu1 %v823_v27  ;;  %v813_v29 = vpop.xlane.xlu0 %812 }
0x1525   :  { %v814_v30 = vsel %vm806_vm11, %v813_v29, %v789_v14 }
0x1526   :  { %v836_v31 = vmul.f32 %v828_v28, %v814_v30 }
0x1528   :  { %837 = vadd.xlane.f32.xlu1 %v836_v31  ;;  %v821_v32 = vpop.xlane.xlu0 %820 }
0x1529   :  { %v822_v33 = vsel %vm806_vm11, %v821_v32, %v797_v17 }
0x152a   :  { %v844_v34 = vmul.f32 %v828_v28, %v822_v33 }
0x152c   :  { %845 = vadd.xlane.f32.xlu1 %v844_v34 }
0x15a9   :  { %v809_v35 = vpop.xlane.xlu1 %808 }
0x15aa   :  { %v810_v36 = vsel %vm806_vm11, %v809_v35, %v785_v20 }
0x15ab   :  { %v832_v37 = vmul.f32 %v828_v28, %v810_v36 }
0x15ad   :  { %833 = vadd.xlane.f32.xlu0 %v832_v37  ;;  %v817_v38 = vpop.xlane.xlu1 %816 }
0x15ae   :  { %v818_v39 = vsel %vm806_vm11, %v817_v38, %v793_v23 }
0x15af   :  { %v840_v40 = vmul.f32 %v828_v28, %v818_v39 }
0x15b1   :  { %841 = vadd.xlane.f32.xlu0 %v840_v40  ;;  %v825_v41 = vpop.xlane.xlu1 %824  ;;  %v940_v40 = vld [vmem:[#allocation0 + $0x2b] ss:$0 sm:$0xff] }
0x15b2   :  { %v826_v43 = vsel %vm806_vm11, %v825_v41, %v801_v26  ;;  %vm1220_vm11 = vcmp.eq.s32.totalorder %v5549_v11, 52 }
0x15b3   :  { %v848_v44 = vmul.f32 %v828_v28, %v826_v43 }
0x15b5   :  { %849 = vadd.xlane.f32.xlu0 %v848_v44  ;;  %v838_v47 = vpop.xlane.xlu1 %837 }
0x15b6   :  { %v839_v48 = vsel %vm831_vm12, %v838_v47, %v814_v30 }
0x15b7   :  { %v861_v49 = vmul.f32 %v853_v46, %v839_v48 }
0x15b9   :  { %862 = vadd.xlane.f32.xlu0 %v861_v49  ;;  %v846_v50 = vpop.xlane.xlu1 %845 }
0x15ba   :  { %v847_v51 = vsel %vm831_vm12, %v846_v50, %v822_v33 }
0x15bb   :  { %v869_v53 = vmul.f32 %v853_v46, %v847_v51 }
0x15bd   :  { %870 = vadd.xlane.f32.xlu0 %v869_v53 }
0x15c1   :  { %878 = vadd.xlane.f32.xlu0 %v877_v54 }
0x163a   :  { %v834_v55 = vpop.xlane.xlu0 %833 }
0x163b   :  { %v835_v56 = vsel %vm831_vm12, %v834_v55, %v810_v36 }
0x163c   :  { %v857_v57 = vmul.f32 %v853_v46, %v835_v56 }
0x163e   :  { %858 = vadd.xlane.f32.xlu1 %v857_v57  ;;  %v842_v58 = vpop.xlane.xlu0 %841 }
0x163f   :  { %v843_v59 = vsel %vm831_vm12, %v842_v58, %v818_v39 }
0x1640   :  { %v865_v60 = vmul.f32 %v853_v46, %v843_v59 }
0x1642   :  { %866 = vadd.xlane.f32.xlu1 %v865_v60  ;;  %v850_v61 = vpop.xlane.xlu0 %849  ;;  %v969_v60 = vld [vmem:[#allocation0 + $0x2c] ss:$0 sm:$0xff] }
0x1643   :  { %v851_v62 = vsel %vm831_vm12, %v850_v61, %v826_v43  ;;  %vm1253_vm12 = vcmp.eq.s32.totalorder %v5549_v11, 53 }
0x1644   :  { %v873_v63 = vmul.f32 %v853_v46, %v851_v62 }
0x1646   :  { %874 = vadd.xlane.f32.xlu1 %v873_v63  ;;  %v863_v1 = vpop.xlane.xlu0 %862 }
0x1647   :  { %v864_v2 = vsel %vm856_vm14, %v863_v1, %v839_v48 }
0x1648   :  { %v890_v3 = vmul.f32 %v882_v0, %v864_v2 }
0x164a   :  { %891 = vadd.xlane.f32.xlu0 %v890_v3  ;;  %v871_v4 = vpop.xlane.xlu0 %870 }
0x164b   :  { %v872_v5 = vsel %vm856_vm14, %v871_v4, %v847_v51 }
0x164c   :  { %v898_v6 = vmul.f32 %v882_v0, %v872_v5 }
0x164e   :  { %899 = vadd.xlane.f32.xlu0 %v898_v6  ;;  %v879_v7 = vpop.xlane.xlu0 %878 }
0x164f   :  { %v880_v8 = vsel %vm856_vm14, %v879_v7, %v110_v52 }
0x1650   :  { %v906_v9 = vmul.f32 %v882_v0, %v880_v8 }
0x1652   :  { %907 = vadd.xlane.f32.xlu0 %v906_v9 }
0x16cb   :  { %v859_v10 = vpop.xlane.xlu1 %858 }
0x16cc   :  { %v860_v13 = vsel %vm856_vm14, %v859_v10, %v835_v56 }
0x16cd   :  { %v886_v14 = vmul.f32 %v882_v0, %v860_v13 }
0x16cf   :  { %v867_v15 = vpop.xlane.xlu1 %866  ;;  %887 = vadd.xlane.f32.xlu1 %v886_v14 }
0x16d0   :  { %v868_v16 = vsel %vm856_vm14, %v867_v15, %v843_v59 }
0x16d1   :  { %v894_v17 = vmul.f32 %v882_v0, %v868_v16 }
0x16d3   :  { %895 = vadd.xlane.f32.xlu1 %v894_v17  ;;  %v875_v18 = vpop.xlane.xlu1 %874  ;;  %v998_v17 = vld [vmem:[#allocation0 + $0x2d] ss:$0 sm:$0xff] }
0x16d4   :  { %v876_v19 = vsel %vm856_vm14, %v875_v18, %v851_v62  ;;  %vm1319_vm14 = vcmp.eq.s32.totalorder %v5549_v11, 55 }
0x16d5   :  { %v902_v20 = vmul.f32 %v882_v0, %v876_v19 }
0x16d7   :  { %903 = vadd.xlane.f32.xlu1 %v902_v20  ;;  %v892_v22 = vpop.xlane.xlu0 %891 }
0x16d8   :  { %v893_v23 = vsel %vm885_vm15, %v892_v22, %v864_v2 }
0x16d9   :  { %v919_v24 = vmul.f32 %v911_v21, %v893_v23 }
0x16db   :  { %920 = vadd.xlane.f32.xlu0 %v919_v24  ;;  %v900_v25 = vpop.xlane.xlu0 %899 }
0x16dc   :  { %v901_v26 = vsel %vm885_vm15, %v900_v25, %v872_v5 }
0x16dd   :  { %v927_v27 = vmul.f32 %v911_v21, %v901_v26 }
0x16df   :  { %928 = vadd.xlane.f32.xlu0 %v927_v27  ;;  %v908_v28 = vpop.xlane.xlu0 %907 }
0x16e0   :  { %v909_v29 = vsel %vm885_vm15, %v908_v28, %v880_v8 }
0x16e1   :  { %v935_v30 = vmul.f32 %v911_v21, %v909_v29 }
0x16e3   :  { %936 = vadd.xlane.f32.xlu0 %v935_v30 }
0x175c   :  { %v888_v31 = vpop.xlane.xlu1 %887 }
0x175d   :  { %v889_v32 = vsel %vm885_vm15, %v888_v31, %v860_v13 }
0x175e   :  { %v915_v33 = vmul.f32 %v911_v21, %v889_v32 }
0x1760   :  { %916 = vadd.xlane.f32.xlu1 %v915_v33  ;;  %v896_v34 = vpop.xlane.xlu1 %895 }
0x1761   :  { %v897_v35 = vsel %vm885_vm15, %v896_v34, %v868_v16 }
0x1762   :  { %v923_v36 = vmul.f32 %v911_v21, %v897_v35 }
0x1764   :  { %924 = vadd.xlane.f32.xlu1 %v923_v36  ;;  %v904_v37 = vpop.xlane.xlu1 %903  ;;  %v1027_v36 = vld [vmem:[#allocation0 + $0x2e] ss:$0 sm:$0xff] }
0x1765   :  { %v905_v38 = vsel %vm885_vm15, %v904_v37, %v876_v19 }
0x1766   :  { %v931_v39 = vmul.f32 %v911_v21, %v905_v38 }
0x1768   :  { %932 = vadd.xlane.f32.xlu1 %v931_v39  ;;  %v921_v41 = vpop.xlane.xlu0 %920 }
0x1769   :  { %v922_v43 = vsel %vm914_vm0, %v921_v41, %v893_v23 }
0x176a   :  { %v948_v44 = vmul.f32 %v940_v40, %v922_v43 }
0x176c   :  { %949 = vadd.xlane.f32.xlu0 %v948_v44  ;;  %v929_v45 = vpop.xlane.xlu0 %928 }
0x176d   :  { %v930_v46 = vsel %vm914_vm0, %v929_v45, %v901_v26 }
0x176e   :  { %v956_v47 = vmul.f32 %v940_v40, %v930_v46 }
0x1770   :  { %957 = vadd.xlane.f32.xlu0 %v956_v47  ;;  %v937_v48 = vpop.xlane.xlu0 %936 }
0x1771   :  { %v938_v49 = vsel %vm914_vm0, %v937_v48, %v909_v29 }
0x1772   :  { %v964_v50 = vmul.f32 %v940_v40, %v938_v49 }
0x1774   :  { %965 = vadd.xlane.f32.xlu0 %v964_v50 }
0x17ed   :  { %v917_v51 = vpop.xlane.xlu1 %916 }
0x17ee   :  { %v918_v52 = vsel %vm914_vm0, %v917_v51, %v889_v32 }
0x17ef   :  { %v944_v53 = vmul.f32 %v940_v40, %v918_v52 }
0x17f1   :  { %945 = vadd.xlane.f32.xlu1 %v944_v53  ;;  %v925_v54 = vpop.xlane.xlu1 %924 }
0x17f2   :  { %v926_v55 = vsel %vm914_vm0, %v925_v54, %v897_v35 }
0x17f3   :  { %v952_v56 = vmul.f32 %v940_v40, %v926_v55 }
0x17f5   :  { %953 = vadd.xlane.f32.xlu1 %v952_v56  ;;  %v933_v57 = vpop.xlane.xlu1 %932  ;;  %v1056_v56 = vld [vmem:[#allocation0 + $0x2f] ss:$0 sm:$0xff] }
0x17f6   :  { %v934_v58 = vsel %vm914_vm0, %v933_v57, %v905_v38  ;;  %vm1352_vm0 = vcmp.eq.s32.totalorder %v5549_v11, 56 }
0x17f7   :  { %v960_v59 = vmul.f32 %v940_v40, %v934_v58 }
0x17f9   :  { %961 = vadd.xlane.f32.xlu1 %v960_v59  ;;  %v950_v61 = vpop.xlane.xlu0 %949 }
0x17fa   :  { %v951_v62 = vsel %vm943_vm1, %v950_v61, %v922_v43 }
0x17fb   :  { %v977_v63 = vmul.f32 %v969_v60, %v951_v62 }
0x17fd   :  { %978 = vadd.xlane.f32.xlu0 %v977_v63  ;;  %v958_v0 = vpop.xlane.xlu0 %957 }
0x17fe   :  { %v959_v1 = vsel %vm943_vm1, %v958_v0, %v930_v46 }
0x17ff   :  { %v985_v2 = vmul.f32 %v969_v60, %v959_v1 }
0x1801   :  { %986 = vadd.xlane.f32.xlu0 %v985_v2  ;;  %v966_v3 = vpop.xlane.xlu0 %965 }
0x1802   :  { %v967_v4 = vsel %vm943_vm1, %v966_v3, %v938_v49 }
0x1803   :  { %v993_v5 = vmul.f32 %v969_v60, %v967_v4 }
0x1805   :  { %994 = vadd.xlane.f32.xlu0 %v993_v5 }
0x187e   :  { %v946_v6 = vpop.xlane.xlu1 %945 }
0x187f   :  { %v947_v7 = vsel %vm943_vm1, %v946_v6, %v918_v52 }
0x1880   :  { %v973_v8 = vmul.f32 %v969_v60, %v947_v7 }
0x1882   :  { %974 = vadd.xlane.f32.xlu1 %v973_v8  ;;  %v954_v9 = vpop.xlane.xlu1 %953 }
0x1883   :  { %v955_v10 = vsel %vm943_vm1, %v954_v9, %v926_v55 }
0x1884   :  { %v981_v13 = vmul.f32 %v969_v60, %v955_v10 }
0x1886   :  { %982 = vadd.xlane.f32.xlu1 %v981_v13  ;;  %v962_v14 = vpop.xlane.xlu1 %961  ;;  %v1085_v13 = vld [vmem:[#allocation0 + $0x30] ss:$0 sm:$0xff] }
0x1887   :  { %v963_v15 = vsel %vm943_vm1, %v962_v14, %v934_v58  ;;  %vm1389_vm1 = vcmp.eq.s32.totalorder %v5549_v11, 57 }
0x1888   :  { %v989_v16 = vmul.f32 %v969_v60, %v963_v15 }
0x188a   :  { %990 = vadd.xlane.f32.xlu1 %v989_v16  ;;  %v979_v18 = vpop.xlane.xlu0 %978 }
0x188b   :  { %v980_v19 = vsel %vm972_vm2, %v979_v18, %v951_v62 }
0x188c   :  { %v1006_v20 = vmul.f32 %v998_v17, %v980_v19 }
0x188e   :  { %1007 = vadd.xlane.f32.xlu0 %v1006_v20  ;;  %v987_v21 = vpop.xlane.xlu0 %986 }
0x188f   :  { %v988_v22 = vsel %vm972_vm2, %v987_v21, %v959_v1 }
0x1890   :  { %v1014_v23 = vmul.f32 %v998_v17, %v988_v22 }
0x1892   :  { %1015 = vadd.xlane.f32.xlu0 %v1014_v23  ;;  %v995_v24 = vpop.xlane.xlu0 %994 }
0x1893   :  { %v996_v25 = vsel %vm972_vm2, %v995_v24, %v967_v4 }
0x1894   :  { %v1022_v26 = vmul.f32 %v998_v17, %v996_v25 }
0x1896   :  { %1023 = vadd.xlane.f32.xlu0 %v1022_v26 }
0x190f   :  { %v975_v27 = vpop.xlane.xlu1 %974 }
0x1910   :  { %v976_v28 = vsel %vm972_vm2, %v975_v27, %v947_v7  ;;  %v115_v27 = vadd.s32 48, %v5551_v12 }
0x1911   :  { %v1002_v29 = vmul.f32 %v998_v17, %v976_v28 }
0x1912   :  { %vm116_vm6 = vcmp.eq.s32.totalorder %v5549_v11, %v115_v27 }
0x1913   :  { %1003 = vadd.xlane.f32.xlu1 %v1002_v29  ;;  %v983_v30 = vpop.xlane.xlu1 %982 }
0x1914   :  { %v984_v31 = vsel %vm972_vm2, %v983_v30, %v955_v10 }
0x1915   :  { %v1010_v32 = vmul.f32 %v998_v17, %v984_v31 }
0x1917   :  { %1011 = vadd.xlane.f32.xlu1 %v1010_v32  ;;  %v991_v33 = vpop.xlane.xlu1 %990 }
0x1918   :  { %v992_v34 = vsel %vm972_vm2, %v991_v33, %v963_v15  ;;  %v117_v33 = vsel %vm116_vm6, 1.0, %v5521_v42  ;;  %vm1426_vm2 = vcmp.eq.s32.totalorder %v5549_v11, 58  ;;  %vm1574_vm6 = vcmp.eq.s32.totalorder %v5549_v11, 62 }
0x1919   :  { %v1018_v35 = vmul.f32 %v998_v17, %v992_v34 }
0x191b   :  { %1019 = vadd.xlane.f32.xlu1 %v1018_v35  ;;  %v1008_v37 = vpop.xlane.xlu0 %1007  ;;  %v1113_v35 = vmul.f32 %v1085_v13, %v117_v33 }
0x191c   :  { %v1009_v38 = vsel %vm1001_vm3, %v1008_v37, %v980_v19  ;;  %v1118_v37 = vld [vmem:[#allocation0 + $0x31] ss:$0 sm:$0xff] }
0x191d   :  { %v1035_v39 = vmul.f32 %v1027_v36, %v1009_v38 }
0x191f   :  { %1036 = vadd.xlane.f32.xlu0 %v1035_v39  ;;  %v1016_v40 = vpop.xlane.xlu0 %1015 }
0x1920   :  { %v1017_v41 = vsel %vm1001_vm3, %v1016_v40, %v988_v22 }
0x1921   :  { %v1043_v43 = vmul.f32 %v1027_v36, %v1017_v41 }
0x1923   :  { %1044 = vadd.xlane.f32.xlu0 %v1043_v43  ;;  %v1024_v44 = vpop.xlane.xlu0 %1023 }
0x1924   :  { %v1025_v45 = vsel %vm1001_vm3, %v1024_v44, %v996_v25 }
0x1925   :  { %v1051_v46 = vmul.f32 %v1027_v36, %v1025_v45 }
0x1927   :  { %1052 = vadd.xlane.f32.xlu0 %v1051_v46 }
0x19a0   :  { %v1004_v47 = vpop.xlane.xlu1 %1003 }
0x19a1   :  { %v1005_v48 = vsel %vm1001_vm3, %v1004_v47, %v976_v28 }
0x19a2   :  { %v1031_v49 = vmul.f32 %v1027_v36, %v1005_v48 }
0x19a4   :  { %1032 = vadd.xlane.f32.xlu1 %v1031_v49  ;;  %v1012_v50 = vpop.xlane.xlu1 %1011 }
0x19a5   :  { %v1013_v51 = vsel %vm1001_vm3, %v1012_v50, %v984_v31 }
0x19a6   :  { %v1039_v52 = vmul.f32 %v1027_v36, %v1013_v51 }
0x19a8   :  { %1040 = vadd.xlane.f32.xlu1 %v1039_v52  ;;  %v1020_v53 = vpop.xlane.xlu1 %1019 }
0x19a9   :  { %v1021_v54 = vsel %vm1001_vm3, %v1020_v53, %v992_v34  ;;  %vm1463_vm3 = vcmp.eq.s32.totalorder %v5549_v11, 59 }
0x19aa   :  { %v1047_v55 = vmul.f32 %v1027_v36, %v1021_v54 }
0x19ac   :  { %1048 = vadd.xlane.f32.xlu1 %v1047_v55  ;;  %v1037_v57 = vpop.xlane.xlu0 %1036 }
0x19ad   :  { %v1038_v58 = vsel %vm1030_vm4, %v1037_v57, %v1009_v38 }
0x19ae   :  { %v1064_v59 = vmul.f32 %v1056_v56, %v1038_v58 }
0x19b0   :  { %1065 = vadd.xlane.f32.xlu0 %v1064_v59  ;;  %v1045_v60 = vpop.xlane.xlu0 %1044 }
0x19b1   :  { %v1046_v61 = vsel %vm1030_vm4, %v1045_v60, %v1017_v41 }
0x19b2   :  { %v1072_v62 = vmul.f32 %v1056_v56, %v1046_v61 }
0x19b4   :  { %1073 = vadd.xlane.f32.xlu0 %v1072_v62  ;;  %v1053_v63 = vpop.xlane.xlu0 %1052 }
0x19b5   :  { %v1054_v0 = vsel %vm1030_vm4, %v1053_v63, %v1025_v45 }
0x19b6   :  { %v1080_v1 = vmul.f32 %v1056_v56, %v1054_v0 }
0x19b8   :  { %1081 = vadd.xlane.f32.xlu0 %v1080_v1 }
0x1a31   :  { %v1033_v2 = vpop.xlane.xlu1 %1032 }
0x1a32   :  { %v1034_v3 = vsel %vm1030_vm4, %v1033_v2, %v1005_v48 }
0x1a33   :  { %v1060_v4 = vmul.f32 %v1056_v56, %v1034_v3 }
0x1a35   :  { %1061 = vadd.xlane.f32.xlu1 %v1060_v4  ;;  %v1041_v5 = vpop.xlane.xlu1 %1040 }
0x1a36   :  { %v1042_v6 = vsel %vm1030_vm4, %v1041_v5, %v1013_v51 }
0x1a37   :  { %v1068_v7 = vmul.f32 %v1056_v56, %v1042_v6 }
0x1a39   :  { %1069 = vadd.xlane.f32.xlu1 %v1068_v7  ;;  %v1049_v8 = vpop.xlane.xlu1 %1048 }
0x1a3a   :  { %v1050_v9 = vsel %vm1030_vm4, %v1049_v8, %v1021_v54  ;;  %vm1500_vm4 = vcmp.eq.s32.totalorder %v5549_v11, 60 }
0x1a3b   :  { %v1076_v10 = vmul.f32 %v1056_v56, %v1050_v9 }
0x1a3d   :  { %1077 = vadd.xlane.f32.xlu1 %v1076_v10  ;;  %v1066_v14 = vpop.xlane.xlu0 %1065 }
0x1a3e   :  { %v1067_v15 = vsel %vm1059_vm5, %v1066_v14, %v1038_v58  ;;  %v1151_v58 = vld [vmem:[#allocation0 + $0x32] ss:$0 sm:$0xff] }
0x1a3f   :  { %v1093_v16 = vmul.f32 %v1085_v13, %v1067_v15 }
0x1a41   :  { %1094 = vadd.xlane.f32.xlu0 %v1093_v16  ;;  %v1074_v17 = vpop.xlane.xlu0 %1073 }
0x1a42   :  { %v1075_v18 = vsel %vm1059_vm5, %v1074_v17, %v1046_v61 }
0x1a43   :  { %v1101_v19 = vmul.f32 %v1085_v13, %v1075_v18 }
0x1a45   :  { %1102 = vadd.xlane.f32.xlu0 %v1101_v19  ;;  %v1082_v20 = vpop.xlane.xlu0 %1081 }
0x1a46   :  { %v1083_v21 = vsel %vm1059_vm5, %v1082_v20, %v1054_v0 }
0x1a47   :  { %v1109_v22 = vmul.f32 %v1085_v13, %v1083_v21 }
0x1a49   :  { %1110 = vadd.xlane.f32.xlu0 %v1109_v22 }
0x1ac2   :  { %v1062_v23 = vpop.xlane.xlu1 %1061 }
0x1ac3   :  { %v1063_v28 = vsel %vm1059_vm5, %v1062_v23, %v1034_v3 }
0x1ac4   :  { %v1089_v30 = vmul.f32 %v1085_v13, %v1063_v28 }
0x1ac6   :  { %v1070_v24 = vpop.xlane.xlu1 %1069 }
0x1ac7   :  { %v1071_v25 = vsel %vm1059_vm5, %v1070_v24, %v1042_v6 }
0x1ac8   :  { %v1097_v26 = vmul.f32 %v1085_v13, %v1071_v25 }
0x1aca   :  { %1098 = vadd.xlane.f32.xlu1 %v1097_v26  ;;  %v1078_v29 = vpop.xlane.xlu1 %1077 }
0x1acb   :  { %v1079_v31 = vsel %vm1059_vm5, %v1078_v29, %v1050_v9  ;;  %vm1537_vm5 = vcmp.eq.s32.totalorder %v5549_v11, 61 }
0x1acc   :  { %v1105_v34 = vmul.f32 %v1085_v13, %v1079_v31 }
0x1ace   :  { %1090 = vadd.xlane.f32.xlu1 %v1089_v30  ;;  %v1095_v32 = vpop.xlane.xlu0 %1094 }
0x1acf   :  { %v1096_v38 = vsel %vm1088_vm7, %v1095_v32, %v1067_v15 }
0x1ad0   :  { %v1126_v39 = vmul.f32 %v1118_v37, %v1096_v38 }
0x1ad2   :  { %1106 = vadd.xlane.f32.xlu1 %v1105_v34  ;;  %v1103_v36 = vpop.xlane.xlu0 %1102 }
0x1ad3   :  { %v1104_v40 = vsel %vm1088_vm7, %v1103_v36, %v1075_v18  ;;  %v1184_v18 = vld [vmem:[#allocation0 + $0x33] ss:$0 sm:$0xff] }
0x1ad4   :  { %v1134_v43 = vmul.f32 %v1118_v37, %v1104_v40 }
0x1ad6   :  { %1114 = vadd.xlane.f32.xlu1 %v1113_v35  ;;  %v1111_v41 = vpop.xlane.xlu0 %1110 }
0x1ad7   :  { %v1112_v44 = vsel %vm1088_vm7, %v1111_v41, %v1083_v21 }
0x1ad8   :  { %v1142_v45 = vmul.f32 %v1118_v37, %v1112_v44 }
0x1ada   :  { %1127 = vadd.xlane.f32.xlu1 %v1126_v39 }
0x1ade   :  { %1135 = vadd.xlane.f32.xlu1 %v1134_v43 }
0x1ae2   :  { %1143 = vadd.xlane.f32.xlu1 %v1142_v45 }
0x1b57   :  { %v1099_v46 = vpop.xlane.xlu1 %1098 }
0x1b58   :  { %v1100_v47 = vsel %vm1088_vm7, %v1099_v46, %v1071_v25 }
0x1b59   :  { %v1130_v48 = vmul.f32 %v1118_v37, %v1100_v47 }
0x1b5b   :  { %v1091_v49 = vpop.xlane.xlu1 %1090  ;;  %1131 = vadd.xlane.f32.xlu0 %v1130_v48 }
0x1b5c   :  { %v1092_v50 = vsel %vm1088_vm7, %v1091_v49, %v1063_v28 }
0x1b5d   :  { %v1122_v51 = vmul.f32 %v1118_v37, %v1092_v50 }
0x1b5f   :  { %v1107_v52 = vpop.xlane.xlu1 %1106  ;;  %1123 = vadd.xlane.f32.xlu0 %v1122_v51 }
0x1b60   :  { %v1108_v53 = vsel %vm1088_vm7, %v1107_v52, %v1079_v31 }
0x1b61   :  { %v1138_v54 = vmul.f32 %v1118_v37, %v1108_v53 }
0x1b63   :  { %v1115_v55 = vpop.xlane.xlu1 %1114  ;;  %1139 = vadd.xlane.f32.xlu0 %v1138_v54 }
0x1b64   :  { %v1116_v56 = vsel %vm1088_vm7, %v1115_v55, %v117_v33  ;;  %vm1611_vm7 = vcmp.eq.s32.totalorder %v5549_v11, 63 }
0x1b65   :  { %v1146_v57 = vmul.f32 %v1118_v37, %v1116_v56 }
0x1b67   :  { %1147 = vadd.xlane.f32.xlu0 %v1146_v57  ;;  %v1128_v59 = vpop.xlane.xlu1 %1127 }
0x1b68   :  { %v1129_v60 = vsel %vm1121_vm8, %v1128_v59, %v1096_v38 }
0x1b69   :  { %v1159_v61 = vmul.f32 %v1151_v58, %v1129_v60 }
0x1b6b   :  { %1160 = vadd.xlane.f32.xlu0 %v1159_v61  ;;  %v1136_v62 = vpop.xlane.xlu1 %1135 }
0x1b6c   :  { %v1137_v63 = vsel %vm1121_vm8, %v1136_v62, %v1104_v40  ;;  %v1217_v40 = vld [vmem:[#allocation0 + $0x34] ss:$0 sm:$0xff] }
0x1b6d   :  { %v1167_v0 = vmul.f32 %v1151_v58, %v1137_v63 }
0x1b6f   :  { %1168 = vadd.xlane.f32.xlu0 %v1167_v0  ;;  %v1144_v1 = vpop.xlane.xlu1 %1143 }
0x1b70   :  { %v1145_v2 = vsel %vm1121_vm8, %v1144_v1, %v1112_v44 }
0x1b71   :  { %v1175_v3 = vmul.f32 %v1151_v58, %v1145_v2 }
0x1b73   :  { %1176 = vadd.xlane.f32.xlu0 %v1175_v3 }
0x1be8   :  { %v1132_v4 = vpop.xlane.xlu0 %1131 }
0x1be9   :  { %v1133_v5 = vsel %vm1121_vm8, %v1132_v4, %v1100_v47 }
0x1bea   :  { %v1163_v6 = vmul.f32 %v1151_v58, %v1133_v5 }
0x1bec   :  { %1164 = vadd.xlane.f32.xlu1 %v1163_v6  ;;  %v1124_v7 = vpop.xlane.xlu0 %1123 }
0x1bed   :  { %v1125_v8 = vsel %vm1121_vm8, %v1124_v7, %v1092_v50 }
0x1bee   :  { %v1155_v9 = vmul.f32 %v1151_v58, %v1125_v8 }
0x1bf0   :  { %1156 = vadd.xlane.f32.xlu1 %v1155_v9  ;;  %v1140_v10 = vpop.xlane.xlu0 %1139 }
0x1bf1   :  { %v1141_v13 = vsel %vm1121_vm8, %v1140_v10, %v1108_v53 }
0x1bf2   :  { %v1171_v14 = vmul.f32 %v1151_v58, %v1141_v13 }
0x1bf4   :  { %1172 = vadd.xlane.f32.xlu1 %v1171_v14  ;;  %v1148_v15 = vpop.xlane.xlu0 %1147 }
0x1bf5   :  { %v1149_v16 = vsel %vm1121_vm8, %v1148_v15, %v1116_v56 }
0x1bf6   :  { %v1179_v17 = vmul.f32 %v1151_v58, %v1149_v16 }
0x1bf8   :  { %1180 = vadd.xlane.f32.xlu1 %v1179_v17  ;;  %v1161_v19 = vpop.xlane.xlu0 %1160 }
0x1bf9   :  { %v1162_v20 = vsel %vm1154_vm9, %v1161_v19, %v1129_v60 }
0x1bfa   :  { %v1192_v21 = vmul.f32 %v1184_v18, %v1162_v20 }
0x1bfc   :  { %1193 = vadd.xlane.f32.xlu1 %v1192_v21  ;;  %v1169_v22 = vpop.xlane.xlu0 %1168 }
0x1bfd   :  { %v1170_v23 = vsel %vm1154_vm9, %v1169_v22, %v1137_v63  ;;  %v1250_v63 = vld [vmem:[#allocation0 + $0x35] ss:$0 sm:$0xff] }
0x1bfe   :  { %v1200_v24 = vmul.f32 %v1184_v18, %v1170_v23 }
0x1c00   :  { %1201 = vadd.xlane.f32.xlu1 %v1200_v24  ;;  %v1177_v25 = vpop.xlane.xlu0 %1176 }
0x1c01   :  { %v1178_v26 = vsel %vm1154_vm9, %v1177_v25, %v1145_v2 }
0x1c02   :  { %v1208_v27 = vmul.f32 %v1184_v18, %v1178_v26 }
0x1c04   :  { %1209 = vadd.xlane.f32.xlu1 %v1208_v27 }
0x1c79   :  { %v1165_v28 = vpop.xlane.xlu1 %1164 }
0x1c7a   :  { %v1166_v29 = vsel %vm1154_vm9, %v1165_v28, %v1133_v5 }
0x1c7b   :  { %v1196_v30 = vmul.f32 %v1184_v18, %v1166_v29 }
0x1c7d   :  { %1197 = vadd.xlane.f32.xlu0 %v1196_v30  ;;  %v1157_v31 = vpop.xlane.xlu1 %1156 }
0x1c7e   :  { %v1158_v32 = vsel %vm1154_vm9, %v1157_v31, %v1125_v8 }
0x1c7f   :  { %v1188_v33 = vmul.f32 %v1184_v18, %v1158_v32 }
0x1c81   :  { %1189 = vadd.xlane.f32.xlu0 %v1188_v33  ;;  %v1173_v34 = vpop.xlane.xlu1 %1172 }
0x1c82   :  { %v1174_v35 = vsel %vm1154_vm9, %v1173_v34, %v1141_v13 }
0x1c83   :  { %v1204_v36 = vmul.f32 %v1184_v18, %v1174_v35 }
0x1c85   :  { %1205 = vadd.xlane.f32.xlu0 %v1204_v36  ;;  %v1181_v37 = vpop.xlane.xlu1 %1180 }
0x1c86   :  { %v1182_v38 = vsel %vm1154_vm9, %v1181_v37, %v1149_v16  ;;  %vm1648_vm9 = vcmp.eq.s32.totalorder %v5549_v11, 64 }
0x1c87   :  { %v1212_v39 = vmul.f32 %v1184_v18, %v1182_v38 }
0x1c89   :  { %1213 = vadd.xlane.f32.xlu0 %v1212_v39  ;;  %v1194_v41 = vpop.xlane.xlu1 %1193 }
0x1c8a   :  { %v1195_v43 = vsel %vm1187_vm10, %v1194_v41, %v1162_v20 }
0x1c8b   :  { %v1225_v44 = vmul.f32 %v1217_v40, %v1195_v43 }
0x1c8d   :  { %1226 = vadd.xlane.f32.xlu0 %v1225_v44  ;;  %v1202_v45 = vpop.xlane.xlu1 %1201 }
0x1c8e   :  { %v1203_v46 = vsel %vm1187_vm10, %v1202_v45, %v1170_v23  ;;  %v1283_v23 = vld [vmem:[#allocation0 + $0x36] ss:$0 sm:$0xff] }
0x1c8f   :  { %v1233_v47 = vmul.f32 %v1217_v40, %v1203_v46 }
0x1c91   :  { %1234 = vadd.xlane.f32.xlu0 %v1233_v47  ;;  %v1210_v48 = vpop.xlane.xlu1 %1209 }
0x1c92   :  { %v1211_v49 = vsel %vm1187_vm10, %v1210_v48, %v1178_v26 }
0x1c93   :  { %v1241_v50 = vmul.f32 %v1217_v40, %v1211_v49 }
0x1c95   :  { %1242 = vadd.xlane.f32.xlu0 %v1241_v50 }
0x1d0a   :  { %v1198_v51 = vpop.xlane.xlu0 %1197 }
0x1d0b   :  { %v1199_v52 = vsel %vm1187_vm10, %v1198_v51, %v1166_v29 }
0x1d0c   :  { %v1229_v53 = vmul.f32 %v1217_v40, %v1199_v52 }
0x1d0e   :  { %1230 = vadd.xlane.f32.xlu1 %v1229_v53  ;;  %v1190_v54 = vpop.xlane.xlu0 %1189 }
0x1d0f   :  { %v1191_v55 = vsel %vm1187_vm10, %v1190_v54, %v1158_v32 }
0x1d10   :  { %v1221_v56 = vmul.f32 %v1217_v40, %v1191_v55 }
0x1d12   :  { %1222 = vadd.xlane.f32.xlu1 %v1221_v56  ;;  %v1206_v57 = vpop.xlane.xlu0 %1205 }
0x1d13   :  { %v1207_v58 = vsel %vm1187_vm10, %v1206_v57, %v1174_v35 }
0x1d14   :  { %v1237_v59 = vmul.f32 %v1217_v40, %v1207_v58 }
0x1d16   :  { %1238 = vadd.xlane.f32.xlu1 %v1237_v59  ;;  %v1214_v60 = vpop.xlane.xlu0 %1213 }
0x1d17   :  { %v1215_v61 = vsel %vm1187_vm10, %v1214_v60, %v1182_v38  ;;  %vm1689_vm10 = vcmp.eq.s32.totalorder %v5549_v11, 65 }
0x1d18   :  { %v1245_v62 = vmul.f32 %v1217_v40, %v1215_v61 }
0x1d1a   :  { %1246 = vadd.xlane.f32.xlu1 %v1245_v62  ;;  %v1227_v0 = vpop.xlane.xlu0 %1226 }
0x1d1b   :  { %v1228_v1 = vsel %vm1220_vm11, %v1227_v0, %v1195_v43 }
0x1d1c   :  { %v1258_v2 = vmul.f32 %v1250_v63, %v1228_v1 }
0x1d1e   :  { %1259 = vadd.xlane.f32.xlu1 %v1258_v2  ;;  %v1235_v3 = vpop.xlane.xlu0 %1234 }
0x1d1f   :  { %v1236_v4 = vsel %vm1220_vm11, %v1235_v3, %v1203_v46  ;;  %v1316_v46 = vld [vmem:[#allocation0 + $0x37] ss:$0 sm:$0xff] }
0x1d20   :  { %v1266_v5 = vmul.f32 %v1250_v63, %v1236_v4 }
0x1d22   :  { %1267 = vadd.xlane.f32.xlu1 %v1266_v5  ;;  %v1243_v6 = vpop.xlane.xlu0 %1242 }
0x1d23   :  { %v1244_v7 = vsel %vm1220_vm11, %v1243_v6, %v1211_v49 }
0x1d24   :  { %v1274_v8 = vmul.f32 %v1250_v63, %v1244_v7 }
0x1d26   :  { %1275 = vadd.xlane.f32.xlu1 %v1274_v8  ;;  %v122_v8 = vadd.s32 56, %v5551_v12 }
0x1d28   :  { %vm123_vm15 = vcmp.eq.s32.totalorder %v5549_v11, %v122_v8 }
0x1d9b   :  { %v1231_v9 = vpop.xlane.xlu1 %1230 }
0x1d9c   :  { %v1232_v10 = vsel %vm1220_vm11, %v1231_v9, %v1199_v52 }
0x1d9d   :  { %v1262_v13 = vmul.f32 %v1250_v63, %v1232_v10 }
0x1d9f   :  { %1263 = vadd.xlane.f32.xlu0 %v1262_v13  ;;  %v1223_v14 = vpop.xlane.xlu1 %1222 }
0x1da0   :  { %v1224_v15 = vsel %vm1220_vm11, %v1223_v14, %v1191_v55 }
0x1da1   :  { %v1254_v16 = vmul.f32 %v1250_v63, %v1224_v15 }
0x1da3   :  { %1255 = vadd.xlane.f32.xlu0 %v1254_v16  ;;  %v1239_v17 = vpop.xlane.xlu1 %1238  ;;  %v124_v16 = vsel %vm123_vm15, 1.0, %v5521_v42  ;;  %vm1894_vm15 = vcmp.eq.s32.totalorder %v5549_v11, 70 }
0x1da4   :  { %v1240_v18 = vsel %vm1220_vm11, %v1239_v17, %v1207_v58 }
0x1da5   :  { %v1270_v19 = vmul.f32 %v1250_v63, %v1240_v18 }
0x1da7   :  { %1271 = vadd.xlane.f32.xlu0 %v1270_v19  ;;  %v1247_v20 = vpop.xlane.xlu1 %1246 }
0x1da8   :  { %v1248_v21 = vsel %vm1220_vm11, %v1247_v20, %v1215_v61  ;;  %vm1730_vm11 = vcmp.eq.s32.totalorder %v5549_v11, 66 }
0x1da9   :  { %v1278_v22 = vmul.f32 %v1250_v63, %v1248_v21 }
0x1dab   :  { %1279 = vadd.xlane.f32.xlu0 %v1278_v22  ;;  %v1260_v24 = vpop.xlane.xlu1 %1259 }
0x1dac   :  { %v1261_v25 = vsel %vm1253_vm12, %v1260_v24, %v1228_v1 }
0x1dad   :  { %v1291_v26 = vmul.f32 %v1283_v23, %v1261_v25 }
0x1daf   :  { %1292 = vadd.xlane.f32.xlu0 %v1291_v26  ;;  %v1268_v27 = vpop.xlane.xlu1 %1267 }
0x1db0   :  { %v1269_v28 = vsel %vm1253_vm12, %v1268_v27, %v1236_v4  ;;  %v1349_v4 = vld [vmem:[#allocation0 + $0x38] ss:$0 sm:$0xff] }
0x1db1   :  { %v1299_v29 = vmul.f32 %v1283_v23, %v1269_v28 }
0x1db3   :  { %1300 = vadd.xlane.f32.xlu0 %v1299_v29  ;;  %v1276_v30 = vpop.xlane.xlu1 %1275 }
0x1db4   :  { %v1277_v31 = vsel %vm1253_vm12, %v1276_v30, %v1244_v7 }
0x1db5   :  { %v1307_v32 = vmul.f32 %v1283_v23, %v1277_v31 }
0x1db7   :  { %1308 = vadd.xlane.f32.xlu0 %v1307_v32 }
0x1e2c   :  { %v1264_v33 = vpop.xlane.xlu0 %1263 }
0x1e2d   :  { %v1265_v34 = vsel %vm1253_vm12, %v1264_v33, %v1232_v10 }
0x1e2e   :  { %v1295_v35 = vmul.f32 %v1283_v23, %v1265_v34 }
0x1e30   :  { %1296 = vadd.xlane.f32.xlu1 %v1295_v35  ;;  %v1256_v36 = vpop.xlane.xlu0 %1255 }
0x1e31   :  { %v1257_v37 = vsel %vm1253_vm12, %v1256_v36, %v1224_v15 }
0x1e32   :  { %v1287_v38 = vmul.f32 %v1283_v23, %v1257_v37 }
0x1e34   :  { %1288 = vadd.xlane.f32.xlu1 %v1287_v38  ;;  %v1272_v39 = vpop.xlane.xlu0 %1271 }
0x1e35   :  { %v1273_v40 = vsel %vm1253_vm12, %v1272_v39, %v1240_v18  ;;  %v1381_v18 = vmul.f32 %v1349_v4, %v124_v16 }
0x1e36   :  { %v1303_v41 = vmul.f32 %v1283_v23, %v1273_v40 }
0x1e38   :  { %1304 = vadd.xlane.f32.xlu1 %v1303_v41  ;;  %v1280_v43 = vpop.xlane.xlu0 %1279 }
0x1e39   :  { %v1281_v44 = vsel %vm1253_vm12, %v1280_v43, %v1248_v21  ;;  %vm1771_vm12 = vcmp.eq.s32.totalorder %v5549_v11, 67 }
0x1e3a   :  { %v1311_v45 = vmul.f32 %v1283_v23, %v1281_v44 }
0x1e3c   :  { %1312 = vadd.xlane.f32.xlu1 %v1311_v45  ;;  %v1293_v47 = vpop.xlane.xlu0 %1292 }
0x1e3d   :  { %v1294_v48 = vsel %vm1286_vm13, %v1293_v47, %v1261_v25 }
0x1e3e   :  { %v1324_v49 = vmul.f32 %v1316_v46, %v1294_v48 }
0x1e40   :  { %1325 = vadd.xlane.f32.xlu1 %v1324_v49  ;;  %v1301_v50 = vpop.xlane.xlu0 %1300 }
0x1e41   :  { %v1302_v51 = vsel %vm1286_vm13, %v1301_v50, %v1269_v28 }
0x1e42   :  { %v1332_v52 = vmul.f32 %v1316_v46, %v1302_v51 }
0x1e44   :  { %1333 = vadd.xlane.f32.xlu1 %v1332_v52  ;;  %v1309_v53 = vpop.xlane.xlu0 %1308 }
0x1e45   :  { %v1310_v54 = vsel %vm1286_vm13, %v1309_v53, %v1277_v31  ;;  %v1386_v31 = vld [vmem:[#allocation0 + $0x39] ss:$0 sm:$0xff] }
0x1e46   :  { %v1340_v55 = vmul.f32 %v1316_v46, %v1310_v54 }
0x1e48   :  { %1341 = vadd.xlane.f32.xlu1 %v1340_v55 }
0x1ebd   :  { %v1297_v56 = vpop.xlane.xlu1 %1296 }
0x1ebe   :  { %v1298_v57 = vsel %vm1286_vm13, %v1297_v56, %v1265_v34 }
0x1ebf   :  { %v1328_v58 = vmul.f32 %v1316_v46, %v1298_v57 }
0x1ec1   :  { %1329 = vadd.xlane.f32.xlu0 %v1328_v58  ;;  %v1289_v59 = vpop.xlane.xlu1 %1288 }
0x1ec2   :  { %v1290_v60 = vsel %vm1286_vm13, %v1289_v59, %v1257_v37 }
0x1ec3   :  { %v1320_v61 = vmul.f32 %v1316_v46, %v1290_v60 }
0x1ec5   :  { %1321 = vadd.xlane.f32.xlu0 %v1320_v61  ;;  %v1305_v62 = vpop.xlane.xlu1 %1304 }
0x1ec6   :  { %v1306_v63 = vsel %vm1286_vm13, %v1305_v62, %v1273_v40 }
0x1ec7   :  { %v1336_v0 = vmul.f32 %v1316_v46, %v1306_v63 }
0x1ec9   :  { %1337 = vadd.xlane.f32.xlu0 %v1336_v0  ;;  %v1313_v1 = vpop.xlane.xlu1 %1312 }
0x1eca   :  { %v1314_v2 = vsel %vm1286_vm13, %v1313_v1, %v1281_v44  ;;  %vm1812_vm13 = vcmp.eq.s32.totalorder %v5549_v11, 68 }
0x1ecb   :  { %v1344_v3 = vmul.f32 %v1316_v46, %v1314_v2 }
0x1ecd   :  { %1345 = vadd.xlane.f32.xlu0 %v1344_v3  ;;  %v1326_v5 = vpop.xlane.xlu1 %1325 }
0x1ece   :  { %v1327_v6 = vsel %vm1319_vm14, %v1326_v5, %v1294_v48 }
0x1ecf   :  { %v1357_v7 = vmul.f32 %v1349_v4, %v1327_v6 }
0x1ed1   :  { %1358 = vadd.xlane.f32.xlu0 %v1357_v7  ;;  %v1334_v9 = vpop.xlane.xlu1 %1333 }
0x1ed2   :  { %v1335_v10 = vsel %vm1319_vm14, %v1334_v9, %v1302_v51 }
0x1ed3   :  { %v1365_v13 = vmul.f32 %v1349_v4, %v1335_v10 }
0x1ed5   :  { %1366 = vadd.xlane.f32.xlu0 %v1365_v13  ;;  %v1342_v14 = vpop.xlane.xlu1 %1341 }
0x1ed6   :  { %v1343_v15 = vsel %vm1319_vm14, %v1342_v14, %v1310_v54 }
0x1ed7   :  { %v1373_v17 = vmul.f32 %v1349_v4, %v1343_v15 }
0x1ed9   :  { %1374 = vadd.xlane.f32.xlu0 %v1373_v17 }
0x1edd   :  { %1382 = vadd.xlane.f32.xlu0 %v1381_v18 }
0x1f4e   :  { %v1330_v19 = vpop.xlane.xlu0 %1329 }
0x1f4f   :  { %v1331_v20 = vsel %vm1319_vm14, %v1330_v19, %v1298_v57  ;;  %v1423_v57 = vld [vmem:[#allocation0 + $0x3a] ss:$0 sm:$0xff] }
0x1f50   :  { %v1361_v21 = vmul.f32 %v1349_v4, %v1331_v20 }
0x1f52   :  { %1362 = vadd.xlane.f32.xlu1 %v1361_v21  ;;  %v1322_v22 = vpop.xlane.xlu0 %1321 }
0x1f53   :  { %v1323_v23 = vsel %vm1319_vm14, %v1322_v22, %v1290_v60 }
0x1f54   :  { %v1353_v24 = vmul.f32 %v1349_v4, %v1323_v23 }
0x1f56   :  { %1354 = vadd.xlane.f32.xlu1 %v1353_v24  ;;  %v1338_v25 = vpop.xlane.xlu0 %1337 }
0x1f57   :  { %v1339_v26 = vsel %vm1319_vm14, %v1338_v25, %v1306_v63 }
0x1f58   :  { %v1369_v27 = vmul.f32 %v1349_v4, %v1339_v26 }
0x1f5a   :  { %1370 = vadd.xlane.f32.xlu1 %v1369_v27  ;;  %v1346_v28 = vpop.xlane.xlu0 %1345 }
0x1f5b   :  { %v1347_v29 = vsel %vm1319_vm14, %v1346_v28, %v1314_v2  ;;  %vm1853_vm14 = vcmp.eq.s32.totalorder %v5549_v11, 69 }
0x1f5c   :  { %v1377_v30 = vmul.f32 %v1349_v4, %v1347_v29 }
0x1f5e   :  { %1378 = vadd.xlane.f32.xlu1 %v1377_v30  ;;  %v1359_v32 = vpop.xlane.xlu0 %1358 }
0x1f5f   :  { %v1360_v33 = vsel %vm1352_vm0, %v1359_v32, %v1327_v6 }
0x1f60   :  { %v1394_v34 = vmul.f32 %v1386_v31, %v1360_v33 }
0x1f62   :  { %1395 = vadd.xlane.f32.xlu0 %v1394_v34  ;;  %v1367_v35 = vpop.xlane.xlu0 %1366 }
0x1f63   :  { %v1368_v36 = vsel %vm1352_vm0, %v1367_v35, %v1335_v10 }
0x1f64   :  { %v1402_v37 = vmul.f32 %v1386_v31, %v1368_v36 }
0x1f66   :  { %1403 = vadd.xlane.f32.xlu0 %v1402_v37  ;;  %v1375_v38 = vpop.xlane.xlu0 %1374 }
0x1f67   :  { %v1376_v39 = vsel %vm1352_vm0, %v1375_v38, %v1343_v15 }
0x1f68   :  { %v1410_v40 = vmul.f32 %v1386_v31, %v1376_v39 }
0x1f6a   :  { %1411 = vadd.xlane.f32.xlu0 %v1410_v40  ;;  %v1383_v41 = vpop.xlane.xlu0 %1382 }
0x1f6b   :  { %v1384_v43 = vsel %vm1352_vm0, %v1383_v41, %v124_v16 }
0x1f6c   :  { %v1418_v44 = vmul.f32 %v1386_v31, %v1384_v43 }
0x1f6e   :  { %1419 = vadd.xlane.f32.xlu0 %v1418_v44 }
0x1fdf   :  { %v1363_v45 = vpop.xlane.xlu1 %1362 }
0x1fe0   :  { %v1364_v46 = vsel %vm1352_vm0, %v1363_v45, %v1331_v20  ;;  %v1460_v20 = vld [vmem:[#allocation0 + $0x3b] ss:$0 sm:$0xff] }
0x1fe1   :  { %v1398_v47 = vmul.f32 %v1386_v31, %v1364_v46 }
0x1fe3   :  { %v1355_v48 = vpop.xlane.xlu1 %1354  ;;  %1399 = vadd.xlane.f32.xlu1 %v1398_v47 }
0x1fe4   :  { %v1356_v49 = vsel %vm1352_vm0, %v1355_v48, %v1323_v23 }
0x1fe5   :  { %v1390_v50 = vmul.f32 %v1386_v31, %v1356_v49 }
0x1fe7   :  { %v1371_v51 = vpop.xlane.xlu1 %1370  ;;  %1391 = vadd.xlane.f32.xlu1 %v1390_v50 }
0x1fe8   :  { %v1372_v52 = vsel %vm1352_vm0, %v1371_v51, %v1339_v26 }
0x1fe9   :  { %v1406_v53 = vmul.f32 %v1386_v31, %v1372_v52 }
0x1feb   :  { %1407 = vadd.xlane.f32.xlu1 %v1406_v53  ;;  %v1379_v54 = vpop.xlane.xlu1 %1378 }
0x1fec   :  { %v1380_v55 = vsel %vm1352_vm0, %v1379_v54, %v1347_v29  ;;  %vm1935_vm0 = vcmp.eq.s32.totalorder %v5549_v11, 71 }
0x1fed   :  { %v1414_v56 = vmul.f32 %v1386_v31, %v1380_v55 }
0x1fef   :  { %1415 = vadd.xlane.f32.xlu1 %v1414_v56  ;;  %v1396_v58 = vpop.xlane.xlu0 %1395 }
0x1ff0   :  { %v1397_v59 = vsel %vm1389_vm1, %v1396_v58, %v1360_v33 }
0x1ff1   :  { %v1431_v60 = vmul.f32 %v1423_v57, %v1397_v59 }
0x1ff3   :  { %1432 = vadd.xlane.f32.xlu0 %v1431_v60  ;;  %v1404_v61 = vpop.xlane.xlu0 %1403 }
0x1ff4   :  { %v1405_v62 = vsel %vm1389_vm1, %v1404_v61, %v1368_v36 }
0x1ff5   :  { %v1439_v63 = vmul.f32 %v1423_v57, %v1405_v62 }
0x1ff7   :  { %1440 = vadd.xlane.f32.xlu0 %v1439_v63  ;;  %v1412_v0 = vpop.xlane.xlu0 %1411 }
0x1ff8   :  { %v1413_v1 = vsel %vm1389_vm1, %v1412_v0, %v1376_v39 }
0x1ff9   :  { %v1447_v2 = vmul.f32 %v1423_v57, %v1413_v1 }
0x1ffb   :  { %1448 = vadd.xlane.f32.xlu0 %v1447_v2  ;;  %v1420_v3 = vpop.xlane.xlu0 %1419 }
0x1ffc   :  { %v1421_v4 = vsel %vm1389_vm1, %v1420_v3, %v1384_v43 }
0x1ffd   :  { %v1455_v5 = vmul.f32 %v1423_v57, %v1421_v4 }
0x1fff   :  { %1456 = vadd.xlane.f32.xlu0 %v1455_v5 }
0x2070   :  { %v1400_v6 = vpop.xlane.xlu1 %1399 }
0x2071   :  { %v1401_v7 = vsel %vm1389_vm1, %v1400_v6, %v1364_v46  ;;  %v1497_v46 = vld [vmem:[#allocation0 + $0x3c] ss:$0 sm:$0xff] }
0x2072   :  { %v1435_v8 = vmul.f32 %v1423_v57, %v1401_v7 }
0x2074   :  { %1436 = vadd.xlane.f32.xlu1 %v1435_v8  ;;  %v1392_v9 = vpop.xlane.xlu1 %1391 }
0x2075   :  { %v1393_v10 = vsel %vm1389_vm1, %v1392_v9, %v1356_v49 }
0x2076   :  { %v1427_v13 = vmul.f32 %v1423_v57, %v1393_v10 }
0x2078   :  { %1428 = vadd.xlane.f32.xlu1 %v1427_v13  ;;  %v1408_v14 = vpop.xlane.xlu1 %1407 }
0x2079   :  { %v1409_v15 = vsel %vm1389_vm1, %v1408_v14, %v1372_v52 }
0x207a   :  { %v1443_v16 = vmul.f32 %v1423_v57, %v1409_v15 }
0x207c   :  { %1444 = vadd.xlane.f32.xlu1 %v1443_v16  ;;  %v1416_v17 = vpop.xlane.xlu1 %1415 }
0x207d   :  { %v1417_v18 = vsel %vm1389_vm1, %v1416_v17, %v1380_v55 }
0x207e   :  { %v1451_v19 = vmul.f32 %v1423_v57, %v1417_v18 }
0x2080   :  { %1452 = vadd.xlane.f32.xlu1 %v1451_v19  ;;  %v1433_v21 = vpop.xlane.xlu0 %1432 }
0x2081   :  { %v1434_v22 = vsel %vm1426_vm2, %v1433_v21, %v1397_v59 }
0x2082   :  { %v1468_v23 = vmul.f32 %v1460_v20, %v1434_v22 }
0x2084   :  { %1469 = vadd.xlane.f32.xlu0 %v1468_v23  ;;  %v1441_v24 = vpop.xlane.xlu0 %1440 }
0x2085   :  { %v1442_v25 = vsel %vm1426_vm2, %v1441_v24, %v1405_v62 }
0x2086   :  { %v1476_v26 = vmul.f32 %v1460_v20, %v1442_v25 }
0x2088   :  { %1477 = vadd.xlane.f32.xlu0 %v1476_v26  ;;  %v1449_v27 = vpop.xlane.xlu0 %1448 }
0x2089   :  { %v1450_v28 = vsel %vm1426_vm2, %v1449_v27, %v1413_v1 }
0x208a   :  { %v1484_v29 = vmul.f32 %v1460_v20, %v1450_v28 }
0x208c   :  { %1485 = vadd.xlane.f32.xlu0 %v1484_v29  ;;  %v1457_v30 = vpop.xlane.xlu0 %1456 }
0x208d   :  { %v1458_v31 = vsel %vm1426_vm2, %v1457_v30, %v1421_v4 }
0x208e   :  { %v1492_v32 = vmul.f32 %v1460_v20, %v1458_v31 }
0x2090   :  { %1493 = vadd.xlane.f32.xlu0 %v1492_v32 }
0x2101   :  { %v1437_v33 = vpop.xlane.xlu1 %1436 }
0x2102   :  { %v1438_v34 = vsel %vm1426_vm2, %v1437_v33, %v1401_v7  ;;  %v1534_v7 = vld [vmem:[#allocation0 + $0x3d] ss:$0 sm:$0xff] }
0x2103   :  { %v1472_v35 = vmul.f32 %v1460_v20, %v1438_v34 }
0x2105   :  { %1473 = vadd.xlane.f32.xlu1 %v1472_v35  ;;  %v1429_v36 = vpop.xlane.xlu1 %1428 }
0x2106   :  { %v1430_v37 = vsel %vm1426_vm2, %v1429_v36, %v1393_v10 }
0x2107   :  { %v1464_v38 = vmul.f32 %v1460_v20, %v1430_v37 }
0x2109   :  { %1465 = vadd.xlane.f32.xlu1 %v1464_v38  ;;  %v1445_v39 = vpop.xlane.xlu1 %1444 }
0x210a   :  { %v1446_v40 = vsel %vm1426_vm2, %v1445_v39, %v1409_v15 }
0x210b   :  { %v1480_v41 = vmul.f32 %v1460_v20, %v1446_v40 }
0x210d   :  { %1481 = vadd.xlane.f32.xlu1 %v1480_v41  ;;  %v1453_v43 = vpop.xlane.xlu1 %1452 }
0x210e   :  { %v1454_v44 = vsel %vm1426_vm2, %v1453_v43, %v1417_v18  ;;  %vm1976_vm2 = vcmp.eq.s32.totalorder %v5549_v11, 72 }
0x210f   :  { %v1488_v45 = vmul.f32 %v1460_v20, %v1454_v44 }
0x2111   :  { %1489 = vadd.xlane.f32.xlu1 %v1488_v45  ;;  %v1470_v47 = vpop.xlane.xlu0 %1469 }
0x2112   :  { %v1471_v48 = vsel %vm1463_vm3, %v1470_v47, %v1434_v22 }
0x2113   :  { %v1505_v49 = vmul.f32 %v1497_v46, %v1471_v48 }
0x2115   :  { %1506 = vadd.xlane.f32.xlu0 %v1505_v49  ;;  %v1478_v50 = vpop.xlane.xlu0 %1477 }
0x2116   :  { %v1479_v51 = vsel %vm1463_vm3, %v1478_v50, %v1442_v25 }
0x2117   :  { %v1513_v52 = vmul.f32 %v1497_v46, %v1479_v51 }
0x2119   :  { %1514 = vadd.xlane.f32.xlu0 %v1513_v52  ;;  %v1486_v53 = vpop.xlane.xlu0 %1485 }
0x211a   :  { %v1487_v54 = vsel %vm1463_vm3, %v1486_v53, %v1450_v28 }
0x211b   :  { %v1521_v55 = vmul.f32 %v1497_v46, %v1487_v54 }
0x211d   :  { %1522 = vadd.xlane.f32.xlu0 %v1521_v55  ;;  %v1494_v56 = vpop.xlane.xlu0 %1493 }
0x211e   :  { %v1495_v57 = vsel %vm1463_vm3, %v1494_v56, %v1458_v31 }
0x211f   :  { %v1529_v58 = vmul.f32 %v1497_v46, %v1495_v57 }
0x2121   :  { %1530 = vadd.xlane.f32.xlu0 %v1529_v58 }
0x2192   :  { %v1474_v59 = vpop.xlane.xlu1 %1473 }
0x2193   :  { %v1475_v60 = vsel %vm1463_vm3, %v1474_v59, %v1438_v34  ;;  %v1571_v34 = vld [vmem:[#allocation0 + $0x3e] ss:$0 sm:$0xff] }
0x2194   :  { %v1509_v61 = vmul.f32 %v1497_v46, %v1475_v60 }
0x2196   :  { %1510 = vadd.xlane.f32.xlu1 %v1509_v61  ;;  %v1466_v62 = vpop.xlane.xlu1 %1465 }
0x2197   :  { %v1467_v63 = vsel %vm1463_vm3, %v1466_v62, %v1430_v37 }
0x2198   :  { %v1501_v0 = vmul.f32 %v1497_v46, %v1467_v63 }
0x219a   :  { %1502 = vadd.xlane.f32.xlu1 %v1501_v0  ;;  %v1482_v1 = vpop.xlane.xlu1 %1481 }
0x219b   :  { %v1483_v2 = vsel %vm1463_vm3, %v1482_v1, %v1446_v40 }
0x219c   :  { %v1517_v3 = vmul.f32 %v1497_v46, %v1483_v2 }
0x219e   :  { %1518 = vadd.xlane.f32.xlu1 %v1517_v3  ;;  %v1490_v4 = vpop.xlane.xlu1 %1489 }
0x219f   :  { %v1491_v5 = vsel %vm1463_vm3, %v1490_v4, %v1454_v44  ;;  %vm2021_vm3 = vcmp.eq.s32.totalorder %v5549_v11, 73 }
0x21a0   :  { %v1525_v6 = vmul.f32 %v1497_v46, %v1491_v5 }
0x21a2   :  { %1526 = vadd.xlane.f32.xlu1 %v1525_v6  ;;  %v1507_v8 = vpop.xlane.xlu0 %1506 }
0x21a3   :  { %v1508_v9 = vsel %vm1500_vm4, %v1507_v8, %v1471_v48 }
0x21a4   :  { %v1542_v10 = vmul.f32 %v1534_v7, %v1508_v9 }
0x21a6   :  { %1543 = vadd.xlane.f32.xlu0 %v1542_v10  ;;  %v1515_v13 = vpop.xlane.xlu0 %1514 }
0x21a7   :  { %v1516_v14 = vsel %vm1500_vm4, %v1515_v13, %v1479_v51 }
0x21a8   :  { %v1550_v15 = vmul.f32 %v1534_v7, %v1516_v14 }
0x21aa   :  { %1551 = vadd.xlane.f32.xlu0 %v1550_v15  ;;  %v1523_v16 = vpop.xlane.xlu0 %1522 }
0x21ab   :  { %v1524_v17 = vsel %vm1500_vm4, %v1523_v16, %v1487_v54 }
0x21ac   :  { %v1558_v18 = vmul.f32 %v1534_v7, %v1524_v17 }
0x21ae   :  { %1559 = vadd.xlane.f32.xlu0 %v1558_v18  ;;  %v1531_v19 = vpop.xlane.xlu0 %1530 }
0x21af   :  { %v1532_v20 = vsel %vm1500_vm4, %v1531_v19, %v1495_v57 }
0x21b0   :  { %v1566_v21 = vmul.f32 %v1534_v7, %v1532_v20 }
0x21b2   :  { %1567 = vadd.xlane.f32.xlu0 %v1566_v21 }
0x2223   :  { %v1511_v22 = vpop.xlane.xlu1 %1510 }
0x2224   :  { %v1512_v23 = vsel %vm1500_vm4, %v1511_v22, %v1475_v60  ;;  %v1608_v60 = vld [vmem:[#allocation0 + $0x3f] ss:$0 sm:$0xff] }
0x2225   :  { %v1546_v24 = vmul.f32 %v1534_v7, %v1512_v23 }
0x2227   :  { %1547 = vadd.xlane.f32.xlu1 %v1546_v24  ;;  %v1503_v25 = vpop.xlane.xlu1 %1502 }
0x2228   :  { %v1504_v26 = vsel %vm1500_vm4, %v1503_v25, %v1467_v63 }
0x2229   :  { %v1538_v27 = vmul.f32 %v1534_v7, %v1504_v26 }
0x222b   :  { %1539 = vadd.xlane.f32.xlu1 %v1538_v27  ;;  %v1519_v28 = vpop.xlane.xlu1 %1518 }
0x222c   :  { %v1520_v29 = vsel %vm1500_vm4, %v1519_v28, %v1483_v2 }
0x222d   :  { %v1554_v30 = vmul.f32 %v1534_v7, %v1520_v29 }
0x222f   :  { %1555 = vadd.xlane.f32.xlu1 %v1554_v30  ;;  %v1527_v31 = vpop.xlane.xlu1 %1526 }
0x2230   :  { %v1528_v32 = vsel %vm1500_vm4, %v1527_v31, %v1491_v5  ;;  %vm2066_vm4 = vcmp.eq.s32.totalorder %v5549_v11, 74 }
0x2231   :  { %v1562_v33 = vmul.f32 %v1534_v7, %v1528_v32 }
0x2233   :  { %1563 = vadd.xlane.f32.xlu1 %v1562_v33  ;;  %v1544_v35 = vpop.xlane.xlu0 %1543 }
0x2234   :  { %v1545_v36 = vsel %vm1537_vm5, %v1544_v35, %v1508_v9 }
0x2235   :  { %v1579_v37 = vmul.f32 %v1571_v34, %v1545_v36 }
0x2237   :  { %1580 = vadd.xlane.f32.xlu0 %v1579_v37  ;;  %v1552_v38 = vpop.xlane.xlu0 %1551 }
0x2238   :  { %v1553_v39 = vsel %vm1537_vm5, %v1552_v38, %v1516_v14 }
0x2239   :  { %v1587_v40 = vmul.f32 %v1571_v34, %v1553_v39 }
0x223b   :  { %1588 = vadd.xlane.f32.xlu0 %v1587_v40  ;;  %v1560_v41 = vpop.xlane.xlu0 %1559 }
0x223c   :  { %v1561_v43 = vsel %vm1537_vm5, %v1560_v41, %v1524_v17 }
0x223d   :  { %v1595_v44 = vmul.f32 %v1571_v34, %v1561_v43 }
0x223f   :  { %1596 = vadd.xlane.f32.xlu0 %v1595_v44  ;;  %v1568_v45 = vpop.xlane.xlu0 %1567  ;;  %v129_v44 = vadd.s32 64, %v5551_v12 }
0x2240   :  { %v1569_v46 = vsel %vm1537_vm5, %v1568_v45, %v1532_v20 }
0x2241   :  { %v1603_v47 = vmul.f32 %v1571_v34, %v1569_v46  ;;  %vm130_vm8 = vcmp.eq.s32.totalorder %v5549_v11, %v129_v44 }
0x2243   :  { %1604 = vadd.xlane.f32.xlu0 %v1603_v47 }
0x22b4   :  { %v1548_v48 = vpop.xlane.xlu1 %1547 }
0x22b5   :  { %v1549_v49 = vsel %vm1537_vm5, %v1548_v48, %v1512_v23  ;;  %v1645_v23 = vld [vmem:[#allocation0 + $0x40] ss:$0 sm:$0xff] }
0x22b6   :  { %v1583_v50 = vmul.f32 %v1571_v34, %v1549_v49 }
0x22b8   :  { %1584 = vadd.xlane.f32.xlu1 %v1583_v50  ;;  %v1540_v51 = vpop.xlane.xlu1 %1539  ;;  %v131_v50 = vsel %vm130_vm8, 1.0, %v5521_v42  ;;  %vm2246_vm8 = vcmp.eq.s32.totalorder %v5549_v11, 78 }
0x22b9   :  { %v1541_v52 = vsel %vm1537_vm5, %v1540_v51, %v1504_v26 }
0x22ba   :  { %v1575_v53 = vmul.f32 %v1571_v34, %v1541_v52 }
0x22bc   :  { %1576 = vadd.xlane.f32.xlu1 %v1575_v53  ;;  %v1556_v54 = vpop.xlane.xlu1 %1555  ;;  %v1681_v53 = vmul.f32 %v1645_v23, %v131_v50 }
0x22bd   :  { %v1557_v55 = vsel %vm1537_vm5, %v1556_v54, %v1520_v29  ;;  %v1686_v54 = vld [vmem:[#allocation0 + $0x41] ss:$0 sm:$0xff] }
0x22be   :  { %v1591_v56 = vmul.f32 %v1571_v34, %v1557_v55 }
0x22c0   :  { %1592 = vadd.xlane.f32.xlu1 %v1591_v56  ;;  %v1564_v57 = vpop.xlane.xlu1 %1563 }
0x22c1   :  { %v1565_v58 = vsel %vm1537_vm5, %v1564_v57, %v1528_v32  ;;  %vm2111_vm5 = vcmp.eq.s32.totalorder %v5549_v11, 75 }
0x22c2   :  { %v1599_v59 = vmul.f32 %v1571_v34, %v1565_v58 }
0x22c4   :  { %1600 = vadd.xlane.f32.xlu1 %v1599_v59  ;;  %v1581_v61 = vpop.xlane.xlu0 %1580 }
0x22c5   :  { %v1582_v62 = vsel %vm1574_vm6, %v1581_v61, %v1545_v36 }
0x22c6   :  { %v1616_v63 = vmul.f32 %v1608_v60, %v1582_v62 }
0x22c8   :  { %1617 = vadd.xlane.f32.xlu0 %v1616_v63  ;;  %v1589_v0 = vpop.xlane.xlu0 %1588 }
0x22c9   :  { %v1590_v1 = vsel %vm1574_vm6, %v1589_v0, %v1553_v39 }
0x22ca   :  { %v1624_v2 = vmul.f32 %v1608_v60, %v1590_v1 }
0x22cc   :  { %1625 = vadd.xlane.f32.xlu0 %v1624_v2  ;;  %v1597_v3 = vpop.xlane.xlu0 %1596 }
0x22cd   :  { %v1598_v4 = vsel %vm1574_vm6, %v1597_v3, %v1561_v43 }
0x22ce   :  { %v1632_v5 = vmul.f32 %v1608_v60, %v1598_v4 }
0x22d0   :  { %1633 = vadd.xlane.f32.xlu0 %v1632_v5  ;;  %v1605_v6 = vpop.xlane.xlu0 %1604 }
0x22d1   :  { %v1606_v7 = vsel %vm1574_vm6, %v1605_v6, %v1569_v46 }
0x22d2   :  { %v1640_v8 = vmul.f32 %v1608_v60, %v1606_v7 }
0x22d4   :  { %1641 = vadd.xlane.f32.xlu0 %v1640_v8 }
0x2345   :  { %v1585_v9 = vpop.xlane.xlu1 %1584 }
0x2346   :  { %v1586_v10 = vsel %vm1574_vm6, %v1585_v9, %v1549_v49 }
0x2347   :  { %v1620_v13 = vmul.f32 %v1608_v60, %v1586_v10 }
0x2349   :  { %1621 = vadd.xlane.f32.xlu1 %v1620_v13  ;;  %v1577_v14 = vpop.xlane.xlu1 %1576 }
0x234a   :  { %v1578_v15 = vsel %vm1574_vm6, %v1577_v14, %v1541_v52 }
0x234b   :  { %v1612_v16 = vmul.f32 %v1608_v60, %v1578_v15 }
0x234d   :  { %1613 = vadd.xlane.f32.xlu1 %v1612_v16  ;;  %v1593_v17 = vpop.xlane.xlu1 %1592 }
0x234e   :  { %v1594_v18 = vsel %vm1574_vm6, %v1593_v17, %v1557_v55 }
0x234f   :  { %v1628_v19 = vmul.f32 %v1608_v60, %v1594_v18 }
0x2351   :  { %1629 = vadd.xlane.f32.xlu1 %v1628_v19  ;;  %v1601_v20 = vpop.xlane.xlu1 %1600 }
0x2352   :  { %v1602_v21 = vsel %vm1574_vm6, %v1601_v20, %v1565_v58  ;;  %vm2156_vm6 = vcmp.eq.s32.totalorder %v5549_v11, 76 }
0x2353   :  { %v1636_v22 = vmul.f32 %v1608_v60, %v1602_v21 }
0x2355   :  { %1637 = vadd.xlane.f32.xlu1 %v1636_v22  ;;  %v1618_v24 = vpop.xlane.xlu0 %1617 }
0x2356   :  { %v1619_v25 = vsel %vm1611_vm7, %v1618_v24, %v1582_v62 }
0x2357   :  { %v1653_v26 = vmul.f32 %v1645_v23, %v1619_v25 }
0x2359   :  { %1654 = vadd.xlane.f32.xlu0 %v1653_v26  ;;  %v1626_v27 = vpop.xlane.xlu0 %1625 }
0x235a   :  { %v1627_v28 = vsel %vm1611_vm7, %v1626_v27, %v1590_v1 }
0x235b   :  { %v1661_v29 = vmul.f32 %v1645_v23, %v1627_v28 }
0x235d   :  { %1662 = vadd.xlane.f32.xlu0 %v1661_v29  ;;  %v1634_v30 = vpop.xlane.xlu0 %1633 }
0x235e   :  { %v1635_v31 = vsel %vm1611_vm7, %v1634_v30, %v1598_v4 }
0x235f   :  { %v1669_v32 = vmul.f32 %v1645_v23, %v1635_v31 }
0x2361   :  { %1670 = vadd.xlane.f32.xlu0 %v1669_v32  ;;  %v1642_v33 = vpop.xlane.xlu0 %1641 }
0x2362   :  { %v1643_v34 = vsel %vm1611_vm7, %v1642_v33, %v1606_v7 }
0x2363   :  { %v1677_v35 = vmul.f32 %v1645_v23, %v1643_v34 }
0x2365   :  { %1678 = vadd.xlane.f32.xlu0 %v1677_v35 }
0x23d6   :  { %v1622_v36 = vpop.xlane.xlu1 %1621 }
0x23d7   :  { %v1623_v37 = vsel %vm1611_vm7, %v1622_v36, %v1586_v10 }
0x23d8   :  { %v1657_v38 = vmul.f32 %v1645_v23, %v1623_v37 }
0x23da   :  { %1658 = vadd.xlane.f32.xlu1 %v1657_v38  ;;  %v1614_v39 = vpop.xlane.xlu1 %1613 }
0x23db   :  { %v1615_v45 = vsel %vm1611_vm7, %v1614_v39, %v1578_v15 }
0x23dc   :  { %v1649_v47 = vmul.f32 %v1645_v23, %v1615_v45 }
0x23de   :  { %v1630_v40 = vpop.xlane.xlu1 %1629 }
0x23df   :  { %v1631_v41 = vsel %vm1611_vm7, %v1630_v40, %v1594_v18  ;;  %v1727_v18 = vld [vmem:[#allocation0 + $0x42] ss:$0 sm:$0xff] }
0x23e0   :  { %v1665_v43 = vmul.f32 %v1645_v23, %v1631_v41 }
0x23e2   :  { %1666 = vadd.xlane.f32.xlu1 %v1665_v43  ;;  %v1638_v46 = vpop.xlane.xlu1 %1637 }
0x23e3   :  { %v1639_v48 = vsel %vm1611_vm7, %v1638_v46, %v1602_v21  ;;  %vm2201_vm7 = vcmp.eq.s32.totalorder %v5549_v11, 77 }
0x23e4   :  { %v1673_v51 = vmul.f32 %v1645_v23, %v1639_v48 }
0x23e6   :  { %1650 = vadd.xlane.f32.xlu1 %v1649_v47  ;;  %v1655_v49 = vpop.xlane.xlu0 %1654  ;;  %v1768_v47 = vld [vmem:[#allocation0 + $0x43] ss:$0 sm:$0xff] }
0x23e7   :  { %v1656_v55 = vsel %vm1648_vm9, %v1655_v49, %v1619_v25 }
0x23e8   :  { %v1694_v56 = vmul.f32 %v1686_v54, %v1656_v55 }
0x23ea   :  { %1674 = vadd.xlane.f32.xlu1 %v1673_v51  ;;  %v1663_v52 = vpop.xlane.xlu0 %1662 }
0x23eb   :  { %v1664_v58 = vsel %vm1648_vm9, %v1663_v52, %v1627_v28 }
0x23ec   :  { %v1702_v59 = vmul.f32 %v1686_v54, %v1664_v58 }
0x23ee   :  { %1682 = vadd.xlane.f32.xlu1 %v1681_v53  ;;  %v1671_v57 = vpop.xlane.xlu0 %1670 }
0x23ef   :  { %v1672_v60 = vsel %vm1648_vm9, %v1671_v57, %v1635_v31 }
0x23f0   :  { %v1710_v62 = vmul.f32 %v1686_v54, %v1672_v60 }
0x23f2   :  { %1695 = vadd.xlane.f32.xlu1 %v1694_v56  ;;  %v1679_v61 = vpop.xlane.xlu0 %1678 }
0x23f3   :  { %v1680_v63 = vsel %vm1648_vm9, %v1679_v61, %v1643_v34 }
0x23f4   :  { %v1718_v0 = vmul.f32 %v1686_v54, %v1680_v63 }
0x23f6   :  { %1703 = vadd.xlane.f32.xlu1 %v1702_v59 }
0x23fa   :  { %1711 = vadd.xlane.f32.xlu1 %v1710_v62 }
0x23fe   :  { %1719 = vadd.xlane.f32.xlu1 %v1718_v0 }
0x2467   :  { %v1659_v1 = vpop.xlane.xlu1 %1658 }
0x2468   :  { %v1660_v2 = vsel %vm1648_vm9, %v1659_v1, %v1623_v37 }
0x2469   :  { %v1698_v3 = vmul.f32 %v1686_v54, %v1660_v2 }
0x246b   :  { %1699 = vadd.xlane.f32.xlu0 %v1698_v3 }
0x246f   :  { %v1667_v4 = vpop.xlane.xlu1 %1666 }
0x2470   :  { %v1668_v5 = vsel %vm1648_vm9, %v1667_v4, %v1631_v41 }
0x2471   :  { %v1706_v6 = vmul.f32 %v1686_v54, %v1668_v5 }
0x2473   :  { %v1651_v7 = vpop.xlane.xlu1 %1650  ;;  %1707 = vadd.xlane.f32.xlu0 %v1706_v6 }
0x2474   :  { %v1652_v8 = vsel %vm1648_vm9, %v1651_v7, %v1615_v45 }
0x2475   :  { %v1690_v9 = vmul.f32 %v1686_v54, %v1652_v8 }
0x2477   :  { %v1675_v10 = vpop.xlane.xlu1 %1674  ;;  %1691 = vadd.xlane.f32.xlu0 %v1690_v9 }
0x2478   :  { %v1676_v13 = vsel %vm1648_vm9, %v1675_v10, %v1639_v48 }
0x2479   :  { %v1714_v14 = vmul.f32 %v1686_v54, %v1676_v13 }
0x247b   :  { %v1683_v15 = vpop.xlane.xlu1 %1682  ;;  %1715 = vadd.xlane.f32.xlu0 %v1714_v14 }
0x247c   :  { %v1684_v16 = vsel %vm1648_vm9, %v1683_v15, %v131_v50  ;;  %vm2291_vm9 = vcmp.eq.s32.totalorder %v5549_v11, 79 }
0x247d   :  { %v1722_v17 = vmul.f32 %v1686_v54, %v1684_v16 }
0x247f   :  { %1723 = vadd.xlane.f32.xlu0 %v1722_v17  ;;  %v1696_v19 = vpop.xlane.xlu1 %1695 }
0x2480   :  { %v1697_v20 = vsel %vm1689_vm10, %v1696_v19, %v1656_v55 }
0x2481   :  { %v1735_v21 = vmul.f32 %v1727_v18, %v1697_v20 }
0x2483   :  { %1736 = vadd.xlane.f32.xlu0 %v1735_v21  ;;  %v1704_v22 = vpop.xlane.xlu1 %1703 }
0x2484   :  { %v1705_v23 = vsel %vm1689_vm10, %v1704_v22, %v1664_v58 }
0x2485   :  { %v1743_v24 = vmul.f32 %v1727_v18, %v1705_v23 }
0x2487   :  { %1744 = vadd.xlane.f32.xlu0 %v1743_v24  ;;  %v1712_v25 = vpop.xlane.xlu1 %1711 }
0x2488   :  { %v1713_v26 = vsel %vm1689_vm10, %v1712_v25, %v1672_v60 }
0x2489   :  { %v1751_v27 = vmul.f32 %v1727_v18, %v1713_v26 }
0x248b   :  { %1752 = vadd.xlane.f32.xlu0 %v1751_v27  ;;  %v1720_v28 = vpop.xlane.xlu1 %1719 }
0x248c   :  { %v1721_v29 = vsel %vm1689_vm10, %v1720_v28, %v1680_v63 }
0x248d   :  { %v1759_v30 = vmul.f32 %v1727_v18, %v1721_v29 }
0x248f   :  { %1760 = vadd.xlane.f32.xlu0 %v1759_v30 }
0x24f8   :  { %v1700_v31 = vpop.xlane.xlu0 %1699 }
0x24f9   :  { %v1701_v32 = vsel %vm1689_vm10, %v1700_v31, %v1660_v2 }
0x24fa   :  { %v1739_v33 = vmul.f32 %v1727_v18, %v1701_v32 }
0x24fc   :  { %1740 = vadd.xlane.f32.xlu1 %v1739_v33 }
0x2500   :  { %v1708_v34 = vpop.xlane.xlu0 %1707 }
0x2501   :  { %v1709_v35 = vsel %vm1689_vm10, %v1708_v34, %v1668_v5 }
0x2502   :  { %v1747_v36 = vmul.f32 %v1727_v18, %v1709_v35 }
0x2504   :  { %1748 = vadd.xlane.f32.xlu1 %v1747_v36  ;;  %v1692_v37 = vpop.xlane.xlu0 %1691 }
0x2505   :  { %v1693_v38 = vsel %vm1689_vm10, %v1692_v37, %v1652_v8 }
0x2506   :  { %v1731_v39 = vmul.f32 %v1727_v18, %v1693_v38 }
0x2508   :  { %1732 = vadd.xlane.f32.xlu1 %v1731_v39  ;;  %v1716_v40 = vpop.xlane.xlu0 %1715 }
0x2509   :  { %v1717_v41 = vsel %vm1689_vm10, %v1716_v40, %v1676_v13  ;;  %v1809_v13 = vld [vmem:[#allocation0 + $0x44] ss:$0 sm:$0xff] }
0x250a   :  { %v1755_v43 = vmul.f32 %v1727_v18, %v1717_v41 }
0x250c   :  { %1756 = vadd.xlane.f32.xlu1 %v1755_v43  ;;  %v1724_v44 = vpop.xlane.xlu0 %1723 }
0x250d   :  { %v1725_v45 = vsel %vm1689_vm10, %v1724_v44, %v1684_v16 }
0x250e   :  { %v1763_v46 = vmul.f32 %v1727_v18, %v1725_v45 }
0x2510   :  { %1764 = vadd.xlane.f32.xlu1 %v1763_v46  ;;  %v1737_v48 = vpop.xlane.xlu0 %1736 }
0x2511   :  { %v1738_v49 = vsel %vm1730_vm11, %v1737_v48, %v1697_v20 }
0x2512   :  { %v1776_v50 = vmul.f32 %v1768_v47, %v1738_v49 }
0x2514   :  { %1777 = vadd.xlane.f32.xlu1 %v1776_v50  ;;  %v1745_v51 = vpop.xlane.xlu0 %1744 }
0x2515   :  { %v1746_v52 = vsel %vm1730_vm11, %v1745_v51, %v1705_v23 }
0x2516   :  { %v1784_v53 = vmul.f32 %v1768_v47, %v1746_v52 }
0x2518   :  { %1785 = vadd.xlane.f32.xlu1 %v1784_v53  ;;  %v1753_v54 = vpop.xlane.xlu0 %1752 }
0x2519   :  { %v1754_v55 = vsel %vm1730_vm11, %v1753_v54, %v1713_v26 }
0x251a   :  { %v1792_v56 = vmul.f32 %v1768_v47, %v1754_v55 }
0x251c   :  { %1793 = vadd.xlane.f32.xlu1 %v1792_v56  ;;  %v1761_v57 = vpop.xlane.xlu0 %1760 }
0x251d   :  { %v1762_v58 = vsel %vm1730_vm11, %v1761_v57, %v1721_v29 }
0x251e   :  { %v1800_v59 = vmul.f32 %v1768_v47, %v1762_v58 }
0x2520   :  { %1801 = vadd.xlane.f32.xlu1 %v1800_v59 }
0x2589   :  { %v1741_v60 = vpop.xlane.xlu1 %1740 }
0x258a   :  { %v1742_v61 = vsel %vm1730_vm11, %v1741_v60, %v1701_v32 }
0x258b   :  { %v1780_v62 = vmul.f32 %v1768_v47, %v1742_v61 }
0x258d   :  { %1781 = vadd.xlane.f32.xlu0 %v1780_v62 }
0x2591   :  { %v1749_v63 = vpop.xlane.xlu1 %1748 }
0x2592   :  { %v1750_v0 = vsel %vm1730_vm11, %v1749_v63, %v1709_v35 }
0x2593   :  { %v1788_v1 = vmul.f32 %v1768_v47, %v1750_v0 }
0x2595   :  { %1789 = vadd.xlane.f32.xlu0 %v1788_v1  ;;  %v1733_v2 = vpop.xlane.xlu1 %1732 }
0x2596   :  { %v1734_v3 = vsel %vm1730_vm11, %v1733_v2, %v1693_v38 }
0x2597   :  { %v1772_v4 = vmul.f32 %v1768_v47, %v1734_v3 }
0x2599   :  { %1773 = vadd.xlane.f32.xlu0 %v1772_v4  ;;  %v1757_v5 = vpop.xlane.xlu1 %1756 }
0x259a   :  { %v1758_v6 = vsel %vm1730_vm11, %v1757_v5, %v1717_v41  ;;  %v1850_v41 = vld [vmem:[#allocation0 + $0x45] ss:$0 sm:$0xff] }
0x259b   :  { %v1796_v7 = vmul.f32 %v1768_v47, %v1758_v6 }
0x259d   :  { %1797 = vadd.xlane.f32.xlu0 %v1796_v7  ;;  %v1765_v8 = vpop.xlane.xlu1 %1764 }
0x259e   :  { %v1766_v9 = vsel %vm1730_vm11, %v1765_v8, %v1725_v45  ;;  %vm2336_vm11 = vcmp.eq.s32.totalorder %v5549_v11, 80 }
0x259f   :  { %v1804_v10 = vmul.f32 %v1768_v47, %v1766_v9 }
0x25a1   :  { %1805 = vadd.xlane.f32.xlu0 %v1804_v10  ;;  %v1778_v14 = vpop.xlane.xlu1 %1777 }
0x25a2   :  { %v1779_v15 = vsel %vm1771_vm12, %v1778_v14, %v1738_v49 }
0x25a3   :  { %v1817_v16 = vmul.f32 %v1809_v13, %v1779_v15 }
0x25a5   :  { %1818 = vadd.xlane.f32.xlu0 %v1817_v16  ;;  %v1786_v17 = vpop.xlane.xlu1 %1785 }
0x25a6   :  { %v1787_v18 = vsel %vm1771_vm12, %v1786_v17, %v1746_v52 }
0x25a7   :  { %v1825_v19 = vmul.f32 %v1809_v13, %v1787_v18 }
0x25a9   :  { %1826 = vadd.xlane.f32.xlu0 %v1825_v19  ;;  %v1794_v20 = vpop.xlane.xlu1 %1793 }
0x25aa   :  { %v1795_v21 = vsel %vm1771_vm12, %v1794_v20, %v1754_v55 }
0x25ab   :  { %v1833_v22 = vmul.f32 %v1809_v13, %v1795_v21 }
0x25ad   :  { %1834 = vadd.xlane.f32.xlu0 %v1833_v22  ;;  %v1802_v23 = vpop.xlane.xlu1 %1801 }
0x25ae   :  { %v1803_v24 = vsel %vm1771_vm12, %v1802_v23, %v1762_v58 }
0x25af   :  { %v1841_v25 = vmul.f32 %v1809_v13, %v1803_v24 }
0x25b1   :  { %1842 = vadd.xlane.f32.xlu0 %v1841_v25 }
0x261a   :  { %v1782_v26 = vpop.xlane.xlu0 %1781 }
0x261b   :  { %v1783_v27 = vsel %vm1771_vm12, %v1782_v26, %v1742_v61 }
0x261c   :  { %v1821_v28 = vmul.f32 %v1809_v13, %v1783_v27 }
0x261e   :  { %1822 = vadd.xlane.f32.xlu1 %v1821_v28 }
0x2622   :  { %v1790_v29 = vpop.xlane.xlu0 %1789 }
0x2623   :  { %v1791_v30 = vsel %vm1771_vm12, %v1790_v29, %v1750_v0 }
0x2624   :  { %v1829_v31 = vmul.f32 %v1809_v13, %v1791_v30 }
0x2626   :  { %1830 = vadd.xlane.f32.xlu1 %v1829_v31  ;;  %v1774_v32 = vpop.xlane.xlu0 %1773 }
0x2627   :  { %v1775_v33 = vsel %vm1771_vm12, %v1774_v32, %v1734_v3 }
0x2628   :  { %v1813_v34 = vmul.f32 %v1809_v13, %v1775_v33 }
0x262a   :  { %1814 = vadd.xlane.f32.xlu1 %v1813_v34  ;;  %v1798_v35 = vpop.xlane.xlu0 %1797 }
0x262b   :  { %v1799_v36 = vsel %vm1771_vm12, %v1798_v35, %v1758_v6  ;;  %v1891_v6 = vld [vmem:[#allocation0 + $0x46] ss:$0 sm:$0xff] }
0x262c   :  { %v1837_v37 = vmul.f32 %v1809_v13, %v1799_v36 }
0x262e   :  { %1838 = vadd.xlane.f32.xlu1 %v1837_v37  ;;  %v1806_v38 = vpop.xlane.xlu0 %1805 }
0x262f   :  { %v1807_v39 = vsel %vm1771_vm12, %v1806_v38, %v1766_v9  ;;  %vm2385_vm12 = vcmp.eq.s32.totalorder %v5549_v11, 81 }
0x2630   :  { %v1845_v40 = vmul.f32 %v1809_v13, %v1807_v39 }
0x2632   :  { %1846 = vadd.xlane.f32.xlu1 %v1845_v40  ;;  %v1819_v43 = vpop.xlane.xlu0 %1818 }
0x2633   :  { %v1820_v44 = vsel %vm1812_vm13, %v1819_v43, %v1779_v15 }
0x2634   :  { %v1858_v45 = vmul.f32 %v1850_v41, %v1820_v44 }
0x2636   :  { %1859 = vadd.xlane.f32.xlu1 %v1858_v45  ;;  %v1827_v46 = vpop.xlane.xlu0 %1826 }
0x2637   :  { %v1828_v47 = vsel %vm1812_vm13, %v1827_v46, %v1787_v18 }
0x2638   :  { %v1866_v48 = vmul.f32 %v1850_v41, %v1828_v47 }
0x263a   :  { %1867 = vadd.xlane.f32.xlu1 %v1866_v48  ;;  %v1835_v49 = vpop.xlane.xlu0 %1834 }
0x263b   :  { %v1836_v50 = vsel %vm1812_vm13, %v1835_v49, %v1795_v21 }
0x263c   :  { %v1874_v51 = vmul.f32 %v1850_v41, %v1836_v50 }
0x263e   :  { %1875 = vadd.xlane.f32.xlu1 %v1874_v51  ;;  %v1843_v52 = vpop.xlane.xlu0 %1842 }
0x263f   :  { %v1844_v53 = vsel %vm1812_vm13, %v1843_v52, %v1803_v24 }
0x2640   :  { %v1882_v54 = vmul.f32 %v1850_v41, %v1844_v53 }
0x2642   :  { %1883 = vadd.xlane.f32.xlu1 %v1882_v54 }
0x26ab   :  { %v1823_v55 = vpop.xlane.xlu1 %1822 }
0x26ac   :  { %v1824_v56 = vsel %vm1812_vm13, %v1823_v55, %v1783_v27 }
0x26ad   :  { %v1862_v57 = vmul.f32 %v1850_v41, %v1824_v56 }
0x26af   :  { %1863 = vadd.xlane.f32.xlu0 %v1862_v57 }
0x26b3   :  { %v1831_v58 = vpop.xlane.xlu1 %1830 }
0x26b4   :  { %v1832_v59 = vsel %vm1812_vm13, %v1831_v58, %v1791_v30 }
0x26b5   :  { %v1870_v60 = vmul.f32 %v1850_v41, %v1832_v59 }
0x26b7   :  { %1871 = vadd.xlane.f32.xlu0 %v1870_v60  ;;  %v1815_v61 = vpop.xlane.xlu1 %1814 }
0x26b8   :  { %v1816_v62 = vsel %vm1812_vm13, %v1815_v61, %v1775_v33 }
0x26b9   :  { %v1854_v63 = vmul.f32 %v1850_v41, %v1816_v62 }
0x26bb   :  { %1855 = vadd.xlane.f32.xlu0 %v1854_v63  ;;  %v1839_v0 = vpop.xlane.xlu1 %1838 }
0x26bc   :  { %v1840_v1 = vsel %vm1812_vm13, %v1839_v0, %v1799_v36  ;;  %v1932_v36 = vld [vmem:[#allocation0 + $0x47] ss:$0 sm:$0xff] }
0x26bd   :  { %v1878_v2 = vmul.f32 %v1850_v41, %v1840_v1 }
0x26bf   :  { %1879 = vadd.xlane.f32.xlu0 %v1878_v2  ;;  %v1847_v3 = vpop.xlane.xlu1 %1846 }
0x26c0   :  { %v1848_v4 = vsel %vm1812_vm13, %v1847_v3, %v1807_v39  ;;  %vm2434_vm13 = vcmp.eq.s32.totalorder %v5549_v11, 82 }
0x26c1   :  { %v1886_v5 = vmul.f32 %v1850_v41, %v1848_v4 }
0x26c3   :  { %1887 = vadd.xlane.f32.xlu0 %v1886_v5  ;;  %v1860_v7 = vpop.xlane.xlu1 %1859 }
0x26c4   :  { %v1861_v8 = vsel %vm1853_vm14, %v1860_v7, %v1820_v44 }
0x26c5   :  { %v1899_v9 = vmul.f32 %v1891_v6, %v1861_v8 }
0x26c7   :  { %1900 = vadd.xlane.f32.xlu0 %v1899_v9  ;;  %v1868_v10 = vpop.xlane.xlu1 %1867 }
0x26c8   :  { %v1869_v13 = vsel %vm1853_vm14, %v1868_v10, %v1828_v47 }
0x26c9   :  { %v1907_v14 = vmul.f32 %v1891_v6, %v1869_v13 }
0x26cb   :  { %1908 = vadd.xlane.f32.xlu0 %v1907_v14  ;;  %v1876_v15 = vpop.xlane.xlu1 %1875 }
0x26cc   :  { %v1877_v16 = vsel %vm1853_vm14, %v1876_v15, %v1836_v50 }
0x26cd   :  { %v1915_v17 = vmul.f32 %v1891_v6, %v1877_v16 }
0x26cf   :  { %1916 = vadd.xlane.f32.xlu0 %v1915_v17  ;;  %v1884_v18 = vpop.xlane.xlu1 %1883 }
0x26d0   :  { %v1885_v19 = vsel %vm1853_vm14, %v1884_v18, %v1844_v53 }
0x26d1   :  { %v1923_v20 = vmul.f32 %v1891_v6, %v1885_v19 }
0x26d3   :  { %1924 = vadd.xlane.f32.xlu0 %v1923_v20 }
0x273c   :  { %v1864_v21 = vpop.xlane.xlu0 %1863 }
0x273d   :  { %v1865_v22 = vsel %vm1853_vm14, %v1864_v21, %v1824_v56 }
0x273e   :  { %v1903_v23 = vmul.f32 %v1891_v6, %v1865_v22 }
0x2740   :  { %1904 = vadd.xlane.f32.xlu1 %v1903_v23 }
0x2744   :  { %v1872_v24 = vpop.xlane.xlu0 %1871 }
0x2745   :  { %v1873_v25 = vsel %vm1853_vm14, %v1872_v24, %v1832_v59 }
0x2746   :  { %v1911_v26 = vmul.f32 %v1891_v6, %v1873_v25 }
0x2748   :  { %1912 = vadd.xlane.f32.xlu1 %v1911_v26  ;;  %v1856_v27 = vpop.xlane.xlu0 %1855 }
0x2749   :  { %v1857_v28 = vsel %vm1853_vm14, %v1856_v27, %v1816_v62 }
0x274a   :  { %v1895_v29 = vmul.f32 %v1891_v6, %v1857_v28 }
0x274c   :  { %1896 = vadd.xlane.f32.xlu1 %v1895_v29  ;;  %v1880_v30 = vpop.xlane.xlu0 %1879 }
0x274d   :  { %v1881_v31 = vsel %vm1853_vm14, %v1880_v30, %v1840_v1  ;;  %v1973_v1 = vld [vmem:[#allocation0 + $0x48] ss:$0 sm:$0xff] }
0x274e   :  { %v1919_v32 = vmul.f32 %v1891_v6, %v1881_v31 }
0x2750   :  { %1920 = vadd.xlane.f32.xlu1 %v1919_v32  ;;  %v1888_v33 = vpop.xlane.xlu0 %1887 }
0x2751   :  { %v1889_v34 = vsel %vm1853_vm14, %v1888_v33, %v1848_v4  ;;  %vm2483_vm14 = vcmp.eq.s32.totalorder %v5549_v11, 83 }
0x2752   :  { %v1927_v35 = vmul.f32 %v1891_v6, %v1889_v34 }
0x2754   :  { %1928 = vadd.xlane.f32.xlu1 %v1927_v35  ;;  %v1901_v37 = vpop.xlane.xlu0 %1900 }
0x2755   :  { %v1902_v38 = vsel %vm1894_vm15, %v1901_v37, %v1861_v8  ;;  %v136_v8 = vadd.s32 72, %v5551_v12 }
0x2756   :  { %v1940_v39 = vmul.f32 %v1932_v36, %v1902_v38 }
0x2757   :  { %vm137_vm1 = vcmp.eq.s32.totalorder %v5549_v11, %v136_v8 }
0x2758   :  { %1941 = vadd.xlane.f32.xlu1 %v1940_v39  ;;  %v1909_v40 = vpop.xlane.xlu0 %1908 }
0x2759   :  { %v1910_v41 = vsel %vm1894_vm15, %v1909_v40, %v1869_v13 }
0x275a   :  { %v1948_v43 = vmul.f32 %v1932_v36, %v1910_v41 }
0x275c   :  { %1949 = vadd.xlane.f32.xlu1 %v1948_v43  ;;  %v1917_v44 = vpop.xlane.xlu0 %1916 }
0x275d   :  { %v1918_v45 = vsel %vm1894_vm15, %v1917_v44, %v1877_v16  ;;  %v138_v16 = vsel %vm137_vm1, 1.0, %v5521_v42  ;;  %vm2630_vm1 = vcmp.eq.s32.totalorder %v5549_v11, 86 }
0x275e   :  { %v1956_v46 = vmul.f32 %v1932_v36, %v1918_v45  ;;  %v2013_v18 = vmul.f32 %v1973_v1, %v138_v16 }
0x2760   :  { %1957 = vadd.xlane.f32.xlu1 %v1956_v46  ;;  %v1925_v47 = vpop.xlane.xlu0 %1924 }
0x2761   :  { %v1926_v48 = vsel %vm1894_vm15, %v1925_v47, %v1885_v19 }
0x2762   :  { %v1964_v49 = vmul.f32 %v1932_v36, %v1926_v48 }
0x2764   :  { %1965 = vadd.xlane.f32.xlu1 %v1964_v49 }
0x27cd   :  { %v1905_v50 = vpop.xlane.xlu1 %1904 }
0x27ce   :  { %v1906_v51 = vsel %vm1894_vm15, %v1905_v50, %v1865_v22 }
0x27cf   :  { %v1944_v52 = vmul.f32 %v1932_v36, %v1906_v51 }
0x27d1   :  { %1945 = vadd.xlane.f32.xlu0 %v1944_v52 }
0x27d5   :  { %v1913_v53 = vpop.xlane.xlu1 %1912 }
0x27d6   :  { %v1914_v54 = vsel %vm1894_vm15, %v1913_v53, %v1873_v25 }
0x27d7   :  { %v1952_v55 = vmul.f32 %v1932_v36, %v1914_v54 }
0x27d9   :  { %1953 = vadd.xlane.f32.xlu0 %v1952_v55  ;;  %v1897_v56 = vpop.xlane.xlu1 %1896 }
0x27da   :  { %v1898_v57 = vsel %vm1894_vm15, %v1897_v56, %v1857_v28 }
0x27db   :  { %v1936_v58 = vmul.f32 %v1932_v36, %v1898_v57 }
0x27dd   :  { %1937 = vadd.xlane.f32.xlu0 %v1936_v58  ;;  %v1921_v59 = vpop.xlane.xlu1 %1920 }
0x27de   :  { %v1922_v60 = vsel %vm1894_vm15, %v1921_v59, %v1881_v31 }
0x27df   :  { %v1960_v61 = vmul.f32 %v1932_v36, %v1922_v60 }
0x27e1   :  { %1961 = vadd.xlane.f32.xlu0 %v1960_v61  ;;  %v1929_v62 = vpop.xlane.xlu1 %1928 }
0x27e2   :  { %v1930_v63 = vsel %vm1894_vm15, %v1929_v62, %v1889_v34  ;;  %v2018_v34 = vld [vmem:[#allocation0 + $0x49] ss:$0 sm:$0xff]  ;;  %vm2532_vm15 = vcmp.eq.s32.totalorder %v5549_v11, 84 }
0x27e3   :  { %v1968_v0 = vmul.f32 %v1932_v36, %v1930_v63 }
0x27e5   :  { %1969 = vadd.xlane.f32.xlu0 %v1968_v0  ;;  %v1942_v2 = vpop.xlane.xlu1 %1941 }
0x27e6   :  { %v1943_v3 = vsel %vm1935_vm0, %v1942_v2, %v1902_v38  ;;  %v2063_v2 = vld [vmem:[#allocation0 + $0x4a] ss:$0 sm:$0xff] }
0x27e7   :  { %v1981_v4 = vmul.f32 %v1973_v1, %v1943_v3 }
0x27e9   :  { %1982 = vadd.xlane.f32.xlu0 %v1981_v4  ;;  %v1950_v5 = vpop.xlane.xlu1 %1949 }
0x27ea   :  { %v1951_v6 = vsel %vm1935_vm0, %v1950_v5, %v1910_v41 }
0x27eb   :  { %v1989_v7 = vmul.f32 %v1973_v1, %v1951_v6 }
0x27ed   :  { %1990 = vadd.xlane.f32.xlu0 %v1989_v7  ;;  %v1958_v9 = vpop.xlane.xlu1 %1957 }
0x27ee   :  { %v1959_v10 = vsel %vm1935_vm0, %v1958_v9, %v1918_v45 }
0x27ef   :  { %v1997_v13 = vmul.f32 %v1973_v1, %v1959_v10 }
0x27f1   :  { %1998 = vadd.xlane.f32.xlu0 %v1997_v13  ;;  %v1966_v14 = vpop.xlane.xlu1 %1965 }
0x27f2   :  { %v1967_v15 = vsel %vm1935_vm0, %v1966_v14, %v1926_v48 }
0x27f3   :  { %v2005_v17 = vmul.f32 %v1973_v1, %v1967_v15 }
0x27f5   :  { %2006 = vadd.xlane.f32.xlu0 %v2005_v17 }
0x27f9   :  { %2014 = vadd.xlane.f32.xlu0 %v2013_v18 }
0x285e   :  { %v1946_v19 = vpop.xlane.xlu0 %1945 }
0x285f   :  { %v1947_v20 = vsel %vm1935_vm0, %v1946_v19, %v1906_v51 }
0x2860   :  { %v1985_v21 = vmul.f32 %v1973_v1, %v1947_v20 }
0x2862   :  { %1986 = vadd.xlane.f32.xlu1 %v1985_v21 }
0x2866   :  { %v1954_v22 = vpop.xlane.xlu0 %1953 }
0x2867   :  { %v1955_v23 = vsel %vm1935_vm0, %v1954_v22, %v1914_v54 }
0x2868   :  { %v1993_v24 = vmul.f32 %v1973_v1, %v1955_v23 }
0x286a   :  { %1994 = vadd.xlane.f32.xlu1 %v1993_v24  ;;  %v1938_v25 = vpop.xlane.xlu0 %1937 }
0x286b   :  { %v1939_v26 = vsel %vm1935_vm0, %v1938_v25, %v1898_v57 }
0x286c   :  { %v1977_v27 = vmul.f32 %v1973_v1, %v1939_v26 }
0x286e   :  { %1978 = vadd.xlane.f32.xlu1 %v1977_v27  ;;  %v1962_v28 = vpop.xlane.xlu0 %1961 }
0x286f   :  { %v1963_v29 = vsel %vm1935_vm0, %v1962_v28, %v1922_v60 }
0x2870   :  { %v2001_v30 = vmul.f32 %v1973_v1, %v1963_v29 }
0x2872   :  { %2002 = vadd.xlane.f32.xlu1 %v2001_v30  ;;  %v1970_v31 = vpop.xlane.xlu0 %1969 }
0x2873   :  { %v1971_v32 = vsel %vm1935_vm0, %v1970_v31, %v1930_v63  ;;  %vm2581_vm0 = vcmp.eq.s32.totalorder %v5549_v11, 85 }
0x2874   :  { %v2009_v33 = vmul.f32 %v1973_v1, %v1971_v32 }
0x2876   :  { %2010 = vadd.xlane.f32.xlu1 %v2009_v33  ;;  %v1983_v35 = vpop.xlane.xlu0 %1982 }
0x2877   :  { %v1984_v36 = vsel %vm1976_vm2, %v1983_v35, %v1943_v3  ;;  %v2108_v35 = vld [vmem:[#allocation0 + $0x4b] ss:$0 sm:$0xff] }
0x2878   :  { %v2026_v37 = vmul.f32 %v2018_v34, %v1984_v36 }
0x287a   :  { %2027 = vadd.xlane.f32.xlu0 %v2026_v37  ;;  %v1991_v38 = vpop.xlane.xlu0 %1990 }
0x287b   :  { %v1992_v39 = vsel %vm1976_vm2, %v1991_v38, %v1951_v6 }
0x287c   :  { %v2034_v40 = vmul.f32 %v2018_v34, %v1992_v39 }
0x287e   :  { %2035 = vadd.xlane.f32.xlu0 %v2034_v40  ;;  %v1999_v41 = vpop.xlane.xlu0 %1998 }
0x287f   :  { %v2000_v43 = vsel %vm1976_vm2, %v1999_v41, %v1959_v10 }
0x2880   :  { %v2042_v44 = vmul.f32 %v2018_v34, %v2000_v43 }
0x2882   :  { %2043 = vadd.xlane.f32.xlu0 %v2042_v44  ;;  %v2007_v45 = vpop.xlane.xlu0 %2006 }
0x2883   :  { %v2008_v46 = vsel %vm1976_vm2, %v2007_v45, %v1967_v15 }
0x2884   :  { %v2050_v47 = vmul.f32 %v2018_v34, %v2008_v46 }
0x2886   :  { %2051 = vadd.xlane.f32.xlu0 %v2050_v47  ;;  %v2015_v48 = vpop.xlane.xlu0 %2014 }
0x2887   :  { %v2016_v49 = vsel %vm1976_vm2, %v2015_v48, %v138_v16 }
0x2888   :  { %v2058_v50 = vmul.f32 %v2018_v34, %v2016_v49 }
0x288a   :  { %2059 = vadd.xlane.f32.xlu0 %v2058_v50 }
0x28ef   :  { %v1987_v51 = vpop.xlane.xlu1 %1986 }
0x28f0   :  { %v1988_v52 = vsel %vm1976_vm2, %v1987_v51, %v1947_v20 }
0x28f1   :  { %v2030_v53 = vmul.f32 %v2018_v34, %v1988_v52 }
0x28f3   :  { %2031 = vadd.xlane.f32.xlu1 %v2030_v53 }
0x28f7   :  { %v1995_v54 = vpop.xlane.xlu1 %1994 }
0x28f8   :  { %v1996_v55 = vsel %vm1976_vm2, %v1995_v54, %v1955_v23 }
0x28f9   :  { %v2038_v56 = vmul.f32 %v2018_v34, %v1996_v55 }
0x28fb   :  { %v1979_v57 = vpop.xlane.xlu1 %1978  ;;  %2039 = vadd.xlane.f32.xlu1 %v2038_v56 }
0x28fc   :  { %v1980_v58 = vsel %vm1976_vm2, %v1979_v57, %v1939_v26 }
0x28fd   :  { %v2022_v59 = vmul.f32 %v2018_v34, %v1980_v58 }
0x28ff   :  { %v2003_v60 = vpop.xlane.xlu1 %2002  ;;  %2023 = vadd.xlane.f32.xlu1 %v2022_v59 }
0x2900   :  { %v2004_v61 = vsel %vm1976_vm2, %v2003_v60, %v1963_v29 }
0x2901   :  { %v2046_v62 = vmul.f32 %v2018_v34, %v2004_v61 }
0x2903   :  { %2047 = vadd.xlane.f32.xlu1 %v2046_v62  ;;  %v2011_v63 = vpop.xlane.xlu1 %2010 }
0x2904   :  { %v2012_v0 = vsel %vm1976_vm2, %v2011_v63, %v1971_v32  ;;  %vm2679_vm2 = vcmp.eq.s32.totalorder %v5549_v11, 87 }
0x2905   :  { %v2054_v1 = vmul.f32 %v2018_v34, %v2012_v0 }
0x2907   :  { %2055 = vadd.xlane.f32.xlu1 %v2054_v1  ;;  %v2028_v3 = vpop.xlane.xlu0 %2027 }
0x2908   :  { %v2029_v4 = vsel %vm2021_vm3, %v2028_v3, %v1984_v36  ;;  %v2153_v3 = vld [vmem:[#allocation0 + $0x4c] ss:$0 sm:$0xff] }
0x2909   :  { %v2071_v5 = vmul.f32 %v2063_v2, %v2029_v4 }
0x290b   :  { %2072 = vadd.xlane.f32.xlu0 %v2071_v5  ;;  %v2036_v6 = vpop.xlane.xlu0 %2035 }
0x290c   :  { %v2037_v7 = vsel %vm2021_vm3, %v2036_v6, %v1992_v39 }
0x290d   :  { %v2079_v8 = vmul.f32 %v2063_v2, %v2037_v7 }
0x290f   :  { %2080 = vadd.xlane.f32.xlu0 %v2079_v8  ;;  %v2044_v9 = vpop.xlane.xlu0 %2043 }
0x2910   :  { %v2045_v10 = vsel %vm2021_vm3, %v2044_v9, %v2000_v43 }
0x2911   :  { %v2087_v13 = vmul.f32 %v2063_v2, %v2045_v10 }
0x2913   :  { %2088 = vadd.xlane.f32.xlu0 %v2087_v13  ;;  %v2052_v14 = vpop.xlane.xlu0 %2051 }
0x2914   :  { %v2053_v15 = vsel %vm2021_vm3, %v2052_v14, %v2008_v46 }
0x2915   :  { %v2095_v16 = vmul.f32 %v2063_v2, %v2053_v15 }
0x2917   :  { %2096 = vadd.xlane.f32.xlu0 %v2095_v16  ;;  %v2060_v17 = vpop.xlane.xlu0 %2059 }
0x2918   :  { %v2061_v18 = vsel %vm2021_vm3, %v2060_v17, %v2016_v49 }
0x2919   :  { %v2103_v19 = vmul.f32 %v2063_v2, %v2061_v18 }
0x291b   :  { %2104 = vadd.xlane.f32.xlu0 %v2103_v19 }
0x2980   :  { %v2032_v20 = vpop.xlane.xlu1 %2031 }
0x2981   :  { %v2033_v21 = vsel %vm2021_vm3, %v2032_v20, %v1988_v52 }
0x2982   :  { %v2075_v22 = vmul.f32 %v2063_v2, %v2033_v21 }
0x2984   :  { %2076 = vadd.xlane.f32.xlu1 %v2075_v22 }
0x2988   :  { %v2040_v23 = vpop.xlane.xlu1 %2039 }
0x2989   :  { %v2041_v24 = vsel %vm2021_vm3, %v2040_v23, %v1996_v55 }
0x298a   :  { %v2083_v25 = vmul.f32 %v2063_v2, %v2041_v24 }
0x298c   :  { %2084 = vadd.xlane.f32.xlu1 %v2083_v25  ;;  %v2024_v26 = vpop.xlane.xlu1 %2023 }
0x298d   :  { %v2025_v27 = vsel %vm2021_vm3, %v2024_v26, %v1980_v58 }
0x298e   :  { %v2067_v28 = vmul.f32 %v2063_v2, %v2025_v27 }
0x2990   :  { %2068 = vadd.xlane.f32.xlu1 %v2067_v28  ;;  %v2048_v29 = vpop.xlane.xlu1 %2047 }
0x2991   :  { %v2049_v30 = vsel %vm2021_vm3, %v2048_v29, %v2004_v61 }
0x2992   :  { %v2091_v31 = vmul.f32 %v2063_v2, %v2049_v30 }
0x2994   :  { %2092 = vadd.xlane.f32.xlu1 %v2091_v31  ;;  %v2056_v32 = vpop.xlane.xlu1 %2055 }
0x2995   :  { %v2057_v33 = vsel %vm2021_vm3, %v2056_v32, %v2012_v0 }
0x2996   :  { %v2099_v34 = vmul.f32 %v2063_v2, %v2057_v33 }
0x2998   :  { %2100 = vadd.xlane.f32.xlu1 %v2099_v34  ;;  %v2073_v36 = vpop.xlane.xlu0 %2072 }
0x2999   :  { %v2074_v37 = vsel %vm2066_vm4, %v2073_v36, %v2029_v4  ;;  %v2198_v36 = vld [vmem:[#allocation0 + $0x4d] ss:$0 sm:$0xff] }
0x299a   :  { %v2116_v38 = vmul.f32 %v2108_v35, %v2074_v37 }
0x299c   :  { %2117 = vadd.xlane.f32.xlu0 %v2116_v38  ;;  %v2081_v39 = vpop.xlane.xlu0 %2080 }
0x299d   :  { %v2082_v40 = vsel %vm2066_vm4, %v2081_v39, %v2037_v7 }
0x299e   :  { %v2124_v41 = vmul.f32 %v2108_v35, %v2082_v40 }
0x29a0   :  { %2125 = vadd.xlane.f32.xlu0 %v2124_v41  ;;  %v2089_v43 = vpop.xlane.xlu0 %2088 }
0x29a1   :  { %v2090_v44 = vsel %vm2066_vm4, %v2089_v43, %v2045_v10 }
0x29a2   :  { %v2132_v45 = vmul.f32 %v2108_v35, %v2090_v44 }
0x29a4   :  { %2133 = vadd.xlane.f32.xlu0 %v2132_v45  ;;  %v2097_v46 = vpop.xlane.xlu0 %2096 }
0x29a5   :  { %v2098_v47 = vsel %vm2066_vm4, %v2097_v46, %v2053_v15 }
0x29a6   :  { %v2140_v48 = vmul.f32 %v2108_v35, %v2098_v47 }
0x29a8   :  { %2141 = vadd.xlane.f32.xlu0 %v2140_v48  ;;  %v2105_v49 = vpop.xlane.xlu0 %2104 }
0x29a9   :  { %v2106_v50 = vsel %vm2066_vm4, %v2105_v49, %v2061_v18 }
0x29aa   :  { %v2148_v51 = vmul.f32 %v2108_v35, %v2106_v50 }
0x29ac   :  { %2149 = vadd.xlane.f32.xlu0 %v2148_v51 }
0x2a11   :  { %v2077_v52 = vpop.xlane.xlu1 %2076 }
0x2a12   :  { %v2078_v53 = vsel %vm2066_vm4, %v2077_v52, %v2033_v21 }
0x2a13   :  { %v2120_v54 = vmul.f32 %v2108_v35, %v2078_v53 }
0x2a15   :  { %2121 = vadd.xlane.f32.xlu1 %v2120_v54 }
0x2a19   :  { %v2085_v55 = vpop.xlane.xlu1 %2084 }
0x2a1a   :  { %v2086_v56 = vsel %vm2066_vm4, %v2085_v55, %v2041_v24 }
0x2a1b   :  { %v2128_v57 = vmul.f32 %v2108_v35, %v2086_v56 }
0x2a1d   :  { %2129 = vadd.xlane.f32.xlu1 %v2128_v57  ;;  %v2069_v58 = vpop.xlane.xlu1 %2068 }
0x2a1e   :  { %v2070_v59 = vsel %vm2066_vm4, %v2069_v58, %v2025_v27 }
0x2a1f   :  { %v2112_v60 = vmul.f32 %v2108_v35, %v2070_v59 }
0x2a21   :  { %2113 = vadd.xlane.f32.xlu1 %v2112_v60  ;;  %v2093_v61 = vpop.xlane.xlu1 %2092 }
0x2a22   :  { %v2094_v62 = vsel %vm2066_vm4, %v2093_v61, %v2049_v30 }
0x2a23   :  { %v2136_v63 = vmul.f32 %v2108_v35, %v2094_v62 }
0x2a25   :  { %2137 = vadd.xlane.f32.xlu1 %v2136_v63  ;;  %v2101_v0 = vpop.xlane.xlu1 %2100 }
0x2a26   :  { %v2102_v1 = vsel %vm2066_vm4, %v2101_v0, %v2057_v33  ;;  %vm2728_vm4 = vcmp.eq.s32.totalorder %v5549_v11, 88 }
0x2a27   :  { %v2144_v2 = vmul.f32 %v2108_v35, %v2102_v1 }
0x2a29   :  { %2145 = vadd.xlane.f32.xlu1 %v2144_v2  ;;  %v2118_v4 = vpop.xlane.xlu0 %2117 }
0x2a2a   :  { %v2119_v5 = vsel %vm2111_vm5, %v2118_v4, %v2074_v37  ;;  %v2243_v4 = vld [vmem:[#allocation0 + $0x4e] ss:$0 sm:$0xff] }
0x2a2b   :  { %v2161_v6 = vmul.f32 %v2153_v3, %v2119_v5 }
0x2a2d   :  { %2162 = vadd.xlane.f32.xlu0 %v2161_v6  ;;  %v2126_v7 = vpop.xlane.xlu0 %2125 }
0x2a2e   :  { %v2127_v8 = vsel %vm2111_vm5, %v2126_v7, %v2082_v40 }
0x2a2f   :  { %v2169_v9 = vmul.f32 %v2153_v3, %v2127_v8 }
0x2a31   :  { %2170 = vadd.xlane.f32.xlu0 %v2169_v9  ;;  %v2134_v10 = vpop.xlane.xlu0 %2133 }
0x2a32   :  { %v2135_v13 = vsel %vm2111_vm5, %v2134_v10, %v2090_v44 }
0x2a33   :  { %v2177_v14 = vmul.f32 %v2153_v3, %v2135_v13 }
0x2a35   :  { %2178 = vadd.xlane.f32.xlu0 %v2177_v14  ;;  %v2142_v15 = vpop.xlane.xlu0 %2141 }
0x2a36   :  { %v2143_v16 = vsel %vm2111_vm5, %v2142_v15, %v2098_v47 }
0x2a37   :  { %v2185_v17 = vmul.f32 %v2153_v3, %v2143_v16 }
0x2a39   :  { %2186 = vadd.xlane.f32.xlu0 %v2185_v17  ;;  %v2150_v18 = vpop.xlane.xlu0 %2149 }
0x2a3a   :  { %v2151_v19 = vsel %vm2111_vm5, %v2150_v18, %v2106_v50 }
0x2a3b   :  { %v2193_v20 = vmul.f32 %v2153_v3, %v2151_v19 }
0x2a3d   :  { %2194 = vadd.xlane.f32.xlu0 %v2193_v20 }
0x2aa2   :  { %v2122_v21 = vpop.xlane.xlu1 %2121 }
0x2aa3   :  { %v2123_v22 = vsel %vm2111_vm5, %v2122_v21, %v2078_v53 }
0x2aa4   :  { %v2165_v23 = vmul.f32 %v2153_v3, %v2123_v22 }
0x2aa6   :  { %2166 = vadd.xlane.f32.xlu1 %v2165_v23 }
0x2aaa   :  { %v2130_v24 = vpop.xlane.xlu1 %2129 }
0x2aab   :  { %v2131_v25 = vsel %vm2111_vm5, %v2130_v24, %v2086_v56 }
0x2aac   :  { %v2173_v26 = vmul.f32 %v2153_v3, %v2131_v25 }
0x2aae   :  { %2174 = vadd.xlane.f32.xlu1 %v2173_v26  ;;  %v2114_v27 = vpop.xlane.xlu1 %2113 }
0x2aaf   :  { %v2115_v28 = vsel %vm2111_vm5, %v2114_v27, %v2070_v59 }
0x2ab0   :  { %v2157_v29 = vmul.f32 %v2153_v3, %v2115_v28 }
0x2ab2   :  { %2158 = vadd.xlane.f32.xlu1 %v2157_v29  ;;  %v2138_v30 = vpop.xlane.xlu1 %2137 }
0x2ab3   :  { %v2139_v31 = vsel %vm2111_vm5, %v2138_v30, %v2094_v62 }
0x2ab4   :  { %v2181_v32 = vmul.f32 %v2153_v3, %v2139_v31 }
0x2ab6   :  { %2182 = vadd.xlane.f32.xlu1 %v2181_v32  ;;  %v2146_v33 = vpop.xlane.xlu1 %2145 }
0x2ab7   :  { %v2147_v34 = vsel %vm2111_vm5, %v2146_v33, %v2102_v1  ;;  %vm2781_vm5 = vcmp.eq.s32.totalorder %v5549_v11, 89 }
0x2ab8   :  { %v2189_v35 = vmul.f32 %v2153_v3, %v2147_v34 }
0x2aba   :  { %2190 = vadd.xlane.f32.xlu1 %v2189_v35  ;;  %v2163_v37 = vpop.xlane.xlu0 %2162 }
0x2abb   :  { %v2164_v38 = vsel %vm2156_vm6, %v2163_v37, %v2119_v5  ;;  %v2288_v37 = vld [vmem:[#allocation0 + $0x4f] ss:$0 sm:$0xff] }
0x2abc   :  { %v2206_v39 = vmul.f32 %v2198_v36, %v2164_v38 }
0x2abe   :  { %2207 = vadd.xlane.f32.xlu0 %v2206_v39  ;;  %v2171_v40 = vpop.xlane.xlu0 %2170 }
0x2abf   :  { %v2172_v41 = vsel %vm2156_vm6, %v2171_v40, %v2127_v8 }
0x2ac0   :  { %v2214_v43 = vmul.f32 %v2198_v36, %v2172_v41 }
0x2ac2   :  { %2215 = vadd.xlane.f32.xlu0 %v2214_v43  ;;  %v2179_v44 = vpop.xlane.xlu0 %2178 }
0x2ac3   :  { %v2180_v45 = vsel %vm2156_vm6, %v2179_v44, %v2135_v13 }
0x2ac4   :  { %v2222_v46 = vmul.f32 %v2198_v36, %v2180_v45 }
0x2ac6   :  { %2223 = vadd.xlane.f32.xlu0 %v2222_v46  ;;  %v2187_v47 = vpop.xlane.xlu0 %2186 }
0x2ac7   :  { %v2188_v48 = vsel %vm2156_vm6, %v2187_v47, %v2143_v16 }
0x2ac8   :  { %v2230_v49 = vmul.f32 %v2198_v36, %v2188_v48 }
0x2aca   :  { %2231 = vadd.xlane.f32.xlu0 %v2230_v49  ;;  %v2195_v50 = vpop.xlane.xlu0 %2194 }
0x2acb   :  { %v2196_v51 = vsel %vm2156_vm6, %v2195_v50, %v2151_v19 }
0x2acc   :  { %v2238_v52 = vmul.f32 %v2198_v36, %v2196_v51 }
0x2ace   :  { %2239 = vadd.xlane.f32.xlu0 %v2238_v52 }
0x2b33   :  { %v2167_v53 = vpop.xlane.xlu1 %2166 }
0x2b34   :  { %v2168_v54 = vsel %vm2156_vm6, %v2167_v53, %v2123_v22 }
0x2b35   :  { %v2210_v55 = vmul.f32 %v2198_v36, %v2168_v54 }
0x2b37   :  { %2211 = vadd.xlane.f32.xlu1 %v2210_v55 }
0x2b3b   :  { %v2175_v56 = vpop.xlane.xlu1 %2174 }
0x2b3c   :  { %v2176_v57 = vsel %vm2156_vm6, %v2175_v56, %v2131_v25 }
0x2b3d   :  { %v2218_v58 = vmul.f32 %v2198_v36, %v2176_v57 }
0x2b3f   :  { %2219 = vadd.xlane.f32.xlu1 %v2218_v58  ;;  %v2159_v59 = vpop.xlane.xlu1 %2158 }
0x2b40   :  { %v2160_v60 = vsel %vm2156_vm6, %v2159_v59, %v2115_v28 }
0x2b41   :  { %v2202_v61 = vmul.f32 %v2198_v36, %v2160_v60 }
0x2b43   :  { %2203 = vadd.xlane.f32.xlu1 %v2202_v61  ;;  %v2183_v62 = vpop.xlane.xlu1 %2182 }
0x2b44   :  { %v2184_v63 = vsel %vm2156_vm6, %v2183_v62, %v2139_v31 }
0x2b45   :  { %v2226_v0 = vmul.f32 %v2198_v36, %v2184_v63 }
0x2b47   :  { %2227 = vadd.xlane.f32.xlu1 %v2226_v0  ;;  %v2191_v1 = vpop.xlane.xlu1 %2190 }
0x2b48   :  { %v2192_v2 = vsel %vm2156_vm6, %v2191_v1, %v2147_v34  ;;  %vm2834_vm6 = vcmp.eq.s32.totalorder %v5549_v11, 90 }
0x2b49   :  { %v2234_v3 = vmul.f32 %v2198_v36, %v2192_v2 }
0x2b4b   :  { %2235 = vadd.xlane.f32.xlu1 %v2234_v3  ;;  %v2208_v5 = vpop.xlane.xlu0 %2207 }
0x2b4c   :  { %v2209_v6 = vsel %vm2201_vm7, %v2208_v5, %v2164_v38  ;;  %v2333_v5 = vld [vmem:[#allocation0 + $0x50] ss:$0 sm:$0xff] }
0x2b4d   :  { %v2251_v7 = vmul.f32 %v2243_v4, %v2209_v6 }
0x2b4f   :  { %2252 = vadd.xlane.f32.xlu0 %v2251_v7  ;;  %v2216_v8 = vpop.xlane.xlu0 %2215 }
0x2b50   :  { %v2217_v9 = vsel %vm2201_vm7, %v2216_v8, %v2172_v41 }
0x2b51   :  { %v2259_v10 = vmul.f32 %v2243_v4, %v2217_v9 }
0x2b53   :  { %2260 = vadd.xlane.f32.xlu0 %v2259_v10  ;;  %v2224_v13 = vpop.xlane.xlu0 %2223 }
0x2b54   :  { %v2225_v14 = vsel %vm2201_vm7, %v2224_v13, %v2180_v45 }
0x2b55   :  { %v2267_v15 = vmul.f32 %v2243_v4, %v2225_v14 }
0x2b57   :  { %2268 = vadd.xlane.f32.xlu0 %v2267_v15  ;;  %v2232_v16 = vpop.xlane.xlu0 %2231 }
0x2b58   :  { %v2233_v17 = vsel %vm2201_vm7, %v2232_v16, %v2188_v48 }
0x2b59   :  { %v2275_v18 = vmul.f32 %v2243_v4, %v2233_v17 }
0x2b5b   :  { %2276 = vadd.xlane.f32.xlu0 %v2275_v18  ;;  %v2240_v19 = vpop.xlane.xlu0 %2239 }
0x2b5c   :  { %v2241_v20 = vsel %vm2201_vm7, %v2240_v19, %v2196_v51 }
0x2b5d   :  { %v2283_v21 = vmul.f32 %v2243_v4, %v2241_v20 }
0x2b5f   :  { %2284 = vadd.xlane.f32.xlu0 %v2283_v21 }
0x2bc4   :  { %v2212_v22 = vpop.xlane.xlu1 %2211 }
0x2bc5   :  { %v2213_v23 = vsel %vm2201_vm7, %v2212_v22, %v2168_v54 }
0x2bc6   :  { %v2255_v24 = vmul.f32 %v2243_v4, %v2213_v23 }
0x2bc8   :  { %2256 = vadd.xlane.f32.xlu1 %v2255_v24 }
0x2bcc   :  { %v2220_v25 = vpop.xlane.xlu1 %2219 }
0x2bcd   :  { %v2221_v26 = vsel %vm2201_vm7, %v2220_v25, %v2176_v57 }
0x2bce   :  { %v2263_v27 = vmul.f32 %v2243_v4, %v2221_v26 }
0x2bd0   :  { %2264 = vadd.xlane.f32.xlu1 %v2263_v27  ;;  %v2204_v28 = vpop.xlane.xlu1 %2203 }
0x2bd1   :  { %v2205_v29 = vsel %vm2201_vm7, %v2204_v28, %v2160_v60 }
0x2bd2   :  { %v2247_v30 = vmul.f32 %v2243_v4, %v2205_v29 }
0x2bd4   :  { %2248 = vadd.xlane.f32.xlu1 %v2247_v30  ;;  %v2228_v31 = vpop.xlane.xlu1 %2227 }
0x2bd5   :  { %v2229_v32 = vsel %vm2201_vm7, %v2228_v31, %v2184_v63 }
0x2bd6   :  { %v2271_v33 = vmul.f32 %v2243_v4, %v2229_v32 }
0x2bd8   :  { %2272 = vadd.xlane.f32.xlu1 %v2271_v33  ;;  %v2236_v34 = vpop.xlane.xlu1 %2235  ;;  %v143_v33 = vadd.s32 80, %v5551_v12 }
0x2bd9   :  { %v2237_v35 = vsel %vm2201_vm7, %v2236_v34, %v2192_v2  ;;  %vm2887_vm7 = vcmp.eq.s32.totalorder %v5549_v11, 91 }
0x2bda   :  { %v2279_v36 = vmul.f32 %v2243_v4, %v2237_v35  ;;  %vm144_vm10 = vcmp.eq.s32.totalorder %v5549_v11, %v143_v33 }
0x2bdc   :  { %2280 = vadd.xlane.f32.xlu1 %v2279_v36  ;;  %v2253_v38 = vpop.xlane.xlu0 %2252 }
0x2bdd   :  { %v2254_v39 = vsel %vm2246_vm8, %v2253_v38, %v2209_v6 }
0x2bde   :  { %v2296_v40 = vmul.f32 %v2288_v37, %v2254_v39 }
0x2be0   :  { %2297 = vadd.xlane.f32.xlu0 %v2296_v40  ;;  %v2261_v41 = vpop.xlane.xlu0 %2260 }
0x2be1   :  { %v2262_v43 = vsel %vm2246_vm8, %v2261_v41, %v2217_v9 }
0x2be2   :  { %v2304_v44 = vmul.f32 %v2288_v37, %v2262_v43 }
0x2be4   :  { %2305 = vadd.xlane.f32.xlu0 %v2304_v44  ;;  %v2269_v45 = vpop.xlane.xlu0 %2268  ;;  %v2382_v44 = vld [vmem:[#allocation0 + $0x51] ss:$0 sm:$0xff] }
0x2be5   :  { %v2270_v46 = vsel %vm2246_vm8, %v2269_v45, %v2225_v14 }
0x2be6   :  { %v2312_v47 = vmul.f32 %v2288_v37, %v2270_v46 }
0x2be8   :  { %2313 = vadd.xlane.f32.xlu0 %v2312_v47  ;;  %v2277_v48 = vpop.xlane.xlu0 %2276 }
0x2be9   :  { %v2278_v49 = vsel %vm2246_vm8, %v2277_v48, %v2233_v17 }
0x2bea   :  { %v2320_v50 = vmul.f32 %v2288_v37, %v2278_v49 }
0x2bec   :  { %2321 = vadd.xlane.f32.xlu0 %v2320_v50  ;;  %v2285_v51 = vpop.xlane.xlu0 %2284 }
0x2bed   :  { %v2286_v52 = vsel %vm2246_vm8, %v2285_v51, %v2241_v20 }
0x2bee   :  { %v2328_v53 = vmul.f32 %v2288_v37, %v2286_v52 }
0x2bf0   :  { %2329 = vadd.xlane.f32.xlu0 %v2328_v53 }
0x2c55   :  { %v2257_v54 = vpop.xlane.xlu1 %2256 }
0x2c56   :  { %v2258_v55 = vsel %vm2246_vm8, %v2257_v54, %v2213_v23 }
0x2c57   :  { %v2300_v56 = vmul.f32 %v2288_v37, %v2258_v55 }
0x2c59   :  { %2301 = vadd.xlane.f32.xlu1 %v2300_v56 }
0x2c5d   :  { %v2265_v57 = vpop.xlane.xlu1 %2264 }
0x2c5e   :  { %v2266_v58 = vsel %vm2246_vm8, %v2265_v57, %v2221_v26 }
0x2c5f   :  { %v2308_v59 = vmul.f32 %v2288_v37, %v2266_v58 }
0x2c61   :  { %2309 = vadd.xlane.f32.xlu1 %v2308_v59  ;;  %v2249_v60 = vpop.xlane.xlu1 %2248 }
0x2c62   :  { %v2250_v61 = vsel %vm2246_vm8, %v2249_v60, %v2205_v29 }
0x2c63   :  { %v2292_v62 = vmul.f32 %v2288_v37, %v2250_v61 }
0x2c65   :  { %2293 = vadd.xlane.f32.xlu1 %v2292_v62  ;;  %v2273_v63 = vpop.xlane.xlu1 %2272 }
0x2c66   :  { %v2274_v0 = vsel %vm2246_vm8, %v2273_v63, %v2229_v32 }
0x2c67   :  { %v2316_v1 = vmul.f32 %v2288_v37, %v2274_v0 }
0x2c69   :  { %2317 = vadd.xlane.f32.xlu1 %v2316_v1  ;;  %v2281_v2 = vpop.xlane.xlu1 %2280 }
0x2c6a   :  { %v2282_v3 = vsel %vm2246_vm8, %v2281_v2, %v2237_v35  ;;  %vm2940_vm8 = vcmp.eq.s32.totalorder %v5549_v11, 92 }
0x2c6b   :  { %v2324_v4 = vmul.f32 %v2288_v37, %v2282_v3 }
0x2c6d   :  { %2325 = vadd.xlane.f32.xlu1 %v2324_v4  ;;  %v2298_v6 = vpop.xlane.xlu0 %2297 }
0x2c6e   :  { %v2299_v7 = vsel %vm2291_vm9, %v2298_v6, %v2254_v39  ;;  %v145_v39 = vsel %vm144_vm10, 1.0, %v5521_v42  ;;  %vm3046_vm10 = vcmp.eq.s32.totalorder %v5549_v11, 94 }
0x2c6f   :  { %v2341_v8 = vmul.f32 %v2333_v5, %v2299_v7 }
0x2c71   :  { %2342 = vadd.xlane.f32.xlu0 %v2341_v8  ;;  %v2306_v9 = vpop.xlane.xlu0 %2305 }
0x2c72   :  { %v2307_v10 = vsel %vm2291_vm9, %v2306_v9, %v2262_v43  ;;  %v2377_v43 = vmul.f32 %v2333_v5, %v145_v39 }
0x2c73   :  { %v2349_v13 = vmul.f32 %v2333_v5, %v2307_v10 }
0x2c75   :  { %2350 = vadd.xlane.f32.xlu0 %v2349_v13  ;;  %v2314_v14 = vpop.xlane.xlu0 %2313 }
0x2c76   :  { %v2315_v15 = vsel %vm2291_vm9, %v2314_v14, %v2270_v46  ;;  %v2431_v14 = vld [vmem:[#allocation0 + $0x52] ss:$0 sm:$0xff] }
0x2c77   :  { %v2357_v16 = vmul.f32 %v2333_v5, %v2315_v15 }
0x2c79   :  { %2358 = vadd.xlane.f32.xlu0 %v2357_v16  ;;  %v2322_v17 = vpop.xlane.xlu0 %2321 }
0x2c7a   :  { %v2323_v18 = vsel %vm2291_vm9, %v2322_v17, %v2278_v49 }
0x2c7b   :  { %v2365_v19 = vmul.f32 %v2333_v5, %v2323_v18 }
0x2c7d   :  { %2366 = vadd.xlane.f32.xlu0 %v2365_v19  ;;  %v2330_v20 = vpop.xlane.xlu0 %2329 }
0x2c7e   :  { %v2331_v21 = vsel %vm2291_vm9, %v2330_v20, %v2286_v52 }
0x2c7f   :  { %v2373_v22 = vmul.f32 %v2333_v5, %v2331_v21 }
0x2c81   :  { %2374 = vadd.xlane.f32.xlu0 %v2373_v22 }
0x2ce6   :  { %v2302_v23 = vpop.xlane.xlu1 %2301 }
0x2ce7   :  { %v2303_v24 = vsel %vm2291_vm9, %v2302_v23, %v2258_v55 }
0x2ce8   :  { %v2345_v25 = vmul.f32 %v2333_v5, %v2303_v24 }
0x2cea   :  { %2346 = vadd.xlane.f32.xlu1 %v2345_v25 }
0x2cee   :  { %v2310_v26 = vpop.xlane.xlu1 %2309 }
0x2cef   :  { %v2311_v27 = vsel %vm2291_vm9, %v2310_v26, %v2266_v58 }
0x2cf0   :  { %v2353_v28 = vmul.f32 %v2333_v5, %v2311_v27 }
0x2cf2   :  { %2354 = vadd.xlane.f32.xlu1 %v2353_v28  ;;  %v2294_v29 = vpop.xlane.xlu1 %2293 }
0x2cf3   :  { %v2295_v34 = vsel %vm2291_vm9, %v2294_v29, %v2250_v61 }
0x2cf4   :  { %v2337_v36 = vmul.f32 %v2333_v5, %v2295_v34 }
0x2cf6   :  { %v2318_v30 = vpop.xlane.xlu1 %2317 }
0x2cf7   :  { %v2319_v31 = vsel %vm2291_vm9, %v2318_v30, %v2274_v0 }
0x2cf8   :  { %v2361_v32 = vmul.f32 %v2333_v5, %v2319_v31 }
0x2cfa   :  { %2362 = vadd.xlane.f32.xlu1 %v2361_v32  ;;  %v2326_v35 = vpop.xlane.xlu1 %2325 }
0x2cfb   :  { %v2327_v37 = vsel %vm2291_vm9, %v2326_v35, %v2282_v3  ;;  %vm2993_vm9 = vcmp.eq.s32.totalorder %v5549_v11, 93 }
0x2cfc   :  { %v2369_v40 = vmul.f32 %v2333_v5, %v2327_v37 }
0x2cfe   :  { %2338 = vadd.xlane.f32.xlu1 %v2337_v36  ;;  %v2343_v38 = vpop.xlane.xlu0 %2342 }
0x2cff   :  { %v2344_v45 = vsel %vm2336_vm11, %v2343_v38, %v2299_v7 }
0x2d00   :  { %v2390_v47 = vmul.f32 %v2382_v44, %v2344_v45 }
0x2d02   :  { %2370 = vadd.xlane.f32.xlu1 %v2369_v40  ;;  %v2351_v41 = vpop.xlane.xlu0 %2350 }
0x2d03   :  { %v2352_v48 = vsel %vm2336_vm11, %v2351_v41, %v2307_v10 }
0x2d04   :  { %v2398_v49 = vmul.f32 %v2382_v44, %v2352_v48 }
0x2d06   :  { %2378 = vadd.xlane.f32.xlu1 %v2377_v43  ;;  %v2359_v46 = vpop.xlane.xlu0 %2358 }
0x2d07   :  { %v2360_v51 = vsel %vm2336_vm11, %v2359_v46, %v2315_v15 }
0x2d08   :  { %v2406_v52 = vmul.f32 %v2382_v44, %v2360_v51 }
0x2d0a   :  { %2391 = vadd.xlane.f32.xlu1 %v2390_v47  ;;  %v2367_v50 = vpop.xlane.xlu0 %2366 }
0x2d0b   :  { %v2368_v53 = vsel %vm2336_vm11, %v2367_v50, %v2323_v18 }
0x2d0c   :  { %v2414_v55 = vmul.f32 %v2382_v44, %v2368_v53 }
0x2d0e   :  { %2399 = vadd.xlane.f32.xlu1 %v2398_v49  ;;  %v2375_v54 = vpop.xlane.xlu0 %2374  ;;  %v2480_v49 = vld [vmem:[#allocation0 + $0x53] ss:$0 sm:$0xff] }
0x2d0f   :  { %v2376_v56 = vsel %vm2336_vm11, %v2375_v54, %v2331_v21 }
0x2d10   :  { %v2422_v57 = vmul.f32 %v2382_v44, %v2376_v56 }
0x2d12   :  { %2407 = vadd.xlane.f32.xlu1 %v2406_v52 }
0x2d16   :  { %2415 = vadd.xlane.f32.xlu1 %v2414_v55 }
0x2d1a   :  { %2423 = vadd.xlane.f32.xlu1 %v2422_v57 }
0x2d77   :  { %v2347_v58 = vpop.xlane.xlu1 %2346 }
0x2d78   :  { %v2348_v59 = vsel %vm2336_vm11, %v2347_v58, %v2303_v24 }
0x2d79   :  { %v2394_v60 = vmul.f32 %v2382_v44, %v2348_v59 }
0x2d7b   :  { %2395 = vadd.xlane.f32.xlu0 %v2394_v60 }
0x2d7f   :  { %v2355_v61 = vpop.xlane.xlu1 %2354 }
0x2d80   :  { %v2356_v62 = vsel %vm2336_vm11, %v2355_v61, %v2311_v27 }
0x2d81   :  { %v2402_v63 = vmul.f32 %v2382_v44, %v2356_v62 }
0x2d83   :  { %2403 = vadd.xlane.f32.xlu0 %v2402_v63 }
0x2d87   :  { %v2363_v0 = vpop.xlane.xlu1 %2362 }
0x2d88   :  { %v2364_v1 = vsel %vm2336_vm11, %v2363_v0, %v2319_v31 }
0x2d89   :  { %v2410_v2 = vmul.f32 %v2382_v44, %v2364_v1 }
0x2d8b   :  { %v2339_v3 = vpop.xlane.xlu1 %2338  ;;  %2411 = vadd.xlane.f32.xlu0 %v2410_v2 }
0x2d8c   :  { %v2340_v4 = vsel %vm2336_vm11, %v2339_v3, %v2295_v34 }
0x2d8d   :  { %v2386_v5 = vmul.f32 %v2382_v44, %v2340_v4 }
0x2d8f   :  { %v2371_v6 = vpop.xlane.xlu1 %2370  ;;  %2387 = vadd.xlane.f32.xlu0 %v2386_v5 }
0x2d90   :  { %v2372_v7 = vsel %vm2336_vm11, %v2371_v6, %v2327_v37 }
0x2d91   :  { %v2418_v8 = vmul.f32 %v2382_v44, %v2372_v7 }
0x2d93   :  { %v2379_v9 = vpop.xlane.xlu1 %2378  ;;  %2419 = vadd.xlane.f32.xlu0 %v2418_v8 }
0x2d94   :  { %v2380_v10 = vsel %vm2336_vm11, %v2379_v9, %v145_v39  ;;  %vm3099_vm11 = vcmp.eq.s32.totalorder %v5549_v11, 95 }
0x2d95   :  { %v2426_v13 = vmul.f32 %v2382_v44, %v2380_v10 }
0x2d97   :  { %2427 = vadd.xlane.f32.xlu0 %v2426_v13  ;;  %v2392_v15 = vpop.xlane.xlu1 %2391 }
0x2d98   :  { %v2393_v16 = vsel %vm2385_vm12, %v2392_v15, %v2344_v45 }
0x2d99   :  { %v2439_v17 = vmul.f32 %v2431_v14, %v2393_v16 }
0x2d9b   :  { %2440 = vadd.xlane.f32.xlu0 %v2439_v17  ;;  %v2400_v18 = vpop.xlane.xlu1 %2399 }
0x2d9c   :  { %v2401_v19 = vsel %vm2385_vm12, %v2400_v18, %v2352_v48 }
0x2d9d   :  { %v2447_v20 = vmul.f32 %v2431_v14, %v2401_v19 }
0x2d9f   :  { %2448 = vadd.xlane.f32.xlu0 %v2447_v20  ;;  %v2408_v21 = vpop.xlane.xlu1 %2407 }
0x2da0   :  { %v2409_v22 = vsel %vm2385_vm12, %v2408_v21, %v2360_v51  ;;  %v2529_v21 = vld [vmem:[#allocation0 + $0x54] ss:$0 sm:$0xff] }
0x2da1   :  { %v2455_v23 = vmul.f32 %v2431_v14, %v2409_v22 }
0x2da3   :  { %2456 = vadd.xlane.f32.xlu0 %v2455_v23  ;;  %v2416_v24 = vpop.xlane.xlu1 %2415 }
0x2da4   :  { %v2417_v25 = vsel %vm2385_vm12, %v2416_v24, %v2368_v53 }
0x2da5   :  { %v2463_v26 = vmul.f32 %v2431_v14, %v2417_v25 }
0x2da7   :  { %2464 = vadd.xlane.f32.xlu0 %v2463_v26  ;;  %v2424_v27 = vpop.xlane.xlu1 %2423 }
0x2da8   :  { %v2425_v28 = vsel %vm2385_vm12, %v2424_v27, %v2376_v56 }
0x2da9   :  { %v2471_v29 = vmul.f32 %v2431_v14, %v2425_v28 }
0x2dab   :  { %2472 = vadd.xlane.f32.xlu0 %v2471_v29 }
0x2e08   :  { %v2396_v30 = vpop.xlane.xlu0 %2395 }
0x2e09   :  { %v2397_v31 = vsel %vm2385_vm12, %v2396_v30, %v2348_v59 }
0x2e0a   :  { %v2443_v32 = vmul.f32 %v2431_v14, %v2397_v31 }
0x2e0c   :  { %2444 = vadd.xlane.f32.xlu1 %v2443_v32 }
0x2e10   :  { %v2404_v33 = vpop.xlane.xlu0 %2403 }
0x2e11   :  { %v2405_v34 = vsel %vm2385_vm12, %v2404_v33, %v2356_v62 }
0x2e12   :  { %v2451_v35 = vmul.f32 %v2431_v14, %v2405_v34 }
0x2e14   :  { %2452 = vadd.xlane.f32.xlu1 %v2451_v35 }
0x2e18   :  { %v2412_v36 = vpop.xlane.xlu0 %2411 }
0x2e19   :  { %v2413_v37 = vsel %vm2385_vm12, %v2412_v36, %v2364_v1 }
0x2e1a   :  { %v2459_v38 = vmul.f32 %v2431_v14, %v2413_v37 }
0x2e1c   :  { %2460 = vadd.xlane.f32.xlu1 %v2459_v38  ;;  %v2388_v39 = vpop.xlane.xlu0 %2387 }
0x2e1d   :  { %v2389_v40 = vsel %vm2385_vm12, %v2388_v39, %v2340_v4 }
0x2e1e   :  { %v2435_v41 = vmul.f32 %v2431_v14, %v2389_v40 }
0x2e20   :  { %2436 = vadd.xlane.f32.xlu1 %v2435_v41  ;;  %v2420_v43 = vpop.xlane.xlu0 %2419 }
0x2e21   :  { %v2421_v44 = vsel %vm2385_vm12, %v2420_v43, %v2372_v7 }
0x2e22   :  { %v2467_v45 = vmul.f32 %v2431_v14, %v2421_v44 }
0x2e24   :  { %2468 = vadd.xlane.f32.xlu1 %v2467_v45  ;;  %v2428_v46 = vpop.xlane.xlu0 %2427 }
0x2e25   :  { %v2429_v47 = vsel %vm2385_vm12, %v2428_v46, %v2380_v10 }
0x2e26   :  { %v2475_v48 = vmul.f32 %v2431_v14, %v2429_v47 }
0x2e28   :  { %2476 = vadd.xlane.f32.xlu1 %v2475_v48  ;;  %v2441_v50 = vpop.xlane.xlu0 %2440 }
0x2e29   :  { %v2442_v51 = vsel %vm2434_vm13, %v2441_v50, %v2393_v16 }
0x2e2a   :  { %v2488_v52 = vmul.f32 %v2480_v49, %v2442_v51 }
0x2e2c   :  { %2489 = vadd.xlane.f32.xlu1 %v2488_v52  ;;  %v2449_v53 = vpop.xlane.xlu0 %2448 }
0x2e2d   :  { %v2450_v54 = vsel %vm2434_vm13, %v2449_v53, %v2401_v19 }
0x2e2e   :  { %v2496_v55 = vmul.f32 %v2480_v49, %v2450_v54 }
0x2e30   :  { %2497 = vadd.xlane.f32.xlu1 %v2496_v55  ;;  %v2457_v56 = vpop.xlane.xlu0 %2456 }
0x2e31   :  { %v2458_v57 = vsel %vm2434_vm13, %v2457_v56, %v2409_v22  ;;  %v2578_v56 = vld [vmem:[#allocation0 + $0x55] ss:$0 sm:$0xff] }
0x2e32   :  { %v2504_v58 = vmul.f32 %v2480_v49, %v2458_v57 }
0x2e34   :  { %2505 = vadd.xlane.f32.xlu1 %v2504_v58  ;;  %v2465_v59 = vpop.xlane.xlu0 %2464 }
0x2e35   :  { %v2466_v60 = vsel %vm2434_vm13, %v2465_v59, %v2417_v25 }
0x2e36   :  { %v2512_v61 = vmul.f32 %v2480_v49, %v2466_v60 }
0x2e38   :  { %2513 = vadd.xlane.f32.xlu1 %v2512_v61  ;;  %v2473_v62 = vpop.xlane.xlu0 %2472 }
0x2e39   :  { %v2474_v63 = vsel %vm2434_vm13, %v2473_v62, %v2425_v28 }
0x2e3a   :  { %v2520_v0 = vmul.f32 %v2480_v49, %v2474_v63 }
0x2e3c   :  { %2521 = vadd.xlane.f32.xlu1 %v2520_v0 }
0x2e99   :  { %v2445_v1 = vpop.xlane.xlu1 %2444 }
0x2e9a   :  { %v2446_v2 = vsel %vm2434_vm13, %v2445_v1, %v2397_v31 }
0x2e9b   :  { %v2492_v3 = vmul.f32 %v2480_v49, %v2446_v2 }
0x2e9d   :  { %2493 = vadd.xlane.f32.xlu0 %v2492_v3 }
0x2ea1   :  { %v2453_v4 = vpop.xlane.xlu1 %2452 }
0x2ea2   :  { %v2454_v5 = vsel %vm2434_vm13, %v2453_v4, %v2405_v34 }
0x2ea3   :  { %v2500_v6 = vmul.f32 %v2480_v49, %v2454_v5 }
0x2ea5   :  { %2501 = vadd.xlane.f32.xlu0 %v2500_v6 }
0x2ea9   :  { %v2461_v7 = vpop.xlane.xlu1 %2460 }
0x2eaa   :  { %v2462_v8 = vsel %vm2434_vm13, %v2461_v7, %v2413_v37 }
0x2eab   :  { %v2508_v9 = vmul.f32 %v2480_v49, %v2462_v8 }
0x2ead   :  { %2509 = vadd.xlane.f32.xlu0 %v2508_v9  ;;  %v2437_v10 = vpop.xlane.xlu1 %2436 }
0x2eae   :  { %v2438_v13 = vsel %vm2434_vm13, %v2437_v10, %v2389_v40 }
0x2eaf   :  { %v2484_v14 = vmul.f32 %v2480_v49, %v2438_v13 }
0x2eb1   :  { %2485 = vadd.xlane.f32.xlu0 %v2484_v14  ;;  %v2469_v15 = vpop.xlane.xlu1 %2468 }
0x2eb2   :  { %v2470_v16 = vsel %vm2434_vm13, %v2469_v15, %v2421_v44 }
0x2eb3   :  { %v2516_v17 = vmul.f32 %v2480_v49, %v2470_v16 }
0x2eb5   :  { %2517 = vadd.xlane.f32.xlu0 %v2516_v17  ;;  %v2477_v18 = vpop.xlane.xlu1 %2476 }
0x2eb6   :  { %v2478_v19 = vsel %vm2434_vm13, %v2477_v18, %v2429_v47  ;;  %vm3152_vm13 = vcmp.eq.s32.totalorder %v5549_v11, 96 }
0x2eb7   :  { %v2524_v20 = vmul.f32 %v2480_v49, %v2478_v19 }
0x2eb9   :  { %2525 = vadd.xlane.f32.xlu0 %v2524_v20  ;;  %v2490_v22 = vpop.xlane.xlu1 %2489 }
0x2eba   :  { %v2491_v23 = vsel %vm2483_vm14, %v2490_v22, %v2442_v51 }
0x2ebb   :  { %v2537_v24 = vmul.f32 %v2529_v21, %v2491_v23 }
0x2ebd   :  { %2538 = vadd.xlane.f32.xlu0 %v2537_v24  ;;  %v2498_v25 = vpop.xlane.xlu1 %2497 }
0x2ebe   :  { %v2499_v26 = vsel %vm2483_vm14, %v2498_v25, %v2450_v54 }
0x2ebf   :  { %v2545_v27 = vmul.f32 %v2529_v21, %v2499_v26 }
0x2ec1   :  { %2546 = vadd.xlane.f32.xlu0 %v2545_v27  ;;  %v2506_v28 = vpop.xlane.xlu1 %2505 }
0x2ec2   :  { %v2507_v29 = vsel %vm2483_vm14, %v2506_v28, %v2458_v57  ;;  %v2627_v28 = vld [vmem:[#allocation0 + $0x56] ss:$0 sm:$0xff] }
0x2ec3   :  { %v2553_v30 = vmul.f32 %v2529_v21, %v2507_v29 }
0x2ec5   :  { %2554 = vadd.xlane.f32.xlu0 %v2553_v30  ;;  %v2514_v31 = vpop.xlane.xlu1 %2513 }
0x2ec6   :  { %v2515_v32 = vsel %vm2483_vm14, %v2514_v31, %v2466_v60 }
0x2ec7   :  { %v2561_v33 = vmul.f32 %v2529_v21, %v2515_v32 }
0x2ec9   :  { %2562 = vadd.xlane.f32.xlu0 %v2561_v33  ;;  %v2522_v34 = vpop.xlane.xlu1 %2521 }
0x2eca   :  { %v2523_v35 = vsel %vm2483_vm14, %v2522_v34, %v2474_v63 }
0x2ecb   :  { %v2569_v36 = vmul.f32 %v2529_v21, %v2523_v35 }
0x2ecd   :  { %2570 = vadd.xlane.f32.xlu0 %v2569_v36 }
0x2f2a   :  { %v2494_v37 = vpop.xlane.xlu0 %2493 }
0x2f2b   :  { %v2495_v38 = vsel %vm2483_vm14, %v2494_v37, %v2446_v2 }
0x2f2c   :  { %v2541_v39 = vmul.f32 %v2529_v21, %v2495_v38 }
0x2f2e   :  { %2542 = vadd.xlane.f32.xlu1 %v2541_v39 }
0x2f32   :  { %v2502_v40 = vpop.xlane.xlu0 %2501 }
0x2f33   :  { %v2503_v41 = vsel %vm2483_vm14, %v2502_v40, %v2454_v5 }
0x2f34   :  { %v2549_v43 = vmul.f32 %v2529_v21, %v2503_v41 }
0x2f36   :  { %2550 = vadd.xlane.f32.xlu1 %v2549_v43 }
0x2f3a   :  { %v2510_v44 = vpop.xlane.xlu0 %2509 }
0x2f3b   :  { %v2511_v45 = vsel %vm2483_vm14, %v2510_v44, %v2462_v8 }
0x2f3c   :  { %v2557_v46 = vmul.f32 %v2529_v21, %v2511_v45 }
0x2f3e   :  { %2558 = vadd.xlane.f32.xlu1 %v2557_v46  ;;  %v2486_v47 = vpop.xlane.xlu0 %2485 }
0x2f3f   :  { %v2487_v48 = vsel %vm2483_vm14, %v2486_v47, %v2438_v13 }
0x2f40   :  { %v2533_v49 = vmul.f32 %v2529_v21, %v2487_v48 }
0x2f42   :  { %2534 = vadd.xlane.f32.xlu1 %v2533_v49  ;;  %v2518_v50 = vpop.xlane.xlu0 %2517 }
0x2f43   :  { %v2519_v51 = vsel %vm2483_vm14, %v2518_v50, %v2470_v16 }
0x2f44   :  { %v2565_v52 = vmul.f32 %v2529_v21, %v2519_v51 }
0x2f46   :  { %2566 = vadd.xlane.f32.xlu1 %v2565_v52  ;;  %v2526_v53 = vpop.xlane.xlu0 %2525 }
0x2f47   :  { %v2527_v54 = vsel %vm2483_vm14, %v2526_v53, %v2478_v19  ;;  %vm3209_vm14 = vcmp.eq.s32.totalorder %v5549_v11, 97 }
0x2f48   :  { %v2573_v55 = vmul.f32 %v2529_v21, %v2527_v54 }
0x2f4a   :  { %2574 = vadd.xlane.f32.xlu1 %v2573_v55  ;;  %v2539_v57 = vpop.xlane.xlu0 %2538 }
0x2f4b   :  { %v2540_v58 = vsel %vm2532_vm15, %v2539_v57, %v2491_v23 }
0x2f4c   :  { %v2586_v59 = vmul.f32 %v2578_v56, %v2540_v58 }
0x2f4e   :  { %2587 = vadd.xlane.f32.xlu1 %v2586_v59  ;;  %v2547_v60 = vpop.xlane.xlu0 %2546 }
0x2f4f   :  { %v2548_v61 = vsel %vm2532_vm15, %v2547_v60, %v2499_v26 }
0x2f50   :  { %v2594_v62 = vmul.f32 %v2578_v56, %v2548_v61 }
0x2f52   :  { %2595 = vadd.xlane.f32.xlu1 %v2594_v62  ;;  %v2555_v63 = vpop.xlane.xlu0 %2554 }
0x2f53   :  { %v2556_v0 = vsel %vm2532_vm15, %v2555_v63, %v2507_v29  ;;  %v2676_v63 = vld [vmem:[#allocation0 + $0x57] ss:$0 sm:$0xff] }
0x2f54   :  { %v2602_v1 = vmul.f32 %v2578_v56, %v2556_v0 }
0x2f56   :  { %2603 = vadd.xlane.f32.xlu1 %v2602_v1  ;;  %v2563_v2 = vpop.xlane.xlu0 %2562 }
0x2f57   :  { %v2564_v3 = vsel %vm2532_vm15, %v2563_v2, %v2515_v32 }
0x2f58   :  { %v2610_v4 = vmul.f32 %v2578_v56, %v2564_v3 }
0x2f5a   :  { %2611 = vadd.xlane.f32.xlu1 %v2610_v4  ;;  %v2571_v5 = vpop.xlane.xlu0 %2570 }
0x2f5b   :  { %v2572_v6 = vsel %vm2532_vm15, %v2571_v5, %v2523_v35 }
0x2f5c   :  { %v2618_v7 = vmul.f32 %v2578_v56, %v2572_v6 }
0x2f5e   :  { %2619 = vadd.xlane.f32.xlu1 %v2618_v7 }
0x2fbb   :  { %v2543_v8 = vpop.xlane.xlu1 %2542 }
0x2fbc   :  { %v2544_v9 = vsel %vm2532_vm15, %v2543_v8, %v2495_v38 }
0x2fbd   :  { %v2590_v10 = vmul.f32 %v2578_v56, %v2544_v9 }
0x2fbf   :  { %2591 = vadd.xlane.f32.xlu0 %v2590_v10 }
0x2fc3   :  { %v2551_v13 = vpop.xlane.xlu1 %2550 }
0x2fc4   :  { %v2552_v14 = vsel %vm2532_vm15, %v2551_v13, %v2503_v41 }
0x2fc5   :  { %v2598_v15 = vmul.f32 %v2578_v56, %v2552_v14 }
0x2fc7   :  { %2599 = vadd.xlane.f32.xlu0 %v2598_v15 }
0x2fcb   :  { %v2559_v16 = vpop.xlane.xlu1 %2558 }
0x2fcc   :  { %v2560_v17 = vsel %vm2532_vm15, %v2559_v16, %v2511_v45 }
0x2fcd   :  { %v2606_v18 = vmul.f32 %v2578_v56, %v2560_v17 }
0x2fcf   :  { %2607 = vadd.xlane.f32.xlu0 %v2606_v18  ;;  %v2535_v19 = vpop.xlane.xlu1 %2534 }
0x2fd0   :  { %v2536_v20 = vsel %vm2532_vm15, %v2535_v19, %v2487_v48 }
0x2fd1   :  { %v2582_v21 = vmul.f32 %v2578_v56, %v2536_v20 }
0x2fd3   :  { %2583 = vadd.xlane.f32.xlu0 %v2582_v21  ;;  %v2567_v22 = vpop.xlane.xlu1 %2566 }
0x2fd4   :  { %v2568_v23 = vsel %vm2532_vm15, %v2567_v22, %v2519_v51 }
0x2fd5   :  { %v2614_v24 = vmul.f32 %v2578_v56, %v2568_v23 }
0x2fd7   :  { %2615 = vadd.xlane.f32.xlu0 %v2614_v24  ;;  %v2575_v25 = vpop.xlane.xlu1 %2574 }
0x2fd8   :  { %v2576_v26 = vsel %vm2532_vm15, %v2575_v25, %v2527_v54  ;;  %vm3266_vm15 = vcmp.eq.s32.totalorder %v5549_v11, 98 }
0x2fd9   :  { %v2622_v27 = vmul.f32 %v2578_v56, %v2576_v26 }
0x2fdb   :  { %2623 = vadd.xlane.f32.xlu0 %v2622_v27  ;;  %v2588_v29 = vpop.xlane.xlu1 %2587 }
0x2fdc   :  { %v2589_v30 = vsel %vm2581_vm0, %v2588_v29, %v2540_v58 }
0x2fdd   :  { %v2635_v31 = vmul.f32 %v2627_v28, %v2589_v30 }
0x2fdf   :  { %2636 = vadd.xlane.f32.xlu0 %v2635_v31  ;;  %v2596_v32 = vpop.xlane.xlu1 %2595 }
0x2fe0   :  { %v2597_v33 = vsel %vm2581_vm0, %v2596_v32, %v2548_v61 }
0x2fe1   :  { %v2643_v34 = vmul.f32 %v2627_v28, %v2597_v33 }
0x2fe3   :  { %2644 = vadd.xlane.f32.xlu0 %v2643_v34  ;;  %v2604_v35 = vpop.xlane.xlu1 %2603 }
0x2fe4   :  { %v2605_v36 = vsel %vm2581_vm0, %v2604_v35, %v2556_v0  ;;  %v2725_v35 = vld [vmem:[#allocation0 + $0x58] ss:$0 sm:$0xff] }
0x2fe5   :  { %v2651_v37 = vmul.f32 %v2627_v28, %v2605_v36 }
0x2fe7   :  { %2652 = vadd.xlane.f32.xlu0 %v2651_v37  ;;  %v2612_v38 = vpop.xlane.xlu1 %2611 }
0x2fe8   :  { %v2613_v39 = vsel %vm2581_vm0, %v2612_v38, %v2564_v3 }
0x2fe9   :  { %v2659_v40 = vmul.f32 %v2627_v28, %v2613_v39 }
0x2feb   :  { %2660 = vadd.xlane.f32.xlu0 %v2659_v40  ;;  %v2620_v41 = vpop.xlane.xlu1 %2619 }
0x2fec   :  { %v2621_v43 = vsel %vm2581_vm0, %v2620_v41, %v2572_v6 }
0x2fed   :  { %v2667_v44 = vmul.f32 %v2627_v28, %v2621_v43 }
0x2fef   :  { %2668 = vadd.xlane.f32.xlu0 %v2667_v44 }
0x304c   :  { %v2592_v45 = vpop.xlane.xlu0 %2591 }
0x304d   :  { %v2593_v46 = vsel %vm2581_vm0, %v2592_v45, %v2544_v9 }
0x304e   :  { %v2639_v47 = vmul.f32 %v2627_v28, %v2593_v46 }
0x3050   :  { %2640 = vadd.xlane.f32.xlu1 %v2639_v47 }
0x3054   :  { %v2600_v48 = vpop.xlane.xlu0 %2599 }
0x3055   :  { %v2601_v49 = vsel %vm2581_vm0, %v2600_v48, %v2552_v14 }
0x3056   :  { %v2647_v50 = vmul.f32 %v2627_v28, %v2601_v49 }
0x3058   :  { %2648 = vadd.xlane.f32.xlu1 %v2647_v50 }
0x305c   :  { %v2608_v51 = vpop.xlane.xlu0 %2607 }
0x305d   :  { %v2609_v52 = vsel %vm2581_vm0, %v2608_v51, %v2560_v17 }
0x305e   :  { %v2655_v53 = vmul.f32 %v2627_v28, %v2609_v52 }
0x3060   :  { %2656 = vadd.xlane.f32.xlu1 %v2655_v53  ;;  %v2584_v54 = vpop.xlane.xlu0 %2583 }
0x3061   :  { %v2585_v55 = vsel %vm2581_vm0, %v2584_v54, %v2536_v20 }
0x3062   :  { %v2631_v56 = vmul.f32 %v2627_v28, %v2585_v55 }
0x3064   :  { %2632 = vadd.xlane.f32.xlu1 %v2631_v56  ;;  %v2616_v57 = vpop.xlane.xlu0 %2615 }
0x3065   :  { %v2617_v58 = vsel %vm2581_vm0, %v2616_v57, %v2568_v23 }
0x3066   :  { %v2663_v59 = vmul.f32 %v2627_v28, %v2617_v58 }
0x3068   :  { %2664 = vadd.xlane.f32.xlu1 %v2663_v59  ;;  %v2624_v60 = vpop.xlane.xlu0 %2623 }
0x3069   :  { %v2625_v61 = vsel %vm2581_vm0, %v2624_v60, %v2576_v26  ;;  %vm3323_vm0 = vcmp.eq.s32.totalorder %v5549_v11, 99 }
0x306a   :  { %v2671_v62 = vmul.f32 %v2627_v28, %v2625_v61 }
0x306c   :  { %2672 = vadd.xlane.f32.xlu1 %v2671_v62  ;;  %v2637_v0 = vpop.xlane.xlu0 %2636 }
0x306d   :  { %v2638_v1 = vsel %vm2630_vm1, %v2637_v0, %v2589_v30 }
0x306e   :  { %v2684_v2 = vmul.f32 %v2676_v63, %v2638_v1 }
0x3070   :  { %2685 = vadd.xlane.f32.xlu1 %v2684_v2  ;;  %v2645_v3 = vpop.xlane.xlu0 %2644 }
0x3071   :  { %v2646_v4 = vsel %vm2630_vm1, %v2645_v3, %v2597_v33 }
0x3072   :  { %v2692_v5 = vmul.f32 %v2676_v63, %v2646_v4 }
0x3074   :  { %2693 = vadd.xlane.f32.xlu1 %v2692_v5  ;;  %v2653_v6 = vpop.xlane.xlu0 %2652 }
0x3075   :  { %v2654_v7 = vsel %vm2630_vm1, %v2653_v6, %v2605_v36 }
0x3076   :  { %v2700_v8 = vmul.f32 %v2676_v63, %v2654_v7 }
0x3078   :  { %2701 = vadd.xlane.f32.xlu1 %v2700_v8  ;;  %v2661_v9 = vpop.xlane.xlu0 %2660 }
0x3079   :  { %v2662_v10 = vsel %vm2630_vm1, %v2661_v9, %v2613_v39  ;;  %v2778_v9 = vld [vmem:[#allocation0 + $0x59] ss:$0 sm:$0xff] }
0x307a   :  { %v2708_v13 = vmul.f32 %v2676_v63, %v2662_v10 }
0x307c   :  { %2709 = vadd.xlane.f32.xlu1 %v2708_v13  ;;  %v2669_v14 = vpop.xlane.xlu0 %2668 }
0x307d   :  { %v2670_v15 = vsel %vm2630_vm1, %v2669_v14, %v2621_v43 }
0x307e   :  { %v2716_v16 = vmul.f32 %v2676_v63, %v2670_v15 }
0x3080   :  { %2717 = vadd.xlane.f32.xlu1 %v2716_v16 }
0x30dd   :  { %v2641_v17 = vpop.xlane.xlu1 %2640 }
0x30de   :  { %v2642_v18 = vsel %vm2630_vm1, %v2641_v17, %v2593_v46  ;;  %v150_v46 = vadd.s32 88, %v5551_v12 }
0x30df   :  { %v2688_v19 = vmul.f32 %v2676_v63, %v2642_v18 }
0x30e0   :  { %vm151_vm3 = vcmp.eq.s32.totalorder %v5549_v11, %v150_v46 }
0x30e1   :  { %2689 = vadd.xlane.f32.xlu0 %v2688_v19 }
0x30e5   :  { %v2649_v20 = vpop.xlane.xlu1 %2648 }
0x30e6   :  { %v2650_v21 = vsel %vm2630_vm1, %v2649_v20, %v2601_v49 }
0x30e7   :  { %v2696_v22 = vmul.f32 %v2676_v63, %v2650_v21 }
0x30e9   :  { %2697 = vadd.xlane.f32.xlu0 %v2696_v22 }
0x30ed   :  { %v2657_v23 = vpop.xlane.xlu1 %2656 }
0x30ee   :  { %v2658_v24 = vsel %vm2630_vm1, %v2657_v23, %v2609_v52  ;;  %v152_v52 = vsel %vm151_vm3, 1.0, %v5521_v42  ;;  %vm3494_vm3 = vcmp.eq.s32.totalorder %v5549_v11, 102 }
0x30ef   :  { %v2704_v25 = vmul.f32 %v2676_v63, %v2658_v24  ;;  %v2773_v54 = vmul.f32 %v2725_v35, %v152_v52 }
0x30f1   :  { %2705 = vadd.xlane.f32.xlu0 %v2704_v25  ;;  %v2633_v26 = vpop.xlane.xlu1 %2632 }
0x30f2   :  { %v2634_v27 = vsel %vm2630_vm1, %v2633_v26, %v2585_v55 }
0x30f3   :  { %v2680_v28 = vmul.f32 %v2676_v63, %v2634_v27 }
0x30f5   :  { %2681 = vadd.xlane.f32.xlu0 %v2680_v28  ;;  %v2665_v29 = vpop.xlane.xlu1 %2664 }
0x30f6   :  { %v2666_v30 = vsel %vm2630_vm1, %v2665_v29, %v2617_v58 }
0x30f7   :  { %v2712_v31 = vmul.f32 %v2676_v63, %v2666_v30 }
0x30f9   :  { %2713 = vadd.xlane.f32.xlu0 %v2712_v31  ;;  %v2673_v32 = vpop.xlane.xlu1 %2672 }
0x30fa   :  { %v2674_v33 = vsel %vm2630_vm1, %v2673_v32, %v2625_v61  ;;  %vm3380_vm1 = vcmp.eq.s32.totalorder %v5549_v11, 100 }
0x30fb   :  { %v2720_v34 = vmul.f32 %v2676_v63, %v2674_v33 }
0x30fd   :  { %2721 = vadd.xlane.f32.xlu0 %v2720_v34  ;;  %v2686_v36 = vpop.xlane.xlu1 %2685 }
0x30fe   :  { %v2687_v37 = vsel %vm2679_vm2, %v2686_v36, %v2638_v1 }
0x30ff   :  { %v2733_v38 = vmul.f32 %v2725_v35, %v2687_v37 }
0x3101   :  { %2734 = vadd.xlane.f32.xlu0 %v2733_v38  ;;  %v2694_v39 = vpop.xlane.xlu1 %2693 }
0x3102   :  { %v2695_v40 = vsel %vm2679_vm2, %v2694_v39, %v2646_v4 }
0x3103   :  { %v2741_v41 = vmul.f32 %v2725_v35, %v2695_v40 }
0x3105   :  { %2742 = vadd.xlane.f32.xlu0 %v2741_v41  ;;  %v2702_v43 = vpop.xlane.xlu1 %2701 }
0x3106   :  { %v2703_v44 = vsel %vm2679_vm2, %v2702_v43, %v2654_v7 }
0x3107   :  { %v2749_v45 = vmul.f32 %v2725_v35, %v2703_v44 }
0x3109   :  { %2750 = vadd.xlane.f32.xlu0 %v2749_v45  ;;  %v2710_v47 = vpop.xlane.xlu1 %2709 }
0x310a   :  { %v2711_v48 = vsel %vm2679_vm2, %v2710_v47, %v2662_v10 }
0x310b   :  { %v2757_v49 = vmul.f32 %v2725_v35, %v2711_v48 }
0x310d   :  { %2758 = vadd.xlane.f32.xlu0 %v2757_v49  ;;  %v2718_v50 = vpop.xlane.xlu1 %2717  ;;  %v2831_v49 = vld [vmem:[#allocation0 + $0x5a] ss:$0 sm:$0xff] }
0x310e   :  { %v2719_v51 = vsel %vm2679_vm2, %v2718_v50, %v2670_v15 }
0x310f   :  { %v2765_v53 = vmul.f32 %v2725_v35, %v2719_v51 }
0x3111   :  { %2766 = vadd.xlane.f32.xlu0 %v2765_v53 }
0x3115   :  { %2774 = vadd.xlane.f32.xlu0 %v2773_v54 }
0x316e   :  { %v2690_v55 = vpop.xlane.xlu0 %2689 }
0x316f   :  { %v2691_v56 = vsel %vm2679_vm2, %v2690_v55, %v2642_v18 }
0x3170   :  { %v2737_v57 = vmul.f32 %v2725_v35, %v2691_v56 }
0x3172   :  { %2738 = vadd.xlane.f32.xlu1 %v2737_v57 }
0x3176   :  { %v2698_v58 = vpop.xlane.xlu0 %2697 }
0x3177   :  { %v2699_v59 = vsel %vm2679_vm2, %v2698_v58, %v2650_v21 }
0x3178   :  { %v2745_v60 = vmul.f32 %v2725_v35, %v2699_v59 }
0x317a   :  { %2746 = vadd.xlane.f32.xlu1 %v2745_v60 }
0x317e   :  { %v2706_v61 = vpop.xlane.xlu0 %2705 }
0x317f   :  { %v2707_v62 = vsel %vm2679_vm2, %v2706_v61, %v2658_v24 }
0x3180   :  { %v2753_v63 = vmul.f32 %v2725_v35, %v2707_v62 }
0x3182   :  { %2754 = vadd.xlane.f32.xlu1 %v2753_v63  ;;  %v2682_v0 = vpop.xlane.xlu0 %2681 }
0x3183   :  { %v2683_v1 = vsel %vm2679_vm2, %v2682_v0, %v2634_v27 }
0x3184   :  { %v2729_v2 = vmul.f32 %v2725_v35, %v2683_v1 }
0x3186   :  { %2730 = vadd.xlane.f32.xlu1 %v2729_v2  ;;  %v2714_v3 = vpop.xlane.xlu0 %2713 }
0x3187   :  { %v2715_v4 = vsel %vm2679_vm2, %v2714_v3, %v2666_v30 }
0x3188   :  { %v2761_v5 = vmul.f32 %v2725_v35, %v2715_v4 }
0x318a   :  { %2762 = vadd.xlane.f32.xlu1 %v2761_v5  ;;  %v2722_v6 = vpop.xlane.xlu0 %2721 }
0x318b   :  { %v2723_v7 = vsel %vm2679_vm2, %v2722_v6, %v2674_v33  ;;  %vm3437_vm2 = vcmp.eq.s32.totalorder %v5549_v11, 101 }
0x318c   :  { %v2769_v8 = vmul.f32 %v2725_v35, %v2723_v7 }
0x318e   :  { %2770 = vadd.xlane.f32.xlu1 %v2769_v8  ;;  %v2735_v10 = vpop.xlane.xlu0 %2734 }
0x318f   :  { %v2736_v13 = vsel %vm2728_vm4, %v2735_v10, %v2687_v37 }
0x3190   :  { %v2786_v14 = vmul.f32 %v2778_v9, %v2736_v13 }
0x3192   :  { %2787 = vadd.xlane.f32.xlu0 %v2786_v14  ;;  %v2743_v15 = vpop.xlane.xlu0 %2742 }
0x3193   :  { %v2744_v16 = vsel %vm2728_vm4, %v2743_v15, %v2695_v40 }
0x3194   :  { %v2794_v17 = vmul.f32 %v2778_v9, %v2744_v16 }
0x3196   :  { %2795 = vadd.xlane.f32.xlu0 %v2794_v17  ;;  %v2751_v18 = vpop.xlane.xlu0 %2750 }
0x3197   :  { %v2752_v19 = vsel %vm2728_vm4, %v2751_v18, %v2703_v44 }
0x3198   :  { %v2802_v20 = vmul.f32 %v2778_v9, %v2752_v19 }
0x319a   :  { %2803 = vadd.xlane.f32.xlu0 %v2802_v20  ;;  %v2759_v21 = vpop.xlane.xlu0 %2758 }
0x319b   :  { %v2760_v22 = vsel %vm2728_vm4, %v2759_v21, %v2711_v48 }
0x319c   :  { %v2810_v23 = vmul.f32 %v2778_v9, %v2760_v22 }
0x319e   :  { %2811 = vadd.xlane.f32.xlu0 %v2810_v23  ;;  %v2767_v24 = vpop.xlane.xlu0 %2766 }
0x319f   :  { %v2768_v25 = vsel %vm2728_vm4, %v2767_v24, %v2719_v51  ;;  %v2884_v24 = vld [vmem:[#allocation0 + $0x5b] ss:$0 sm:$0xff] }
0x31a0   :  { %v2818_v26 = vmul.f32 %v2778_v9, %v2768_v25 }
0x31a2   :  { %2819 = vadd.xlane.f32.xlu0 %v2818_v26  ;;  %v2775_v27 = vpop.xlane.xlu0 %2774 }
0x31a3   :  { %v2776_v28 = vsel %vm2728_vm4, %v2775_v27, %v152_v52 }
0x31a4   :  { %v2826_v29 = vmul.f32 %v2778_v9, %v2776_v28 }
0x31a6   :  { %2827 = vadd.xlane.f32.xlu0 %v2826_v29 }
0x31ff   :  { %v2739_v30 = vpop.xlane.xlu1 %2738 }
0x3200   :  { %v2740_v31 = vsel %vm2728_vm4, %v2739_v30, %v2691_v56 }
0x3201   :  { %v2790_v32 = vmul.f32 %v2778_v9, %v2740_v31 }
0x3203   :  { %2791 = vadd.xlane.f32.xlu1 %v2790_v32 }
0x3207   :  { %v2747_v33 = vpop.xlane.xlu1 %2746 }
0x3208   :  { %v2748_v34 = vsel %vm2728_vm4, %v2747_v33, %v2699_v59 }
0x3209   :  { %v2798_v35 = vmul.f32 %v2778_v9, %v2748_v34 }
0x320b   :  { %2799 = vadd.xlane.f32.xlu1 %v2798_v35 }
0x320f   :  { %v2755_v36 = vpop.xlane.xlu1 %2754 }
0x3210   :  { %v2756_v37 = vsel %vm2728_vm4, %v2755_v36, %v2707_v62 }
0x3211   :  { %v2806_v38 = vmul.f32 %v2778_v9, %v2756_v37 }
0x3213   :  { %v2731_v39 = vpop.xlane.xlu1 %2730  ;;  %2807 = vadd.xlane.f32.xlu1 %v2806_v38 }
0x3214   :  { %v2732_v40 = vsel %vm2728_vm4, %v2731_v39, %v2683_v1 }
0x3215   :  { %v2782_v41 = vmul.f32 %v2778_v9, %v2732_v40 }
0x3217   :  { %v2763_v43 = vpop.xlane.xlu1 %2762  ;;  %2783 = vadd.xlane.f32.xlu1 %v2782_v41 }
0x3218   :  { %v2764_v44 = vsel %vm2728_vm4, %v2763_v43, %v2715_v4 }
0x3219   :  { %v2814_v45 = vmul.f32 %v2778_v9, %v2764_v44 }
0x321b   :  { %2815 = vadd.xlane.f32.xlu1 %v2814_v45  ;;  %v2771_v46 = vpop.xlane.xlu1 %2770 }
0x321c   :  { %v2772_v47 = vsel %vm2728_vm4, %v2771_v46, %v2723_v7  ;;  %vm3551_vm4 = vcmp.eq.s32.totalorder %v5549_v11, 103 }
0x321d   :  { %v2822_v48 = vmul.f32 %v2778_v9, %v2772_v47 }
0x321f   :  { %2823 = vadd.xlane.f32.xlu1 %v2822_v48  ;;  %v2788_v50 = vpop.xlane.xlu0 %2787 }
0x3220   :  { %v2789_v51 = vsel %vm2781_vm5, %v2788_v50, %v2736_v13 }
0x3221   :  { %v2839_v52 = vmul.f32 %v2831_v49, %v2789_v51 }
0x3223   :  { %2840 = vadd.xlane.f32.xlu0 %v2839_v52  ;;  %v2796_v53 = vpop.xlane.xlu0 %2795 }
0x3224   :  { %v2797_v54 = vsel %vm2781_vm5, %v2796_v53, %v2744_v16 }
0x3225   :  { %v2847_v55 = vmul.f32 %v2831_v49, %v2797_v54 }
0x3227   :  { %2848 = vadd.xlane.f32.xlu0 %v2847_v55  ;;  %v2804_v56 = vpop.xlane.xlu0 %2803 }
0x3228   :  { %v2805_v57 = vsel %vm2781_vm5, %v2804_v56, %v2752_v19 }
0x3229   :  { %v2855_v58 = vmul.f32 %v2831_v49, %v2805_v57 }
0x322b   :  { %2856 = vadd.xlane.f32.xlu0 %v2855_v58  ;;  %v2812_v59 = vpop.xlane.xlu0 %2811 }
0x322c   :  { %v2813_v60 = vsel %vm2781_vm5, %v2812_v59, %v2760_v22 }
0x322d   :  { %v2863_v61 = vmul.f32 %v2831_v49, %v2813_v60 }
0x322f   :  { %2864 = vadd.xlane.f32.xlu0 %v2863_v61  ;;  %v2820_v62 = vpop.xlane.xlu0 %2819 }
0x3230   :  { %v2821_v63 = vsel %vm2781_vm5, %v2820_v62, %v2768_v25  ;;  %v2937_v62 = vld [vmem:[#allocation0 + $0x5c] ss:$0 sm:$0xff] }
0x3231   :  { %v2871_v0 = vmul.f32 %v2831_v49, %v2821_v63 }
0x3233   :  { %2872 = vadd.xlane.f32.xlu0 %v2871_v0  ;;  %v2828_v1 = vpop.xlane.xlu0 %2827 }
0x3234   :  { %v2829_v2 = vsel %vm2781_vm5, %v2828_v1, %v2776_v28 }
0x3235   :  { %v2879_v3 = vmul.f32 %v2831_v49, %v2829_v2 }
0x3237   :  { %2880 = vadd.xlane.f32.xlu0 %v2879_v3 }
0x3290   :  { %v2792_v4 = vpop.xlane.xlu1 %2791 }
0x3291   :  { %v2793_v5 = vsel %vm2781_vm5, %v2792_v4, %v2740_v31 }
0x3292   :  { %v2843_v6 = vmul.f32 %v2831_v49, %v2793_v5 }
0x3294   :  { %2844 = vadd.xlane.f32.xlu1 %v2843_v6 }
0x3298   :  { %v2800_v7 = vpop.xlane.xlu1 %2799 }
0x3299   :  { %v2801_v8 = vsel %vm2781_vm5, %v2800_v7, %v2748_v34 }
0x329a   :  { %v2851_v9 = vmul.f32 %v2831_v49, %v2801_v8 }
0x329c   :  { %2852 = vadd.xlane.f32.xlu1 %v2851_v9 }
0x32a0   :  { %v2808_v10 = vpop.xlane.xlu1 %2807 }
0x32a1   :  { %v2809_v13 = vsel %vm2781_vm5, %v2808_v10, %v2756_v37 }
0x32a2   :  { %v2859_v14 = vmul.f32 %v2831_v49, %v2809_v13 }
0x32a4   :  { %2860 = vadd.xlane.f32.xlu1 %v2859_v14  ;;  %v2784_v15 = vpop.xlane.xlu1 %2783 }
0x32a5   :  { %v2785_v16 = vsel %vm2781_vm5, %v2784_v15, %v2732_v40 }
0x32a6   :  { %v2835_v17 = vmul.f32 %v2831_v49, %v2785_v16 }
0x32a8   :  { %2836 = vadd.xlane.f32.xlu1 %v2835_v17  ;;  %v2816_v18 = vpop.xlane.xlu1 %2815 }
0x32a9   :  { %v2817_v19 = vsel %vm2781_vm5, %v2816_v18, %v2764_v44 }
0x32aa   :  { %v2867_v20 = vmul.f32 %v2831_v49, %v2817_v19 }
0x32ac   :  { %2868 = vadd.xlane.f32.xlu1 %v2867_v20  ;;  %v2824_v21 = vpop.xlane.xlu1 %2823 }
0x32ad   :  { %v2825_v22 = vsel %vm2781_vm5, %v2824_v21, %v2772_v47 }
0x32ae   :  { %v2875_v23 = vmul.f32 %v2831_v49, %v2825_v22 }
0x32b0   :  { %2876 = vadd.xlane.f32.xlu1 %v2875_v23  ;;  %v2841_v25 = vpop.xlane.xlu0 %2840 }
0x32b1   :  { %v2842_v26 = vsel %vm2834_vm6, %v2841_v25, %v2789_v51 }
0x32b2   :  { %v2892_v27 = vmul.f32 %v2884_v24, %v2842_v26 }
0x32b4   :  { %2893 = vadd.xlane.f32.xlu0 %v2892_v27  ;;  %v2849_v28 = vpop.xlane.xlu0 %2848 }
0x32b5   :  { %v2850_v29 = vsel %vm2834_vm6, %v2849_v28, %v2797_v54 }
0x32b6   :  { %v2900_v30 = vmul.f32 %v2884_v24, %v2850_v29 }
0x32b8   :  { %2901 = vadd.xlane.f32.xlu0 %v2900_v30  ;;  %v2857_v31 = vpop.xlane.xlu0 %2856 }
0x32b9   :  { %v2858_v32 = vsel %vm2834_vm6, %v2857_v31, %v2805_v57 }
0x32ba   :  { %v2908_v33 = vmul.f32 %v2884_v24, %v2858_v32 }
0x32bc   :  { %2909 = vadd.xlane.f32.xlu0 %v2908_v33  ;;  %v2865_v34 = vpop.xlane.xlu0 %2864 }
0x32bd   :  { %v2866_v35 = vsel %vm2834_vm6, %v2865_v34, %v2813_v60 }
0x32be   :  { %v2916_v36 = vmul.f32 %v2884_v24, %v2866_v35 }
0x32c0   :  { %2917 = vadd.xlane.f32.xlu0 %v2916_v36  ;;  %v2873_v37 = vpop.xlane.xlu0 %2872 }
0x32c1   :  { %v2874_v38 = vsel %vm2834_vm6, %v2873_v37, %v2821_v63  ;;  %v2990_v37 = vld [vmem:[#allocation0 + $0x5d] ss:$0 sm:$0xff] }
0x32c2   :  { %v2924_v39 = vmul.f32 %v2884_v24, %v2874_v38 }
0x32c4   :  { %2925 = vadd.xlane.f32.xlu0 %v2924_v39  ;;  %v2881_v40 = vpop.xlane.xlu0 %2880 }
0x32c5   :  { %v2882_v41 = vsel %vm2834_vm6, %v2881_v40, %v2829_v2 }
0x32c6   :  { %v2932_v43 = vmul.f32 %v2884_v24, %v2882_v41 }
0x32c8   :  { %2933 = vadd.xlane.f32.xlu0 %v2932_v43 }
0x3321   :  { %v2845_v44 = vpop.xlane.xlu1 %2844 }
0x3322   :  { %v2846_v45 = vsel %vm2834_vm6, %v2845_v44, %v2793_v5 }
0x3323   :  { %v2896_v46 = vmul.f32 %v2884_v24, %v2846_v45 }
0x3325   :  { %2897 = vadd.xlane.f32.xlu1 %v2896_v46 }
0x3329   :  { %v2853_v47 = vpop.xlane.xlu1 %2852 }
0x332a   :  { %v2854_v48 = vsel %vm2834_vm6, %v2853_v47, %v2801_v8 }
0x332b   :  { %v2904_v49 = vmul.f32 %v2884_v24, %v2854_v48 }
0x332d   :  { %2905 = vadd.xlane.f32.xlu1 %v2904_v49 }
0x3331   :  { %v2861_v50 = vpop.xlane.xlu1 %2860 }
0x3332   :  { %v2862_v51 = vsel %vm2834_vm6, %v2861_v50, %v2809_v13 }
0x3333   :  { %v2912_v52 = vmul.f32 %v2884_v24, %v2862_v51 }
0x3335   :  { %2913 = vadd.xlane.f32.xlu1 %v2912_v52  ;;  %v2837_v53 = vpop.xlane.xlu1 %2836 }
0x3336   :  { %v2838_v54 = vsel %vm2834_vm6, %v2837_v53, %v2785_v16 }
0x3337   :  { %v2888_v55 = vmul.f32 %v2884_v24, %v2838_v54 }
0x3339   :  { %2889 = vadd.xlane.f32.xlu1 %v2888_v55  ;;  %v2869_v56 = vpop.xlane.xlu1 %2868 }
0x333a   :  { %v2870_v57 = vsel %vm2834_vm6, %v2869_v56, %v2817_v19 }
0x333b   :  { %v2920_v58 = vmul.f32 %v2884_v24, %v2870_v57 }
0x333d   :  { %2921 = vadd.xlane.f32.xlu1 %v2920_v58  ;;  %v2877_v59 = vpop.xlane.xlu1 %2876 }
0x333e   :  { %v2878_v60 = vsel %vm2834_vm6, %v2877_v59, %v2825_v22  ;;  %vm3608_vm6 = vcmp.eq.s32.totalorder %v5549_v11, 104 }
0x333f   :  { %v2928_v61 = vmul.f32 %v2884_v24, %v2878_v60 }
0x3341   :  { %2929 = vadd.xlane.f32.xlu1 %v2928_v61  ;;  %v2894_v63 = vpop.xlane.xlu0 %2893 }
0x3342   :  { %v2895_v0 = vsel %vm2887_vm7, %v2894_v63, %v2842_v26 }
0x3343   :  { %v2945_v1 = vmul.f32 %v2937_v62, %v2895_v0 }
0x3345   :  { %2946 = vadd.xlane.f32.xlu0 %v2945_v1  ;;  %v2902_v2 = vpop.xlane.xlu0 %2901 }
0x3346   :  { %v2903_v3 = vsel %vm2887_vm7, %v2902_v2, %v2850_v29 }
0x3347   :  { %v2953_v4 = vmul.f32 %v2937_v62, %v2903_v3 }
0x3349   :  { %2954 = vadd.xlane.f32.xlu0 %v2953_v4  ;;  %v2910_v5 = vpop.xlane.xlu0 %2909 }
0x334a   :  { %v2911_v6 = vsel %vm2887_vm7, %v2910_v5, %v2858_v32 }
0x334b   :  { %v2961_v7 = vmul.f32 %v2937_v62, %v2911_v6 }
0x334d   :  { %2962 = vadd.xlane.f32.xlu0 %v2961_v7  ;;  %v2918_v8 = vpop.xlane.xlu0 %2917 }
0x334e   :  { %v2919_v9 = vsel %vm2887_vm7, %v2918_v8, %v2866_v35 }
0x334f   :  { %v2969_v10 = vmul.f32 %v2937_v62, %v2919_v9 }
0x3351   :  { %2970 = vadd.xlane.f32.xlu0 %v2969_v10  ;;  %v2926_v13 = vpop.xlane.xlu0 %2925 }
0x3352   :  { %v2927_v14 = vsel %vm2887_vm7, %v2926_v13, %v2874_v38  ;;  %v3043_v13 = vld [vmem:[#allocation0 + $0x5e] ss:$0 sm:$0xff] }
0x3353   :  { %v2977_v15 = vmul.f32 %v2937_v62, %v2927_v14 }
0x3355   :  { %2978 = vadd.xlane.f32.xlu0 %v2977_v15  ;;  %v2934_v16 = vpop.xlane.xlu0 %2933 }
0x3356   :  { %v2935_v17 = vsel %vm2887_vm7, %v2934_v16, %v2882_v41 }
0x3357   :  { %v2985_v18 = vmul.f32 %v2937_v62, %v2935_v17 }
0x3359   :  { %2986 = vadd.xlane.f32.xlu0 %v2985_v18 }
0x33b2   :  { %v2898_v19 = vpop.xlane.xlu1 %2897 }
0x33b3   :  { %v2899_v20 = vsel %vm2887_vm7, %v2898_v19, %v2846_v45 }
0x33b4   :  { %v2949_v21 = vmul.f32 %v2937_v62, %v2899_v20 }
0x33b6   :  { %2950 = vadd.xlane.f32.xlu1 %v2949_v21 }
0x33ba   :  { %v2906_v22 = vpop.xlane.xlu1 %2905 }
0x33bb   :  { %v2907_v23 = vsel %vm2887_vm7, %v2906_v22, %v2854_v48 }
0x33bc   :  { %v2957_v24 = vmul.f32 %v2937_v62, %v2907_v23 }
0x33be   :  { %2958 = vadd.xlane.f32.xlu1 %v2957_v24 }
0x33c2   :  { %v2914_v25 = vpop.xlane.xlu1 %2913 }
0x33c3   :  { %v2915_v26 = vsel %vm2887_vm7, %v2914_v25, %v2862_v51 }
0x33c4   :  { %v2965_v27 = vmul.f32 %v2937_v62, %v2915_v26 }
0x33c6   :  { %2966 = vadd.xlane.f32.xlu1 %v2965_v27  ;;  %v2890_v28 = vpop.xlane.xlu1 %2889 }
0x33c7   :  { %v2891_v29 = vsel %vm2887_vm7, %v2890_v28, %v2838_v54 }
0x33c8   :  { %v2941_v30 = vmul.f32 %v2937_v62, %v2891_v29 }
0x33ca   :  { %2942 = vadd.xlane.f32.xlu1 %v2941_v30  ;;  %v2922_v31 = vpop.xlane.xlu1 %2921 }
0x33cb   :  { %v2923_v32 = vsel %vm2887_vm7, %v2922_v31, %v2870_v57 }
0x33cc   :  { %v2973_v33 = vmul.f32 %v2937_v62, %v2923_v32 }
0x33ce   :  { %2974 = vadd.xlane.f32.xlu1 %v2973_v33  ;;  %v2930_v34 = vpop.xlane.xlu1 %2929 }
0x33cf   :  { %v2931_v35 = vsel %vm2887_vm7, %v2930_v34, %v2878_v60  ;;  %vm3669_vm7 = vcmp.eq.s32.totalorder %v5549_v11, 105 }
0x33d0   :  { %v2981_v36 = vmul.f32 %v2937_v62, %v2931_v35 }
0x33d2   :  { %2982 = vadd.xlane.f32.xlu1 %v2981_v36  ;;  %v2947_v38 = vpop.xlane.xlu0 %2946 }
0x33d3   :  { %v2948_v39 = vsel %vm2940_vm8, %v2947_v38, %v2895_v0 }
0x33d4   :  { %v2998_v40 = vmul.f32 %v2990_v37, %v2948_v39 }
0x33d6   :  { %2999 = vadd.xlane.f32.xlu0 %v2998_v40  ;;  %v2955_v41 = vpop.xlane.xlu0 %2954 }
0x33d7   :  { %v2956_v43 = vsel %vm2940_vm8, %v2955_v41, %v2903_v3 }
0x33d8   :  { %v3006_v44 = vmul.f32 %v2990_v37, %v2956_v43 }
0x33da   :  { %3007 = vadd.xlane.f32.xlu0 %v3006_v44  ;;  %v2963_v45 = vpop.xlane.xlu0 %2962 }
0x33db   :  { %v2964_v46 = vsel %vm2940_vm8, %v2963_v45, %v2911_v6 }
0x33dc   :  { %v3014_v47 = vmul.f32 %v2990_v37, %v2964_v46 }
0x33de   :  { %3015 = vadd.xlane.f32.xlu0 %v3014_v47  ;;  %v2971_v48 = vpop.xlane.xlu0 %2970 }
0x33df   :  { %v2972_v49 = vsel %vm2940_vm8, %v2971_v48, %v2919_v9 }
0x33e0   :  { %v3022_v50 = vmul.f32 %v2990_v37, %v2972_v49 }
0x33e2   :  { %3023 = vadd.xlane.f32.xlu0 %v3022_v50  ;;  %v2979_v51 = vpop.xlane.xlu0 %2978 }
0x33e3   :  { %v2980_v52 = vsel %vm2940_vm8, %v2979_v51, %v2927_v14  ;;  %v3096_v51 = vld [vmem:[#allocation0 + $0x5f] ss:$0 sm:$0xff] }
0x33e4   :  { %v3030_v53 = vmul.f32 %v2990_v37, %v2980_v52 }
0x33e6   :  { %3031 = vadd.xlane.f32.xlu0 %v3030_v53  ;;  %v2987_v54 = vpop.xlane.xlu0 %2986 }
0x33e7   :  { %v2988_v55 = vsel %vm2940_vm8, %v2987_v54, %v2935_v17 }
0x33e8   :  { %v3038_v56 = vmul.f32 %v2990_v37, %v2988_v55 }
0x33ea   :  { %3039 = vadd.xlane.f32.xlu0 %v3038_v56 }
0x3443   :  { %v2951_v57 = vpop.xlane.xlu1 %2950 }
0x3444   :  { %v2952_v58 = vsel %vm2940_vm8, %v2951_v57, %v2899_v20 }
0x3445   :  { %v3002_v59 = vmul.f32 %v2990_v37, %v2952_v58 }
0x3447   :  { %3003 = vadd.xlane.f32.xlu1 %v3002_v59 }
0x344b   :  { %v2959_v60 = vpop.xlane.xlu1 %2958 }
0x344c   :  { %v2960_v61 = vsel %vm2940_vm8, %v2959_v60, %v2907_v23 }
0x344d   :  { %v3010_v62 = vmul.f32 %v2990_v37, %v2960_v61 }
0x344f   :  { %3011 = vadd.xlane.f32.xlu1 %v3010_v62 }
0x3453   :  { %v2967_v63 = vpop.xlane.xlu1 %2966 }
0x3454   :  { %v2968_v0 = vsel %vm2940_vm8, %v2967_v63, %v2915_v26 }
0x3455   :  { %v3018_v1 = vmul.f32 %v2990_v37, %v2968_v0 }
0x3457   :  { %3019 = vadd.xlane.f32.xlu1 %v3018_v1  ;;  %v2943_v2 = vpop.xlane.xlu1 %2942 }
0x3458   :  { %v2944_v3 = vsel %vm2940_vm8, %v2943_v2, %v2891_v29 }
0x3459   :  { %v2994_v4 = vmul.f32 %v2990_v37, %v2944_v3 }
0x345b   :  { %2995 = vadd.xlane.f32.xlu1 %v2994_v4  ;;  %v2975_v5 = vpop.xlane.xlu1 %2974 }
0x345c   :  { %v2976_v6 = vsel %vm2940_vm8, %v2975_v5, %v2923_v32 }
0x345d   :  { %v3026_v7 = vmul.f32 %v2990_v37, %v2976_v6 }
0x345f   :  { %3027 = vadd.xlane.f32.xlu1 %v3026_v7  ;;  %v2983_v8 = vpop.xlane.xlu1 %2982 }
0x3460   :  { %v2984_v9 = vsel %vm2940_vm8, %v2983_v8, %v2931_v35  ;;  %vm3730_vm8 = vcmp.eq.s32.totalorder %v5549_v11, 106 }
0x3461   :  { %v3034_v10 = vmul.f32 %v2990_v37, %v2984_v9 }
0x3463   :  { %3035 = vadd.xlane.f32.xlu1 %v3034_v10  ;;  %v3000_v14 = vpop.xlane.xlu0 %2999 }
0x3464   :  { %v3001_v15 = vsel %vm2993_vm9, %v3000_v14, %v2948_v39 }
0x3465   :  { %v3051_v16 = vmul.f32 %v3043_v13, %v3001_v15 }
0x3467   :  { %3052 = vadd.xlane.f32.xlu0 %v3051_v16  ;;  %v3008_v17 = vpop.xlane.xlu0 %3007 }
0x3468   :  { %v3009_v18 = vsel %vm2993_vm9, %v3008_v17, %v2956_v43 }
0x3469   :  { %v3059_v19 = vmul.f32 %v3043_v13, %v3009_v18 }
0x346b   :  { %3060 = vadd.xlane.f32.xlu0 %v3059_v19  ;;  %v3016_v20 = vpop.xlane.xlu0 %3015 }
0x346c   :  { %v3017_v21 = vsel %vm2993_vm9, %v3016_v20, %v2964_v46 }
0x346d   :  { %v3067_v22 = vmul.f32 %v3043_v13, %v3017_v21 }
0x346f   :  { %3068 = vadd.xlane.f32.xlu0 %v3067_v22  ;;  %v3024_v23 = vpop.xlane.xlu0 %3023 }
0x3470   :  { %v3025_v24 = vsel %vm2993_vm9, %v3024_v23, %v2972_v49 }
0x3471   :  { %v3075_v25 = vmul.f32 %v3043_v13, %v3025_v24 }
0x3473   :  { %3076 = vadd.xlane.f32.xlu0 %v3075_v25  ;;  %v3032_v26 = vpop.xlane.xlu0 %3031 }
0x3474   :  { %v3033_v27 = vsel %vm2993_vm9, %v3032_v26, %v2980_v52  ;;  %v3149_v26 = vld [vmem:[#allocation0 + $0x60] ss:$0 sm:$0xff] }
0x3475   :  { %v3083_v28 = vmul.f32 %v3043_v13, %v3033_v27 }
0x3477   :  { %3084 = vadd.xlane.f32.xlu0 %v3083_v28  ;;  %v3040_v29 = vpop.xlane.xlu0 %3039 }
0x3478   :  { %v3041_v30 = vsel %vm2993_vm9, %v3040_v29, %v2988_v55 }
0x3479   :  { %v3091_v31 = vmul.f32 %v3043_v13, %v3041_v30 }
0x347b   :  { %3092 = vadd.xlane.f32.xlu0 %v3091_v31 }
0x34d4   :  { %v3004_v32 = vpop.xlane.xlu1 %3003 }
0x34d5   :  { %v3005_v33 = vsel %vm2993_vm9, %v3004_v32, %v2952_v58 }
0x34d6   :  { %v3055_v34 = vmul.f32 %v3043_v13, %v3005_v33 }
0x34d8   :  { %3056 = vadd.xlane.f32.xlu1 %v3055_v34 }
0x34dc   :  { %v3012_v35 = vpop.xlane.xlu1 %3011 }
0x34dd   :  { %v3013_v36 = vsel %vm2993_vm9, %v3012_v35, %v2960_v61 }
0x34de   :  { %v3063_v37 = vmul.f32 %v3043_v13, %v3013_v36 }
0x34e0   :  { %3064 = vadd.xlane.f32.xlu1 %v3063_v37 }
0x34e4   :  { %v3020_v38 = vpop.xlane.xlu1 %3019 }
0x34e5   :  { %v3021_v39 = vsel %vm2993_vm9, %v3020_v38, %v2968_v0 }
0x34e6   :  { %v3071_v40 = vmul.f32 %v3043_v13, %v3021_v39 }
0x34e8   :  { %3072 = vadd.xlane.f32.xlu1 %v3071_v40  ;;  %v2996_v41 = vpop.xlane.xlu1 %2995 }
0x34e9   :  { %v2997_v43 = vsel %vm2993_vm9, %v2996_v41, %v2944_v3 }
0x34ea   :  { %v3047_v44 = vmul.f32 %v3043_v13, %v2997_v43 }
0x34ec   :  { %3048 = vadd.xlane.f32.xlu1 %v3047_v44  ;;  %v3028_v45 = vpop.xlane.xlu1 %3027 }
0x34ed   :  { %v3029_v46 = vsel %vm2993_vm9, %v3028_v45, %v2976_v6 }
0x34ee   :  { %v3079_v47 = vmul.f32 %v3043_v13, %v3029_v46 }
0x34f0   :  { %3080 = vadd.xlane.f32.xlu1 %v3079_v47  ;;  %v3036_v48 = vpop.xlane.xlu1 %3035 }
0x34f1   :  { %v3037_v49 = vsel %vm2993_vm9, %v3036_v48, %v2984_v9  ;;  %vm3791_vm9 = vcmp.eq.s32.totalorder %v5549_v11, 107 }
0x34f2   :  { %v3087_v50 = vmul.f32 %v3043_v13, %v3037_v49 }
0x34f4   :  { %3088 = vadd.xlane.f32.xlu1 %v3087_v50  ;;  %v3053_v52 = vpop.xlane.xlu0 %3052 }
0x34f5   :  { %v3054_v53 = vsel %vm3046_vm10, %v3053_v52, %v3001_v15 }
0x34f6   :  { %v3104_v54 = vmul.f32 %v3096_v51, %v3054_v53 }
0x34f8   :  { %3105 = vadd.xlane.f32.xlu0 %v3104_v54  ;;  %v3061_v55 = vpop.xlane.xlu0 %3060 }
0x34f9   :  { %v3062_v56 = vsel %vm3046_vm10, %v3061_v55, %v3009_v18 }
0x34fa   :  { %v3112_v57 = vmul.f32 %v3096_v51, %v3062_v56 }
0x34fc   :  { %3113 = vadd.xlane.f32.xlu0 %v3112_v57  ;;  %v3069_v58 = vpop.xlane.xlu0 %3068 }
0x34fd   :  { %v3070_v59 = vsel %vm3046_vm10, %v3069_v58, %v3017_v21 }
0x34fe   :  { %v3120_v60 = vmul.f32 %v3096_v51, %v3070_v59 }
0x3500   :  { %3121 = vadd.xlane.f32.xlu0 %v3120_v60  ;;  %v3077_v61 = vpop.xlane.xlu0 %3076 }
0x3501   :  { %v3078_v62 = vsel %vm3046_vm10, %v3077_v61, %v3025_v24 }
0x3502   :  { %v3128_v63 = vmul.f32 %v3096_v51, %v3078_v62 }
0x3504   :  { %3129 = vadd.xlane.f32.xlu0 %v3128_v63  ;;  %v3085_v0 = vpop.xlane.xlu0 %3084 }
0x3505   :  { %v3086_v1 = vsel %vm3046_vm10, %v3085_v0, %v3033_v27 }
0x3506   :  { %v3136_v2 = vmul.f32 %v3096_v51, %v3086_v1 }
0x3508   :  { %3137 = vadd.xlane.f32.xlu0 %v3136_v2  ;;  %v3093_v3 = vpop.xlane.xlu0 %3092 }
0x3509   :  { %v3094_v4 = vsel %vm3046_vm10, %v3093_v3, %v3041_v30 }
0x350a   :  { %v3144_v5 = vmul.f32 %v3096_v51, %v3094_v4 }
0x350c   :  { %3145 = vadd.xlane.f32.xlu0 %v3144_v5  ;;  %v3206_v5 = vld [vmem:[#allocation0 + $0x61] ss:$0 sm:$0xff] }
0x3565   :  { %v3057_v6 = vpop.xlane.xlu1 %3056 }
0x3566   :  { %v3058_v7 = vsel %vm3046_vm10, %v3057_v6, %v3005_v33 }
0x3567   :  { %v3108_v8 = vmul.f32 %v3096_v51, %v3058_v7 }
0x3569   :  { %3109 = vadd.xlane.f32.xlu1 %v3108_v8 }
0x356d   :  { %v3065_v9 = vpop.xlane.xlu1 %3064 }
0x356e   :  { %v3066_v10 = vsel %vm3046_vm10, %v3065_v9, %v3013_v36 }
0x356f   :  { %v3116_v13 = vmul.f32 %v3096_v51, %v3066_v10 }
0x3571   :  { %3117 = vadd.xlane.f32.xlu1 %v3116_v13 }
0x3575   :  { %v3073_v14 = vpop.xlane.xlu1 %3072 }
0x3576   :  { %v3074_v15 = vsel %vm3046_vm10, %v3073_v14, %v3021_v39 }
0x3577   :  { %v3124_v16 = vmul.f32 %v3096_v51, %v3074_v15 }
0x3579   :  { %3125 = vadd.xlane.f32.xlu1 %v3124_v16  ;;  %v3049_v17 = vpop.xlane.xlu1 %3048 }
0x357a   :  { %v3050_v18 = vsel %vm3046_vm10, %v3049_v17, %v2997_v43 }
0x357b   :  { %v3100_v19 = vmul.f32 %v3096_v51, %v3050_v18 }
0x357d   :  { %3101 = vadd.xlane.f32.xlu1 %v3100_v19  ;;  %v3081_v20 = vpop.xlane.xlu1 %3080 }
0x357e   :  { %v3082_v21 = vsel %vm3046_vm10, %v3081_v20, %v3029_v46 }
0x357f   :  { %v3132_v22 = vmul.f32 %v3096_v51, %v3082_v21 }
0x3581   :  { %3133 = vadd.xlane.f32.xlu1 %v3132_v22  ;;  %v3089_v23 = vpop.xlane.xlu1 %3088 }
0x3582   :  { %v3090_v24 = vsel %vm3046_vm10, %v3089_v23, %v3037_v49  ;;  %vm3852_vm10 = vcmp.eq.s32.totalorder %v5549_v11, 108 }
0x3583   :  { %v3140_v25 = vmul.f32 %v3096_v51, %v3090_v24 }
0x3585   :  { %3141 = vadd.xlane.f32.xlu1 %v3140_v25  ;;  %v3106_v27 = vpop.xlane.xlu0 %3105 }
0x3586   :  { %v3107_v28 = vsel %vm3099_vm11, %v3106_v27, %v3054_v53 }
0x3587   :  { %v3157_v29 = vmul.f32 %v3149_v26, %v3107_v28 }
0x3589   :  { %3158 = vadd.xlane.f32.xlu0 %v3157_v29  ;;  %v3114_v30 = vpop.xlane.xlu0 %3113 }
0x358a   :  { %v3115_v31 = vsel %vm3099_vm11, %v3114_v30, %v3062_v56 }
0x358b   :  { %v3165_v32 = vmul.f32 %v3149_v26, %v3115_v31 }
0x358d   :  { %3166 = vadd.xlane.f32.xlu0 %v3165_v32  ;;  %v3122_v33 = vpop.xlane.xlu0 %3121 }
0x358e   :  { %v3123_v34 = vsel %vm3099_vm11, %v3122_v33, %v3070_v59  ;;  %v157_v59 = vadd.s32 96, %v5551_v12 }
0x358f   :  { %v3173_v35 = vmul.f32 %v3149_v26, %v3123_v34 }
0x3590   :  { %vm158_vm12 = vcmp.eq.s32.totalorder %v5549_v11, %v157_v59 }
0x3591   :  { %3174 = vadd.xlane.f32.xlu0 %v3173_v35  ;;  %v3130_v36 = vpop.xlane.xlu0 %3129 }
0x3592   :  { %v3131_v37 = vsel %vm3099_vm11, %v3130_v36, %v3078_v62 }
0x3593   :  { %v3181_v38 = vmul.f32 %v3149_v26, %v3131_v37 }
0x3595   :  { %3182 = vadd.xlane.f32.xlu0 %v3181_v38  ;;  %v3138_v39 = vpop.xlane.xlu0 %3137 }
0x3596   :  { %v3139_v40 = vsel %vm3099_vm11, %v3138_v39, %v3086_v1  ;;  %v159_v1 = vsel %vm158_vm12, 1.0, %v5521_v42  ;;  %vm3974_vm12 = vcmp.eq.s32.totalorder %v5549_v11, 110 }
0x3597   :  { %v3189_v41 = vmul.f32 %v3149_v26, %v3139_v40 }
0x3599   :  { %3190 = vadd.xlane.f32.xlu0 %v3189_v41  ;;  %v3146_v43 = vpop.xlane.xlu0 %3145 }
0x359a   :  { %v3147_v44 = vsel %vm3099_vm11, %v3146_v43, %v3094_v4  ;;  %v3201_v4 = vmul.f32 %v3149_v26, %v159_v1 }
0x359b   :  { %v3197_v45 = vmul.f32 %v3149_v26, %v3147_v44 }
0x359d   :  { %3198 = vadd.xlane.f32.xlu0 %v3197_v45 }
0x35f6   :  { %v3110_v46 = vpop.xlane.xlu1 %3109 }
0x35f7   :  { %v3111_v47 = vsel %vm3099_vm11, %v3110_v46, %v3058_v7  ;;  %v3263_v46 = vld [vmem:[#allocation0 + $0x62] ss:$0 sm:$0xff] }
0x35f8   :  { %v3161_v48 = vmul.f32 %v3149_v26, %v3111_v47 }
0x35fa   :  { %3162 = vadd.xlane.f32.xlu1 %v3161_v48 }
0x35fe   :  { %v3118_v49 = vpop.xlane.xlu1 %3117 }
0x35ff   :  { %v3119_v50 = vsel %vm3099_vm11, %v3118_v49, %v3066_v10 }
0x3600   :  { %v3169_v51 = vmul.f32 %v3149_v26, %v3119_v50 }
0x3602   :  { %3170 = vadd.xlane.f32.xlu1 %v3169_v51 }
0x3606   :  { %v3126_v52 = vpop.xlane.xlu1 %3125 }
0x3607   :  { %v3127_v53 = vsel %vm3099_vm11, %v3126_v52, %v3074_v15 }
0x3608   :  { %v3177_v54 = vmul.f32 %v3149_v26, %v3127_v53 }
0x360a   :  { %3178 = vadd.xlane.f32.xlu1 %v3177_v54  ;;  %v3102_v55 = vpop.xlane.xlu1 %3101 }
0x360b   :  { %v3103_v60 = vsel %vm3099_vm11, %v3102_v55, %v3050_v18 }
0x360c   :  { %v3153_v62 = vmul.f32 %v3149_v26, %v3103_v60 }
0x360e   :  { %v3134_v56 = vpop.xlane.xlu1 %3133 }
0x360f   :  { %v3135_v57 = vsel %vm3099_vm11, %v3134_v56, %v3082_v21 }
0x3610   :  { %v3185_v58 = vmul.f32 %v3149_v26, %v3135_v57 }
0x3612   :  { %3186 = vadd.xlane.f32.xlu1 %v3185_v58  ;;  %v3142_v61 = vpop.xlane.xlu1 %3141 }
0x3613   :  { %v3143_v63 = vsel %vm3099_vm11, %v3142_v61, %v3090_v24  ;;  %vm3913_vm11 = vcmp.eq.s32.totalorder %v5549_v11, 109 }
0x3614   :  { %v3193_v2 = vmul.f32 %v3149_v26, %v3143_v63 }
0x3616   :  { %3154 = vadd.xlane.f32.xlu1 %v3153_v62  ;;  %v3159_v0 = vpop.xlane.xlu0 %3158 }
0x3617   :  { %v3160_v6 = vsel %vm3152_vm13, %v3159_v0, %v3107_v28 }
0x3618   :  { %v3214_v8 = vmul.f32 %v3206_v5, %v3160_v6 }
0x361a   :  { %3194 = vadd.xlane.f32.xlu1 %v3193_v2  ;;  %v3167_v3 = vpop.xlane.xlu0 %3166 }
0x361b   :  { %v3168_v9 = vsel %vm3152_vm13, %v3167_v3, %v3115_v31 }
0x361c   :  { %v3222_v13 = vmul.f32 %v3206_v5, %v3168_v9 }
0x361e   :  { %3202 = vadd.xlane.f32.xlu1 %v3201_v4  ;;  %v3175_v7 = vpop.xlane.xlu0 %3174 }
0x361f   :  { %v3176_v14 = vsel %vm3152_vm13, %v3175_v7, %v3123_v34 }
0x3620   :  { %v3230_v15 = vmul.f32 %v3206_v5, %v3176_v14 }
0x3622   :  { %3215 = vadd.xlane.f32.xlu1 %v3214_v8  ;;  %v3183_v10 = vpop.xlane.xlu0 %3182 }
0x3623   :  { %v3184_v17 = vsel %vm3152_vm13, %v3183_v10, %v3131_v37 }
0x3624   :  { %v3238_v18 = vmul.f32 %v3206_v5, %v3184_v17 }
0x3626   :  { %3223 = vadd.xlane.f32.xlu1 %v3222_v13  ;;  %v3191_v16 = vpop.xlane.xlu0 %3190 }
0x3627   :  { %v3192_v19 = vsel %vm3152_vm13, %v3191_v16, %v3139_v40 }
0x3628   :  { %v3246_v21 = vmul.f32 %v3206_v5, %v3192_v19 }
0x362a   :  { %3231 = vadd.xlane.f32.xlu1 %v3230_v15  ;;  %v3199_v20 = vpop.xlane.xlu0 %3198 }
0x362b   :  { %v3200_v22 = vsel %vm3152_vm13, %v3199_v20, %v3147_v44 }
0x362c   :  { %v3254_v23 = vmul.f32 %v3206_v5, %v3200_v22 }
0x362e   :  { %3239 = vadd.xlane.f32.xlu1 %v3238_v18 }
0x3632   :  { %3247 = vadd.xlane.f32.xlu1 %v3246_v21 }
0x3636   :  { %3255 = vadd.xlane.f32.xlu1 %v3254_v23 }
0x3687   :  { %v3163_v24 = vpop.xlane.xlu1 %3162 }
0x3688   :  { %v3164_v25 = vsel %vm3152_vm13, %v3163_v24, %v3111_v47  ;;  %v3320_v24 = vld [vmem:[#allocation0 + $0x63] ss:$0 sm:$0xff] }
0x3689   :  { %v3218_v26 = vmul.f32 %v3206_v5, %v3164_v25 }
0x368b   :  { %3219 = vadd.xlane.f32.xlu0 %v3218_v26 }
0x368f   :  { %v3171_v27 = vpop.xlane.xlu1 %3170 }
0x3690   :  { %v3172_v28 = vsel %vm3152_vm13, %v3171_v27, %v3119_v50 }
0x3691   :  { %v3226_v29 = vmul.f32 %v3206_v5, %v3172_v28 }
0x3693   :  { %3227 = vadd.xlane.f32.xlu0 %v3226_v29 }
0x3697   :  { %v3179_v30 = vpop.xlane.xlu1 %3178 }
0x3698   :  { %v3180_v31 = vsel %vm3152_vm13, %v3179_v30, %v3127_v53 }
0x3699   :  { %v3234_v32 = vmul.f32 %v3206_v5, %v3180_v31 }
0x369b   :  { %3235 = vadd.xlane.f32.xlu0 %v3234_v32 }
0x369f   :  { %v3187_v33 = vpop.xlane.xlu1 %3186 }
0x36a0   :  { %v3188_v34 = vsel %vm3152_vm13, %v3187_v33, %v3135_v57 }
0x36a1   :  { %v3242_v35 = vmul.f32 %v3206_v5, %v3188_v34 }
0x36a3   :  { %v3155_v36 = vpop.xlane.xlu1 %3154  ;;  %3243 = vadd.xlane.f32.xlu0 %v3242_v35 }
0x36a4   :  { %v3156_v37 = vsel %vm3152_vm13, %v3155_v36, %v3103_v60 }
0x36a5   :  { %v3210_v38 = vmul.f32 %v3206_v5, %v3156_v37 }
0x36a7   :  { %v3195_v39 = vpop.xlane.xlu1 %3194  ;;  %3211 = vadd.xlane.f32.xlu0 %v3210_v38 }
0x36a8   :  { %v3196_v40 = vsel %vm3152_vm13, %v3195_v39, %v3143_v63 }
0x36a9   :  { %v3250_v41 = vmul.f32 %v3206_v5, %v3196_v40 }
0x36ab   :  { %v3203_v43 = vpop.xlane.xlu1 %3202  ;;  %3251 = vadd.xlane.f32.xlu0 %v3250_v41 }
0x36ac   :  { %v3204_v44 = vsel %vm3152_vm13, %v3203_v43, %v159_v1  ;;  %vm4035_vm13 = vcmp.eq.s32.totalorder %v5549_v11, 111 }
0x36ad   :  { %v3258_v45 = vmul.f32 %v3206_v5, %v3204_v44 }
0x36af   :  { %3259 = vadd.xlane.f32.xlu0 %v3258_v45  ;;  %v3216_v47 = vpop.xlane.xlu1 %3215 }
0x36b0   :  { %v3217_v48 = vsel %vm3209_vm14, %v3216_v47, %v3160_v6 }
0x36b1   :  { %v3271_v49 = vmul.f32 %v3263_v46, %v3217_v48 }
0x36b3   :  { %3272 = vadd.xlane.f32.xlu0 %v3271_v49  ;;  %v3224_v50 = vpop.xlane.xlu1 %3223 }
0x36b4   :  { %v3225_v51 = vsel %vm3209_vm14, %v3224_v50, %v3168_v9 }
0x36b5   :  { %v3279_v52 = vmul.f32 %v3263_v46, %v3225_v51 }
0x36b7   :  { %3280 = vadd.xlane.f32.xlu0 %v3279_v52  ;;  %v3232_v53 = vpop.xlane.xlu1 %3231 }
0x36b8   :  { %v3233_v54 = vsel %vm3209_vm14, %v3232_v53, %v3176_v14 }
0x36b9   :  { %v3287_v55 = vmul.f32 %v3263_v46, %v3233_v54 }
0x36bb   :  { %3288 = vadd.xlane.f32.xlu0 %v3287_v55  ;;  %v3240_v56 = vpop.xlane.xlu1 %3239 }
0x36bc   :  { %v3241_v57 = vsel %vm3209_vm14, %v3240_v56, %v3184_v17 }
0x36bd   :  { %v3295_v58 = vmul.f32 %v3263_v46, %v3241_v57 }
0x36bf   :  { %3296 = vadd.xlane.f32.xlu0 %v3295_v58  ;;  %v3248_v59 = vpop.xlane.xlu1 %3247 }
0x36c0   :  { %v3249_v60 = vsel %vm3209_vm14, %v3248_v59, %v3192_v19 }
0x36c1   :  { %v3303_v61 = vmul.f32 %v3263_v46, %v3249_v60 }
0x36c3   :  { %3304 = vadd.xlane.f32.xlu0 %v3303_v61  ;;  %v3256_v62 = vpop.xlane.xlu1 %3255 }
0x36c4   :  { %v3257_v63 = vsel %vm3209_vm14, %v3256_v62, %v3200_v22 }
0x36c5   :  { %v3311_v0 = vmul.f32 %v3263_v46, %v3257_v63 }
0x36c7   :  { %3312 = vadd.xlane.f32.xlu0 %v3311_v0 }
0x3718   :  { %v3220_v1 = vpop.xlane.xlu0 %3219 }
0x3719   :  { %v3221_v2 = vsel %vm3209_vm14, %v3220_v1, %v3164_v25  ;;  %v3377_v1 = vld [vmem:[#allocation0 + $0x64] ss:$0 sm:$0xff] }
0x371a   :  { %v3275_v3 = vmul.f32 %v3263_v46, %v3221_v2 }
0x371c   :  { %3276 = vadd.xlane.f32.xlu1 %v3275_v3 }
0x3720   :  { %v3228_v4 = vpop.xlane.xlu0 %3227 }
0x3721   :  { %v3229_v5 = vsel %vm3209_vm14, %v3228_v4, %v3172_v28 }
0x3722   :  { %v3283_v6 = vmul.f32 %v3263_v46, %v3229_v5 }
0x3724   :  { %3284 = vadd.xlane.f32.xlu1 %v3283_v6 }
0x3728   :  { %v3236_v7 = vpop.xlane.xlu0 %3235 }
0x3729   :  { %v3237_v8 = vsel %vm3209_vm14, %v3236_v7, %v3180_v31 }
0x372a   :  { %v3291_v9 = vmul.f32 %v3263_v46, %v3237_v8 }
0x372c   :  { %3292 = vadd.xlane.f32.xlu1 %v3291_v9 }
0x3730   :  { %v3244_v10 = vpop.xlane.xlu0 %3243 }
0x3731   :  { %v3245_v13 = vsel %vm3209_vm14, %v3244_v10, %v3188_v34 }
0x3732   :  { %v3299_v14 = vmul.f32 %v3263_v46, %v3245_v13 }
0x3734   :  { %3300 = vadd.xlane.f32.xlu1 %v3299_v14  ;;  %v3212_v15 = vpop.xlane.xlu0 %3211 }
0x3735   :  { %v3213_v16 = vsel %vm3209_vm14, %v3212_v15, %v3156_v37 }
0x3736   :  { %v3267_v17 = vmul.f32 %v3263_v46, %v3213_v16 }
0x3738   :  { %3268 = vadd.xlane.f32.xlu1 %v3267_v17  ;;  %v3252_v18 = vpop.xlane.xlu0 %3251 }
0x3739   :  { %v3253_v19 = vsel %vm3209_vm14, %v3252_v18, %v3196_v40 }
0x373a   :  { %v3307_v20 = vmul.f32 %v3263_v46, %v3253_v19 }
0x373c   :  { %3308 = vadd.xlane.f32.xlu1 %v3307_v20  ;;  %v3260_v21 = vpop.xlane.xlu0 %3259 }
0x373d   :  { %v3261_v22 = vsel %vm3209_vm14, %v3260_v21, %v3204_v44 }
0x373e   :  { %v3315_v23 = vmul.f32 %v3263_v46, %v3261_v22 }
0x3740   :  { %3316 = vadd.xlane.f32.xlu1 %v3315_v23  ;;  %v3273_v25 = vpop.xlane.xlu0 %3272 }
0x3741   :  { %v3274_v26 = vsel %vm3266_vm15, %v3273_v25, %v3217_v48 }
0x3742   :  { %v3328_v27 = vmul.f32 %v3320_v24, %v3274_v26 }
0x3744   :  { %3329 = vadd.xlane.f32.xlu1 %v3328_v27  ;;  %v3281_v28 = vpop.xlane.xlu0 %3280 }
0x3745   :  { %v3282_v29 = vsel %vm3266_vm15, %v3281_v28, %v3225_v51 }
0x3746   :  { %v3336_v30 = vmul.f32 %v3320_v24, %v3282_v29 }
0x3748   :  { %3337 = vadd.xlane.f32.xlu1 %v3336_v30  ;;  %v3289_v31 = vpop.xlane.xlu0 %3288 }
0x3749   :  { %v3290_v32 = vsel %vm3266_vm15, %v3289_v31, %v3233_v54 }
0x374a   :  { %v3344_v33 = vmul.f32 %v3320_v24, %v3290_v32 }
0x374c   :  { %3345 = vadd.xlane.f32.xlu1 %v3344_v33  ;;  %v3297_v34 = vpop.xlane.xlu0 %3296 }
0x374d   :  { %v3298_v35 = vsel %vm3266_vm15, %v3297_v34, %v3241_v57 }
0x374e   :  { %v3352_v36 = vmul.f32 %v3320_v24, %v3298_v35 }
0x3750   :  { %3353 = vadd.xlane.f32.xlu1 %v3352_v36  ;;  %v3305_v37 = vpop.xlane.xlu0 %3304 }
0x3751   :  { %v3306_v38 = vsel %vm3266_vm15, %v3305_v37, %v3249_v60 }
0x3752   :  { %v3360_v39 = vmul.f32 %v3320_v24, %v3306_v38 }
0x3754   :  { %3361 = vadd.xlane.f32.xlu1 %v3360_v39  ;;  %v3313_v40 = vpop.xlane.xlu0 %3312 }
0x3755   :  { %v3314_v41 = vsel %vm3266_vm15, %v3313_v40, %v3257_v63 }
0x3756   :  { %v3368_v43 = vmul.f32 %v3320_v24, %v3314_v41 }
0x3758   :  { %3369 = vadd.xlane.f32.xlu1 %v3368_v43 }
0x37a9   :  { %v3277_v44 = vpop.xlane.xlu1 %3276 }
0x37aa   :  { %v3278_v45 = vsel %vm3266_vm15, %v3277_v44, %v3221_v2  ;;  %v3434_v44 = vld [vmem:[#allocation0 + $0x65] ss:$0 sm:$0xff] }
0x37ab   :  { %v3332_v46 = vmul.f32 %v3320_v24, %v3278_v45 }
0x37ad   :  { %3333 = vadd.xlane.f32.xlu0 %v3332_v46 }
0x37b1   :  { %v3285_v47 = vpop.xlane.xlu1 %3284 }
0x37b2   :  { %v3286_v48 = vsel %vm3266_vm15, %v3285_v47, %v3229_v5 }
0x37b3   :  { %v3340_v49 = vmul.f32 %v3320_v24, %v3286_v48 }
0x37b5   :  { %3341 = vadd.xlane.f32.xlu0 %v3340_v49 }
0x37b9   :  { %v3293_v50 = vpop.xlane.xlu1 %3292 }
0x37ba   :  { %v3294_v51 = vsel %vm3266_vm15, %v3293_v50, %v3237_v8 }
0x37bb   :  { %v3348_v52 = vmul.f32 %v3320_v24, %v3294_v51 }
0x37bd   :  { %3349 = vadd.xlane.f32.xlu0 %v3348_v52 }
0x37c1   :  { %v3301_v53 = vpop.xlane.xlu1 %3300 }
0x37c2   :  { %v3302_v54 = vsel %vm3266_vm15, %v3301_v53, %v3245_v13 }
0x37c3   :  { %v3356_v55 = vmul.f32 %v3320_v24, %v3302_v54 }
0x37c5   :  { %3357 = vadd.xlane.f32.xlu0 %v3356_v55  ;;  %v3269_v56 = vpop.xlane.xlu1 %3268 }
0x37c6   :  { %v3270_v57 = vsel %vm3266_vm15, %v3269_v56, %v3213_v16 }
0x37c7   :  { %v3324_v58 = vmul.f32 %v3320_v24, %v3270_v57 }
0x37c9   :  { %3325 = vadd.xlane.f32.xlu0 %v3324_v58  ;;  %v3309_v59 = vpop.xlane.xlu1 %3308 }
0x37ca   :  { %v3310_v60 = vsel %vm3266_vm15, %v3309_v59, %v3253_v19 }
0x37cb   :  { %v3364_v61 = vmul.f32 %v3320_v24, %v3310_v60 }
0x37cd   :  { %3365 = vadd.xlane.f32.xlu0 %v3364_v61  ;;  %v3317_v62 = vpop.xlane.xlu1 %3316 }
0x37ce   :  { %v3318_v63 = vsel %vm3266_vm15, %v3317_v62, %v3261_v22  ;;  %vm4096_vm15 = vcmp.eq.s32.totalorder %v5549_v11, 112 }
0x37cf   :  { %v3372_v0 = vmul.f32 %v3320_v24, %v3318_v63 }
0x37d1   :  { %3373 = vadd.xlane.f32.xlu0 %v3372_v0  ;;  %v3330_v2 = vpop.xlane.xlu1 %3329 }
0x37d2   :  { %v3331_v3 = vsel %vm3323_vm0, %v3330_v2, %v3274_v26 }
0x37d3   :  { %v3385_v4 = vmul.f32 %v3377_v1, %v3331_v3 }
0x37d5   :  { %3386 = vadd.xlane.f32.xlu0 %v3385_v4  ;;  %v3338_v5 = vpop.xlane.xlu1 %3337 }
0x37d6   :  { %v3339_v6 = vsel %vm3323_vm0, %v3338_v5, %v3282_v29 }
0x37d7   :  { %v3393_v7 = vmul.f32 %v3377_v1, %v3339_v6 }
0x37d9   :  { %3394 = vadd.xlane.f32.xlu0 %v3393_v7  ;;  %v3346_v8 = vpop.xlane.xlu1 %3345 }
0x37da   :  { %v3347_v9 = vsel %vm3323_vm0, %v3346_v8, %v3290_v32 }
0x37db   :  { %v3401_v10 = vmul.f32 %v3377_v1, %v3347_v9 }
0x37dd   :  { %3402 = vadd.xlane.f32.xlu0 %v3401_v10  ;;  %v3354_v13 = vpop.xlane.xlu1 %3353 }
0x37de   :  { %v3355_v14 = vsel %vm3323_vm0, %v3354_v13, %v3298_v35 }
0x37df   :  { %v3409_v15 = vmul.f32 %v3377_v1, %v3355_v14 }
0x37e1   :  { %3410 = vadd.xlane.f32.xlu0 %v3409_v15  ;;  %v3362_v16 = vpop.xlane.xlu1 %3361 }
0x37e2   :  { %v3363_v17 = vsel %vm3323_vm0, %v3362_v16, %v3306_v38 }
0x37e3   :  { %v3417_v18 = vmul.f32 %v3377_v1, %v3363_v17 }
0x37e5   :  { %3418 = vadd.xlane.f32.xlu0 %v3417_v18  ;;  %v3370_v19 = vpop.xlane.xlu1 %3369 }
0x37e6   :  { %v3371_v20 = vsel %vm3323_vm0, %v3370_v19, %v3314_v41 }
0x37e7   :  { %v3425_v21 = vmul.f32 %v3377_v1, %v3371_v20 }
0x37e9   :  { %3426 = vadd.xlane.f32.xlu0 %v3425_v21 }
0x383a   :  { %v3334_v22 = vpop.xlane.xlu0 %3333 }
0x383b   :  { %v3335_v23 = vsel %vm3323_vm0, %v3334_v22, %v3278_v45  ;;  %v3491_v22 = vld [vmem:[#allocation0 + $0x66] ss:$0 sm:$0xff] }
0x383c   :  { %v3389_v24 = vmul.f32 %v3377_v1, %v3335_v23 }
0x383e   :  { %3390 = vadd.xlane.f32.xlu1 %v3389_v24 }
0x3842   :  { %v3342_v25 = vpop.xlane.xlu0 %3341 }
0x3843   :  { %v3343_v26 = vsel %vm3323_vm0, %v3342_v25, %v3286_v48 }
0x3844   :  { %v3397_v27 = vmul.f32 %v3377_v1, %v3343_v26 }
0x3846   :  { %3398 = vadd.xlane.f32.xlu1 %v3397_v27 }
0x384a   :  { %v3350_v28 = vpop.xlane.xlu0 %3349 }
0x384b   :  { %v3351_v29 = vsel %vm3323_vm0, %v3350_v28, %v3294_v51 }
0x384c   :  { %v3405_v30 = vmul.f32 %v3377_v1, %v3351_v29 }
0x384e   :  { %3406 = vadd.xlane.f32.xlu1 %v3405_v30 }
0x3852   :  { %v3358_v31 = vpop.xlane.xlu0 %3357 }
0x3853   :  { %v3359_v32 = vsel %vm3323_vm0, %v3358_v31, %v3302_v54 }
0x3854   :  { %v3413_v33 = vmul.f32 %v3377_v1, %v3359_v32 }
0x3856   :  { %3414 = vadd.xlane.f32.xlu1 %v3413_v33  ;;  %v3326_v34 = vpop.xlane.xlu0 %3325 }
0x3857   :  { %v3327_v35 = vsel %vm3323_vm0, %v3326_v34, %v3270_v57 }
0x3858   :  { %v3381_v36 = vmul.f32 %v3377_v1, %v3327_v35 }
0x385a   :  { %3382 = vadd.xlane.f32.xlu1 %v3381_v36  ;;  %v3366_v37 = vpop.xlane.xlu0 %3365 }
0x385b   :  { %v3367_v38 = vsel %vm3323_vm0, %v3366_v37, %v3310_v60 }
0x385c   :  { %v3421_v39 = vmul.f32 %v3377_v1, %v3367_v38 }
0x385e   :  { %3422 = vadd.xlane.f32.xlu1 %v3421_v39  ;;  %v3374_v40 = vpop.xlane.xlu0 %3373 }
0x385f   :  { %v3375_v41 = vsel %vm3323_vm0, %v3374_v40, %v3318_v63  ;;  %vm4161_vm0 = vcmp.eq.s32.totalorder %v5549_v11, 113 }
0x3860   :  { %v3429_v43 = vmul.f32 %v3377_v1, %v3375_v41 }
0x3862   :  { %3430 = vadd.xlane.f32.xlu1 %v3429_v43  ;;  %v3387_v45 = vpop.xlane.xlu0 %3386 }
0x3863   :  { %v3388_v46 = vsel %vm3380_vm1, %v3387_v45, %v3331_v3 }
0x3864   :  { %v3442_v47 = vmul.f32 %v3434_v44, %v3388_v46 }
0x3866   :  { %3443 = vadd.xlane.f32.xlu1 %v3442_v47  ;;  %v3395_v48 = vpop.xlane.xlu0 %3394 }
0x3867   :  { %v3396_v49 = vsel %vm3380_vm1, %v3395_v48, %v3339_v6 }
0x3868   :  { %v3450_v50 = vmul.f32 %v3434_v44, %v3396_v49 }
0x386a   :  { %3451 = vadd.xlane.f32.xlu1 %v3450_v50  ;;  %v3403_v51 = vpop.xlane.xlu0 %3402 }
0x386b   :  { %v3404_v52 = vsel %vm3380_vm1, %v3403_v51, %v3347_v9 }
0x386c   :  { %v3458_v53 = vmul.f32 %v3434_v44, %v3404_v52 }
0x386e   :  { %3459 = vadd.xlane.f32.xlu1 %v3458_v53  ;;  %v3411_v54 = vpop.xlane.xlu0 %3410 }
0x386f   :  { %v3412_v55 = vsel %vm3380_vm1, %v3411_v54, %v3355_v14 }
0x3870   :  { %v3466_v56 = vmul.f32 %v3434_v44, %v3412_v55 }
0x3872   :  { %3467 = vadd.xlane.f32.xlu1 %v3466_v56  ;;  %v3419_v57 = vpop.xlane.xlu0 %3418 }
0x3873   :  { %v3420_v58 = vsel %vm3380_vm1, %v3419_v57, %v3363_v17 }
0x3874   :  { %v3474_v59 = vmul.f32 %v3434_v44, %v3420_v58 }
0x3876   :  { %3475 = vadd.xlane.f32.xlu1 %v3474_v59  ;;  %v3427_v60 = vpop.xlane.xlu0 %3426 }
0x3877   :  { %v3428_v61 = vsel %vm3380_vm1, %v3427_v60, %v3371_v20 }
0x3878   :  { %v3482_v62 = vmul.f32 %v3434_v44, %v3428_v61 }
0x387a   :  { %3483 = vadd.xlane.f32.xlu1 %v3482_v62 }
0x38cb   :  { %v3391_v63 = vpop.xlane.xlu1 %3390 }
0x38cc   :  { %v3392_v0 = vsel %vm3380_vm1, %v3391_v63, %v3335_v23  ;;  %v3548_v63 = vld [vmem:[#allocation0 + $0x67] ss:$0 sm:$0xff] }
0x38cd   :  { %v3446_v1 = vmul.f32 %v3434_v44, %v3392_v0 }
0x38cf   :  { %3447 = vadd.xlane.f32.xlu0 %v3446_v1 }
0x38d3   :  { %v3399_v2 = vpop.xlane.xlu1 %3398 }
0x38d4   :  { %v3400_v3 = vsel %vm3380_vm1, %v3399_v2, %v3343_v26 }
0x38d5   :  { %v3454_v4 = vmul.f32 %v3434_v44, %v3400_v3 }
0x38d7   :  { %3455 = vadd.xlane.f32.xlu0 %v3454_v4 }
0x38db   :  { %v3407_v5 = vpop.xlane.xlu1 %3406 }
0x38dc   :  { %v3408_v6 = vsel %vm3380_vm1, %v3407_v5, %v3351_v29 }
0x38dd   :  { %v3462_v7 = vmul.f32 %v3434_v44, %v3408_v6 }
0x38df   :  { %3463 = vadd.xlane.f32.xlu0 %v3462_v7 }
0x38e3   :  { %v3415_v8 = vpop.xlane.xlu1 %3414 }
0x38e4   :  { %v3416_v9 = vsel %vm3380_vm1, %v3415_v8, %v3359_v32 }
0x38e5   :  { %v3470_v10 = vmul.f32 %v3434_v44, %v3416_v9 }
0x38e7   :  { %3471 = vadd.xlane.f32.xlu0 %v3470_v10  ;;  %v3383_v13 = vpop.xlane.xlu1 %3382 }
0x38e8   :  { %v3384_v14 = vsel %vm3380_vm1, %v3383_v13, %v3327_v35 }
0x38e9   :  { %v3438_v15 = vmul.f32 %v3434_v44, %v3384_v14 }
0x38eb   :  { %3439 = vadd.xlane.f32.xlu0 %v3438_v15  ;;  %v3423_v16 = vpop.xlane.xlu1 %3422 }
0x38ec   :  { %v3424_v17 = vsel %vm3380_vm1, %v3423_v16, %v3367_v38 }
0x38ed   :  { %v3478_v18 = vmul.f32 %v3434_v44, %v3424_v17 }
0x38ef   :  { %3479 = vadd.xlane.f32.xlu0 %v3478_v18  ;;  %v3431_v19 = vpop.xlane.xlu1 %3430 }
0x38f0   :  { %v3432_v20 = vsel %vm3380_vm1, %v3431_v19, %v3375_v41  ;;  %vm4226_vm1 = vcmp.eq.s32.totalorder %v5549_v11, 114 }
0x38f1   :  { %v3486_v21 = vmul.f32 %v3434_v44, %v3432_v20 }
0x38f3   :  { %3487 = vadd.xlane.f32.xlu0 %v3486_v21  ;;  %v3444_v23 = vpop.xlane.xlu1 %3443 }
0x38f4   :  { %v3445_v24 = vsel %vm3437_vm2, %v3444_v23, %v3388_v46 }
0x38f5   :  { %v3499_v25 = vmul.f32 %v3491_v22, %v3445_v24 }
0x38f7   :  { %3500 = vadd.xlane.f32.xlu0 %v3499_v25  ;;  %v3452_v26 = vpop.xlane.xlu1 %3451 }
0x38f8   :  { %v3453_v27 = vsel %vm3437_vm2, %v3452_v26, %v3396_v49 }
0x38f9   :  { %v3507_v28 = vmul.f32 %v3491_v22, %v3453_v27 }
0x38fb   :  { %3508 = vadd.xlane.f32.xlu0 %v3507_v28  ;;  %v3460_v29 = vpop.xlane.xlu1 %3459 }
0x38fc   :  { %v3461_v30 = vsel %vm3437_vm2, %v3460_v29, %v3404_v52 }
0x38fd   :  { %v3515_v31 = vmul.f32 %v3491_v22, %v3461_v30 }
0x38ff   :  { %3516 = vadd.xlane.f32.xlu0 %v3515_v31  ;;  %v3468_v32 = vpop.xlane.xlu1 %3467 }
0x3900   :  { %v3469_v33 = vsel %vm3437_vm2, %v3468_v32, %v3412_v55 }
0x3901   :  { %v3523_v34 = vmul.f32 %v3491_v22, %v3469_v33 }
0x3903   :  { %3524 = vadd.xlane.f32.xlu0 %v3523_v34  ;;  %v3476_v35 = vpop.xlane.xlu1 %3475 }
0x3904   :  { %v3477_v36 = vsel %vm3437_vm2, %v3476_v35, %v3420_v58 }
0x3905   :  { %v3531_v37 = vmul.f32 %v3491_v22, %v3477_v36 }
0x3907   :  { %3532 = vadd.xlane.f32.xlu0 %v3531_v37  ;;  %v3484_v38 = vpop.xlane.xlu1 %3483 }
0x3908   :  { %v3485_v39 = vsel %vm3437_vm2, %v3484_v38, %v3428_v61 }
0x3909   :  { %v3539_v40 = vmul.f32 %v3491_v22, %v3485_v39 }
0x390b   :  { %3540 = vadd.xlane.f32.xlu0 %v3539_v40 }
0x395c   :  { %v3448_v41 = vpop.xlane.xlu0 %3447 }
0x395d   :  { %v3449_v43 = vsel %vm3437_vm2, %v3448_v41, %v3392_v0  ;;  %v3605_v41 = vld [vmem:[#allocation0 + $0x68] ss:$0 sm:$0xff] }
0x395e   :  { %v3503_v44 = vmul.f32 %v3491_v22, %v3449_v43 }
0x3960   :  { %3504 = vadd.xlane.f32.xlu1 %v3503_v44 }
0x3964   :  { %v3456_v45 = vpop.xlane.xlu0 %3455 }
0x3965   :  { %v3457_v46 = vsel %vm3437_vm2, %v3456_v45, %v3400_v3 }
0x3966   :  { %v3511_v47 = vmul.f32 %v3491_v22, %v3457_v46 }
0x3968   :  { %3512 = vadd.xlane.f32.xlu1 %v3511_v47 }
0x396c   :  { %v3464_v48 = vpop.xlane.xlu0 %3463 }
0x396d   :  { %v3465_v49 = vsel %vm3437_vm2, %v3464_v48, %v3408_v6 }
0x396e   :  { %v3519_v50 = vmul.f32 %v3491_v22, %v3465_v49 }
0x3970   :  { %3520 = vadd.xlane.f32.xlu1 %v3519_v50 }
0x3974   :  { %v3472_v51 = vpop.xlane.xlu0 %3471 }
0x3975   :  { %v3473_v52 = vsel %vm3437_vm2, %v3472_v51, %v3416_v9 }
0x3976   :  { %v3527_v53 = vmul.f32 %v3491_v22, %v3473_v52 }
0x3978   :  { %3528 = vadd.xlane.f32.xlu1 %v3527_v53  ;;  %v3440_v54 = vpop.xlane.xlu0 %3439 }
0x3979   :  { %v3441_v55 = vsel %vm3437_vm2, %v3440_v54, %v3384_v14 }
0x397a   :  { %v3495_v56 = vmul.f32 %v3491_v22, %v3441_v55 }
0x397c   :  { %3496 = vadd.xlane.f32.xlu1 %v3495_v56  ;;  %v3480_v57 = vpop.xlane.xlu0 %3479 }
0x397d   :  { %v3481_v58 = vsel %vm3437_vm2, %v3480_v57, %v3424_v17 }
0x397e   :  { %v3535_v59 = vmul.f32 %v3491_v22, %v3481_v58 }
0x3980   :  { %3536 = vadd.xlane.f32.xlu1 %v3535_v59  ;;  %v3488_v60 = vpop.xlane.xlu0 %3487 }
0x3981   :  { %v3489_v61 = vsel %vm3437_vm2, %v3488_v60, %v3432_v20  ;;  %vm4291_vm2 = vcmp.eq.s32.totalorder %v5549_v11, 115 }
0x3982   :  { %v3543_v62 = vmul.f32 %v3491_v22, %v3489_v61 }
0x3984   :  { %3544 = vadd.xlane.f32.xlu1 %v3543_v62  ;;  %v3501_v0 = vpop.xlane.xlu0 %3500 }
0x3985   :  { %v3502_v1 = vsel %vm3494_vm3, %v3501_v0, %v3445_v24 }
0x3986   :  { %v3556_v2 = vmul.f32 %v3548_v63, %v3502_v1 }
0x3988   :  { %3557 = vadd.xlane.f32.xlu1 %v3556_v2  ;;  %v3509_v3 = vpop.xlane.xlu0 %3508 }
0x3989   :  { %v3510_v4 = vsel %vm3494_vm3, %v3509_v3, %v3453_v27 }
0x398a   :  { %v3564_v5 = vmul.f32 %v3548_v63, %v3510_v4 }
0x398c   :  { %3565 = vadd.xlane.f32.xlu1 %v3564_v5  ;;  %v3517_v6 = vpop.xlane.xlu0 %3516 }
0x398d   :  { %v3518_v7 = vsel %vm3494_vm3, %v3517_v6, %v3461_v30 }
0x398e   :  { %v3572_v8 = vmul.f32 %v3548_v63, %v3518_v7 }
0x3990   :  { %3573 = vadd.xlane.f32.xlu1 %v3572_v8  ;;  %v3525_v9 = vpop.xlane.xlu0 %3524 }
0x3991   :  { %v3526_v10 = vsel %vm3494_vm3, %v3525_v9, %v3469_v33 }
0x3992   :  { %v3580_v13 = vmul.f32 %v3548_v63, %v3526_v10 }
0x3994   :  { %3581 = vadd.xlane.f32.xlu1 %v3580_v13  ;;  %v3533_v14 = vpop.xlane.xlu0 %3532 }
0x3995   :  { %v3534_v15 = vsel %vm3494_vm3, %v3533_v14, %v3477_v36 }
0x3996   :  { %v3588_v16 = vmul.f32 %v3548_v63, %v3534_v15 }
0x3998   :  { %3589 = vadd.xlane.f32.xlu1 %v3588_v16  ;;  %v3541_v17 = vpop.xlane.xlu0 %3540 }
0x3999   :  { %v3542_v18 = vsel %vm3494_vm3, %v3541_v17, %v3485_v39 }
0x399a   :  { %v3596_v19 = vmul.f32 %v3548_v63, %v3542_v18 }
0x399c   :  { %3597 = vadd.xlane.f32.xlu1 %v3596_v19 }
0x39ed   :  { %v3505_v20 = vpop.xlane.xlu1 %3504 }
0x39ee   :  { %v3506_v21 = vsel %vm3494_vm3, %v3505_v20, %v3449_v43 }
0x39ef   :  { %v3560_v22 = vmul.f32 %v3548_v63, %v3506_v21 }
0x39f1   :  { %3561 = vadd.xlane.f32.xlu0 %v3560_v22 }
0x39f5   :  { %v3513_v23 = vpop.xlane.xlu1 %3512 }
0x39f6   :  { %v3514_v24 = vsel %vm3494_vm3, %v3513_v23, %v3457_v46  ;;  %v3666_v23 = vld [vmem:[#allocation0 + $0x69] ss:$0 sm:$0xff] }
0x39f7   :  { %v3568_v25 = vmul.f32 %v3548_v63, %v3514_v24 }
0x39f9   :  { %3569 = vadd.xlane.f32.xlu0 %v3568_v25 }
0x39fd   :  { %v3521_v26 = vpop.xlane.xlu1 %3520 }
0x39fe   :  { %v3522_v27 = vsel %vm3494_vm3, %v3521_v26, %v3465_v49 }
0x39ff   :  { %v3576_v28 = vmul.f32 %v3548_v63, %v3522_v27 }
0x3a01   :  { %3577 = vadd.xlane.f32.xlu0 %v3576_v28 }
0x3a05   :  { %v3529_v29 = vpop.xlane.xlu1 %3528 }
0x3a06   :  { %v3530_v30 = vsel %vm3494_vm3, %v3529_v29, %v3473_v52 }
0x3a07   :  { %v3584_v31 = vmul.f32 %v3548_v63, %v3530_v30 }
0x3a09   :  { %3585 = vadd.xlane.f32.xlu0 %v3584_v31  ;;  %v3497_v32 = vpop.xlane.xlu1 %3496 }
0x3a0a   :  { %v3498_v33 = vsel %vm3494_vm3, %v3497_v32, %v3441_v55  ;;  %v164_v55 = vadd.s32 104, %v5551_v12 }
0x3a0b   :  { %v3552_v34 = vmul.f32 %v3548_v63, %v3498_v33 }
0x3a0c   :  { %vm165_vm5 = vcmp.eq.s32.totalorder %v5549_v11, %v164_v55 }
0x3a0d   :  { %3553 = vadd.xlane.f32.xlu0 %v3552_v34  ;;  %v3537_v35 = vpop.xlane.xlu1 %3536 }
0x3a0e   :  { %v3538_v36 = vsel %vm3494_vm3, %v3537_v35, %v3481_v58 }
0x3a0f   :  { %v3592_v37 = vmul.f32 %v3548_v63, %v3538_v36 }
0x3a11   :  { %3593 = vadd.xlane.f32.xlu0 %v3592_v37  ;;  %v3545_v38 = vpop.xlane.xlu1 %3544 }
0x3a12   :  { %v3546_v39 = vsel %vm3494_vm3, %v3545_v38, %v3489_v61  ;;  %v166_v61 = vsel %vm165_vm5, 1.0, %v5521_v42  ;;  %vm4356_vm3 = vcmp.eq.s32.totalorder %v5549_v11, 116  ;;  %vm4486_vm5 = vcmp.eq.s32.totalorder %v5549_v11, 118 }
0x3a13   :  { %v3600_v40 = vmul.f32 %v3548_v63, %v3546_v39  ;;  %v3661_v63 = vmul.f32 %v3605_v41, %v166_v61 }
0x3a15   :  { %3601 = vadd.xlane.f32.xlu0 %v3600_v40  ;;  %v3558_v43 = vpop.xlane.xlu1 %3557 }
0x3a16   :  { %v3559_v44 = vsel %vm3551_vm4, %v3558_v43, %v3502_v1 }
0x3a17   :  { %v3613_v45 = vmul.f32 %v3605_v41, %v3559_v44 }
0x3a19   :  { %3614 = vadd.xlane.f32.xlu0 %v3613_v45  ;;  %v3566_v46 = vpop.xlane.xlu1 %3565 }
0x3a1a   :  { %v3567_v47 = vsel %vm3551_vm4, %v3566_v46, %v3510_v4 }
0x3a1b   :  { %v3621_v48 = vmul.f32 %v3605_v41, %v3567_v47 }
0x3a1d   :  { %3622 = vadd.xlane.f32.xlu0 %v3621_v48  ;;  %v3574_v49 = vpop.xlane.xlu1 %3573 }
0x3a1e   :  { %v3575_v50 = vsel %vm3551_vm4, %v3574_v49, %v3518_v7 }
0x3a1f   :  { %v3629_v51 = vmul.f32 %v3605_v41, %v3575_v50 }
0x3a21   :  { %3630 = vadd.xlane.f32.xlu0 %v3629_v51  ;;  %v3582_v52 = vpop.xlane.xlu1 %3581 }
0x3a22   :  { %v3583_v53 = vsel %vm3551_vm4, %v3582_v52, %v3526_v10 }
0x3a23   :  { %v3637_v54 = vmul.f32 %v3605_v41, %v3583_v53 }
0x3a25   :  { %3638 = vadd.xlane.f32.xlu0 %v3637_v54  ;;  %v3590_v56 = vpop.xlane.xlu1 %3589 }
0x3a26   :  { %v3591_v57 = vsel %vm3551_vm4, %v3590_v56, %v3534_v15 }
0x3a27   :  { %v3645_v58 = vmul.f32 %v3605_v41, %v3591_v57 }
0x3a29   :  { %3646 = vadd.xlane.f32.xlu0 %v3645_v58  ;;  %v3598_v59 = vpop.xlane.xlu1 %3597 }
0x3a2a   :  { %v3599_v60 = vsel %vm3551_vm4, %v3598_v59, %v3542_v18 }
0x3a2b   :  { %v3653_v62 = vmul.f32 %v3605_v41, %v3599_v60 }
0x3a2d   :  { %3654 = vadd.xlane.f32.xlu0 %v3653_v62 }
0x3a31   :  { %3662 = vadd.xlane.f32.xlu0 %v3661_v63 }
0x3a7e   :  { %v3562_v0 = vpop.xlane.xlu0 %3561 }
0x3a7f   :  { %v3563_v1 = vsel %vm3551_vm4, %v3562_v0, %v3506_v21 }
0x3a80   :  { %v3617_v2 = vmul.f32 %v3605_v41, %v3563_v1 }
0x3a82   :  { %3618 = vadd.xlane.f32.xlu1 %v3617_v2 }
0x3a86   :  { %v3570_v3 = vpop.xlane.xlu0 %3569 }
0x3a87   :  { %v3571_v4 = vsel %vm3551_vm4, %v3570_v3, %v3514_v24  ;;  %v3727_v3 = vld [vmem:[#allocation0 + $0x6a] ss:$0 sm:$0xff] }
0x3a88   :  { %v3625_v5 = vmul.f32 %v3605_v41, %v3571_v4 }
0x3a8a   :  { %3626 = vadd.xlane.f32.xlu1 %v3625_v5 }
0x3a8e   :  { %v3578_v6 = vpop.xlane.xlu0 %3577 }
0x3a8f   :  { %v3579_v7 = vsel %vm3551_vm4, %v3578_v6, %v3522_v27 }
0x3a90   :  { %v3633_v8 = vmul.f32 %v3605_v41, %v3579_v7 }
0x3a92   :  { %3634 = vadd.xlane.f32.xlu1 %v3633_v8 }
0x3a96   :  { %v3586_v9 = vpop.xlane.xlu0 %3585 }
0x3a97   :  { %v3587_v10 = vsel %vm3551_vm4, %v3586_v9, %v3530_v30 }
0x3a98   :  { %v3641_v13 = vmul.f32 %v3605_v41, %v3587_v10 }
0x3a9a   :  { %3642 = vadd.xlane.f32.xlu1 %v3641_v13  ;;  %v3554_v14 = vpop.xlane.xlu0 %3553 }
0x3a9b   :  { %v3555_v15 = vsel %vm3551_vm4, %v3554_v14, %v3498_v33 }
0x3a9c   :  { %v3609_v16 = vmul.f32 %v3605_v41, %v3555_v15 }
0x3a9e   :  { %3610 = vadd.xlane.f32.xlu1 %v3609_v16  ;;  %v3594_v17 = vpop.xlane.xlu0 %3593 }
0x3a9f   :  { %v3595_v18 = vsel %vm3551_vm4, %v3594_v17, %v3538_v36 }
0x3aa0   :  { %v3649_v19 = vmul.f32 %v3605_v41, %v3595_v18 }
0x3aa2   :  { %3650 = vadd.xlane.f32.xlu1 %v3649_v19  ;;  %v3602_v20 = vpop.xlane.xlu0 %3601 }
0x3aa3   :  { %v3603_v21 = vsel %vm3551_vm4, %v3602_v20, %v3546_v39  ;;  %vm4421_vm4 = vcmp.eq.s32.totalorder %v5549_v11, 117 }
0x3aa4   :  { %v3657_v22 = vmul.f32 %v3605_v41, %v3603_v21 }
0x3aa6   :  { %3658 = vadd.xlane.f32.xlu1 %v3657_v22  ;;  %v3615_v24 = vpop.xlane.xlu0 %3614 }
0x3aa7   :  { %v3616_v25 = vsel %vm3608_vm6, %v3615_v24, %v3559_v44 }
0x3aa8   :  { %v3674_v26 = vmul.f32 %v3666_v23, %v3616_v25 }
0x3aaa   :  { %3675 = vadd.xlane.f32.xlu0 %v3674_v26  ;;  %v3623_v27 = vpop.xlane.xlu0 %3622 }
0x3aab   :  { %v3624_v28 = vsel %vm3608_vm6, %v3623_v27, %v3567_v47 }
0x3aac   :  { %v3682_v29 = vmul.f32 %v3666_v23, %v3624_v28 }
0x3aae   :  { %3683 = vadd.xlane.f32.xlu0 %v3682_v29  ;;  %v3631_v30 = vpop.xlane.xlu0 %3630 }
0x3aaf   :  { %v3632_v31 = vsel %vm3608_vm6, %v3631_v30, %v3575_v50 }
0x3ab0   :  { %v3690_v32 = vmul.f32 %v3666_v23, %v3632_v31 }
0x3ab2   :  { %3691 = vadd.xlane.f32.xlu0 %v3690_v32  ;;  %v3639_v33 = vpop.xlane.xlu0 %3638 }
0x3ab3   :  { %v3640_v34 = vsel %vm3608_vm6, %v3639_v33, %v3583_v53 }
0x3ab4   :  { %v3698_v35 = vmul.f32 %v3666_v23, %v3640_v34 }
0x3ab6   :  { %3699 = vadd.xlane.f32.xlu0 %v3698_v35  ;;  %v3647_v36 = vpop.xlane.xlu0 %3646 }
0x3ab7   :  { %v3648_v37 = vsel %vm3608_vm6, %v3647_v36, %v3591_v57 }
0x3ab8   :  { %v3706_v38 = vmul.f32 %v3666_v23, %v3648_v37 }
0x3aba   :  { %3707 = vadd.xlane.f32.xlu0 %v3706_v38  ;;  %v3655_v39 = vpop.xlane.xlu0 %3654 }
0x3abb   :  { %v3656_v40 = vsel %vm3608_vm6, %v3655_v39, %v3599_v60 }
0x3abc   :  { %v3714_v41 = vmul.f32 %v3666_v23, %v3656_v40 }
0x3abe   :  { %3715 = vadd.xlane.f32.xlu0 %v3714_v41  ;;  %v3663_v43 = vpop.xlane.xlu0 %3662 }
0x3abf   :  { %v3664_v44 = vsel %vm3608_vm6, %v3663_v43, %v166_v61 }
0x3ac0   :  { %v3722_v45 = vmul.f32 %v3666_v23, %v3664_v44 }
0x3ac2   :  { %3723 = vadd.xlane.f32.xlu0 %v3722_v45 }
0x3b0f   :  { %v3619_v46 = vpop.xlane.xlu1 %3618 }
0x3b10   :  { %v3620_v47 = vsel %vm3608_vm6, %v3619_v46, %v3563_v1 }
0x3b11   :  { %v3678_v48 = vmul.f32 %v3666_v23, %v3620_v47 }
0x3b13   :  { %3679 = vadd.xlane.f32.xlu1 %v3678_v48 }
0x3b17   :  { %v3627_v49 = vpop.xlane.xlu1 %3626 }
0x3b18   :  { %v3628_v50 = vsel %vm3608_vm6, %v3627_v49, %v3571_v4  ;;  %v3788_v49 = vld [vmem:[#allocation0 + $0x6b] ss:$0 sm:$0xff] }
0x3b19   :  { %v3686_v51 = vmul.f32 %v3666_v23, %v3628_v50 }
0x3b1b   :  { %3687 = vadd.xlane.f32.xlu1 %v3686_v51 }
0x3b1f   :  { %v3635_v52 = vpop.xlane.xlu1 %3634 }
0x3b20   :  { %v3636_v53 = vsel %vm3608_vm6, %v3635_v52, %v3579_v7 }
0x3b21   :  { %v3694_v54 = vmul.f32 %v3666_v23, %v3636_v53 }
0x3b23   :  { %3695 = vadd.xlane.f32.xlu1 %v3694_v54 }
0x3b27   :  { %v3643_v55 = vpop.xlane.xlu1 %3642 }
0x3b28   :  { %v3644_v56 = vsel %vm3608_vm6, %v3643_v55, %v3587_v10 }
0x3b29   :  { %v3702_v57 = vmul.f32 %v3666_v23, %v3644_v56 }
0x3b2b   :  { %v3611_v58 = vpop.xlane.xlu1 %3610  ;;  %3703 = vadd.xlane.f32.xlu1 %v3702_v57 }
0x3b2c   :  { %v3612_v59 = vsel %vm3608_vm6, %v3611_v58, %v3555_v15 }
0x3b2d   :  { %v3670_v60 = vmul.f32 %v3666_v23, %v3612_v59 }
0x3b2f   :  { %v3651_v61 = vpop.xlane.xlu1 %3650  ;;  %3671 = vadd.xlane.f32.xlu1 %v3670_v60 }
0x3b30   :  { %v3652_v62 = vsel %vm3608_vm6, %v3651_v61, %v3595_v18 }
0x3b31   :  { %v3710_v63 = vmul.f32 %v3666_v23, %v3652_v62 }
0x3b33   :  { %3711 = vadd.xlane.f32.xlu1 %v3710_v63  ;;  %v3659_v0 = vpop.xlane.xlu1 %3658 }
0x3b34   :  { %v3660_v1 = vsel %vm3608_vm6, %v3659_v0, %v3603_v21  ;;  %vm4551_vm6 = vcmp.eq.s32.totalorder %v5549_v11, 119 }
0x3b35   :  { %v3718_v2 = vmul.f32 %v3666_v23, %v3660_v1 }
0x3b37   :  { %3719 = vadd.xlane.f32.xlu1 %v3718_v2  ;;  %v3676_v4 = vpop.xlane.xlu0 %3675 }
0x3b38   :  { %v3677_v5 = vsel %vm3669_vm7, %v3676_v4, %v3616_v25 }
0x3b39   :  { %v3735_v6 = vmul.f32 %v3727_v3, %v3677_v5 }
0x3b3b   :  { %3736 = vadd.xlane.f32.xlu0 %v3735_v6  ;;  %v3684_v7 = vpop.xlane.xlu0 %3683 }
0x3b3c   :  { %v3685_v8 = vsel %vm3669_vm7, %v3684_v7, %v3624_v28 }
0x3b3d   :  { %v3743_v9 = vmul.f32 %v3727_v3, %v3685_v8 }
0x3b3f   :  { %3744 = vadd.xlane.f32.xlu0 %v3743_v9  ;;  %v3692_v10 = vpop.xlane.xlu0 %3691 }
0x3b40   :  { %v3693_v13 = vsel %vm3669_vm7, %v3692_v10, %v3632_v31 }
0x3b41   :  { %v3751_v14 = vmul.f32 %v3727_v3, %v3693_v13 }
0x3b43   :  { %3752 = vadd.xlane.f32.xlu0 %v3751_v14  ;;  %v3700_v15 = vpop.xlane.xlu0 %3699 }
0x3b44   :  { %v3701_v16 = vsel %vm3669_vm7, %v3700_v15, %v3640_v34 }
0x3b45   :  { %v3759_v17 = vmul.f32 %v3727_v3, %v3701_v16 }
0x3b47   :  { %3760 = vadd.xlane.f32.xlu0 %v3759_v17  ;;  %v3708_v18 = vpop.xlane.xlu0 %3707 }
0x3b48   :  { %v3709_v19 = vsel %vm3669_vm7, %v3708_v18, %v3648_v37 }
0x3b49   :  { %v3767_v20 = vmul.f32 %v3727_v3, %v3709_v19 }
0x3b4b   :  { %3768 = vadd.xlane.f32.xlu0 %v3767_v20  ;;  %v3716_v21 = vpop.xlane.xlu0 %3715 }
0x3b4c   :  { %v3717_v22 = vsel %vm3669_vm7, %v3716_v21, %v3656_v40 }
0x3b4d   :  { %v3775_v23 = vmul.f32 %v3727_v3, %v3717_v22 }
0x3b4f   :  { %3776 = vadd.xlane.f32.xlu0 %v3775_v23  ;;  %v3724_v24 = vpop.xlane.xlu0 %3723 }
0x3b50   :  { %v3725_v25 = vsel %vm3669_vm7, %v3724_v24, %v3664_v44 }
0x3b51   :  { %v3783_v26 = vmul.f32 %v3727_v3, %v3725_v25 }
0x3b53   :  { %3784 = vadd.xlane.f32.xlu0 %v3783_v26 }
0x3ba0   :  { %v3680_v27 = vpop.xlane.xlu1 %3679 }
0x3ba1   :  { %v3681_v28 = vsel %vm3669_vm7, %v3680_v27, %v3620_v47 }
0x3ba2   :  { %v3739_v29 = vmul.f32 %v3727_v3, %v3681_v28 }
0x3ba4   :  { %3740 = vadd.xlane.f32.xlu1 %v3739_v29 }
0x3ba8   :  { %v3688_v30 = vpop.xlane.xlu1 %3687 }
0x3ba9   :  { %v3689_v31 = vsel %vm3669_vm7, %v3688_v30, %v3628_v50  ;;  %v3849_v30 = vld [vmem:[#allocation0 + $0x6c] ss:$0 sm:$0xff] }
0x3baa   :  { %v3747_v32 = vmul.f32 %v3727_v3, %v3689_v31 }
0x3bac   :  { %3748 = vadd.xlane.f32.xlu1 %v3747_v32 }
0x3bb0   :  { %v3696_v33 = vpop.xlane.xlu1 %3695 }
0x3bb1   :  { %v3697_v34 = vsel %vm3669_vm7, %v3696_v33, %v3636_v53 }
0x3bb2   :  { %v3755_v35 = vmul.f32 %v3727_v3, %v3697_v34 }
0x3bb4   :  { %3756 = vadd.xlane.f32.xlu1 %v3755_v35 }
0x3bb8   :  { %v3704_v36 = vpop.xlane.xlu1 %3703 }
0x3bb9   :  { %v3705_v37 = vsel %vm3669_vm7, %v3704_v36, %v3644_v56 }
0x3bba   :  { %v3763_v38 = vmul.f32 %v3727_v3, %v3705_v37 }
0x3bbc   :  { %3764 = vadd.xlane.f32.xlu1 %v3763_v38  ;;  %v3672_v39 = vpop.xlane.xlu1 %3671 }
0x3bbd   :  { %v3673_v40 = vsel %vm3669_vm7, %v3672_v39, %v3612_v59 }
0x3bbe   :  { %v3731_v41 = vmul.f32 %v3727_v3, %v3673_v40 }
0x3bc0   :  { %3732 = vadd.xlane.f32.xlu1 %v3731_v41  ;;  %v3712_v43 = vpop.xlane.xlu1 %3711 }
0x3bc1   :  { %v3713_v44 = vsel %vm3669_vm7, %v3712_v43, %v3652_v62 }
0x3bc2   :  { %v3771_v45 = vmul.f32 %v3727_v3, %v3713_v44 }
0x3bc4   :  { %3772 = vadd.xlane.f32.xlu1 %v3771_v45  ;;  %v3720_v46 = vpop.xlane.xlu1 %3719 }
0x3bc5   :  { %v3721_v47 = vsel %vm3669_vm7, %v3720_v46, %v3660_v1 }
0x3bc6   :  { %v3779_v48 = vmul.f32 %v3727_v3, %v3721_v47 }
0x3bc8   :  { %3780 = vadd.xlane.f32.xlu1 %v3779_v48  ;;  %v3737_v50 = vpop.xlane.xlu0 %3736 }
0x3bc9   :  { %v3738_v51 = vsel %vm3730_vm8, %v3737_v50, %v3677_v5 }
0x3bca   :  { %v3796_v52 = vmul.f32 %v3788_v49, %v3738_v51 }
0x3bcc   :  { %3797 = vadd.xlane.f32.xlu0 %v3796_v52  ;;  %v3745_v53 = vpop.xlane.xlu0 %3744 }
0x3bcd   :  { %v3746_v54 = vsel %vm3730_vm8, %v3745_v53, %v3685_v8 }
0x3bce   :  { %v3804_v55 = vmul.f32 %v3788_v49, %v3746_v54 }
0x3bd0   :  { %3805 = vadd.xlane.f32.xlu0 %v3804_v55  ;;  %v3753_v56 = vpop.xlane.xlu0 %3752 }
0x3bd1   :  { %v3754_v57 = vsel %vm3730_vm8, %v3753_v56, %v3693_v13 }
0x3bd2   :  { %v3812_v58 = vmul.f32 %v3788_v49, %v3754_v57 }
0x3bd4   :  { %3813 = vadd.xlane.f32.xlu0 %v3812_v58  ;;  %v3761_v59 = vpop.xlane.xlu0 %3760 }
0x3bd5   :  { %v3762_v60 = vsel %vm3730_vm8, %v3761_v59, %v3701_v16 }
0x3bd6   :  { %v3820_v61 = vmul.f32 %v3788_v49, %v3762_v60 }
0x3bd8   :  { %3821 = vadd.xlane.f32.xlu0 %v3820_v61  ;;  %v3769_v62 = vpop.xlane.xlu0 %3768 }
0x3bd9   :  { %v3770_v63 = vsel %vm3730_vm8, %v3769_v62, %v3709_v19 }
0x3bda   :  { %v3828_v0 = vmul.f32 %v3788_v49, %v3770_v63 }
0x3bdc   :  { %3829 = vadd.xlane.f32.xlu0 %v3828_v0  ;;  %v3777_v1 = vpop.xlane.xlu0 %3776 }
0x3bdd   :  { %v3778_v2 = vsel %vm3730_vm8, %v3777_v1, %v3717_v22 }
0x3bde   :  { %v3836_v3 = vmul.f32 %v3788_v49, %v3778_v2 }
0x3be0   :  { %3837 = vadd.xlane.f32.xlu0 %v3836_v3  ;;  %v3785_v4 = vpop.xlane.xlu0 %3784 }
0x3be1   :  { %v3786_v5 = vsel %vm3730_vm8, %v3785_v4, %v3725_v25 }
0x3be2   :  { %v3844_v6 = vmul.f32 %v3788_v49, %v3786_v5 }
0x3be4   :  { %3845 = vadd.xlane.f32.xlu0 %v3844_v6 }
0x3c31   :  { %v3741_v7 = vpop.xlane.xlu1 %3740 }
0x3c32   :  { %v3742_v8 = vsel %vm3730_vm8, %v3741_v7, %v3681_v28 }
0x3c33   :  { %v3800_v9 = vmul.f32 %v3788_v49, %v3742_v8 }
0x3c35   :  { %3801 = vadd.xlane.f32.xlu1 %v3800_v9 }
0x3c39   :  { %v3749_v10 = vpop.xlane.xlu1 %3748 }
0x3c3a   :  { %v3750_v13 = vsel %vm3730_vm8, %v3749_v10, %v3689_v31  ;;  %v3910_v10 = vld [vmem:[#allocation0 + $0x6d] ss:$0 sm:$0xff] }
0x3c3b   :  { %v3808_v14 = vmul.f32 %v3788_v49, %v3750_v13 }
0x3c3d   :  { %3809 = vadd.xlane.f32.xlu1 %v3808_v14 }
0x3c41   :  { %v3757_v15 = vpop.xlane.xlu1 %3756 }
0x3c42   :  { %v3758_v16 = vsel %vm3730_vm8, %v3757_v15, %v3697_v34 }
0x3c43   :  { %v3816_v17 = vmul.f32 %v3788_v49, %v3758_v16 }
0x3c45   :  { %3817 = vadd.xlane.f32.xlu1 %v3816_v17 }
0x3c49   :  { %v3765_v18 = vpop.xlane.xlu1 %3764 }
0x3c4a   :  { %v3766_v19 = vsel %vm3730_vm8, %v3765_v18, %v3705_v37 }
0x3c4b   :  { %v3824_v20 = vmul.f32 %v3788_v49, %v3766_v19 }
0x3c4d   :  { %3825 = vadd.xlane.f32.xlu1 %v3824_v20  ;;  %v3733_v21 = vpop.xlane.xlu1 %3732 }
0x3c4e   :  { %v3734_v22 = vsel %vm3730_vm8, %v3733_v21, %v3673_v40 }
0x3c4f   :  { %v3792_v23 = vmul.f32 %v3788_v49, %v3734_v22 }
0x3c51   :  { %3793 = vadd.xlane.f32.xlu1 %v3792_v23  ;;  %v3773_v24 = vpop.xlane.xlu1 %3772 }
0x3c52   :  { %v3774_v25 = vsel %vm3730_vm8, %v3773_v24, %v3713_v44 }
0x3c53   :  { %v3832_v26 = vmul.f32 %v3788_v49, %v3774_v25 }
0x3c55   :  { %3833 = vadd.xlane.f32.xlu1 %v3832_v26  ;;  %v3781_v27 = vpop.xlane.xlu1 %3780 }
0x3c56   :  { %v3782_v28 = vsel %vm3730_vm8, %v3781_v27, %v3721_v47  ;;  %vm4616_vm8 = vcmp.eq.s32.totalorder %v5549_v11, 120 }
0x3c57   :  { %v3840_v29 = vmul.f32 %v3788_v49, %v3782_v28 }
0x3c59   :  { %3841 = vadd.xlane.f32.xlu1 %v3840_v29  ;;  %v3798_v31 = vpop.xlane.xlu0 %3797 }
0x3c5a   :  { %v3799_v32 = vsel %vm3791_vm9, %v3798_v31, %v3738_v51 }
0x3c5b   :  { %v3857_v33 = vmul.f32 %v3849_v30, %v3799_v32 }
0x3c5d   :  { %3858 = vadd.xlane.f32.xlu0 %v3857_v33  ;;  %v3806_v34 = vpop.xlane.xlu0 %3805 }
0x3c5e   :  { %v3807_v35 = vsel %vm3791_vm9, %v3806_v34, %v3746_v54 }
0x3c5f   :  { %v3865_v36 = vmul.f32 %v3849_v30, %v3807_v35 }
0x3c61   :  { %3866 = vadd.xlane.f32.xlu0 %v3865_v36  ;;  %v3814_v37 = vpop.xlane.xlu0 %3813 }
0x3c62   :  { %v3815_v38 = vsel %vm3791_vm9, %v3814_v37, %v3754_v57 }
0x3c63   :  { %v3873_v39 = vmul.f32 %v3849_v30, %v3815_v38 }
0x3c65   :  { %3874 = vadd.xlane.f32.xlu0 %v3873_v39  ;;  %v3822_v40 = vpop.xlane.xlu0 %3821 }
0x3c66   :  { %v3823_v41 = vsel %vm3791_vm9, %v3822_v40, %v3762_v60 }
0x3c67   :  { %v3881_v43 = vmul.f32 %v3849_v30, %v3823_v41 }
0x3c69   :  { %3882 = vadd.xlane.f32.xlu0 %v3881_v43  ;;  %v3830_v44 = vpop.xlane.xlu0 %3829 }
0x3c6a   :  { %v3831_v45 = vsel %vm3791_vm9, %v3830_v44, %v3770_v63 }
0x3c6b   :  { %v3889_v46 = vmul.f32 %v3849_v30, %v3831_v45 }
0x3c6d   :  { %3890 = vadd.xlane.f32.xlu0 %v3889_v46  ;;  %v3838_v47 = vpop.xlane.xlu0 %3837 }
0x3c6e   :  { %v3839_v48 = vsel %vm3791_vm9, %v3838_v47, %v3778_v2 }
0x3c6f   :  { %v3897_v49 = vmul.f32 %v3849_v30, %v3839_v48 }
0x3c71   :  { %3898 = vadd.xlane.f32.xlu0 %v3897_v49  ;;  %v3846_v50 = vpop.xlane.xlu0 %3845 }
0x3c72   :  { %v3847_v51 = vsel %vm3791_vm9, %v3846_v50, %v3786_v5 }
0x3c73   :  { %v3905_v52 = vmul.f32 %v3849_v30, %v3847_v51 }
0x3c75   :  { %3906 = vadd.xlane.f32.xlu0 %v3905_v52 }
0x3cc2   :  { %v3802_v53 = vpop.xlane.xlu1 %3801 }
0x3cc3   :  { %v3803_v54 = vsel %vm3791_vm9, %v3802_v53, %v3742_v8 }
0x3cc4   :  { %v3861_v55 = vmul.f32 %v3849_v30, %v3803_v54 }
0x3cc6   :  { %3862 = vadd.xlane.f32.xlu1 %v3861_v55 }
0x3cca   :  { %v3810_v56 = vpop.xlane.xlu1 %3809 }
0x3ccb   :  { %v3811_v57 = vsel %vm3791_vm9, %v3810_v56, %v3750_v13  ;;  %v3971_v56 = vld [vmem:[#allocation0 + $0x6e] ss:$0 sm:$0xff] }
0x3ccc   :  { %v3869_v58 = vmul.f32 %v3849_v30, %v3811_v57 }
0x3cce   :  { %3870 = vadd.xlane.f32.xlu1 %v3869_v58 }
0x3cd2   :  { %v3818_v59 = vpop.xlane.xlu1 %3817 }
0x3cd3   :  { %v3819_v60 = vsel %vm3791_vm9, %v3818_v59, %v3758_v16 }
0x3cd4   :  { %v3877_v61 = vmul.f32 %v3849_v30, %v3819_v60 }
0x3cd6   :  { %3878 = vadd.xlane.f32.xlu1 %v3877_v61 }
0x3cda   :  { %v3826_v62 = vpop.xlane.xlu1 %3825 }
0x3cdb   :  { %v3827_v63 = vsel %vm3791_vm9, %v3826_v62, %v3766_v19 }
0x3cdc   :  { %v3885_v0 = vmul.f32 %v3849_v30, %v3827_v63 }
0x3cde   :  { %3886 = vadd.xlane.f32.xlu1 %v3885_v0  ;;  %v3794_v1 = vpop.xlane.xlu1 %3793 }
0x3cdf   :  { %v3795_v2 = vsel %vm3791_vm9, %v3794_v1, %v3734_v22 }
0x3ce0   :  { %v3853_v3 = vmul.f32 %v3849_v30, %v3795_v2 }
0x3ce2   :  { %3854 = vadd.xlane.f32.xlu1 %v3853_v3  ;;  %v3834_v4 = vpop.xlane.xlu1 %3833 }
0x3ce3   :  { %v3835_v5 = vsel %vm3791_vm9, %v3834_v4, %v3774_v25 }
0x3ce4   :  { %v3893_v6 = vmul.f32 %v3849_v30, %v3835_v5 }
0x3ce6   :  { %3894 = vadd.xlane.f32.xlu1 %v3893_v6  ;;  %v3842_v7 = vpop.xlane.xlu1 %3841 }
0x3ce7   :  { %v3843_v8 = vsel %vm3791_vm9, %v3842_v7, %v3782_v28  ;;  %vm4685_vm9 = vcmp.eq.s32.totalorder %v5549_v11, 121 }
0x3ce8   :  { %v3901_v9 = vmul.f32 %v3849_v30, %v3843_v8 }
0x3cea   :  { %3902 = vadd.xlane.f32.xlu1 %v3901_v9  ;;  %v3859_v13 = vpop.xlane.xlu0 %3858 }
0x3ceb   :  { %v3860_v14 = vsel %vm3852_vm10, %v3859_v13, %v3799_v32 }
0x3cec   :  { %v3918_v15 = vmul.f32 %v3910_v10, %v3860_v14 }
0x3cee   :  { %3919 = vadd.xlane.f32.xlu0 %v3918_v15  ;;  %v3867_v16 = vpop.xlane.xlu0 %3866 }
0x3cef   :  { %v3868_v17 = vsel %vm3852_vm10, %v3867_v16, %v3807_v35 }
0x3cf0   :  { %v3926_v18 = vmul.f32 %v3910_v10, %v3868_v17 }
0x3cf2   :  { %3927 = vadd.xlane.f32.xlu0 %v3926_v18  ;;  %v3875_v19 = vpop.xlane.xlu0 %3874 }
0x3cf3   :  { %v3876_v20 = vsel %vm3852_vm10, %v3875_v19, %v3815_v38 }
0x3cf4   :  { %v3934_v21 = vmul.f32 %v3910_v10, %v3876_v20 }
0x3cf6   :  { %3935 = vadd.xlane.f32.xlu0 %v3934_v21  ;;  %v3883_v22 = vpop.xlane.xlu0 %3882 }
0x3cf7   :  { %v3884_v23 = vsel %vm3852_vm10, %v3883_v22, %v3823_v41 }
0x3cf8   :  { %v3942_v24 = vmul.f32 %v3910_v10, %v3884_v23 }
0x3cfa   :  { %3943 = vadd.xlane.f32.xlu0 %v3942_v24  ;;  %v3891_v25 = vpop.xlane.xlu0 %3890 }
0x3cfb   :  { %v3892_v26 = vsel %vm3852_vm10, %v3891_v25, %v3831_v45 }
0x3cfc   :  { %v3950_v27 = vmul.f32 %v3910_v10, %v3892_v26 }
0x3cfe   :  { %3951 = vadd.xlane.f32.xlu0 %v3950_v27  ;;  %v3899_v28 = vpop.xlane.xlu0 %3898 }
0x3cff   :  { %v3900_v29 = vsel %vm3852_vm10, %v3899_v28, %v3839_v48 }
0x3d00   :  { %v3958_v30 = vmul.f32 %v3910_v10, %v3900_v29 }
0x3d02   :  { %3959 = vadd.xlane.f32.xlu0 %v3958_v30  ;;  %v3907_v31 = vpop.xlane.xlu0 %3906 }
0x3d03   :  { %v3908_v32 = vsel %vm3852_vm10, %v3907_v31, %v3847_v51 }
0x3d04   :  { %v3966_v33 = vmul.f32 %v3910_v10, %v3908_v32 }
0x3d06   :  { %3967 = vadd.xlane.f32.xlu0 %v3966_v33 }
0x3d53   :  { %v3863_v34 = vpop.xlane.xlu1 %3862 }
0x3d54   :  { %v3864_v35 = vsel %vm3852_vm10, %v3863_v34, %v3803_v54 }
0x3d55   :  { %v3922_v36 = vmul.f32 %v3910_v10, %v3864_v35 }
0x3d57   :  { %3923 = vadd.xlane.f32.xlu1 %v3922_v36 }
0x3d5b   :  { %v3871_v37 = vpop.xlane.xlu1 %3870 }
0x3d5c   :  { %v3872_v38 = vsel %vm3852_vm10, %v3871_v37, %v3811_v57  ;;  %v4032_v37 = vld [vmem:[#allocation0 + $0x6f] ss:$0 sm:$0xff] }
0x3d5d   :  { %v3930_v39 = vmul.f32 %v3910_v10, %v3872_v38 }
0x3d5f   :  { %3931 = vadd.xlane.f32.xlu1 %v3930_v39 }
0x3d63   :  { %v3879_v40 = vpop.xlane.xlu1 %3878 }
0x3d64   :  { %v3880_v41 = vsel %vm3852_vm10, %v3879_v40, %v3819_v60 }
0x3d65   :  { %v3938_v43 = vmul.f32 %v3910_v10, %v3880_v41 }
0x3d67   :  { %3939 = vadd.xlane.f32.xlu1 %v3938_v43 }
0x3d6b   :  { %v3887_v44 = vpop.xlane.xlu1 %3886 }
0x3d6c   :  { %v3888_v45 = vsel %vm3852_vm10, %v3887_v44, %v3827_v63 }
0x3d6d   :  { %v3946_v46 = vmul.f32 %v3910_v10, %v3888_v45 }
0x3d6f   :  { %3947 = vadd.xlane.f32.xlu1 %v3946_v46  ;;  %v3855_v47 = vpop.xlane.xlu1 %3854 }
0x3d70   :  { %v3856_v48 = vsel %vm3852_vm10, %v3855_v47, %v3795_v2 }
0x3d71   :  { %v3914_v49 = vmul.f32 %v3910_v10, %v3856_v48 }
0x3d73   :  { %3915 = vadd.xlane.f32.xlu1 %v3914_v49  ;;  %v3895_v50 = vpop.xlane.xlu1 %3894 }
0x3d74   :  { %v3896_v51 = vsel %vm3852_vm10, %v3895_v50, %v3835_v5 }
0x3d75   :  { %v3954_v52 = vmul.f32 %v3910_v10, %v3896_v51 }
0x3d77   :  { %3955 = vadd.xlane.f32.xlu1 %v3954_v52  ;;  %v3903_v53 = vpop.xlane.xlu1 %3902 }
0x3d78   :  { %v3904_v54 = vsel %vm3852_vm10, %v3903_v53, %v3843_v8  ;;  %vm4754_vm10 = vcmp.eq.s32.totalorder %v5549_v11, 122 }
0x3d79   :  { %v3962_v55 = vmul.f32 %v3910_v10, %v3904_v54 }
0x3d7b   :  { %3963 = vadd.xlane.f32.xlu1 %v3962_v55  ;;  %v3920_v57 = vpop.xlane.xlu0 %3919 }
0x3d7c   :  { %v3921_v58 = vsel %vm3913_vm11, %v3920_v57, %v3860_v14 }
0x3d7d   :  { %v3979_v59 = vmul.f32 %v3971_v56, %v3921_v58 }
0x3d7f   :  { %3980 = vadd.xlane.f32.xlu0 %v3979_v59  ;;  %v3928_v60 = vpop.xlane.xlu0 %3927 }
0x3d80   :  { %v3929_v61 = vsel %vm3913_vm11, %v3928_v60, %v3868_v17 }
0x3d81   :  { %v3987_v62 = vmul.f32 %v3971_v56, %v3929_v61 }
0x3d83   :  { %3988 = vadd.xlane.f32.xlu0 %v3987_v62  ;;  %v3936_v63 = vpop.xlane.xlu0 %3935 }
0x3d84   :  { %v3937_v0 = vsel %vm3913_vm11, %v3936_v63, %v3876_v20 }
0x3d85   :  { %v3995_v1 = vmul.f32 %v3971_v56, %v3937_v0 }
0x3d87   :  { %3996 = vadd.xlane.f32.xlu0 %v3995_v1  ;;  %v3944_v2 = vpop.xlane.xlu0 %3943 }
0x3d88   :  { %v3945_v3 = vsel %vm3913_vm11, %v3944_v2, %v3884_v23 }
0x3d89   :  { %v4003_v4 = vmul.f32 %v3971_v56, %v3945_v3 }
0x3d8b   :  { %4004 = vadd.xlane.f32.xlu0 %v4003_v4  ;;  %v3952_v5 = vpop.xlane.xlu0 %3951 }
0x3d8c   :  { %v3953_v6 = vsel %vm3913_vm11, %v3952_v5, %v3892_v26 }
0x3d8d   :  { %v4011_v7 = vmul.f32 %v3971_v56, %v3953_v6 }
0x3d8f   :  { %4012 = vadd.xlane.f32.xlu0 %v4011_v7  ;;  %v3960_v8 = vpop.xlane.xlu0 %3959 }
0x3d90   :  { %v3961_v9 = vsel %vm3913_vm11, %v3960_v8, %v3900_v29 }
0x3d91   :  { %v4019_v10 = vmul.f32 %v3971_v56, %v3961_v9 }
0x3d93   :  { %4020 = vadd.xlane.f32.xlu0 %v4019_v10  ;;  %v3968_v13 = vpop.xlane.xlu0 %3967 }
0x3d94   :  { %v3969_v14 = vsel %vm3913_vm11, %v3968_v13, %v3908_v32 }
0x3d95   :  { %v4027_v15 = vmul.f32 %v3971_v56, %v3969_v14 }
0x3d97   :  { %4028 = vadd.xlane.f32.xlu0 %v4027_v15 }
0x3de4   :  { %v3924_v16 = vpop.xlane.xlu1 %3923 }
0x3de5   :  { %v3925_v17 = vsel %vm3913_vm11, %v3924_v16, %v3864_v35 }
0x3de6   :  { %v3983_v18 = vmul.f32 %v3971_v56, %v3925_v17 }
0x3de8   :  { %3984 = vadd.xlane.f32.xlu1 %v3983_v18 }
0x3dec   :  { %v3932_v19 = vpop.xlane.xlu1 %3931 }
0x3ded   :  { %v3933_v20 = vsel %vm3913_vm11, %v3932_v19, %v3872_v38  ;;  %v7271_v19 = vld [vmem:[#allocation0 + $0x70] ss:$0 sm:$0xff] }
0x3dee   :  { %v3991_v21 = vmul.f32 %v3971_v56, %v3933_v20 }
0x3df0   :  { %3992 = vadd.xlane.f32.xlu1 %v3991_v21 }
0x3df4   :  { %v3940_v22 = vpop.xlane.xlu1 %3939 }
0x3df5   :  { %v3941_v23 = vsel %vm3913_vm11, %v3940_v22, %v3880_v41 }
0x3df6   :  { %v3999_v24 = vmul.f32 %v3971_v56, %v3941_v23 }
0x3df8   :  { %4000 = vadd.xlane.f32.xlu1 %v3999_v24 }
0x3dfc   :  { %v3948_v25 = vpop.xlane.xlu1 %3947 }
0x3dfd   :  { %v3949_v26 = vsel %vm3913_vm11, %v3948_v25, %v3888_v45 }
0x3dfe   :  { %v4007_v27 = vmul.f32 %v3971_v56, %v3949_v26 }
0x3e00   :  { %4008 = vadd.xlane.f32.xlu1 %v4007_v27  ;;  %v3916_v28 = vpop.xlane.xlu1 %3915 }
0x3e01   :  { %v3917_v29 = vsel %vm3913_vm11, %v3916_v28, %v3856_v48 }
0x3e02   :  { %v3975_v30 = vmul.f32 %v3971_v56, %v3917_v29 }
0x3e04   :  { %3976 = vadd.xlane.f32.xlu1 %v3975_v30  ;;  %v3956_v31 = vpop.xlane.xlu1 %3955 }
0x3e05   :  { %v3957_v32 = vsel %vm3913_vm11, %v3956_v31, %v3896_v51 }
0x3e06   :  { %v4015_v33 = vmul.f32 %v3971_v56, %v3957_v32 }
0x3e08   :  { %4016 = vadd.xlane.f32.xlu1 %v4015_v33  ;;  %v3964_v34 = vpop.xlane.xlu1 %3963 }
0x3e09   :  { %v3965_v35 = vsel %vm3913_vm11, %v3964_v34, %v3904_v54  ;;  %vm4823_vm11 = vcmp.eq.s32.totalorder %v5549_v11, 123 }
0x3e0a   :  { %v4023_v36 = vmul.f32 %v3971_v56, %v3965_v35 }
0x3e0c   :  { %4024 = vadd.xlane.f32.xlu1 %v4023_v36  ;;  %v3981_v38 = vpop.xlane.xlu0 %3980 }
0x3e0d   :  { %v3982_v39 = vsel %vm3974_vm12, %v3981_v38, %v3921_v58 }
0x3e0e   :  { %v4040_v40 = vmul.f32 %v4032_v37, %v3982_v39 }
0x3e10   :  { %4041 = vadd.xlane.f32.xlu0 %v4040_v40  ;;  %v3989_v41 = vpop.xlane.xlu0 %3988 }
0x3e11   :  { %v3990_v43 = vsel %vm3974_vm12, %v3989_v41, %v3929_v61 }
0x3e12   :  { %v4048_v44 = vmul.f32 %v4032_v37, %v3990_v43 }
0x3e14   :  { %4049 = vadd.xlane.f32.xlu0 %v4048_v44  ;;  %v3997_v45 = vpop.xlane.xlu0 %3996 }
0x3e15   :  { %v3998_v46 = vsel %vm3974_vm12, %v3997_v45, %v3937_v0 }
0x3e16   :  { %v4056_v47 = vmul.f32 %v4032_v37, %v3998_v46 }
0x3e18   :  { %4057 = vadd.xlane.f32.xlu0 %v4056_v47  ;;  %v4005_v48 = vpop.xlane.xlu0 %4004 }
0x3e19   :  { %v4006_v49 = vsel %vm3974_vm12, %v4005_v48, %v3945_v3 }
0x3e1a   :  { %v4064_v50 = vmul.f32 %v4032_v37, %v4006_v49 }
0x3e1c   :  { %4065 = vadd.xlane.f32.xlu0 %v4064_v50  ;;  %v4013_v51 = vpop.xlane.xlu0 %4012 }
0x3e1d   :  { %v4014_v52 = vsel %vm3974_vm12, %v4013_v51, %v3953_v6 }
0x3e1e   :  { %v4072_v53 = vmul.f32 %v4032_v37, %v4014_v52 }
0x3e20   :  { %4073 = vadd.xlane.f32.xlu0 %v4072_v53  ;;  %v4021_v54 = vpop.xlane.xlu0 %4020 }
0x3e21   :  { %v4022_v55 = vsel %vm3974_vm12, %v4021_v54, %v3961_v9 }
0x3e22   :  { %v4080_v56 = vmul.f32 %v4032_v37, %v4022_v55 }
0x3e24   :  { %4081 = vadd.xlane.f32.xlu0 %v4080_v56  ;;  %v4029_v57 = vpop.xlane.xlu0 %4028 }
0x3e25   :  { %v4030_v58 = vsel %vm3974_vm12, %v4029_v57, %v3969_v14 }
0x3e26   :  { %v4088_v59 = vmul.f32 %v4032_v37, %v4030_v58 }
0x3e28   :  { %4089 = vadd.xlane.f32.xlu0 %v4088_v59 }
0x3e75   :  { %v3985_v60 = vpop.xlane.xlu1 %3984 }
0x3e76   :  { %v3986_v61 = vsel %vm3974_vm12, %v3985_v60, %v3925_v17 }
0x3e77   :  { %v4044_v62 = vmul.f32 %v4032_v37, %v3986_v61 }
0x3e79   :  { %4045 = vadd.xlane.f32.xlu1 %v4044_v62 }
0x3e7d   :  { %v3993_v63 = vpop.xlane.xlu1 %3992 }
0x3e7e   :  { %v3994_v0 = vsel %vm3974_vm12, %v3993_v63, %v3933_v20 }
0x3e7f   :  { %v4052_v1 = vmul.f32 %v4032_v37, %v3994_v0 }
0x3e81   :  { %4053 = vadd.xlane.f32.xlu1 %v4052_v1 }
0x3e85   :  { %v4001_v2 = vpop.xlane.xlu1 %4000 }
0x3e86   :  { %v4002_v3 = vsel %vm3974_vm12, %v4001_v2, %v3941_v23 }
0x3e87   :  { %v4060_v4 = vmul.f32 %v4032_v37, %v4002_v3 }
0x3e89   :  { %4061 = vadd.xlane.f32.xlu1 %v4060_v4  ;;  %v4158_v4 = vld [vmem:[#allocation0 + $0x71] ss:$0 sm:$0xff] }
0x3e8d   :  { %v4009_v5 = vpop.xlane.xlu1 %4008 }
0x3e8e   :  { %v4010_v6 = vsel %vm3974_vm12, %v4009_v5, %v3949_v26 }
0x3e8f   :  { %v4068_v7 = vmul.f32 %v4032_v37, %v4010_v6 }
0x3e91   :  { %4069 = vadd.xlane.f32.xlu1 %v4068_v7  ;;  %v3977_v8 = vpop.xlane.xlu1 %3976 }
0x3e92   :  { %v7263_v9 = vsel %vm3974_vm12, %v3977_v8, %v3917_v29 }
0x3e93   :  { %v4036_v10 = vmul.f32 %v4032_v37, %v7263_v9 }
0x3e95   :  { %4037 = vadd.xlane.f32.xlu1 %v4036_v10  ;;  %v4017_v13 = vpop.xlane.xlu1 %4016 }
0x3e96   :  { %v4018_v14 = vsel %vm3974_vm12, %v4017_v13, %v3957_v32 }
0x3e97   :  { %v4076_v15 = vmul.f32 %v4032_v37, %v4018_v14 }
0x3e99   :  { %4077 = vadd.xlane.f32.xlu1 %v4076_v15  ;;  %v4025_v16 = vpop.xlane.xlu1 %4024 }
0x3e9a   :  { %v4026_v17 = vsel %vm3974_vm12, %v4025_v16, %v3965_v35  ;;  %vm4892_vm12 = vcmp.eq.s32.totalorder %v5549_v11, 124 }
0x3e9b   :  { %v4084_v18 = vmul.f32 %v4032_v37, %v4026_v17 }
0x3e9d   :  { %4085 = vadd.xlane.f32.xlu1 %v4084_v18  ;;  %v4042_v20 = vpop.xlane.xlu0 %4041 }
0x3e9e   :  { %v7275_v21 = vsel %vm4035_vm13, %v4042_v20, %v3982_v39 }
0x3e9f   :  { %v4101_v22 = vmul.f32 %v7271_v19, %v7275_v21 }
0x3ea1   :  { %4102 = vadd.xlane.f32.xlu0 %v4101_v22  ;;  %v4050_v23 = vpop.xlane.xlu0 %4049 }
0x3ea2   :  { %v7281_v24 = vsel %vm4035_vm13, %v4050_v23, %v3990_v43 }
0x3ea3   :  { %v4109_v25 = vmul.f32 %v7271_v19, %v7281_v24 }
0x3ea5   :  { %4110 = vadd.xlane.f32.xlu0 %v4109_v25  ;;  %v4058_v26 = vpop.xlane.xlu0 %4057 }
0x3ea6   :  { %v7287_v27 = vsel %vm4035_vm13, %v4058_v26, %v3998_v46 }
0x3ea7   :  { %v4117_v28 = vmul.f32 %v7271_v19, %v7287_v27 }
0x3ea9   :  { %4118 = vadd.xlane.f32.xlu0 %v4117_v28  ;;  %v4066_v29 = vpop.xlane.xlu0 %4065 }
0x3eaa   :  { %v7293_v30 = vsel %vm4035_vm13, %v4066_v29, %v4006_v49 }
0x3eab   :  { %v4125_v31 = vmul.f32 %v7271_v19, %v7293_v30 }
0x3ead   :  { %4126 = vadd.xlane.f32.xlu0 %v4125_v31  ;;  %v4074_v32 = vpop.xlane.xlu0 %4073 }
0x3eae   :  { %v7299_v33 = vsel %vm4035_vm13, %v4074_v32, %v4014_v52 }
0x3eaf   :  { %v4133_v34 = vmul.f32 %v7271_v19, %v7299_v33 }
0x3eb1   :  { %4134 = vadd.xlane.f32.xlu0 %v4133_v34  ;;  %v4082_v35 = vpop.xlane.xlu0 %4081 }
0x3eb2   :  { %v7305_v36 = vsel %vm4035_vm13, %v4082_v35, %v4022_v55 }
0x3eb3   :  { %v4141_v37 = vmul.f32 %v7271_v19, %v7305_v36 }
0x3eb5   :  { %4142 = vadd.xlane.f32.xlu0 %v4141_v37  ;;  %v4090_v38 = vpop.xlane.xlu0 %4089 }
0x3eb6   :  { %v7311_v39 = vsel %vm4035_vm13, %v4090_v38, %v4030_v58  ;;  %v171_v58 = vadd.s32 112, %v5551_v12 }
0x3eb7   :  { %v4149_v40 = vmul.f32 %v7271_v19, %v7311_v39 }
0x3eb8   :  { %vm172_vm14 = vcmp.eq.s32.totalorder %v5549_v11, %v171_v58 }
0x3eb9   :  { %4150 = vadd.xlane.f32.xlu0 %v4149_v40 }
0x3f06   :  { %v4046_v41 = vpop.xlane.xlu1 %4045 }
0x3f07   :  { %v7317_v43 = vsel %vm4035_vm13, %v4046_v41, %v3986_v61 }
0x3f08   :  { %v4105_v44 = vmul.f32 %v7271_v19, %v7317_v43 }
0x3f0a   :  { %4106 = vadd.xlane.f32.xlu1 %v4105_v44 }
0x3f0e   :  { %v4054_v45 = vpop.xlane.xlu1 %4053 }
0x3f0f   :  { %v7323_v46 = vsel %vm4035_vm13, %v4054_v45, %v3994_v0  ;;  %v7359_v0 = vsel %vm172_vm14, 1.0, %v5521_v42  ;;  %vm5030_vm14 = vcmp.eq.s32.totalorder %v5549_v11, 126 }
0x3f10   :  { %v4113_v47 = vmul.f32 %v7271_v19, %v7323_v46 }
0x3f12   :  { %4114 = vadd.xlane.f32.xlu1 %v4113_v47 }
0x3f16   :  { %v4062_v48 = vpop.xlane.xlu1 %4061 }
0x3f17   :  { %v7329_v49 = vsel %vm4035_vm13, %v4062_v48, %v4002_v3  ;;  %v4153_v3 = vmul.f32 %v7271_v19, %v7359_v0 }
0x3f18   :  { %v4121_v50 = vmul.f32 %v7271_v19, %v7329_v49 }
0x3f1a   :  { %4122 = vadd.xlane.f32.xlu1 %v4121_v50 }
0x3f1e   :  { %v4070_v51 = vpop.xlane.xlu1 %4069 }
0x3f1f   :  { %v7335_v52 = vsel %vm4035_vm13, %v4070_v51, %v4010_v6  ;;  %v4223_v51 = vld [vmem:[#allocation0 + $0x72] ss:$0 sm:$0xff] }
0x3f20   :  { %v4129_v53 = vmul.f32 %v7271_v19, %v7335_v52 }
0x3f22   :  { %4130 = vadd.xlane.f32.xlu1 %v4129_v53  ;;  %v4038_v54 = vpop.xlane.xlu1 %4037 }
0x3f23   :  { %v7349_v59 = vsel %vm4035_vm13, %v4038_v54, %v7263_v9 }
0x3f24   :  { %v4097_v61 = vmul.f32 %v7271_v19, %v7349_v59 }
0x3f26   :  { %v4078_v55 = vpop.xlane.xlu1 %4077 }
0x3f27   :  { %v7341_v56 = vsel %vm4035_vm13, %v4078_v55, %v4018_v14 }
0x3f28   :  { %v4137_v57 = vmul.f32 %v7271_v19, %v7341_v56 }
0x3f2a   :  { %4138 = vadd.xlane.f32.xlu1 %v4137_v57  ;;  %v4086_v60 = vpop.xlane.xlu1 %4085 }
0x3f2b   :  { %v7356_v62 = vsel %vm4035_vm13, %v4086_v60, %v4026_v17  ;;  %vm4961_vm13 = vcmp.eq.s32.totalorder %v5549_v11, 125 }
0x3f2c   :  { %v4145_v1 = vmul.f32 %v7271_v19, %v7356_v62 }
0x3f2e   :  { %4098 = vadd.xlane.f32.xlu1 %v4097_v61  ;;  %v4103_v63 = vpop.xlane.xlu0 %4102 }
0x3f2f   :  { %v7369_v5 = vsel %vm4096_vm15, %v4103_v63, %v7275_v21 }
0x3f30   :  { %v4166_v7 = vmul.f32 %v4158_v4, %v7369_v5 }
0x3f32   :  { %4146 = vadd.xlane.f32.xlu1 %v4145_v1  ;;  %v4111_v2 = vpop.xlane.xlu0 %4110 }
0x3f33   :  { %v7375_v8 = vsel %vm4096_vm15, %v4111_v2, %v7281_v24 }
0x3f34   :  { %v4174_v10 = vmul.f32 %v4158_v4, %v7375_v8 }
0x3f36   :  { %4154 = vadd.xlane.f32.xlu1 %v4153_v3  ;;  %v4119_v6 = vpop.xlane.xlu0 %4118 }
0x3f37   :  { %v7381_v13 = vsel %vm4096_vm15, %v4119_v6, %v7287_v27 }
0x3f38   :  { %v4182_v15 = vmul.f32 %v4158_v4, %v7381_v13 }
0x3f3a   :  { %4167 = vadd.xlane.f32.xlu1 %v4166_v7  ;;  %v4127_v9 = vpop.xlane.xlu0 %4126 }
0x3f3b   :  { %v7387_v16 = vsel %vm4096_vm15, %v4127_v9, %v7293_v30 }
0x3f3c   :  { %v4190_v17 = vmul.f32 %v4158_v4, %v7387_v16 }
0x3f3e   :  { %4175 = vadd.xlane.f32.xlu1 %v4174_v10  ;;  %v4135_v14 = vpop.xlane.xlu0 %4134 }
0x3f3f   :  { %v7393_v19 = vsel %vm4096_vm15, %v4135_v14, %v7299_v33 }
0x3f40   :  { %v4198_v20 = vmul.f32 %v4158_v4, %v7393_v19 }
0x3f42   :  { %4183 = vadd.xlane.f32.xlu1 %v4182_v15  ;;  %v4143_v18 = vpop.xlane.xlu0 %4142 }
0x3f43   :  { %v7399_v21 = vsel %vm4096_vm15, %v4143_v18, %v7305_v36 }
0x3f44   :  { %v4206_v23 = vmul.f32 %v4158_v4, %v7399_v21 }
0x3f46   :  { %4191 = vadd.xlane.f32.xlu1 %v4190_v17  ;;  %v4151_v22 = vpop.xlane.xlu0 %4150 }
0x3f47   :  { %v7405_v24 = vsel %vm4096_vm15, %v4151_v22, %v7311_v39 }
0x3f48   :  { %v4214_v25 = vmul.f32 %v4158_v4, %v7405_v24 }
0x3f4a   :  { %4199 = vadd.xlane.f32.xlu1 %v4198_v20 }
0x3f4e   :  { %4207 = vadd.xlane.f32.xlu1 %v4206_v23 }
0x3f52   :  { %4215 = vadd.xlane.f32.xlu1 %v4214_v25 }
0x3f97   :  { %v4107_v26 = vpop.xlane.xlu1 %4106 }
0x3f98   :  { %v7411_v27 = vsel %vm4096_vm15, %v4107_v26, %v7317_v43 }
0x3f99   :  { %v4170_v28 = vmul.f32 %v4158_v4, %v7411_v27 }
0x3f9b   :  { %4171 = vadd.xlane.f32.xlu0 %v4170_v28 }
0x3f9f   :  { %v4115_v29 = vpop.xlane.xlu1 %4114 }
0x3fa0   :  { %v7417_v30 = vsel %vm4096_vm15, %v4115_v29, %v7323_v46 }
0x3fa1   :  { %v4178_v31 = vmul.f32 %v4158_v4, %v7417_v30 }
0x3fa3   :  { %4179 = vadd.xlane.f32.xlu0 %v4178_v31 }
0x3fa7   :  { %v4123_v32 = vpop.xlane.xlu1 %4122 }
0x3fa8   :  { %v7423_v33 = vsel %vm4096_vm15, %v4123_v32, %v7329_v49 }
0x3fa9   :  { %v4186_v34 = vmul.f32 %v4158_v4, %v7423_v33 }
0x3fab   :  { %4187 = vadd.xlane.f32.xlu0 %v4186_v34 }
0x3faf   :  { %v4131_v35 = vpop.xlane.xlu1 %4130 }
0x3fb0   :  { %v7429_v36 = vsel %vm4096_vm15, %v4131_v35, %v7335_v52  ;;  %v4288_v35 = vld [vmem:[#allocation0 + $0x73] ss:$0 sm:$0xff] }
0x3fb1   :  { %v4194_v37 = vmul.f32 %v4158_v4, %v7429_v36 }
0x3fb3   :  { %4195 = vadd.xlane.f32.xlu0 %v4194_v37 }
0x3fb7   :  { %v4139_v38 = vpop.xlane.xlu1 %4138 }
0x3fb8   :  { %v7435_v39 = vsel %vm4096_vm15, %v4139_v38, %v7341_v56 }
0x3fb9   :  { %v4202_v40 = vmul.f32 %v4158_v4, %v7435_v39 }
0x3fbb   :  { %v4099_v41 = vpop.xlane.xlu1 %4098  ;;  %4203 = vadd.xlane.f32.xlu0 %v4202_v40 }
0x3fbc   :  { %v7441_v43 = vsel %vm4096_vm15, %v4099_v41, %v7349_v59 }
0x3fbd   :  { %v4162_v44 = vmul.f32 %v4158_v4, %v7441_v43 }
0x3fbf   :  { %v4147_v45 = vpop.xlane.xlu1 %4146  ;;  %4163 = vadd.xlane.f32.xlu0 %v4162_v44 }
0x3fc0   :  { %v7447_v46 = vsel %vm4096_vm15, %v4147_v45, %v7356_v62 }
0x3fc1   :  { %v4210_v47 = vmul.f32 %v4158_v4, %v7447_v46 }
0x3fc3   :  { %v4155_v48 = vpop.xlane.xlu1 %4154  ;;  %4211 = vadd.xlane.f32.xlu0 %v4210_v47 }
0x3fc4   :  { %v7453_v49 = vsel %vm4096_vm15, %v4155_v48, %v7359_v0  ;;  %vm5099_vm15 = vcmp.eq.s32.totalorder %v5549_v11, 127 }
0x3fc5   :  { %v4218_v50 = vmul.f32 %v4158_v4, %v7453_v49 }
0x3fc7   :  { %4219 = vadd.xlane.f32.xlu0 %v4218_v50  ;;  %v4168_v52 = vpop.xlane.xlu1 %4167 }
0x3fc8   :  { %v7460_v53 = vsel %vm4161_vm0, %v4168_v52, %v7369_v5 }
0x3fc9   :  { %v4231_v54 = vmul.f32 %v4223_v51, %v7460_v53 }
0x3fcb   :  { %4232 = vadd.xlane.f32.xlu0 %v4231_v54  ;;  %v4176_v55 = vpop.xlane.xlu1 %4175 }
0x3fcc   :  { %v7466_v56 = vsel %vm4161_vm0, %v4176_v55, %v7375_v8 }
0x3fcd   :  { %v4239_v57 = vmul.f32 %v4223_v51, %v7466_v56 }
0x3fcf   :  { %4240 = vadd.xlane.f32.xlu0 %v4239_v57  ;;  %v4184_v58 = vpop.xlane.xlu1 %4183 }
0x3fd0   :  { %v7472_v59 = vsel %vm4161_vm0, %v4184_v58, %v7381_v13 }
0x3fd1   :  { %v4247_v60 = vmul.f32 %v4223_v51, %v7472_v59 }
0x3fd3   :  { %4248 = vadd.xlane.f32.xlu0 %v4247_v60  ;;  %v4192_v61 = vpop.xlane.xlu1 %4191 }
0x3fd4   :  { %v7478_v62 = vsel %vm4161_vm0, %v4192_v61, %v7387_v16 }
0x3fd5   :  { %v4255_v63 = vmul.f32 %v4223_v51, %v7478_v62 }
0x3fd7   :  { %4256 = vadd.xlane.f32.xlu0 %v4255_v63  ;;  %v4200_v0 = vpop.xlane.xlu1 %4199 }
0x3fd8   :  { %v7484_v1 = vsel %vm4161_vm0, %v4200_v0, %v7393_v19 }
0x3fd9   :  { %v4263_v2 = vmul.f32 %v4223_v51, %v7484_v1 }
0x3fdb   :  { %4264 = vadd.xlane.f32.xlu0 %v4263_v2  ;;  %v4208_v3 = vpop.xlane.xlu1 %4207 }
0x3fdc   :  { %v7490_v4 = vsel %vm4161_vm0, %v4208_v3, %v7399_v21 }
0x3fdd   :  { %v4271_v5 = vmul.f32 %v4223_v51, %v7490_v4 }
0x3fdf   :  { %4272 = vadd.xlane.f32.xlu0 %v4271_v5  ;;  %v4216_v6 = vpop.xlane.xlu1 %4215 }
0x3fe0   :  { %v7496_v7 = vsel %vm4161_vm0, %v4216_v6, %v7405_v24 }
0x3fe1   :  { %v4279_v8 = vmul.f32 %v4223_v51, %v7496_v7 }
0x3fe3   :  { %4280 = vadd.xlane.f32.xlu0 %v4279_v8 }
0x4028   :  { %v4172_v9 = vpop.xlane.xlu0 %4171 }
0x4029   :  { %v7502_v10 = vsel %vm4161_vm0, %v4172_v9, %v7411_v27 }
0x402a   :  { %v4235_v13 = vmul.f32 %v4223_v51, %v7502_v10 }
0x402c   :  { %4236 = vadd.xlane.f32.xlu1 %v4235_v13 }
0x4030   :  { %v4180_v14 = vpop.xlane.xlu0 %4179 }
0x4031   :  { %v7508_v15 = vsel %vm4161_vm0, %v4180_v14, %v7417_v30 }
0x4032   :  { %v4243_v16 = vmul.f32 %v4223_v51, %v7508_v15 }
0x4034   :  { %4244 = vadd.xlane.f32.xlu1 %v4243_v16 }
0x4038   :  { %v4188_v17 = vpop.xlane.xlu0 %4187 }
0x4039   :  { %v7514_v18 = vsel %vm4161_vm0, %v4188_v17, %v7423_v33 }
0x403a   :  { %v4251_v19 = vmul.f32 %v4223_v51, %v7514_v18 }
0x403c   :  { %4252 = vadd.xlane.f32.xlu1 %v4251_v19 }
0x4040   :  { %v4196_v20 = vpop.xlane.xlu0 %4195 }
0x4041   :  { %v7520_v21 = vsel %vm4161_vm0, %v4196_v20, %v7429_v36  ;;  %v4353_v20 = vld [vmem:[#allocation0 + $0x74] ss:$0 sm:$0xff] }
0x4042   :  { %v4259_v22 = vmul.f32 %v4223_v51, %v7520_v21 }
0x4044   :  { %4260 = vadd.xlane.f32.xlu1 %v4259_v22 }
0x4048   :  { %v4204_v23 = vpop.xlane.xlu0 %4203 }
0x4049   :  { %v7526_v24 = vsel %vm4161_vm0, %v4204_v23, %v7435_v39 }
0x404a   :  { %v4267_v25 = vmul.f32 %v4223_v51, %v7526_v24 }
0x404c   :  { %4268 = vadd.xlane.f32.xlu1 %v4267_v25  ;;  %v4164_v26 = vpop.xlane.xlu0 %4163 }
0x404d   :  { %v7532_v27 = vsel %vm4161_vm0, %v4164_v26, %v7441_v43 }
0x404e   :  { %v4227_v28 = vmul.f32 %v4223_v51, %v7532_v27 }
0x4050   :  { %4228 = vadd.xlane.f32.xlu1 %v4227_v28  ;;  %v4212_v29 = vpop.xlane.xlu0 %4211 }
0x4051   :  { %v7538_v30 = vsel %vm4161_vm0, %v4212_v29, %v7447_v46 }
0x4052   :  { %v4275_v31 = vmul.f32 %v4223_v51, %v7538_v30 }
0x4054   :  { %4276 = vadd.xlane.f32.xlu1 %v4275_v31  ;;  %v4220_v32 = vpop.xlane.xlu0 %4219 }
0x4055   :  { %v7544_v33 = vsel %vm4161_vm0, %v4220_v32, %v7453_v49 }
0x4056   :  { %v4283_v34 = vmul.f32 %v4223_v51, %v7544_v33 }
0x4058   :  { %4284 = vadd.xlane.f32.xlu1 %v4283_v34  ;;  %v4233_v36 = vpop.xlane.xlu0 %4232 }
0x4059   :  { %v7551_v37 = vsel %vm4226_vm1, %v4233_v36, %v7460_v53 }
0x405a   :  { %v4296_v38 = vmul.f32 %v4288_v35, %v7551_v37 }
0x405c   :  { %4297 = vadd.xlane.f32.xlu1 %v4296_v38  ;;  %v4241_v39 = vpop.xlane.xlu0 %4240 }
0x405d   :  { %v7557_v40 = vsel %vm4226_vm1, %v4241_v39, %v7466_v56 }
0x405e   :  { %v4304_v41 = vmul.f32 %v4288_v35, %v7557_v40 }
0x4060   :  { %4305 = vadd.xlane.f32.xlu1 %v4304_v41  ;;  %v4249_v43 = vpop.xlane.xlu0 %4248 }
0x4061   :  { %v7563_v44 = vsel %vm4226_vm1, %v4249_v43, %v7472_v59 }
0x4062   :  { %v4312_v45 = vmul.f32 %v4288_v35, %v7563_v44 }
0x4064   :  { %4313 = vadd.xlane.f32.xlu1 %v4312_v45  ;;  %v4257_v46 = vpop.xlane.xlu0 %4256 }
0x4065   :  { %v7569_v47 = vsel %vm4226_vm1, %v4257_v46, %v7478_v62 }
0x4066   :  { %v4320_v48 = vmul.f32 %v4288_v35, %v7569_v47 }
0x4068   :  { %4321 = vadd.xlane.f32.xlu1 %v4320_v48  ;;  %v4265_v49 = vpop.xlane.xlu0 %4264 }
0x4069   :  { %v7575_v50 = vsel %vm4226_vm1, %v4265_v49, %v7484_v1 }
0x406a   :  { %v4328_v51 = vmul.f32 %v4288_v35, %v7575_v50 }
0x406c   :  { %4329 = vadd.xlane.f32.xlu1 %v4328_v51  ;;  %v4273_v52 = vpop.xlane.xlu0 %4272 }
0x406d   :  { %v7581_v53 = vsel %vm4226_vm1, %v4273_v52, %v7490_v4 }
0x406e   :  { %v4336_v54 = vmul.f32 %v4288_v35, %v7581_v53 }
0x4070   :  { %4337 = vadd.xlane.f32.xlu1 %v4336_v54  ;;  %v4281_v55 = vpop.xlane.xlu0 %4280 }
0x4071   :  { %v7587_v56 = vsel %vm4226_vm1, %v4281_v55, %v7496_v7 }
0x4072   :  { %v4344_v57 = vmul.f32 %v4288_v35, %v7587_v56 }
0x4074   :  { %4345 = vadd.xlane.f32.xlu1 %v4344_v57 }
0x40b9   :  { %v4237_v58 = vpop.xlane.xlu1 %4236 }
0x40ba   :  { %v7593_v59 = vsel %vm4226_vm1, %v4237_v58, %v7502_v10 }
0x40bb   :  { %v4300_v60 = vmul.f32 %v4288_v35, %v7593_v59 }
0x40bd   :  { %4301 = vadd.xlane.f32.xlu0 %v4300_v60 }
0x40c1   :  { %v4245_v61 = vpop.xlane.xlu1 %4244 }
0x40c2   :  { %v7599_v62 = vsel %vm4226_vm1, %v4245_v61, %v7508_v15 }
0x40c3   :  { %v4308_v63 = vmul.f32 %v4288_v35, %v7599_v62 }
0x40c5   :  { %4309 = vadd.xlane.f32.xlu0 %v4308_v63 }
0x40c9   :  { %v4253_v0 = vpop.xlane.xlu1 %4252 }
0x40ca   :  { %v7605_v1 = vsel %vm4226_vm1, %v4253_v0, %v7514_v18 }
0x40cb   :  { %v4316_v2 = vmul.f32 %v4288_v35, %v7605_v1 }
0x40cd   :  { %4317 = vadd.xlane.f32.xlu0 %v4316_v2 }
0x40d1   :  { %v4261_v3 = vpop.xlane.xlu1 %4260 }
0x40d2   :  { %v7611_v4 = vsel %vm4226_vm1, %v4261_v3, %v7520_v21  ;;  %v4418_v3 = vld [vmem:[#allocation0 + $0x75] ss:$0 sm:$0xff] }
0x40d3   :  { %v4324_v5 = vmul.f32 %v4288_v35, %v7611_v4 }
0x40d5   :  { %4325 = vadd.xlane.f32.xlu0 %v4324_v5 }
0x40d9   :  { %v4269_v6 = vpop.xlane.xlu1 %4268 }
0x40da   :  { %v7617_v7 = vsel %vm4226_vm1, %v4269_v6, %v7526_v24 }
0x40db   :  { %v4332_v8 = vmul.f32 %v4288_v35, %v7617_v7 }
0x40dd   :  { %4333 = vadd.xlane.f32.xlu0 %v4332_v8  ;;  %v4229_v9 = vpop.xlane.xlu1 %4228 }
0x40de   :  { %v7623_v10 = vsel %vm4226_vm1, %v4229_v9, %v7532_v27 }
0x40df   :  { %v4292_v13 = vmul.f32 %v4288_v35, %v7623_v10 }
0x40e1   :  { %4293 = vadd.xlane.f32.xlu0 %v4292_v13  ;;  %v4277_v14 = vpop.xlane.xlu1 %4276 }
0x40e2   :  { %v7629_v15 = vsel %vm4226_vm1, %v4277_v14, %v7538_v30 }
0x40e3   :  { %v4340_v16 = vmul.f32 %v4288_v35, %v7629_v15 }
0x40e5   :  { %4341 = vadd.xlane.f32.xlu0 %v4340_v16  ;;  %v4285_v17 = vpop.xlane.xlu1 %4284 }
0x40e6   :  { %v7635_v18 = vsel %vm4226_vm1, %v4285_v17, %v7544_v33 }
0x40e7   :  { %v4348_v19 = vmul.f32 %v4288_v35, %v7635_v18 }
0x40e9   :  { %4349 = vadd.xlane.f32.xlu0 %v4348_v19  ;;  %v4298_v21 = vpop.xlane.xlu1 %4297 }
0x40ea   :  { %v7642_v22 = vsel %vm4291_vm2, %v4298_v21, %v7551_v37 }
0x40eb   :  { %v4361_v23 = vmul.f32 %v4353_v20, %v7642_v22 }
0x40ed   :  { %4362 = vadd.xlane.f32.xlu0 %v4361_v23  ;;  %v4306_v24 = vpop.xlane.xlu1 %4305 }
0x40ee   :  { %v7648_v25 = vsel %vm4291_vm2, %v4306_v24, %v7557_v40 }
0x40ef   :  { %v4369_v26 = vmul.f32 %v4353_v20, %v7648_v25 }
0x40f1   :  { %4370 = vadd.xlane.f32.xlu0 %v4369_v26  ;;  %v4314_v27 = vpop.xlane.xlu1 %4313 }
0x40f2   :  { %v7654_v28 = vsel %vm4291_vm2, %v4314_v27, %v7563_v44 }
0x40f3   :  { %v4377_v29 = vmul.f32 %v4353_v20, %v7654_v28 }
0x40f5   :  { %4378 = vadd.xlane.f32.xlu0 %v4377_v29  ;;  %v4322_v30 = vpop.xlane.xlu1 %4321 }
0x40f6   :  { %v7660_v31 = vsel %vm4291_vm2, %v4322_v30, %v7569_v47 }
0x40f7   :  { %v4385_v32 = vmul.f32 %v4353_v20, %v7660_v31 }
0x40f9   :  { %4386 = vadd.xlane.f32.xlu0 %v4385_v32  ;;  %v4330_v33 = vpop.xlane.xlu1 %4329 }
0x40fa   :  { %v7666_v34 = vsel %vm4291_vm2, %v4330_v33, %v7575_v50 }
0x40fb   :  { %v4393_v35 = vmul.f32 %v4353_v20, %v7666_v34 }
0x40fd   :  { %4394 = vadd.xlane.f32.xlu0 %v4393_v35  ;;  %v4338_v36 = vpop.xlane.xlu1 %4337 }
0x40fe   :  { %v7672_v37 = vsel %vm4291_vm2, %v4338_v36, %v7581_v53 }
0x40ff   :  { %v4401_v38 = vmul.f32 %v4353_v20, %v7672_v37 }
0x4101   :  { %4402 = vadd.xlane.f32.xlu0 %v4401_v38  ;;  %v4346_v39 = vpop.xlane.xlu1 %4345 }
0x4102   :  { %v7678_v40 = vsel %vm4291_vm2, %v4346_v39, %v7587_v56 }
0x4103   :  { %v4409_v41 = vmul.f32 %v4353_v20, %v7678_v40 }
0x4105   :  { %4410 = vadd.xlane.f32.xlu0 %v4409_v41 }
0x414a   :  { %v4302_v43 = vpop.xlane.xlu0 %4301 }
0x414b   :  { %v7684_v44 = vsel %vm4291_vm2, %v4302_v43, %v7593_v59 }
0x414c   :  { %v4365_v45 = vmul.f32 %v4353_v20, %v7684_v44 }
0x414e   :  { %4366 = vadd.xlane.f32.xlu1 %v4365_v45 }
0x4152   :  { %v4310_v46 = vpop.xlane.xlu0 %4309 }
0x4153   :  { %v7690_v47 = vsel %vm4291_vm2, %v4310_v46, %v7599_v62 }
0x4154   :  { %v4373_v48 = vmul.f32 %v4353_v20, %v7690_v47 }
0x4156   :  { %4374 = vadd.xlane.f32.xlu1 %v4373_v48 }
0x415a   :  { %v4318_v49 = vpop.xlane.xlu0 %4317 }
0x415b   :  { %v7696_v50 = vsel %vm4291_vm2, %v4318_v49, %v7605_v1 }
0x415c   :  { %v4381_v51 = vmul.f32 %v4353_v20, %v7696_v50 }
0x415e   :  { %4382 = vadd.xlane.f32.xlu1 %v4381_v51 }
0x4162   :  { %v4326_v52 = vpop.xlane.xlu0 %4325 }
0x4163   :  { %v7702_v53 = vsel %vm4291_vm2, %v4326_v52, %v7611_v4  ;;  %v4483_v52 = vld [vmem:[#allocation0 + $0x76] ss:$0 sm:$0xff] }
0x4164   :  { %v4389_v54 = vmul.f32 %v4353_v20, %v7702_v53 }
0x4166   :  { %4390 = vadd.xlane.f32.xlu1 %v4389_v54 }
0x416a   :  { %v4334_v55 = vpop.xlane.xlu0 %4333 }
0x416b   :  { %v7708_v56 = vsel %vm4291_vm2, %v4334_v55, %v7617_v7 }
0x416c   :  { %v4397_v57 = vmul.f32 %v4353_v20, %v7708_v56 }
0x416e   :  { %4398 = vadd.xlane.f32.xlu1 %v4397_v57  ;;  %v4294_v58 = vpop.xlane.xlu0 %4293 }
0x416f   :  { %v7714_v59 = vsel %vm4291_vm2, %v4294_v58, %v7623_v10 }
0x4170   :  { %v4357_v60 = vmul.f32 %v4353_v20, %v7714_v59 }
0x4172   :  { %4358 = vadd.xlane.f32.xlu1 %v4357_v60  ;;  %v4342_v61 = vpop.xlane.xlu0 %4341 }
0x4173   :  { %v7720_v62 = vsel %vm4291_vm2, %v4342_v61, %v7629_v15 }
0x4174   :  { %v4405_v63 = vmul.f32 %v4353_v20, %v7720_v62 }
0x4176   :  { %4406 = vadd.xlane.f32.xlu1 %v4405_v63  ;;  %v4350_v0 = vpop.xlane.xlu0 %4349 }
0x4177   :  { %v7726_v1 = vsel %vm4291_vm2, %v4350_v0, %v7635_v18 }
0x4178   :  { %v4413_v2 = vmul.f32 %v4353_v20, %v7726_v1 }
0x417a   :  { %4414 = vadd.xlane.f32.xlu1 %v4413_v2  ;;  %v4363_v4 = vpop.xlane.xlu0 %4362 }
0x417b   :  { %v7733_v5 = vsel %vm4356_vm3, %v4363_v4, %v7642_v22 }
0x417c   :  { %v4426_v6 = vmul.f32 %v4418_v3, %v7733_v5 }
0x417e   :  { %4427 = vadd.xlane.f32.xlu1 %v4426_v6  ;;  %v4371_v7 = vpop.xlane.xlu0 %4370 }
0x417f   :  { %v7739_v8 = vsel %vm4356_vm3, %v4371_v7, %v7648_v25 }
0x4180   :  { %v4434_v9 = vmul.f32 %v4418_v3, %v7739_v8 }
0x4182   :  { %4435 = vadd.xlane.f32.xlu1 %v4434_v9  ;;  %v4379_v10 = vpop.xlane.xlu0 %4378 }
0x4183   :  { %v7745_v13 = vsel %vm4356_vm3, %v4379_v10, %v7654_v28 }
0x4184   :  { %v4442_v14 = vmul.f32 %v4418_v3, %v7745_v13 }
0x4186   :  { %4443 = vadd.xlane.f32.xlu1 %v4442_v14  ;;  %v4387_v15 = vpop.xlane.xlu0 %4386 }
0x4187   :  { %v7751_v16 = vsel %vm4356_vm3, %v4387_v15, %v7660_v31 }
0x4188   :  { %v4450_v17 = vmul.f32 %v4418_v3, %v7751_v16 }
0x418a   :  { %4451 = vadd.xlane.f32.xlu1 %v4450_v17  ;;  %v4395_v18 = vpop.xlane.xlu0 %4394 }
0x418b   :  { %v7757_v19 = vsel %vm4356_vm3, %v4395_v18, %v7666_v34 }
0x418c   :  { %v4458_v20 = vmul.f32 %v4418_v3, %v7757_v19 }
0x418e   :  { %4459 = vadd.xlane.f32.xlu1 %v4458_v20  ;;  %v4403_v21 = vpop.xlane.xlu0 %4402 }
0x418f   :  { %v7763_v22 = vsel %vm4356_vm3, %v4403_v21, %v7672_v37 }
0x4190   :  { %v4466_v23 = vmul.f32 %v4418_v3, %v7763_v22 }
0x4192   :  { %4467 = vadd.xlane.f32.xlu1 %v4466_v23  ;;  %v4411_v24 = vpop.xlane.xlu0 %4410 }
0x4193   :  { %v7769_v25 = vsel %vm4356_vm3, %v4411_v24, %v7678_v40 }
0x4194   :  { %v4474_v26 = vmul.f32 %v4418_v3, %v7769_v25 }
0x4196   :  { %4475 = vadd.xlane.f32.xlu1 %v4474_v26 }
0x41db   :  { %v4367_v27 = vpop.xlane.xlu1 %4366 }
0x41dc   :  { %v7775_v28 = vsel %vm4356_vm3, %v4367_v27, %v7684_v44 }
0x41dd   :  { %v4430_v29 = vmul.f32 %v4418_v3, %v7775_v28 }
0x41df   :  { %4431 = vadd.xlane.f32.xlu0 %v4430_v29 }
0x41e3   :  { %v4375_v30 = vpop.xlane.xlu1 %4374 }
0x41e4   :  { %v7781_v31 = vsel %vm4356_vm3, %v4375_v30, %v7690_v47 }
0x41e5   :  { %v4438_v32 = vmul.f32 %v4418_v3, %v7781_v31 }
0x41e7   :  { %4439 = vadd.xlane.f32.xlu0 %v4438_v32 }
0x41eb   :  { %v4383_v33 = vpop.xlane.xlu1 %4382 }
0x41ec   :  { %v7787_v34 = vsel %vm4356_vm3, %v4383_v33, %v7696_v50 }
0x41ed   :  { %v4446_v35 = vmul.f32 %v4418_v3, %v7787_v34 }
0x41ef   :  { %4447 = vadd.xlane.f32.xlu0 %v4446_v35 }
0x41f3   :  { %v4391_v36 = vpop.xlane.xlu1 %4390 }
0x41f4   :  { %v7793_v37 = vsel %vm4356_vm3, %v4391_v36, %v7702_v53  ;;  %v4548_v36 = vld [vmem:[#allocation0 + $0x77] ss:$0 sm:$0xff] }
0x41f5   :  { %v4454_v38 = vmul.f32 %v4418_v3, %v7793_v37 }
0x41f7   :  { %4455 = vadd.xlane.f32.xlu0 %v4454_v38 }
0x41fb   :  { %v4399_v39 = vpop.xlane.xlu1 %4398 }
0x41fc   :  { %v7799_v40 = vsel %vm4356_vm3, %v4399_v39, %v7708_v56 }
0x41fd   :  { %v4462_v41 = vmul.f32 %v4418_v3, %v7799_v40 }
0x41ff   :  { %4463 = vadd.xlane.f32.xlu0 %v4462_v41  ;;  %v4359_v43 = vpop.xlane.xlu1 %4358 }
0x4200   :  { %v7805_v44 = vsel %vm4356_vm3, %v4359_v43, %v7714_v59 }
0x4201   :  { %v4422_v45 = vmul.f32 %v4418_v3, %v7805_v44 }
0x4203   :  { %4423 = vadd.xlane.f32.xlu0 %v4422_v45  ;;  %v4407_v46 = vpop.xlane.xlu1 %4406 }
0x4204   :  { %v7811_v47 = vsel %vm4356_vm3, %v4407_v46, %v7720_v62 }
0x4205   :  { %v4470_v48 = vmul.f32 %v4418_v3, %v7811_v47 }
0x4207   :  { %4471 = vadd.xlane.f32.xlu0 %v4470_v48  ;;  %v4415_v49 = vpop.xlane.xlu1 %4414 }
0x4208   :  { %v7817_v50 = vsel %vm4356_vm3, %v4415_v49, %v7726_v1 }
0x4209   :  { %v4478_v51 = vmul.f32 %v4418_v3, %v7817_v50 }
0x420b   :  { %4479 = vadd.xlane.f32.xlu0 %v4478_v51  ;;  %v4428_v53 = vpop.xlane.xlu1 %4427 }
0x420c   :  { %v7824_v54 = vsel %vm4421_vm4, %v4428_v53, %v7733_v5 }
0x420d   :  { %v4491_v55 = vmul.f32 %v4483_v52, %v7824_v54 }
0x420f   :  { %4492 = vadd.xlane.f32.xlu0 %v4491_v55  ;;  %v4436_v56 = vpop.xlane.xlu1 %4435 }
0x4210   :  { %v7830_v57 = vsel %vm4421_vm4, %v4436_v56, %v7739_v8 }
0x4211   :  { %v4499_v58 = vmul.f32 %v4483_v52, %v7830_v57 }
0x4213   :  { %4500 = vadd.xlane.f32.xlu0 %v4499_v58  ;;  %v4444_v59 = vpop.xlane.xlu1 %4443 }
0x4214   :  { %v7836_v60 = vsel %vm4421_vm4, %v4444_v59, %v7745_v13 }
0x4215   :  { %v4507_v61 = vmul.f32 %v4483_v52, %v7836_v60 }
0x4217   :  { %4508 = vadd.xlane.f32.xlu0 %v4507_v61  ;;  %v4452_v62 = vpop.xlane.xlu1 %4451 }
0x4218   :  { %v7842_v63 = vsel %vm4421_vm4, %v4452_v62, %v7751_v16 }
0x4219   :  { %v4515_v0 = vmul.f32 %v4483_v52, %v7842_v63 }
0x421b   :  { %4516 = vadd.xlane.f32.xlu0 %v4515_v0  ;;  %v4460_v1 = vpop.xlane.xlu1 %4459 }
0x421c   :  { %v7848_v2 = vsel %vm4421_vm4, %v4460_v1, %v7757_v19 }
0x421d   :  { %v4523_v3 = vmul.f32 %v4483_v52, %v7848_v2 }
0x421f   :  { %4524 = vadd.xlane.f32.xlu0 %v4523_v3  ;;  %v4468_v4 = vpop.xlane.xlu1 %4467 }
0x4220   :  { %v7854_v5 = vsel %vm4421_vm4, %v4468_v4, %v7763_v22 }
0x4221   :  { %v4531_v6 = vmul.f32 %v4483_v52, %v7854_v5 }
0x4223   :  { %4532 = vadd.xlane.f32.xlu0 %v4531_v6  ;;  %v4476_v7 = vpop.xlane.xlu1 %4475 }
0x4224   :  { %v7860_v8 = vsel %vm4421_vm4, %v4476_v7, %v7769_v25 }
0x4225   :  { %v4539_v9 = vmul.f32 %v4483_v52, %v7860_v8 }
0x4227   :  { %4540 = vadd.xlane.f32.xlu0 %v4539_v9 }
0x426c   :  { %v4432_v10 = vpop.xlane.xlu0 %4431 }
0x426d   :  { %v7866_v13 = vsel %vm4421_vm4, %v4432_v10, %v7775_v28 }
0x426e   :  { %v4495_v14 = vmul.f32 %v4483_v52, %v7866_v13 }
0x4270   :  { %4496 = vadd.xlane.f32.xlu1 %v4495_v14 }
0x4274   :  { %v4440_v15 = vpop.xlane.xlu0 %4439 }
0x4275   :  { %v7872_v16 = vsel %vm4421_vm4, %v4440_v15, %v7781_v31 }
0x4276   :  { %v4503_v17 = vmul.f32 %v4483_v52, %v7872_v16 }
0x4278   :  { %4504 = vadd.xlane.f32.xlu1 %v4503_v17 }
0x427c   :  { %v4448_v18 = vpop.xlane.xlu0 %4447 }
0x427d   :  { %v7878_v19 = vsel %vm4421_vm4, %v4448_v18, %v7787_v34 }
0x427e   :  { %v4511_v20 = vmul.f32 %v4483_v52, %v7878_v19 }
0x4280   :  { %4512 = vadd.xlane.f32.xlu1 %v4511_v20 }
0x4284   :  { %v4456_v21 = vpop.xlane.xlu0 %4455 }
0x4285   :  { %v7884_v22 = vsel %vm4421_vm4, %v4456_v21, %v7793_v37  ;;  %v8003_v21 = vld [vmem:[#allocation0 + $0x78] ss:$0 sm:$0xff] }
0x4286   :  { %v4519_v23 = vmul.f32 %v4483_v52, %v7884_v22 }
0x4288   :  { %4520 = vadd.xlane.f32.xlu1 %v4519_v23 }
0x428c   :  { %v4464_v24 = vpop.xlane.xlu0 %4463 }
0x428d   :  { %v7890_v25 = vsel %vm4421_vm4, %v4464_v24, %v7799_v40 }
0x428e   :  { %v4527_v26 = vmul.f32 %v4483_v52, %v7890_v25 }
0x4290   :  { %4528 = vadd.xlane.f32.xlu1 %v4527_v26  ;;  %v4424_v27 = vpop.xlane.xlu0 %4423 }
0x4291   :  { %v7896_v28 = vsel %vm4421_vm4, %v4424_v27, %v7805_v44 }
0x4292   :  { %v4487_v29 = vmul.f32 %v4483_v52, %v7896_v28 }
0x4294   :  { %4488 = vadd.xlane.f32.xlu1 %v4487_v29  ;;  %v4472_v30 = vpop.xlane.xlu0 %4471 }
0x4295   :  { %v7902_v31 = vsel %vm4421_vm4, %v4472_v30, %v7811_v47 }
0x4296   :  { %v4535_v32 = vmul.f32 %v4483_v52, %v7902_v31 }
0x4298   :  { %4536 = vadd.xlane.f32.xlu1 %v4535_v32  ;;  %v4480_v33 = vpop.xlane.xlu0 %4479 }
0x4299   :  { %v7908_v34 = vsel %vm4421_vm4, %v4480_v33, %v7817_v50 }
0x429a   :  { %v4543_v35 = vmul.f32 %v4483_v52, %v7908_v34 }
0x429c   :  { %4544 = vadd.xlane.f32.xlu1 %v4543_v35  ;;  %v4493_v37 = vpop.xlane.xlu0 %4492 }
0x429d   :  { %v7915_v38 = vsel %vm4486_vm5, %v4493_v37, %v7824_v54  ;;  %v178_v37 = vadd.s32 120, %v5551_v12 }
0x429e   :  { %v4556_v39 = vmul.f32 %v4548_v36, %v7915_v38 }
0x429f   :  { %vm179_vm7 = vcmp.eq.s32.totalorder %v5549_v11, %v178_v37 }
0x42a0   :  { %4557 = vadd.xlane.f32.xlu1 %v4556_v39  ;;  %v4501_v40 = vpop.xlane.xlu0 %4500  ;;  %v8055_v12 = vsel %vm179_vm7, 1.0, %v5521_v42 }
0x42a1   :  { %v7921_v41 = vsel %vm4486_vm5, %v4501_v40, %v7830_v57 }
0x42a2   :  { %v4564_v43 = vmul.f32 %v4548_v36, %v7921_v41 }
0x42a4   :  { %4565 = vadd.xlane.f32.xlu1 %v4564_v43  ;;  %v4509_v44 = vpop.xlane.xlu0 %4508 }
0x42a5   :  { %v7927_v45 = vsel %vm4486_vm5, %v4509_v44, %v7836_v60 }
0x42a6   :  { %v4572_v46 = vmul.f32 %v4548_v36, %v7927_v45 }
0x42a8   :  { %4573 = vadd.xlane.f32.xlu1 %v4572_v46  ;;  %v4517_v47 = vpop.xlane.xlu0 %4516 }
0x42a9   :  { %v7933_v48 = vsel %vm4486_vm5, %v4517_v47, %v7842_v63 }
0x42aa   :  { %v4580_v49 = vmul.f32 %v4548_v36, %v7933_v48 }
0x42ac   :  { %4581 = vadd.xlane.f32.xlu1 %v4580_v49  ;;  %v4525_v50 = vpop.xlane.xlu0 %4524 }
0x42ad   :  { %v7939_v51 = vsel %vm4486_vm5, %v4525_v50, %v7848_v2 }
0x42ae   :  { %v4588_v52 = vmul.f32 %v4548_v36, %v7939_v51 }
0x42b0   :  { %4589 = vadd.xlane.f32.xlu1 %v4588_v52  ;;  %v4533_v53 = vpop.xlane.xlu0 %4532 }
0x42b1   :  { %v7945_v54 = vsel %vm4486_vm5, %v4533_v53, %v7854_v5 }
0x42b2   :  { %v4596_v55 = vmul.f32 %v4548_v36, %v7945_v54 }
0x42b4   :  { %4597 = vadd.xlane.f32.xlu1 %v4596_v55  ;;  %v4541_v56 = vpop.xlane.xlu0 %4540 }
0x42b5   :  { %v7951_v57 = vsel %vm4486_vm5, %v4541_v56, %v7860_v8 }
0x42b6   :  { %v4604_v58 = vmul.f32 %v4548_v36, %v7951_v57 }
0x42b8   :  { %4605 = vadd.xlane.f32.xlu1 %v4604_v58 }
0x42fd   :  { %v4497_v59 = vpop.xlane.xlu1 %4496 }
0x42fe   :  { %v7957_v60 = vsel %vm4486_vm5, %v4497_v59, %v7866_v13 }
0x42ff   :  { %v4560_v61 = vmul.f32 %v4548_v36, %v7957_v60 }
0x4301   :  { %4561 = vadd.xlane.f32.xlu0 %v4560_v61 }
0x4305   :  { %v4505_v62 = vpop.xlane.xlu1 %4504 }
0x4306   :  { %v7963_v63 = vsel %vm4486_vm5, %v4505_v62, %v7872_v16 }
0x4307   :  { %v4568_v0 = vmul.f32 %v4548_v36, %v7963_v63 }
0x4309   :  { %4569 = vadd.xlane.f32.xlu0 %v4568_v0 }
0x430d   :  { %v4513_v1 = vpop.xlane.xlu1 %4512 }
0x430e   :  { %v7969_v2 = vsel %vm4486_vm5, %v4513_v1, %v7878_v19 }
0x430f   :  { %v4576_v3 = vmul.f32 %v4548_v36, %v7969_v2 }
0x4311   :  { %4577 = vadd.xlane.f32.xlu0 %v4576_v3 }
0x4315   :  { %v4521_v4 = vpop.xlane.xlu1 %4520 }
0x4316   :  { %v7975_v5 = vsel %vm4486_vm5, %v4521_v4, %v7884_v22 }
0x4317   :  { %v4584_v6 = vmul.f32 %v4548_v36, %v7975_v5 }
0x4319   :  { %4585 = vadd.xlane.f32.xlu0 %v4584_v6 }
0x431d   :  { %v4529_v7 = vpop.xlane.xlu1 %4528 }
0x431e   :  { %v7981_v8 = vsel %vm4486_vm5, %v4529_v7, %v7890_v25 }
0x431f   :  { %v4592_v9 = vmul.f32 %v4548_v36, %v7981_v8 }
0x4321   :  { %4593 = vadd.xlane.f32.xlu0 %v4592_v9  ;;  %v4489_v10 = vpop.xlane.xlu1 %4488 }
0x4322   :  { %v7987_v13 = vsel %vm4486_vm5, %v4489_v10, %v7896_v28 }
0x4323   :  { %v4552_v14 = vmul.f32 %v4548_v36, %v7987_v13 }
0x4325   :  { %4553 = vadd.xlane.f32.xlu0 %v4552_v14  ;;  %v4537_v15 = vpop.xlane.xlu1 %4536 }
0x4326   :  { %v7993_v16 = vsel %vm4486_vm5, %v4537_v15, %v7902_v31 }
0x4327   :  { %v4600_v17 = vmul.f32 %v4548_v36, %v7993_v16 }
0x4329   :  { %4601 = vadd.xlane.f32.xlu0 %v4600_v17  ;;  %v4545_v18 = vpop.xlane.xlu1 %4544 }
0x432a   :  { %v7999_v19 = vsel %vm4486_vm5, %v4545_v18, %v7908_v34 }
0x432b   :  { %v4608_v20 = vmul.f32 %v4548_v36, %v7999_v19 }
0x432d   :  { %4609 = vadd.xlane.f32.xlu0 %v4608_v20  ;;  %v4558_v22 = vpop.xlane.xlu1 %4557 }
0x432e   :  { %v8008_v23 = vsel %vm4551_vm6, %v4558_v22, %v7915_v38 }
0x432f   :  { %v4621_v24 = vmul.f32 %v8003_v21, %v8008_v23 }
0x4331   :  { %4622 = vadd.xlane.f32.xlu0 %v4621_v24  ;;  %v4566_v25 = vpop.xlane.xlu1 %4565 }
0x4332   :  { %v8015_v26 = vsel %vm4551_vm6, %v4566_v25, %v7921_v41 }
0x4333   :  { %v4629_v27 = vmul.f32 %v8003_v21, %v8015_v26 }
0x4335   :  { %4630 = vadd.xlane.f32.xlu0 %v4629_v27  ;;  %v4574_v28 = vpop.xlane.xlu1 %4573 }
0x4336   :  { %v8022_v29 = vsel %vm4551_vm6, %v4574_v28, %v7927_v45  ;;  %v4677_v45 = vmul.f32 %v8003_v21, %v8055_v12 }
0x4337   :  { %v4637_v30 = vmul.f32 %v8003_v21, %v8022_v29 }
0x4339   :  { %4638 = vadd.xlane.f32.xlu0 %v4637_v30  ;;  %v4582_v31 = vpop.xlane.xlu1 %4581 }
0x433a   :  { %v8029_v32 = vsel %vm4551_vm6, %v4582_v31, %v7933_v48 }
0x433b   :  { %v4645_v33 = vmul.f32 %v8003_v21, %v8029_v32 }
0x433d   :  { %4646 = vadd.xlane.f32.xlu0 %v4645_v33  ;;  %v4590_v34 = vpop.xlane.xlu1 %4589 }
0x433e   :  { %v8036_v35 = vsel %vm4551_vm6, %v4590_v34, %v7939_v51 }
0x433f   :  { %v4653_v36 = vmul.f32 %v8003_v21, %v8036_v35 }
0x4341   :  { %4654 = vadd.xlane.f32.xlu0 %v4653_v36  ;;  %v4598_v38 = vpop.xlane.xlu1 %4597 }
0x4342   :  { %v8044_v39 = vsel %vm4551_vm6, %v4598_v38, %v7945_v54 }
0x4343   :  { %v4661_v40 = vmul.f32 %v8003_v21, %v8044_v39 }
0x4345   :  { %4662 = vadd.xlane.f32.xlu0 %v4661_v40  ;;  %v4606_v41 = vpop.xlane.xlu1 %4605 }
0x4346   :  { %v8052_v43 = vsel %vm4551_vm6, %v4606_v41, %v7951_v57 }
0x4347   :  { %v4669_v44 = vmul.f32 %v8003_v21, %v8052_v43 }
0x4349   :  { %4670 = vadd.xlane.f32.xlu0 %v4669_v44 }
0x434d   :  { %4678 = vadd.xlane.f32.xlu0 %v4677_v45 }
0x438e   :  { %v4562_v46 = vpop.xlane.xlu0 %4561 }
0x438f   :  { %v8064_v47 = vsel %vm4551_vm6, %v4562_v46, %v7957_v60 }
0x4390   :  { %v4625_v48 = vmul.f32 %v8003_v21, %v8064_v47 }
0x4392   :  { %4626 = vadd.xlane.f32.xlu1 %v4625_v48 }
0x4396   :  { %v4570_v42 = vpop.xlane.xlu0 %4569 }
0x4397   :  { %v8071_v49 = vsel %vm4551_vm6, %v4570_v42, %v7963_v63 }
0x4398   :  { %v4633_v50 = vmul.f32 %v8003_v21, %v8071_v49 }
0x439a   :  { %4634 = vadd.xlane.f32.xlu1 %v4633_v50 }
0x439e   :  { %v4578_v51 = vpop.xlane.xlu0 %4577 }
0x439f   :  { %v8078_v52 = vsel %vm4551_vm6, %v4578_v51, %v7969_v2 }
0x43a0   :  { %v4641_v53 = vmul.f32 %v8003_v21, %v8078_v52 }
0x43a2   :  { %4642 = vadd.xlane.f32.xlu1 %v4641_v53 }
0x43a6   :  { %v4586_v54 = vpop.xlane.xlu0 %4585 }
0x43a7   :  { %v8085_v55 = vsel %vm4551_vm6, %v4586_v54, %v7975_v5  ;;  %v8118_v5 = vld [vmem:[#allocation0 + $0x79] ss:$0 sm:$0xff] }
0x43a8   :  { %v4649_v56 = vmul.f32 %v8003_v21, %v8085_v55 }
0x43aa   :  { %4650 = vadd.xlane.f32.xlu1 %v4649_v56 }
0x43ae   :  { %v4594_v57 = vpop.xlane.xlu0 %4593 }
0x43af   :  { %v8092_v58 = vsel %vm4551_vm6, %v4594_v57, %v7981_v8 }
0x43b0   :  { %v4657_v59 = vmul.f32 %v8003_v21, %v8092_v58 }
0x43b2   :  { %4658 = vadd.xlane.f32.xlu1 %v4657_v59  ;;  %v4554_v60 = vpop.xlane.xlu0 %4553 }
0x43b3   :  { %v8099_v61 = vsel %vm4551_vm6, %v4554_v60, %v7987_v13 }
0x43b4   :  { %v4617_v62 = vmul.f32 %v8003_v21, %v8099_v61 }
0x43b6   :  { %4618 = vadd.xlane.f32.xlu1 %v4617_v62  ;;  %v4602_v63 = vpop.xlane.xlu0 %4601 }
0x43b7   :  { %v8106_v0 = vsel %vm4551_vm6, %v4602_v63, %v7993_v16 }
0x43b8   :  { %v4665_v1 = vmul.f32 %v8003_v21, %v8106_v0 }
0x43ba   :  { %4666 = vadd.xlane.f32.xlu1 %v4665_v1  ;;  %v4610_v2 = vpop.xlane.xlu0 %4609 }
0x43bb   :  { %v8113_v3 = vsel %vm4551_vm6, %v4610_v2, %v7999_v19 }
0x43bc   :  { %v4673_v4 = vmul.f32 %v8003_v21, %v8113_v3 }
0x43be   :  { %4674 = vadd.xlane.f32.xlu1 %v4673_v4  ;;  %v4623_v6 = vpop.xlane.xlu0 %4622 }
0x43bf   :  { %v8123_v7 = vsel %vm4616_vm8, %v4623_v6, %v8008_v23 }
0x43c0   :  { %v4690_v8 = vmul.f32 %v8118_v5, %v8123_v7 }
0x43c2   :  { %4691 = vadd.xlane.f32.xlu0 %v4690_v8  ;;  %v4631_v9 = vpop.xlane.xlu0 %4630 }
0x43c3   :  { %v8130_v10 = vsel %vm4616_vm8, %v4631_v9, %v8015_v26 }
0x43c4   :  { %v4698_v13 = vmul.f32 %v8118_v5, %v8130_v10 }
0x43c6   :  { %4699 = vadd.xlane.f32.xlu0 %v4698_v13  ;;  %v4639_v14 = vpop.xlane.xlu0 %4638 }
0x43c7   :  { %v8137_v15 = vsel %vm4616_vm8, %v4639_v14, %v8022_v29 }
0x43c8   :  { %v4706_v16 = vmul.f32 %v8118_v5, %v8137_v15 }
0x43ca   :  { %4707 = vadd.xlane.f32.xlu0 %v4706_v16  ;;  %v4647_v17 = vpop.xlane.xlu0 %4646 }
0x43cb   :  { %v8144_v18 = vsel %vm4616_vm8, %v4647_v17, %v8029_v32 }
0x43cc   :  { %v4714_v19 = vmul.f32 %v8118_v5, %v8144_v18 }
0x43ce   :  { %4715 = vadd.xlane.f32.xlu0 %v4714_v19  ;;  %v4655_v20 = vpop.xlane.xlu0 %4654 }
0x43cf   :  { %v8151_v21 = vsel %vm4616_vm8, %v4655_v20, %v8036_v35 }
0x43d0   :  { %v4722_v22 = vmul.f32 %v8118_v5, %v8151_v21 }
0x43d2   :  { %4723 = vadd.xlane.f32.xlu0 %v4722_v22  ;;  %v4663_v23 = vpop.xlane.xlu0 %4662 }
0x43d3   :  { %v8158_v24 = vsel %vm4616_vm8, %v4663_v23, %v8044_v39 }
0x43d4   :  { %v4730_v25 = vmul.f32 %v8118_v5, %v8158_v24 }
0x43d6   :  { %4731 = vadd.xlane.f32.xlu0 %v4730_v25  ;;  %v4671_v26 = vpop.xlane.xlu0 %4670 }
0x43d7   :  { %v8165_v27 = vsel %vm4616_vm8, %v4671_v26, %v8052_v43 }
0x43d8   :  { %v4738_v28 = vmul.f32 %v8118_v5, %v8165_v27 }
0x43da   :  { %4739 = vadd.xlane.f32.xlu0 %v4738_v28  ;;  %v4679_v29 = vpop.xlane.xlu0 %4678 }
0x43db   :  { %v8172_v30 = vsel %vm4616_vm8, %v4679_v29, %v8055_v12 }
0x43dc   :  { %v4746_v31 = vmul.f32 %v8118_v5, %v8172_v30 }
0x43de   :  { %4747 = vadd.xlane.f32.xlu0 %v4746_v31 }
0x441f   :  { %v4627_v32 = vpop.xlane.xlu1 %4626 }
0x4420   :  { %v8179_v33 = vsel %vm4616_vm8, %v4627_v32, %v8064_v47 }
0x4421   :  { %v4694_v34 = vmul.f32 %v8118_v5, %v8179_v33 }
0x4423   :  { %4695 = vadd.xlane.f32.xlu1 %v4694_v34 }
0x4427   :  { %v4635_v35 = vpop.xlane.xlu1 %4634 }
0x4428   :  { %v8186_v36 = vsel %vm4616_vm8, %v4635_v35, %v8071_v49 }
0x4429   :  { %v4702_v37 = vmul.f32 %v8118_v5, %v8186_v36 }
0x442b   :  { %4703 = vadd.xlane.f32.xlu1 %v4702_v37 }
0x442f   :  { %v4643_v38 = vpop.xlane.xlu1 %4642 }
0x4430   :  { %v8193_v39 = vsel %vm4616_vm8, %v4643_v38, %v8078_v52 }
0x4431   :  { %v4710_v40 = vmul.f32 %v8118_v5, %v8193_v39 }
0x4433   :  { %4711 = vadd.xlane.f32.xlu1 %v4710_v40 }
0x4437   :  { %v4651_v41 = vpop.xlane.xlu1 %4650 }
0x4438   :  { %v8200_v43 = vsel %vm4616_vm8, %v4651_v41, %v8085_v55  ;;  %v8233_v55 = vld [vmem:[#allocation0 + $0x7a] ss:$0 sm:$0xff] }
0x4439   :  { %v4718_v12 = vmul.f32 %v8118_v5, %v8200_v43 }
0x443b   :  { %4719 = vadd.xlane.f32.xlu1 %v4718_v12 }
0x443f   :  { %v4659_v44 = vpop.xlane.xlu1 %4658 }
0x4440   :  { %v8207_v45 = vsel %vm4616_vm8, %v4659_v44, %v8092_v58 }
0x4441   :  { %v4726_v46 = vmul.f32 %v8118_v5, %v8207_v45 }
0x4443   :  { %v4619_v47 = vpop.xlane.xlu1 %4618  ;;  %4727 = vadd.xlane.f32.xlu1 %v4726_v46 }
0x4444   :  { %v8214_v48 = vsel %vm4616_vm8, %v4619_v47, %v8099_v61 }
0x4445   :  { %v4686_v42 = vmul.f32 %v8118_v5, %v8214_v48 }
0x4447   :  { %v4667_v49 = vpop.xlane.xlu1 %4666  ;;  %4687 = vadd.xlane.f32.xlu1 %v4686_v42 }
0x4448   :  { %v8221_v50 = vsel %vm4616_vm8, %v4667_v49, %v8106_v0 }
0x4449   :  { %v4734_v51 = vmul.f32 %v8118_v5, %v8221_v50 }
0x444b   :  { %4735 = vadd.xlane.f32.xlu1 %v4734_v51  ;;  %v4675_v52 = vpop.xlane.xlu1 %4674 }
0x444c   :  { %v8228_v53 = vsel %vm4616_vm8, %v4675_v52, %v8113_v3 }
0x444d   :  { %v4742_v54 = vmul.f32 %v8118_v5, %v8228_v53 }
0x444f   :  { %4743 = vadd.xlane.f32.xlu1 %v4742_v54  ;;  %v4692_v56 = vpop.xlane.xlu0 %4691 }
0x4450   :  { %v8238_v57 = vsel %vm4685_vm9, %v4692_v56, %v8123_v7 }
0x4451   :  { %v4759_v58 = vmul.f32 %v8233_v55, %v8238_v57 }
0x4453   :  { %4760 = vadd.xlane.f32.xlu0 %v4759_v58  ;;  %v4700_v59 = vpop.xlane.xlu0 %4699 }
0x4454   :  { %v8245_v60 = vsel %vm4685_vm9, %v4700_v59, %v8130_v10 }
0x4455   :  { %v4767_v61 = vmul.f32 %v8233_v55, %v8245_v60 }
0x4457   :  { %4768 = vadd.xlane.f32.xlu0 %v4767_v61  ;;  %v4708_v62 = vpop.xlane.xlu0 %4707 }
0x4458   :  { %v8252_v63 = vsel %vm4685_vm9, %v4708_v62, %v8137_v15 }
0x4459   :  { %v4775_v0 = vmul.f32 %v8233_v55, %v8252_v63 }
0x445b   :  { %4776 = vadd.xlane.f32.xlu0 %v4775_v0  ;;  %v4716_v1 = vpop.xlane.xlu0 %4715 }
0x445c   :  { %v8259_v2 = vsel %vm4685_vm9, %v4716_v1, %v8144_v18 }
0x445d   :  { %v4783_v3 = vmul.f32 %v8233_v55, %v8259_v2 }
0x445f   :  { %4784 = vadd.xlane.f32.xlu0 %v4783_v3  ;;  %v4724_v4 = vpop.xlane.xlu0 %4723 }
0x4460   :  { %v8266_v5 = vsel %vm4685_vm9, %v4724_v4, %v8151_v21 }
0x4461   :  { %v4791_v6 = vmul.f32 %v8233_v55, %v8266_v5 }
0x4463   :  { %4792 = vadd.xlane.f32.xlu0 %v4791_v6  ;;  %v4732_v7 = vpop.xlane.xlu0 %4731 }
0x4464   :  { %v8273_v8 = vsel %vm4685_vm9, %v4732_v7, %v8158_v24 }
0x4465   :  { %v4799_v9 = vmul.f32 %v8233_v55, %v8273_v8 }
0x4467   :  { %4800 = vadd.xlane.f32.xlu0 %v4799_v9  ;;  %v4740_v10 = vpop.xlane.xlu0 %4739 }
0x4468   :  { %v8280_v13 = vsel %vm4685_vm9, %v4740_v10, %v8165_v27 }
0x4469   :  { %v4807_v14 = vmul.f32 %v8233_v55, %v8280_v13 }
0x446b   :  { %4808 = vadd.xlane.f32.xlu0 %v4807_v14  ;;  %v4748_v15 = vpop.xlane.xlu0 %4747 }
0x446c   :  { %v8287_v16 = vsel %vm4685_vm9, %v4748_v15, %v8172_v30 }
0x446d   :  { %v4815_v17 = vmul.f32 %v8233_v55, %v8287_v16 }
0x446f   :  { %4816 = vadd.xlane.f32.xlu0 %v4815_v17 }
0x44b0   :  { %v4696_v18 = vpop.xlane.xlu1 %4695 }
0x44b1   :  { %v8294_v19 = vsel %vm4685_vm9, %v4696_v18, %v8179_v33 }
0x44b2   :  { %v4763_v20 = vmul.f32 %v8233_v55, %v8294_v19 }
0x44b4   :  { %4764 = vadd.xlane.f32.xlu1 %v4763_v20 }
0x44b8   :  { %v4704_v21 = vpop.xlane.xlu1 %4703 }
0x44b9   :  { %v8301_v22 = vsel %vm4685_vm9, %v4704_v21, %v8186_v36 }
0x44ba   :  { %v4771_v23 = vmul.f32 %v8233_v55, %v8301_v22 }
0x44bc   :  { %4772 = vadd.xlane.f32.xlu1 %v4771_v23 }
0x44c0   :  { %v4712_v24 = vpop.xlane.xlu1 %4711 }
0x44c1   :  { %v8308_v25 = vsel %vm4685_vm9, %v4712_v24, %v8193_v39 }
0x44c2   :  { %v4779_v26 = vmul.f32 %v8233_v55, %v8308_v25 }
0x44c4   :  { %4780 = vadd.xlane.f32.xlu1 %v4779_v26 }
0x44c8   :  { %v4720_v27 = vpop.xlane.xlu1 %4719 }
0x44c9   :  { %v8315_v28 = vsel %vm4685_vm9, %v4720_v27, %v8200_v43  ;;  %v8348_v43 = vld [vmem:[#allocation0 + $0x7b] ss:$0 sm:$0xff] }
0x44ca   :  { %v4787_v29 = vmul.f32 %v8233_v55, %v8315_v28 }
0x44cc   :  { %4788 = vadd.xlane.f32.xlu1 %v4787_v29 }
0x44d0   :  { %v4728_v30 = vpop.xlane.xlu1 %4727 }
0x44d1   :  { %v8322_v31 = vsel %vm4685_vm9, %v4728_v30, %v8207_v45 }
0x44d2   :  { %v4795_v32 = vmul.f32 %v8233_v55, %v8322_v31 }
0x44d4   :  { %4796 = vadd.xlane.f32.xlu1 %v4795_v32  ;;  %v4688_v33 = vpop.xlane.xlu1 %4687 }
0x44d5   :  { %v8329_v34 = vsel %vm4685_vm9, %v4688_v33, %v8214_v48 }
0x44d6   :  { %v4755_v35 = vmul.f32 %v8233_v55, %v8329_v34 }
0x44d8   :  { %4756 = vadd.xlane.f32.xlu1 %v4755_v35  ;;  %v4736_v36 = vpop.xlane.xlu1 %4735 }
0x44d9   :  { %v8336_v37 = vsel %vm4685_vm9, %v4736_v36, %v8221_v50 }
0x44da   :  { %v4803_v38 = vmul.f32 %v8233_v55, %v8336_v37 }
0x44dc   :  { %4804 = vadd.xlane.f32.xlu1 %v4803_v38  ;;  %v4744_v39 = vpop.xlane.xlu1 %4743 }
0x44dd   :  { %v8343_v40 = vsel %vm4685_vm9, %v4744_v39, %v8228_v53 }
0x44de   :  { %v4811_v41 = vmul.f32 %v8233_v55, %v8343_v40 }
0x44e0   :  { %4812 = vadd.xlane.f32.xlu1 %v4811_v41  ;;  %v4761_v12 = vpop.xlane.xlu0 %4760 }
0x44e1   :  { %v8353_v44 = vsel %vm4754_vm10, %v4761_v12, %v8238_v57 }
0x44e2   :  { %v4828_v45 = vmul.f32 %v8348_v43, %v8353_v44 }
0x44e4   :  { %4829 = vadd.xlane.f32.xlu0 %v4828_v45  ;;  %v4769_v46 = vpop.xlane.xlu0 %4768 }
0x44e5   :  { %v8360_v47 = vsel %vm4754_vm10, %v4769_v46, %v8245_v60 }
0x44e6   :  { %v4836_v48 = vmul.f32 %v8348_v43, %v8360_v47 }
0x44e8   :  { %4837 = vadd.xlane.f32.xlu0 %v4836_v48  ;;  %v4777_v42 = vpop.xlane.xlu0 %4776 }
0x44e9   :  { %v8367_v49 = vsel %vm4754_vm10, %v4777_v42, %v8252_v63 }
0x44ea   :  { %v4844_v50 = vmul.f32 %v8348_v43, %v8367_v49 }
0x44ec   :  { %4845 = vadd.xlane.f32.xlu0 %v4844_v50  ;;  %v4785_v51 = vpop.xlane.xlu0 %4784 }
0x44ed   :  { %v8374_v52 = vsel %vm4754_vm10, %v4785_v51, %v8259_v2 }
0x44ee   :  { %v4852_v53 = vmul.f32 %v8348_v43, %v8374_v52 }
0x44f0   :  { %4853 = vadd.xlane.f32.xlu0 %v4852_v53  ;;  %v4793_v54 = vpop.xlane.xlu0 %4792 }
0x44f1   :  { %v8381_v55 = vsel %vm4754_vm10, %v4793_v54, %v8266_v5 }
0x44f2   :  { %v4860_v56 = vmul.f32 %v8348_v43, %v8381_v55 }
0x44f4   :  { %4861 = vadd.xlane.f32.xlu0 %v4860_v56  ;;  %v4801_v57 = vpop.xlane.xlu0 %4800 }
0x44f5   :  { %v8388_v58 = vsel %vm4754_vm10, %v4801_v57, %v8273_v8 }
0x44f6   :  { %v4868_v59 = vmul.f32 %v8348_v43, %v8388_v58 }
0x44f8   :  { %4869 = vadd.xlane.f32.xlu0 %v4868_v59  ;;  %v4809_v60 = vpop.xlane.xlu0 %4808 }
0x44f9   :  { %v8395_v61 = vsel %vm4754_vm10, %v4809_v60, %v8280_v13 }
0x44fa   :  { %v4876_v62 = vmul.f32 %v8348_v43, %v8395_v61 }
0x44fc   :  { %4877 = vadd.xlane.f32.xlu0 %v4876_v62  ;;  %v4817_v63 = vpop.xlane.xlu0 %4816 }
0x44fd   :  { %v8402_v0 = vsel %vm4754_vm10, %v4817_v63, %v8287_v16 }
0x44fe   :  { %v4884_v1 = vmul.f32 %v8348_v43, %v8402_v0 }
0x4500   :  { %4885 = vadd.xlane.f32.xlu0 %v4884_v1 }
0x4541   :  { %v4765_v2 = vpop.xlane.xlu1 %4764 }
0x4542   :  { %v8409_v3 = vsel %vm4754_vm10, %v4765_v2, %v8294_v19 }
0x4543   :  { %v4832_v4 = vmul.f32 %v8348_v43, %v8409_v3 }
0x4545   :  { %4833 = vadd.xlane.f32.xlu1 %v4832_v4 }
0x4549   :  { %v4773_v5 = vpop.xlane.xlu1 %4772 }
0x454a   :  { %v8416_v6 = vsel %vm4754_vm10, %v4773_v5, %v8301_v22 }
0x454b   :  { %v4840_v7 = vmul.f32 %v8348_v43, %v8416_v6 }
0x454d   :  { %4841 = vadd.xlane.f32.xlu1 %v4840_v7 }
0x4551   :  { %v4781_v8 = vpop.xlane.xlu1 %4780 }
0x4552   :  { %v8423_v9 = vsel %vm4754_vm10, %v4781_v8, %v8308_v25 }
0x4553   :  { %v4848_v10 = vmul.f32 %v8348_v43, %v8423_v9 }
0x4555   :  { %4849 = vadd.xlane.f32.xlu1 %v4848_v10 }
0x4559   :  { %v4789_v13 = vpop.xlane.xlu1 %4788 }
0x455a   :  { %v8430_v14 = vsel %vm4754_vm10, %v4789_v13, %v8315_v28  ;;  %v8463_v28 = vld [vmem:[#allocation0 + $0x7c] ss:$0 sm:$0xff] }
0x455b   :  { %v4856_v15 = vmul.f32 %v8348_v43, %v8430_v14 }
0x455d   :  { %4857 = vadd.xlane.f32.xlu1 %v4856_v15 }
0x4561   :  { %v4797_v16 = vpop.xlane.xlu1 %4796 }
0x4562   :  { %v8437_v17 = vsel %vm4754_vm10, %v4797_v16, %v8322_v31 }
0x4563   :  { %v4864_v18 = vmul.f32 %v8348_v43, %v8437_v17 }
0x4565   :  { %4865 = vadd.xlane.f32.xlu1 %v4864_v18  ;;  %v4757_v19 = vpop.xlane.xlu1 %4756 }
0x4566   :  { %v8444_v20 = vsel %vm4754_vm10, %v4757_v19, %v8329_v34 }
0x4567   :  { %v4824_v21 = vmul.f32 %v8348_v43, %v8444_v20 }
0x4569   :  { %4825 = vadd.xlane.f32.xlu1 %v4824_v21  ;;  %v4805_v22 = vpop.xlane.xlu1 %4804 }
0x456a   :  { %v8451_v23 = vsel %vm4754_vm10, %v4805_v22, %v8336_v37 }
0x456b   :  { %v4872_v24 = vmul.f32 %v8348_v43, %v8451_v23 }
0x456d   :  { %4873 = vadd.xlane.f32.xlu1 %v4872_v24  ;;  %v4813_v25 = vpop.xlane.xlu1 %4812 }
0x456e   :  { %v8458_v26 = vsel %vm4754_vm10, %v4813_v25, %v8343_v40 }
0x456f   :  { %v4880_v27 = vmul.f32 %v8348_v43, %v8458_v26 }
0x4571   :  { %4881 = vadd.xlane.f32.xlu1 %v4880_v27  ;;  %v4830_v29 = vpop.xlane.xlu0 %4829 }
0x4572   :  { %v8468_v30 = vsel %vm4823_vm11, %v4830_v29, %v8353_v44 }
0x4573   :  { %v4897_v31 = vmul.f32 %v8463_v28, %v8468_v30 }
0x4575   :  { %4898 = vadd.xlane.f32.xlu0 %v4897_v31  ;;  %v4838_v32 = vpop.xlane.xlu0 %4837 }
0x4576   :  { %v8475_v33 = vsel %vm4823_vm11, %v4838_v32, %v8360_v47 }
0x4577   :  { %v4905_v34 = vmul.f32 %v8463_v28, %v8475_v33 }
0x4579   :  { %4906 = vadd.xlane.f32.xlu0 %v4905_v34  ;;  %v4846_v35 = vpop.xlane.xlu0 %4845 }
0x457a   :  { %v8482_v36 = vsel %vm4823_vm11, %v4846_v35, %v8367_v49 }
0x457b   :  { %v4913_v37 = vmul.f32 %v8463_v28, %v8482_v36 }
0x457d   :  { %4914 = vadd.xlane.f32.xlu0 %v4913_v37  ;;  %v4854_v38 = vpop.xlane.xlu0 %4853 }
0x457e   :  { %v8489_v39 = vsel %vm4823_vm11, %v4854_v38, %v8374_v52 }
0x457f   :  { %v4921_v40 = vmul.f32 %v8463_v28, %v8489_v39 }
0x4581   :  { %4922 = vadd.xlane.f32.xlu0 %v4921_v40  ;;  %v4862_v41 = vpop.xlane.xlu0 %4861 }
0x4582   :  { %v8496_v43 = vsel %vm4823_vm11, %v4862_v41, %v8381_v55 }
0x4583   :  { %v4929_v12 = vmul.f32 %v8463_v28, %v8496_v43 }
0x4585   :  { %4930 = vadd.xlane.f32.xlu0 %v4929_v12  ;;  %v4870_v44 = vpop.xlane.xlu0 %4869 }
0x4586   :  { %v8503_v45 = vsel %vm4823_vm11, %v4870_v44, %v8388_v58 }
0x4587   :  { %v4937_v46 = vmul.f32 %v8463_v28, %v8503_v45 }
0x4589   :  { %4938 = vadd.xlane.f32.xlu0 %v4937_v46  ;;  %v4878_v47 = vpop.xlane.xlu0 %4877 }
0x458a   :  { %v8510_v48 = vsel %vm4823_vm11, %v4878_v47, %v8395_v61 }
0x458b   :  { %v4945_v42 = vmul.f32 %v8463_v28, %v8510_v48 }
0x458d   :  { %4946 = vadd.xlane.f32.xlu0 %v4945_v42  ;;  %v4886_v49 = vpop.xlane.xlu0 %4885 }
0x458e   :  { %v8517_v50 = vsel %vm4823_vm11, %v4886_v49, %v8402_v0 }
0x458f   :  { %v4953_v51 = vmul.f32 %v8463_v28, %v8517_v50 }
0x4591   :  { %4954 = vadd.xlane.f32.xlu0 %v4953_v51 }
0x45d2   :  { %v4834_v52 = vpop.xlane.xlu1 %4833 }
0x45d3   :  { %v8524_v53 = vsel %vm4823_vm11, %v4834_v52, %v8409_v3 }
0x45d4   :  { %v4901_v54 = vmul.f32 %v8463_v28, %v8524_v53 }
0x45d6   :  { %4902 = vadd.xlane.f32.xlu1 %v4901_v54 }
0x45da   :  { %v4842_v55 = vpop.xlane.xlu1 %4841 }
0x45db   :  { %v8531_v56 = vsel %vm4823_vm11, %v4842_v55, %v8416_v6 }
0x45dc   :  { %v4909_v57 = vmul.f32 %v8463_v28, %v8531_v56 }
0x45de   :  { %4910 = vadd.xlane.f32.xlu1 %v4909_v57 }
0x45e2   :  { %v4850_v58 = vpop.xlane.xlu1 %4849 }
0x45e3   :  { %v8538_v59 = vsel %vm4823_vm11, %v4850_v58, %v8423_v9 }
0x45e4   :  { %v4917_v60 = vmul.f32 %v8463_v28, %v8538_v59 }
0x45e6   :  { %4918 = vadd.xlane.f32.xlu1 %v4917_v60 }
0x45ea   :  { %v4858_v61 = vpop.xlane.xlu1 %4857 }
0x45eb   :  { %v8545_v62 = vsel %vm4823_vm11, %v4858_v61, %v8430_v14  ;;  %v8578_v14 = vld [vmem:[#allocation0 + $0x7d] ss:$0 sm:$0xff] }
0x45ec   :  { %v4925_v63 = vmul.f32 %v8463_v28, %v8545_v62 }
0x45ee   :  { %4926 = vadd.xlane.f32.xlu1 %v4925_v63 }
0x45f2   :  { %v4866_v0 = vpop.xlane.xlu1 %4865 }
0x45f3   :  { %v8552_v1 = vsel %vm4823_vm11, %v4866_v0, %v8437_v17 }
0x45f4   :  { %v4933_v2 = vmul.f32 %v8463_v28, %v8552_v1 }
0x45f6   :  { %4934 = vadd.xlane.f32.xlu1 %v4933_v2  ;;  %v4826_v3 = vpop.xlane.xlu1 %4825 }
0x45f7   :  { %v8559_v4 = vsel %vm4823_vm11, %v4826_v3, %v8444_v20 }
0x45f8   :  { %v4893_v5 = vmul.f32 %v8463_v28, %v8559_v4 }
0x45fa   :  { %4894 = vadd.xlane.f32.xlu1 %v4893_v5  ;;  %v4874_v6 = vpop.xlane.xlu1 %4873 }
0x45fb   :  { %v8566_v7 = vsel %vm4823_vm11, %v4874_v6, %v8451_v23 }
0x45fc   :  { %v4941_v8 = vmul.f32 %v8463_v28, %v8566_v7 }
0x45fe   :  { %4942 = vadd.xlane.f32.xlu1 %v4941_v8  ;;  %v4882_v9 = vpop.xlane.xlu1 %4881 }
0x45ff   :  { %v8573_v10 = vsel %vm4823_vm11, %v4882_v9, %v8458_v26 }
0x4600   :  { %v4949_v13 = vmul.f32 %v8463_v28, %v8573_v10 }
0x4602   :  { %4950 = vadd.xlane.f32.xlu1 %v4949_v13  ;;  %v4899_v15 = vpop.xlane.xlu0 %4898 }
0x4603   :  { %v8583_v16 = vsel %vm4892_vm12, %v4899_v15, %v8468_v30 }
0x4604   :  { %v4966_v17 = vmul.f32 %v8578_v14, %v8583_v16 }
0x4606   :  { %4967 = vadd.xlane.f32.xlu0 %v4966_v17  ;;  %v4907_v18 = vpop.xlane.xlu0 %4906 }
0x4607   :  { %v8590_v19 = vsel %vm4892_vm12, %v4907_v18, %v8475_v33 }
0x4608   :  { %v4974_v20 = vmul.f32 %v8578_v14, %v8590_v19 }
0x460a   :  { %4975 = vadd.xlane.f32.xlu0 %v4974_v20  ;;  %v4915_v21 = vpop.xlane.xlu0 %4914 }
0x460b   :  { %v8597_v22 = vsel %vm4892_vm12, %v4915_v21, %v8482_v36 }
0x460c   :  { %v4982_v23 = vmul.f32 %v8578_v14, %v8597_v22 }
0x460e   :  { %4983 = vadd.xlane.f32.xlu0 %v4982_v23  ;;  %v4923_v24 = vpop.xlane.xlu0 %4922 }
0x460f   :  { %v8604_v25 = vsel %vm4892_vm12, %v4923_v24, %v8489_v39 }
0x4610   :  { %v4990_v26 = vmul.f32 %v8578_v14, %v8604_v25 }
0x4612   :  { %4991 = vadd.xlane.f32.xlu0 %v4990_v26  ;;  %v4931_v27 = vpop.xlane.xlu0 %4930 }
0x4613   :  { %v8611_v28 = vsel %vm4892_vm12, %v4931_v27, %v8496_v43 }
0x4614   :  { %v4998_v29 = vmul.f32 %v8578_v14, %v8611_v28 }
0x4616   :  { %4999 = vadd.xlane.f32.xlu0 %v4998_v29  ;;  %v4939_v30 = vpop.xlane.xlu0 %4938 }
0x4617   :  { %v8618_v31 = vsel %vm4892_vm12, %v4939_v30, %v8503_v45 }
0x4618   :  { %v5006_v32 = vmul.f32 %v8578_v14, %v8618_v31 }
0x461a   :  { %5007 = vadd.xlane.f32.xlu0 %v5006_v32  ;;  %v4947_v33 = vpop.xlane.xlu0 %4946 }
0x461b   :  { %v8625_v34 = vsel %vm4892_vm12, %v4947_v33, %v8510_v48 }
0x461c   :  { %v5014_v35 = vmul.f32 %v8578_v14, %v8625_v34 }
0x461e   :  { %5015 = vadd.xlane.f32.xlu0 %v5014_v35  ;;  %v4955_v36 = vpop.xlane.xlu0 %4954 }
0x461f   :  { %v8632_v37 = vsel %vm4892_vm12, %v4955_v36, %v8517_v50 }
0x4620   :  { %v5022_v38 = vmul.f32 %v8578_v14, %v8632_v37 }
0x4622   :  { %5023 = vadd.xlane.f32.xlu0 %v5022_v38 }
0x4663   :  { %v4903_v39 = vpop.xlane.xlu1 %4902 }
0x4664   :  { %v8639_v40 = vsel %vm4892_vm12, %v4903_v39, %v8524_v53 }
0x4665   :  { %v4970_v41 = vmul.f32 %v8578_v14, %v8639_v40 }
0x4667   :  { %4971 = vadd.xlane.f32.xlu1 %v4970_v41 }
0x466b   :  { %v4911_v43 = vpop.xlane.xlu1 %4910 }
0x466c   :  { %v8646_v12 = vsel %vm4892_vm12, %v4911_v43, %v8531_v56 }
0x466d   :  { %v4978_v44 = vmul.f32 %v8578_v14, %v8646_v12 }
0x466f   :  { %4979 = vadd.xlane.f32.xlu1 %v4978_v44 }
0x4673   :  { %v4919_v45 = vpop.xlane.xlu1 %4918 }
0x4674   :  { %v8653_v46 = vsel %vm4892_vm12, %v4919_v45, %v8538_v59 }
0x4675   :  { %v4986_v47 = vmul.f32 %v8578_v14, %v8653_v46 }
0x4677   :  { %4987 = vadd.xlane.f32.xlu1 %v4986_v47 }
0x467b   :  { %v4927_v48 = vpop.xlane.xlu1 %4926 }
0x467c   :  { %v8660_v42 = vsel %vm4892_vm12, %v4927_v48, %v8545_v62  ;;  %v8693_v62 = vld [vmem:[#allocation0 + $0x7e] ss:$0 sm:$0xff] }
0x467d   :  { %v4994_v49 = vmul.f32 %v8578_v14, %v8660_v42 }
0x467f   :  { %4995 = vadd.xlane.f32.xlu1 %v4994_v49 }
0x4683   :  { %v4935_v50 = vpop.xlane.xlu1 %4934 }
0x4684   :  { %v8667_v51 = vsel %vm4892_vm12, %v4935_v50, %v8552_v1 }
0x4685   :  { %v5002_v52 = vmul.f32 %v8578_v14, %v8667_v51 }
0x4687   :  { %5003 = vadd.xlane.f32.xlu1 %v5002_v52  ;;  %v4895_v53 = vpop.xlane.xlu1 %4894 }
0x4688   :  { %v8674_v54 = vsel %vm4892_vm12, %v4895_v53, %v8559_v4 }
0x4689   :  { %v4962_v55 = vmul.f32 %v8578_v14, %v8674_v54 }
0x468b   :  { %4963 = vadd.xlane.f32.xlu1 %v4962_v55  ;;  %v4943_v56 = vpop.xlane.xlu1 %4942 }
0x468c   :  { %v8681_v57 = vsel %vm4892_vm12, %v4943_v56, %v8566_v7 }
0x468d   :  { %v5010_v58 = vmul.f32 %v8578_v14, %v8681_v57 }
0x468f   :  { %5011 = vadd.xlane.f32.xlu1 %v5010_v58  ;;  %v4951_v59 = vpop.xlane.xlu1 %4950 }
0x4690   :  { %v8688_v60 = vsel %vm4892_vm12, %v4951_v59, %v8573_v10 }
0x4691   :  { %v5018_v61 = vmul.f32 %v8578_v14, %v8688_v60 }
0x4693   :  { %5019 = vadd.xlane.f32.xlu1 %v5018_v61  ;;  %v4968_v63 = vpop.xlane.xlu0 %4967 }
0x4694   :  { %v8698_v0 = vsel %vm4961_vm13, %v4968_v63, %v8583_v16 }
0x4695   :  { %v5035_v1 = vmul.f32 %v8693_v62, %v8698_v0 }
0x4697   :  { %5036 = vadd.xlane.f32.xlu0 %v5035_v1  ;;  %v4976_v2 = vpop.xlane.xlu0 %4975 }
0x4698   :  { %v8705_v3 = vsel %vm4961_vm13, %v4976_v2, %v8590_v19 }
0x4699   :  { %v5043_v4 = vmul.f32 %v8693_v62, %v8705_v3 }
0x469b   :  { %5044 = vadd.xlane.f32.xlu0 %v5043_v4  ;;  %v4984_v5 = vpop.xlane.xlu0 %4983 }
0x469c   :  { %v8712_v6 = vsel %vm4961_vm13, %v4984_v5, %v8597_v22 }
0x469d   :  { %v5051_v7 = vmul.f32 %v8693_v62, %v8712_v6 }
0x469f   :  { %5052 = vadd.xlane.f32.xlu0 %v5051_v7  ;;  %v4992_v8 = vpop.xlane.xlu0 %4991 }
0x46a0   :  { %v8719_v9 = vsel %vm4961_vm13, %v4992_v8, %v8604_v25 }
0x46a1   :  { %v5059_v10 = vmul.f32 %v8693_v62, %v8719_v9 }
0x46a3   :  { %5060 = vadd.xlane.f32.xlu0 %v5059_v10  ;;  %v5000_v13 = vpop.xlane.xlu0 %4999 }
0x46a4   :  { %v8726_v14 = vsel %vm4961_vm13, %v5000_v13, %v8611_v28 }
0x46a5   :  { %v5067_v15 = vmul.f32 %v8693_v62, %v8726_v14 }
0x46a7   :  { %5068 = vadd.xlane.f32.xlu0 %v5067_v15  ;;  %v5008_v16 = vpop.xlane.xlu0 %5007 }
0x46a8   :  { %v8733_v17 = vsel %vm4961_vm13, %v5008_v16, %v8618_v31 }
0x46a9   :  { %v5075_v18 = vmul.f32 %v8693_v62, %v8733_v17 }
0x46ab   :  { %5076 = vadd.xlane.f32.xlu0 %v5075_v18  ;;  %v5016_v19 = vpop.xlane.xlu0 %5015 }
0x46ac   :  { %v8740_v20 = vsel %vm4961_vm13, %v5016_v19, %v8625_v34 }
0x46ad   :  { %v5083_v21 = vmul.f32 %v8693_v62, %v8740_v20 }
0x46af   :  { %5084 = vadd.xlane.f32.xlu0 %v5083_v21  ;;  %v5024_v22 = vpop.xlane.xlu0 %5023 }
0x46b0   :  { %v8747_v23 = vsel %vm4961_vm13, %v5024_v22, %v8632_v37 }
0x46b1   :  { %v5091_v24 = vmul.f32 %v8693_v62, %v8747_v23 }
0x46b3   :  { %5092 = vadd.xlane.f32.xlu0 %v5091_v24 }
0x46f4   :  { %v4972_v25 = vpop.xlane.xlu1 %4971 }
0x46f5   :  { %v8754_v26 = vsel %vm4961_vm13, %v4972_v25, %v8639_v40 }
0x46f6   :  { %v5039_v27 = vmul.f32 %v8693_v62, %v8754_v26 }
0x46f8   :  { %5040 = vadd.xlane.f32.xlu1 %v5039_v27 }
0x46fc   :  { %v4980_v28 = vpop.xlane.xlu1 %4979 }
0x46fd   :  { %v8761_v29 = vsel %vm4961_vm13, %v4980_v28, %v8646_v12 }
0x46fe   :  { %v5047_v30 = vmul.f32 %v8693_v62, %v8761_v29 }
0x4700   :  { %5048 = vadd.xlane.f32.xlu1 %v5047_v30 }
0x4704   :  { %v4988_v31 = vpop.xlane.xlu1 %4987 }
0x4705   :  { %v8768_v32 = vsel %vm4961_vm13, %v4988_v31, %v8653_v46 }
0x4706   :  { %v5055_v33 = vmul.f32 %v8693_v62, %v8768_v32 }
0x4708   :  { %5056 = vadd.xlane.f32.xlu1 %v5055_v33 }
0x470c   :  { %v4996_v34 = vpop.xlane.xlu1 %4995 }
0x470d   :  { %v8775_v35 = vsel %vm4961_vm13, %v4996_v34, %v8660_v42  ;;  %v8808_v42 = vld [vmem:[#allocation0 + $0x7f] ss:$0 sm:$0xff] }
0x470e   :  { %v5063_v36 = vmul.f32 %v8693_v62, %v8775_v35 }
0x4710   :  { %5064 = vadd.xlane.f32.xlu1 %v5063_v36 }
0x4714   :  { %v5004_v37 = vpop.xlane.xlu1 %5003 }
0x4715   :  { %v8782_v38 = vsel %vm4961_vm13, %v5004_v37, %v8667_v51 }
0x4716   :  { %v5071_v39 = vmul.f32 %v8693_v62, %v8782_v38 }
0x4718   :  { %5072 = vadd.xlane.f32.xlu1 %v5071_v39  ;;  %v4964_v40 = vpop.xlane.xlu1 %4963 }
0x4719   :  { %v8789_v41 = vsel %vm4961_vm13, %v4964_v40, %v8674_v54 }
0x471a   :  { %v5031_v43 = vmul.f32 %v8693_v62, %v8789_v41 }
0x471c   :  { %5032 = vadd.xlane.f32.xlu1 %v5031_v43  ;;  %v5012_v12 = vpop.xlane.xlu1 %5011 }
0x471d   :  { %v8796_v44 = vsel %vm4961_vm13, %v5012_v12, %v8681_v57 }
0x471e   :  { %v5079_v45 = vmul.f32 %v8693_v62, %v8796_v44 }
0x4720   :  { %5080 = vadd.xlane.f32.xlu1 %v5079_v45  ;;  %v5020_v46 = vpop.xlane.xlu1 %5019 }
0x4721   :  { %v8803_v47 = vsel %vm4961_vm13, %v5020_v46, %v8688_v60 }
0x4722   :  { %v5087_v48 = vmul.f32 %v8693_v62, %v8803_v47 }
0x4724   :  { %5088 = vadd.xlane.f32.xlu1 %v5087_v48  ;;  %v5037_v49 = vpop.xlane.xlu0 %5036 }
0x4725   :  { %v8813_v50 = vsel %vm5030_vm14, %v5037_v49, %v8698_v0 }
0x4726   :  { %v5104_v51 = vmul.f32 %v8808_v42, %v8813_v50 }
0x4728   :  { %5105 = vadd.xlane.f32.xlu0 %v5104_v51  ;;  %v5045_v52 = vpop.xlane.xlu0 %5044 }
0x4729   :  { %v8820_v53 = vsel %vm5030_vm14, %v5045_v52, %v8705_v3 }
0x472a   :  { %v5112_v54 = vmul.f32 %v8808_v42, %v8820_v53 }
0x472c   :  { %5113 = vadd.xlane.f32.xlu0 %v5112_v54  ;;  %v5053_v55 = vpop.xlane.xlu0 %5052 }
0x472d   :  { %v8827_v56 = vsel %vm5030_vm14, %v5053_v55, %v8712_v6 }
0x472e   :  { %v5120_v57 = vmul.f32 %v8808_v42, %v8827_v56 }
0x4730   :  { %5121 = vadd.xlane.f32.xlu0 %v5120_v57  ;;  %v5061_v58 = vpop.xlane.xlu0 %5060 }
0x4731   :  { %v8834_v59 = vsel %vm5030_vm14, %v5061_v58, %v8719_v9 }
0x4732   :  { %v5128_v60 = vmul.f32 %v8808_v42, %v8834_v59 }
0x4734   :  { %5129 = vadd.xlane.f32.xlu0 %v5128_v60  ;;  %v5069_v61 = vpop.xlane.xlu0 %5068 }
0x4735   :  { %v5070_v62 = vsel %vm5030_vm14, %v5069_v61, %v8726_v14 }
0x4736   :  { %v5136_v63 = vmul.f32 %v8808_v42, %v5070_v62 }
0x4738   :  { %5137 = vadd.xlane.f32.xlu0 %v5136_v63  ;;  %v5077_v0 = vpop.xlane.xlu0 %5076 }
0x4739   :  { %v5078_v1 = vsel %vm5030_vm14, %v5077_v0, %v8733_v17 }
0x473a   :  { %v5144_v2 = vmul.f32 %v8808_v42, %v5078_v1 }
0x473c   :  { %5145 = vadd.xlane.f32.xlu0 %v5144_v2  ;;  %v5085_v3 = vpop.xlane.xlu0 %5084 }
0x473d   :  { %v5086_v4 = vsel %vm5030_vm14, %v5085_v3, %v8740_v20 }
0x473e   :  { %v5152_v5 = vmul.f32 %v8808_v42, %v5086_v4 }
0x4740   :  { %5153 = vadd.xlane.f32.xlu0 %v5152_v5  ;;  %v5093_v6 = vpop.xlane.xlu0 %5092 }
0x4741   :  { %v5094_v7 = vsel %vm5030_vm14, %v5093_v6, %v8747_v23 }
0x4742   :  { %v5160_v8 = vmul.f32 %v8808_v42, %v5094_v7 }
0x4744   :  { %5161 = vadd.xlane.f32.xlu0 %v5160_v8 }
0x4785   :  { %v5041_v9 = vpop.xlane.xlu1 %5040 }
0x4786   :  { %v5042_v10 = vsel %vm5030_vm14, %v5041_v9, %v8754_v26 }
0x4787   :  { %v5108_v13 = vmul.f32 %v8808_v42, %v5042_v10 }
0x4789   :  { %5109 = vadd.xlane.f32.xlu1 %v5108_v13 }
0x478d   :  { %v5049_v14 = vpop.xlane.xlu1 %5048 }
0x478e   :  { %v5050_v15 = vsel %vm5030_vm14, %v5049_v14, %v8761_v29 }
0x478f   :  { %v5116_v16 = vmul.f32 %v8808_v42, %v5050_v15 }
0x4791   :  { %5117 = vadd.xlane.f32.xlu1 %v5116_v16 }
0x4795   :  { %v5057_v17 = vpop.xlane.xlu1 %5056 }
0x4796   :  { %v5058_v18 = vsel %vm5030_vm14, %v5057_v17, %v8768_v32 }
0x4797   :  { %v5124_v19 = vmul.f32 %v8808_v42, %v5058_v18 }
0x4799   :  { %5125 = vadd.xlane.f32.xlu1 %v5124_v19 }
0x479d   :  { %v5065_v20 = vpop.xlane.xlu1 %5064 }
0x479e   :  { %v5066_v21 = vsel %vm5030_vm14, %v5065_v20, %v8775_v35 }
0x479f   :  { %v5132_v22 = vmul.f32 %v8808_v42, %v5066_v21 }
0x47a1   :  { %5133 = vadd.xlane.f32.xlu1 %v5132_v22 }
0x47a5   :  { %v5073_v23 = vpop.xlane.xlu1 %5072 }
0x47a6   :  { %v5074_v24 = vsel %vm5030_vm14, %v5073_v23, %v8782_v38 }
0x47a7   :  { %v5140_v25 = vmul.f32 %v8808_v42, %v5074_v24 }
0x47a9   :  { %5141 = vadd.xlane.f32.xlu1 %v5140_v25  ;;  %v5033_v26 = vpop.xlane.xlu1 %5032 }
0x47aa   :  { %v5034_v27 = vsel %vm5030_vm14, %v5033_v26, %v8789_v41 }
0x47ab   :  { %v5100_v28 = vmul.f32 %v8808_v42, %v5034_v27 }
0x47ad   :  { %5101 = vadd.xlane.f32.xlu1 %v5100_v28  ;;  %v5081_v29 = vpop.xlane.xlu1 %5080 }
0x47ae   :  { %v5082_v30 = vsel %vm5030_vm14, %v5081_v29, %v8796_v44 }
0x47af   :  { %v5148_v31 = vmul.f32 %v8808_v42, %v5082_v30 }
0x47b1   :  { %5149 = vadd.xlane.f32.xlu1 %v5148_v31  ;;  %v5089_v32 = vpop.xlane.xlu1 %5088 }
0x47b2   :  { %v5090_v33 = vsel %vm5030_vm14, %v5089_v32, %v8803_v47 }
0x47b3   :  { %v5156_v34 = vmul.f32 %v8808_v42, %v5090_v33 }
0x47b5   :  { %5157 = vadd.xlane.f32.xlu1 %v5156_v34  ;;  %v5106_v35 = vpop.xlane.xlu0 %5105 }
0x47b6   :  { %v5107_v36 = vsel %vm5099_vm15, %v5106_v35, %v8813_v50 }
0x47b7   :  { %5166 = vst [vmem:[#allocation1 + $0x8] sm:$0xff] %v5107_v36 }
0x47b9   :  { %v5114_v37 = vpop.xlane.xlu0 %5113 }
0x47ba   :  { %v5115_v38 = vsel %vm5099_vm15, %v5114_v37, %v8820_v53 }
0x47bb   :  { %5170 = vst [vmem:[#allocation1 + $0x18] sm:$0xff] %v5115_v38 }
0x47bd   :  { %v5122_v39 = vpop.xlane.xlu0 %5121 }
0x47be   :  { %v5123_v40 = vsel %vm5099_vm15, %v5122_v39, %v8827_v56 }
0x47bf   :  { %5174 = vst [vmem:[#allocation1 + $0x28] sm:$0xff] %v5123_v40 }
0x47c1   :  { %v5130_v41 = vpop.xlane.xlu0 %5129 }
0x47c2   :  { %v5131_v43 = vsel %vm5099_vm15, %v5130_v41, %v8834_v59 }
0x47c3   :  { %5178 = vst [vmem:[#allocation1 + $0x38] sm:$0xff] %v5131_v43 }
0x47c5   :  { %v5138_v12 = vpop.xlane.xlu0 %5137 }
0x47c6   :  { %v5139_v44 = vsel %vm5099_vm15, %v5138_v12, %v5070_v62 }
0x47c7   :  { %5182 = vst [vmem:[#allocation1 + $0x48] sm:$0xff] %v5139_v44 }
0x47c9   :  { %v5146_v45 = vpop.xlane.xlu0 %5145 }
0x47ca   :  { %v5147_v46 = vsel %vm5099_vm15, %v5146_v45, %v5078_v1 }
0x47cb   :  { %5186 = vst [vmem:[#allocation1 + $0x58] sm:$0xff] %v5147_v46 }
0x47cd   :  { %v5154_v47 = vpop.xlane.xlu0 %5153 }
0x47ce   :  { %v5155_v48 = vsel %vm5099_vm15, %v5154_v47, %v5086_v4 }
0x47cf   :  { %5190 = vst [vmem:[#allocation1 + $0x68] sm:$0xff] %v5155_v48 }
0x47d1   :  { %v5162_v42 = vpop.xlane.xlu0 %5161 }
0x47d2   :  { %v5163_v49 = vsel %vm5099_vm15, %v5162_v42, %v5094_v7 }
0x47d3   :  { %5194 = vst [vmem:[#allocation1 + $0x78] sm:$0xff] %v5163_v49 }
0x4816   :  { %v5110_v50 = vpop.xlane.xlu1 %5109 }
0x4817   :  { %v5111_v51 = vsel %vm5099_vm15, %v5110_v50, %v5042_v10 }
0x4818   :  { %5168 = vst [vmem:[#allocation1 + $0x10] sm:$0xff] %v5111_v51 }
0x481e   :  { %v5118_v52 = vpop.xlane.xlu1 %5117 }
0x481f   :  { %v5119_v53 = vsel %vm5099_vm15, %v5118_v52, %v5050_v15 }
0x4820   :  { %5172 = vst [vmem:[#allocation1 + $0x20] sm:$0xff] %v5119_v53 }
0x4826   :  { %v5126_v54 = vpop.xlane.xlu1 %5125 }
0x4827   :  { %v5127_v55 = vsel %vm5099_vm15, %v5126_v54, %v5058_v18 }
0x4828   :  { %5176 = vst [vmem:[#allocation1 + $0x30] sm:$0xff] %v5127_v55 }
0x482e   :  { %v5134_v56 = vpop.xlane.xlu1 %5133 }
0x482f   :  { %v5135_v57 = vsel %vm5099_vm15, %v5134_v56, %v5066_v21 }
0x4830   :  { %5180 = vst [vmem:[#allocation1 + $0x40] sm:$0xff] %v5135_v57 }
0x4836   :  { %v5142_v58 = vpop.xlane.xlu1 %5141 }
0x4837   :  { %v5143_v59 = vsel %vm5099_vm15, %v5142_v58, %v5074_v24 }
0x4838   :  { %5184 = vst [vmem:[#allocation1 + $0x50] sm:$0xff] %v5143_v59 }
0x483a   :  { %v5102_v60 = vpop.xlane.xlu1 %5101 }
0x483b   :  { %v5103_v61 = vsel %vm5099_vm15, %v5102_v60, %v5034_v27  }
0x483c   :  { %5164 = vst [vmem:[#allocation1] sm:$0xff] %v5103_v61  ;;  %v5501_v2 = vmov %v5103_v61  }
0x483e   :  { %v5150_v62 = vpop.xlane.xlu1 %5149 }
0x483f   :  { %v5151_v63 = vsel %vm5099_vm15, %v5150_v62, %v5082_v30 }
0x4840   :  { %5188 = vst [vmem:[#allocation1 + $0x60] sm:$0xff] %v5151_v63 }
0x4842   :  { %v5158_v0 = vpop.xlane.xlu1 %5157 }
0x4843   :  { %v5159_v1 = vsel %vm5099_vm15, %v5158_v0, %v5090_v33 }
0x4844   :  { %5192 = vst [vmem:[#allocation1 + $0x70] sm:$0xff] %v5159_v1 }
0x4845 LB: > { %5217 = vst [vmem:[%s5507_s23] sm:$0xff] %v5503_v2  ;;  %s5232_s1 = scalar_lea.vmem %s5511_s24, 64   ;;  %s5233_s25 = scalar_lea.vmem %s5507_s23, 64   ;;  %s5511_s24 = sphi %s5509_s24, %s5510_s24   ;;  %s5507_s23 = sphi %s5505_s23, %s5506_s23   ;;  %v5503_v2 = vphi %v5501_v2, %v5234_v2  }
0x4846   : > { %p5214_p3 = scmp.gt.s32.totalorder %s5232_s1, %s8923_s20 }
0x4847   :  { %p5297_p4 = scmp.gt.s32.totalorder (%p5214_p3), %s5232_s1, [#allocation1 + $0x78] }
0x4849   :  { %5216 = sbr.rel (!%p5214_p3) target bundleno = 18501 (0x4845), region = 233 }
0x484b   : > { %v5218_v3 = vld [vmem:[%s5511_s24 + $0x8] sm:$0xff]  ;;  %v5220_v4 = vld [vmem:[%s5511_s24 + $0x10] sm:$0xff]  ;;  %v5222_v11 = vld [vmem:[%s5511_s24 + $0x18] sm:$0xff] }
0x484c   : > { %5219 = vst [vmem:[%s5507_s23 + $0x8] sm:$0xff] %v5218_v3  ;;  %5221 = vst [vmem:[%s5507_s23 + $0x10] sm:$0xff] %v5220_v4  ;;  %v5224_v5 = vld [vmem:[%s5511_s24 + $0x20] sm:$0xff]  ;;  %v5226_v6 = vld [vmem:[%s5511_s24 + $0x28] sm:$0xff] }
0x484d   : > { %5223 = vst [vmem:[%s5507_s23 + $0x18] sm:$0xff] %v5222_v11  ;;  %v5228_v7 = vld [vmem:[%s5511_s24 + $0x30] sm:$0xff]  ;;  %5225 = vst [vmem:[%s5507_s23 + $0x20] sm:$0xff] %v5224_v5  ;;  %v5230_v8 = vld [vmem:[%s5511_s24 + $0x38] sm:$0xff] }
0x484e   : > { %5227 = vst [vmem:[%s5507_s23 + $0x28] sm:$0xff] %v5226_v6  ;;  %5229 = vst [vmem:[%s5507_s23 + $0x30] sm:$0xff] %v5228_v7  ;;  %v5234_v2 = vld [vmem:[%s5511_s24 + $0x40] sm:$0xff]   ;;  %s5510_s24 = smov %s5232_s1  }
0x484f   : > { %5231 = vst [vmem:[%s5507_s23 + $0x38] sm:$0xff] %v5230_v8  ;;  %s5506_s23 = smov %s5233_s25  }
0x4850   :  { %5298 = sbr.rel (%p5297_p4) target bundleno = 18529 (0x4861), region = 238  ;;  %s5513_s26 = smov (!%p5297_p4), %s5233_s25  }
0x4851   :  { %s5517_s27 = smov (!%p5297_p4), %s5232_s1  }
0x4857 LB: > { %v5242_v9 = vld [vmem:[%s5519_s27] sm:$0xff]  ;;  %s5244_s27 = scalar_lea.vmem %s5519_s27, 8   ;;  %s5519_s27 = sphi %s5517_s27, %s5244_s27   ;;  %s5515_s26 = sphi %s5513_s26, %s5245_s26  }
0x4858   : > { %5243 = vst [vmem:[%s5515_s26] sm:$0xff] %v5242_v9  ;;  %s5245_s26 = scalar_lea.vmem %s5515_s26, 8   ;;  %p5239_p5 = scmp.gt.s32.totalorder %s5244_s27, [#allocation1 + $0x78] }
0x485a   :  { %5241 = sbr.rel (!%p5239_p5) target bundleno = 18519 (0x4857), region = 244 }
0x4861 PF:  {}

// kernel: rm_forward.1
= control target key start
LH: loop header
LB: loop body
LE: loop exit
PB: predicated region body
PF: predicated region fallthrough
CT: control target
= control target key end

     0   :  { %s319_s1 = inlined_call_operand.vmem [shape: f32[256,128], index: 1, kind: input, shape index: {}]   ;;  %s320_s0 = inlined_call_operand.vmem [shape: f32[8,256], index: 0, kind: input, shape index: {}]   ;;  %s321_s2 = inlined_call_operand.vmem [shape: f32[8,128], index: 2, kind: output, shape index: {}]  }
   0x1   :  { %v35_v0 = vld [vmem:[%s319_s1 + $0x80] sm:$0xff]  ;;  %v36_v1 = vld [vmem:[%s319_s1 + $0x88] sm:$0xff]  ;;  %v37_v5 = vld [vmem:[%s319_s1 + $0x90] sm:$0xff] }
   0x2   :  { %v19_v2 = vld [vmem:[%s319_s1] sm:$0xff]  ;;  %v167_v3 = vpack.c.bf16 %v36_v1, %v35_v0  ;;  %v20_v4 = vld [vmem:[%s319_s1 + $0x8] sm:$0xff]  ;;  %v38_v6 = vld [vmem:[%s319_s1 + $0x98] sm:$0xff] }
   0x3   :  { %v169_v7 = vpack.c.bf16 %v20_v4, %v19_v2  ;;  %v171_v8 = vpack.c.bf16 %v38_v6, %v37_v5  ;;  %v21_v9 = vld [vmem:[%s319_s1 + $0x10] sm:$0xff]  ;;  %v22_v10 = vld [vmem:[%s319_s1 + $0x18] sm:$0xff]  ;;  %v39_v11 = vld [vmem:[%s319_s1 + $0xa0] sm:$0xff] }
   0x4   :  { %168 = vmatprep.subr.bf16.mxu0 %v167_v3  ;;  %v40_v12 = vld [vmem:[%s319_s1 + $0xa8] sm:$0xff]  ;;  %v173_v13 = vpack.c.bf16 %v22_v10, %v21_v9  ;;  %v23_v15 = vld [vmem:[%s319_s1 + $0x20] sm:$0xff]  ;;  %v41_v17 = vld [vmem:[%s319_s1 + $0xb0] sm:$0xff] }
   0x5   :  { %170 = vmatpush3.bf16.msra.mxu0 %v169_v7  ;;  %v175_v14 = vpack.c.bf16 %v40_v12, %v39_v11  ;;  %v24_v16 = vld [vmem:[%s319_s1 + $0x28] sm:$0xff]  ;;  %v42_v18 = vld [vmem:[%s319_s1 + $0xb8] sm:$0xff]  ;;  %v25_v21 = vld [vmem:[%s319_s1 + $0x30] sm:$0xff] }
   0x6   :  { %172 = vmatprep.subr.bf16.mxu0 %v171_v8  ;;  %v177_v19 = vpack.c.bf16 %v24_v16, %v23_v15  ;;  %v179_v20 = vpack.c.bf16 %v42_v18, %v41_v17  ;;  %v26_v22 = vld [vmem:[%s319_s1 + $0x38] sm:$0xff]  ;;  %v43_v23 = vld [vmem:[%s319_s1 + $0xc0] sm:$0xff]  ;;  %v44_v24 = vld [vmem:[%s319_s1 + $0xc8] sm:$0xff] }
   0x7   :  { %v18_v25 = vld [vmem:[%s320_s0 + $0x8] sm:$0xff]  ;;  %v181_v26 = vpack.c.bf16 %v26_v22, %v25_v21  ;;  %v183_v27 = vpack.c.bf16 %v44_v24, %v43_v23  ;;  %v27_v28 = vld [vmem:[%s319_s1 + $0x40] sm:$0xff]  ;;  %v45_v30 = vld [vmem:[%s319_s1 + $0xd0] sm:$0xff] }
   0x8   :  { %115 = vmatprep.mubr.f32.mxu0 %v18_v25  ;;  %v28_v29 = vld [vmem:[%s319_s1 + $0x48] sm:$0xff]  ;;  %v46_v31 = vld [vmem:[%s319_s1 + $0xd8] sm:$0xff]  ;;  %v29_v34 = vld [vmem:[%s319_s1 + $0x50] sm:$0xff] }
   0x9   :  { %174 = vmatpush3.bf16.msra.mxu0 %v173_v13  ;;  %v185_v32 = vpack.c.bf16 %v28_v29, %v27_v28  ;;  %v187_v33 = vpack.c.bf16 %v46_v31, %v45_v30  ;;  %v30_v35 = vld [vmem:[%s319_s1 + $0x58] sm:$0xff]  ;;  %v47_v36 = vld [vmem:[%s319_s1 + $0xe0] sm:$0xff]  ;;  %v48_v37 = vld [vmem:[%s319_s1 + $0xe8] sm:$0xff] }
   0xa   :  { %176 = vmatprep.subr.bf16.mxu0 %v175_v14  ;;  %v189_v38 = vpack.c.bf16 %v30_v35, %v29_v34  ;;  %v191_v39 = vpack.c.bf16 %v48_v37, %v47_v36  ;;  %v31_v40 = vld [vmem:[%s319_s1 + $0x60] sm:$0xff]  ;;  %v32_v41 = vld [vmem:[%s319_s1 + $0x68] sm:$0xff]  ;;  %v49_v42 = vld [vmem:[%s319_s1 + $0xf0] sm:$0xff] }
   0xb   :  { %v50_v43 = vld [vmem:[%s319_s1 + $0xf8] sm:$0xff]  ;;  %v193_v44 = vpack.c.bf16 %v32_v41, %v31_v40  ;;  %v33_v46 = vld [vmem:[%s319_s1 + $0x70] sm:$0xff]  ;;  %v17_v49 = vld [vmem:[%s320_s0] sm:$0xff] }
   0xc   :  { %v195_v45 = vpack.c.bf16 %v50_v43, %v49_v42  ;;  %v34_v47 = vld [vmem:[%s319_s1 + $0x78] sm:$0xff] }
   0xd   :  { %178 = vmatpush3.bf16.msra.mxu0 %v177_v19  ;;  %v197_v48 = vpack.c.bf16 %v34_v47, %v33_v46 }
   0xe   :  { %180 = vmatprep.subr.bf16.mxu0 %v179_v20 }
  0x11   :  { %182 = vmatpush3.bf16.msra.mxu0 %v181_v26 }
  0x12   :  { %184 = vmatprep.subr.bf16.mxu0 %v183_v27 }
  0x15   :  { %186 = vmatpush3.bf16.msra.mxu0 %v185_v32 }
  0x16   :  { %188 = vmatprep.subr.bf16.mxu0 %v187_v33 }
  0x19   :  { %190 = vmatpush3.bf16.msra.mxu0 %v189_v38 }
  0x1a   :  { %192 = vmatprep.subr.bf16.mxu0 %v191_v39 }
  0x1d   :  { %194 = vmatpush3.bf16.msra.mxu0 %v193_v44 }
  0x1e   :  { %196 = vmatprep.subr.bf16.mxu0 %v195_v45 }
  0x21   :  { %198 = vmatpush3.bf16.msra.mxu0 %v197_v48 }
  0x24   :  { %116 = vmatmul.mubr.f32.vlgmr.msra.gmra.mrb[0].mxu0 %v17_v49 }
  0xf7   :  { %v164_v50 = vpop.f32.mrb[0].mxu0 }
  0xf8   :  { %v165_v51 = vpop.f32.mrb[1].mxu0 }
  0xf9   :  { %v166_v52 = vadd.f32 %v165_v51, %v164_v50 }
  0xfb   :  { %127 = vst [vmem:[%s321_s2] sm:$0xff] %v166_v52 }

</bundles_post_ra>
